<compile_context>
chip_gen: v6e
topology: v6e:2x2x1
jax: 0.10.0
libtpu: 0.0.40
codegen_flags: <defaults>
</compile_context>

<pallas_src>
import jax
import jax.numpy as jnp
from jax.experimental import pallas as pl
from jax.experimental.pallas import tpu as pltpu

EPS = 1e-5


# -----------------------------------------------------------------------------
# Fused whole-network kernel (one grid step == B_TILE batch elements)
# -----------------------------------------------------------------------------
def _make_dual_kernel(H, W, Cin, F, R, BT):
    HW = H * W
    M = BT * HW
    TAPS = [(dy, dx) for dy in range(3) for dx in range(3)]

    def kernel(xin_ref, w0_ref, b0_ref, wt_ref, bt_ref, wh_ref, bh_ref,
               wp_ref, bp_ref, wv1_ref, bv1_ref, wv2_ref, bv2_ref,
               p_ref, v_ref, xpad_ref):
        # Zero the padded activation scratch every step: the 1-pixel halo must be zero for
        # every tower layer, and scratch contents are per-core (parallel axis may be sharded
        # across TensorCores), so a program_id==0 guard would be unsafe. 51KB store ~ free.
        xpad_ref[...] = jnp.zeros((BT, H + 2, W + 2, F), jnp.float32)

        def im2col(src_ref, c):
            # 9 shifted (BT, H, W, c) windows -> one lane-dense (M, 9*c) operand.
            return jnp.concatenate(
                [src_ref[:, dy:dy + H, dx:dx + W, :].reshape(M, c) for dy, dx in TAPS],
                axis=-1)

        # initial ConvBlock: single K=9*Cin GEMM + folded-BN bias + ReLU
        y = jnp.dot(im2col(xin_ref, Cin), w0_ref[...],
                    preferred_element_type=jnp.float32)
        y = jnp.maximum(y + b0_ref[...], 0.0)                    # (M, F)

        # residual tower: y = relu(ConvBlock2(ConvBlock1(y)) + y)
        for l in range(R):
            res = y
            for j in range(2):
                xpad_ref[:, 1:H + 1, 1:W + 1, :] = y.reshape(BT, H, W, F)
                y = jnp.dot(im2col(xpad_ref, F), wt_ref[2 * l + j],
                            preferred_element_type=jnp.float32)  # K = 9*F
                y = jnp.maximum(y + bt_ref[2 * l + j], 0.0)
            y = jnp.maximum(y + res, 0.0)

        # fused policy(2)+value(1) 1x1 head conv, computed transposed so rows = head channel
        # and lanes = spatial*batch (lane-dense).
        hT = jnp.dot(wh_ref[...], y.T, preferred_element_type=jnp.float32) + bh_ref[...]
        hT = jnp.maximum(hT, 0.0)                                 # (3, M)

        def per_image(c):
            # (BT, HW) slab of head channel c via lane slices + sublane concat
            # (no last-dim-changing reshape).
            return jnp.concatenate(
                [hT[c:c + 1, b * HW:(b + 1) * HW] for b in range(BT)], axis=0)

        # policy head: NCHW flatten == [channel0 HW | channel1 HW] along lanes, one GEMM
        pol = jnp.concatenate([per_image(0), per_image(1)], axis=1)      # (BT, 2*HW)
        p = jnp.dot(pol, wp_ref[...], preferred_element_type=jnp.float32) + bp_ref[...]
        p_ref[...] = p.astype(p_ref.dtype)                                # (BT, O)

        # value head: fc1 -> relu -> fc2 -> tanh, entirely in-register
        val = per_image(2)                                                # (BT, HW)
        v1 = jnp.dot(val, wv1_ref[...], preferred_element_type=jnp.float32) + bv1_ref[...]
        v1 = jnp.maximum(v1, 0.0)
        v2 = jnp.dot(v1, wv2_ref[...], preferred_element_type=jnp.float32) + bv2_ref[...]
        v_ref[...] = jnp.tanh(v2).astype(v_ref.dtype)                     # (BT, 1)

    return kernel


def dual_network_forward(params, x_nchw, b_tile=None):
    B, Cin, H, W = x_nchw.shape
    HW = H * W
    F = params["b0"].shape[-1]
    R = params["wt"].shape[0] // 2
    O = params["bp"].shape[-1]

    # Pick B_TILE so the GEMM M dimension (B_TILE*HW) is ~256 (fills v6e/v7x MXU; >=128 v5e).
    if b_tile is None:
        b_tile = max(1, min(32, 256 // max(1, HW)))
    G = -(-B // b_tile)          # ceil
    Bp = G * b_tile

    # NCHW -> NHWC, pad batch up to a multiple of B_TILE, add the 1-pixel zero halo.
    x = jnp.transpose(x_nchw, (0, 2, 3, 1)).astype(jnp.float32)
    x = jnp.pad(x, ((0, Bp - B), (1, 1), (1, 1), (0, 0)))        # (Bp, H+2, W+2, Cin)

    def whole(arr):  # full-array block, constant index map -> fetched once, stays in VMEM
        n = arr.ndim
        return pl.BlockSpec(arr.shape, lambda g, n=n: (0,) * n)

    weight_keys = ["w0", "b0", "wt", "bt", "wh", "bh", "wp", "bp", "wv1", "bv1", "wv2", "bv2"]
    weights = [params[k] for k in weight_keys]

    p3, v3 = pl.pallas_call(
        _make_dual_kernel(H, W, Cin, F, R, b_tile),
        out_shape=(jax.ShapeDtypeStruct((G, b_tile, O), jnp.float32),
                   jax.ShapeDtypeStruct((G, b_tile, 1), jnp.float32)),
        grid=(G,),
        in_specs=[pl.BlockSpec((b_tile, H + 2, W + 2, Cin), lambda g: (g, 0, 0, 0))]
                 + [whole(w) for w in weights],
        out_specs=(pl.BlockSpec((None, b_tile, O), lambda g: (g, 0, 0)),
                   pl.BlockSpec((None, b_tile, 1), lambda g: (g, 0, 0))),
        scratch_shapes=[pltpu.VMEM((b_tile, H + 2, W + 2, F), jnp.float32)],
        compiler_params=pltpu.CompilerParams(dimension_semantics=("parallel",)),
    )(x, *weights)

    return p3.reshape(Bp, O)[:B], v3.reshape(Bp, 1)[:B]


# -----------------------------------------------------------------------------
# Parameter construction (deterministic, synthetic; BN folded at init)
# For real torch weights: conv w -> w.permute(2,3,1,0).reshape(9*Cin, Cout) after scaling.
# -----------------------------------------------------------------------------
def _fold_bn(gamma, beta, mean, var, conv_bias=None):
    scale = gamma / jnp.sqrt(var + EPS)
    bias = beta - mean * scale
    if conv_bias is not None:
        bias = bias + conv_bias * scale
    return scale, bias


def init_dual_network(key, input_shape, filters, residual_blocks, output_size):
    T, C, H, W = input_shape
    in_ch = T * C
    HW = H * W
    keys = iter(jax.random.split(key, 64))
    nxt = lambda: next(keys)

    def conv3x3_folded(cin, cout):
        w = jax.random.normal(nxt(), (3, 3, cin, cout), jnp.float32) * (0.1 / jnp.sqrt(cin))
        # BatchNorm2d at PyTorch inference defaults (running_mean=0, running_var=1, affine 1/0)
        scale, bias = _fold_bn(jnp.ones((cout,)), jnp.zeros((cout,)),
                               jnp.zeros((cout,)), jnp.ones((cout,)))
        w_eff = (w * scale[None, None, None, :]).reshape(9 * cin, cout)   # tap-major rows
        return w_eff, bias.reshape(1, cout)

    params = {}
    params["w0"], params["b0"] = conv3x3_folded(in_ch, filters)

    wt, bt = [], []
    for _ in range(residual_blocks):
        for _ in range(2):                     # ConvBlock1, ConvBlock2 of each ResidualBlock
            w, b = conv3x3_folded(filters, filters)
            wt.append(w)
            bt.append(b)
    params["wt"] = jnp.stack(wt)               # (2R, 9F, F)
    params["bt"] = jnp.stack(bt)               # (2R, 1, F)

    # policy 1x1 conv (F->2, bias) + BN(2)  and  value 1x1 conv (F->1, bias) + BN(1), fused
    wpc = jax.random.normal(nxt(), (filters, 2), jnp.float32) * 0.05
    bpc = jax.random.normal(nxt(), (2,), jnp.float32) * 0.05
    sp, bpf = _fold_bn(jnp.ones((2,)), jnp.zeros((2,)), jnp.zeros((2,)), jnp.ones((2,)), bpc)
    wvc = jax.random.normal(nxt(), (filters, 1), jnp.float32) * 0.05
    bvc = jax.random.normal(nxt(), (1,), jnp.float32) * 0.05
    sv, bvf = _fold_bn(jnp.ones((1,)), jnp.zeros((1,)), jnp.zeros((1,)), jnp.ones((1,)), bvc)
    wh = jnp.concatenate([wpc * sp[None, :], wvc * sv[None, :]], axis=1)   # (F, 3)
    params["wh"] = wh.T                                                     # (3, F) transposed head conv
    params["bh"] = jnp.concatenate([bpf, bvf]).reshape(3, 1)

    # policy FC Linear(2*H*W, out): rows ordered c*HW + hw == NCHW flatten order
    params["wp"] = jax.random.normal(nxt(), (2 * HW, output_size), jnp.float32) * 0.05
    params["bp"] = (jax.random.normal(nxt(), (output_size,), jnp.float32) * 0.05).reshape(1, output_size)

    # value FCs
    params["wv1"] = jax.random.normal(nxt(), (HW, 256), jnp.float32) * 0.05
    params["bv1"] = (jax.random.normal(nxt(), (256,), jnp.float32) * 0.05).reshape(1, 256)
    params["wv2"] = jax.random.normal(nxt(), (256, 1), jnp.float32) * 0.05
    params["bv2"] = (jax.random.normal(nxt(), (1,), jnp.float32) * 0.05).reshape(1, 1)
    return params


# -----------------------------------------------------------------------------
# Pure-jnp reference (no Pallas) used to validate the fused kernel
# -----------------------------------------------------------------------------
def dual_network_reference(params, x_nchw):
    B, Cin, H, W = x_nchw.shape
    F = params["b0"].shape[-1]
    R = params["wt"].shape[0] // 2
    HW = H * W
    x = jnp.transpose(x_nchw, (0, 2, 3, 1)).astype(jnp.float32)

    def conv_block(xn, w9, bias):
        Bq, Hq, Wq, Cq = xn.shape
        xp = jnp.pad(xn, ((0, 0), (1, 1), (1, 1), (0, 0)))
        cols = jnp.concatenate([xp[:, dy:dy + Hq, dx:dx + Wq, :]
                                for dy in range(3) for dx in range(3)], axis=-1)
        y = cols.reshape(Bq * Hq * Wq, 9 * Cq) @ w9 + bias
        return jnp.maximum(y, 0.0).reshape(Bq, Hq, Wq, -1)

    y = conv_block(x, params["w0"], params["b0"])
    for l in range(R):
        res = y
        y = conv_block(y, params["wt"][2 * l], params["bt"][2 * l])
        y = conv_block(y, params["wt"][2 * l + 1], params["bt"][2 * l + 1])
        y = jnp.maximum(y + res, 0.0)

    xf = y.reshape(B * HW, F)
    h = jnp.maximum(xf @ params["wh"].T + params["bh"].reshape(1, 3), 0.0)      # (B*HW, 3)
    p = h[:, :2].reshape(B, HW, 2).transpose(0, 2, 1).reshape(B, 2 * HW)        # NCHW flatten
    p = p @ params["wp"] + params["bp"]
    v = h[:, 2].reshape(B, HW)
    v = jnp.maximum(v @ params["wv1"] + params["bv1"], 0.0)
    v = jnp.tanh(v @ params["wv2"] + params["bv2"])
    return p, v


if __name__ == "__main__":
    key = jax.random.PRNGKey(0)
    # DualNetwork(input_shape=(time_steps, channels, H, W), filters, residual_blocks, output)
    input_shape = (3, 2, 8, 8)        # "3his": 3 history steps x 2 planes on an 8x8 board
    filters, residual_blocks, output_size = 32, 2, 16
    batch = 8                          # 2 grid steps of B_TILE=4 (M=256 per conv GEMM)

    k_params, k_x = jax.random.split(key)
    params = init_dual_network(k_params, input_shape, filters, residual_blocks, output_size)

    T, C, H, W = input_shape
    x = jax.random.normal(k_x, (batch, T * C, H, W), jnp.float32)  # NCHW, like the PyTorch module

    fwd = jax.jit(lambda inp: dual_network_forward(params, inp))
    p_out, v_out = fwd(x)
    jax.block_until_ready((p_out, v_out))

    assert p_out.shape == (batch, output_size), p_out.shape
    assert v_out.shape == (batch, 1), v_out.shape
    assert bool(jnp.all(jnp.isfinite(p_out))) and bool(jnp.all(jnp.isfinite(v_out)))

    # validate the fused kernel against the pure-jnp reference of the same folded params
    p_ref, v_ref = jax.jit(lambda inp: dual_network_reference(params, inp))(x)
    assert bool(jnp.allclose(p_out, p_ref, atol=1e-3, rtol=1e-3)), "policy head mismatch"
    assert bool(jnp.allclose(v_out, v_ref, atol=1e-3, rtol=1e-3)), "value head mismatch"

    print("KERNEL_OK")
</pallas_src>

<mosaic_0001>
module attributes {stable_mosaic.version = 11 : i64} {
  func.func @kernel(%arg0: i32, %arg1: memref<4x10x10x6xf32, #tpu.memory_space<vmem>>, %arg2: memref<54x32xf32, #tpu.memory_space<vmem>>, %arg3: memref<1x32xf32, #tpu.memory_space<vmem>>, %arg4: memref<4x288x32xf32, #tpu.memory_space<vmem>>, %arg5: memref<4x1x32xf32, #tpu.memory_space<vmem>>, %arg6: memref<3x32xf32, #tpu.memory_space<vmem>>, %arg7: memref<3x1xf32, #tpu.memory_space<vmem>>, %arg8: memref<128x16xf32, #tpu.memory_space<vmem>>, %arg9: memref<1x16xf32, #tpu.memory_space<vmem>>, %arg10: memref<64x256xf32, #tpu.memory_space<vmem>>, %arg11: memref<1x256xf32, #tpu.memory_space<vmem>>, %arg12: memref<256x1xf32, #tpu.memory_space<vmem>>, %arg13: memref<1x1xf32, #tpu.memory_space<vmem>>, %arg14: memref<1x4x16xf32, #tpu.memory_space<vmem>>, %arg15: memref<1x4x1xf32, #tpu.memory_space<vmem>>, %arg16: memref<4x10x10x32xf32, #tpu.memory_space<vmem>>) attributes {dimension_semantics = [#tpu.dimension_semantics<parallel>], iteration_bounds = array<i64: 2>, scalar_prefetch = 0 : i64, scratch_operands = 1 : i64, tpu.core_type = #tpu.core_type<tc>, window_params = [{transform_indices = @transform_0, window_bounds = array<i64: 4, 10, 10, 6>}, {pipeline_mode = #tpu.pipeline_mode<synchronous>, transform_indices = @transform_1, window_bounds = array<i64: 54, 32>}, {pipeline_mode = #tpu.pipeline_mode<synchronous>, transform_indices = @transform_2, window_bounds = array<i64: 1, 32>}, {pipeline_mode = #tpu.pipeline_mode<synchronous>, transform_indices = @transform_3, window_bounds = array<i64: 4, 288, 32>}, {pipeline_mode = #tpu.pipeline_mode<synchronous>, transform_indices = @transform_4, window_bounds = array<i64: 4, 1, 32>}, {pipeline_mode = #tpu.pipeline_mode<synchronous>, transform_indices = @transform_5, window_bounds = array<i64: 3, 32>}, {pipeline_mode = #tpu.pipeline_mode<synchronous>, transform_indices = @transform_6, window_bounds = array<i64: 3, 1>}, {pipeline_mode = #tpu.pipeline_mode<synchronous>, transform_indices = @transform_7, window_bounds = array<i64: 128, 16>}, {pipeline_mode = #tpu.pipeline_mode<synchronous>, transform_indices = @transform_8, window_bounds = array<i64: 1, 16>}, {pipeline_mode = #tpu.pipeline_mode<synchronous>, transform_indices = @transform_9, window_bounds = array<i64: 64, 256>}, {pipeline_mode = #tpu.pipeline_mode<synchronous>, transform_indices = @transform_10, window_bounds = array<i64: 1, 256>}, {pipeline_mode = #tpu.pipeline_mode<synchronous>, transform_indices = @transform_11, window_bounds = array<i64: 256, 1>}, {pipeline_mode = #tpu.pipeline_mode<synchronous>, transform_indices = @transform_12, window_bounds = array<i64: 1, 1>}, {transform_indices = @transform_13, window_bounds = array<i64: 1, 4, 16>}, {transform_indices = @transform_14, window_bounds = array<i64: 1, 4, 1>}]} {
    %cst = arith.constant 0.000000e+00 : f32
    %0 = vector.broadcast %cst : f32 to vector<4x10x10x32xf32>
    %c0 = arith.constant 0 : index
    %c0_0 = arith.constant 0 : index
    %c0_1 = arith.constant 0 : index
    %c0_2 = arith.constant 0 : index
    %1 = vector.load %arg16[%c0, %c0_0, %c0_1, %c0_2] : memref<4x10x10x32xf32, #tpu.memory_space<vmem>>, vector<4x10x10x32xf32>
    tpu.vector_store %arg16[%c0, %c0_0, %c0_1, %c0_2], %0 {strides = array<i32>} : memref<4x10x10x32xf32, #tpu.memory_space<vmem>>, vector<4x10x10x32xf32>,
    %c0_3 = arith.constant 0 : index
    %c0_4 = arith.constant 0 : index
    %c0_5 = arith.constant 0 : index
    %c0_6 = arith.constant 0 : index
    %2 = vector.load %arg1[%c0_3, %c0_4, %c0_5, %c0_6] : memref<4x10x10x6xf32, #tpu.memory_space<vmem>>, vector<4x8x8x6xf32>
    %3 = vector.shape_cast %2 : vector<4x8x8x6xf32> to vector<256x6xf32>
    %c0_7 = arith.constant 0 : index
    %c0_8 = arith.constant 0 : index
    %c1 = arith.constant 1 : index
    %c0_9 = arith.constant 0 : index
    %4 = vector.load %arg1[%c0_7, %c0_8, %c1, %c0_9] : memref<4x10x10x6xf32, #tpu.memory_space<vmem>>, vector<4x8x8x6xf32>
    %5 = vector.shape_cast %4 : vector<4x8x8x6xf32> to vector<256x6xf32>
    %c0_10 = arith.constant 0 : index
    %c0_11 = arith.constant 0 : index
    %c2 = arith.constant 2 : index
    %c0_12 = arith.constant 0 : index
    %6 = vector.load %arg1[%c0_10, %c0_11, %c2, %c0_12] : memref<4x10x10x6xf32, #tpu.memory_space<vmem>>, vector<4x8x8x6xf32>
    %7 = vector.shape_cast %6 : vector<4x8x8x6xf32> to vector<256x6xf32>
    %c0_13 = arith.constant 0 : index
    %c1_14 = arith.constant 1 : index
    %c0_15 = arith.constant 0 : index
    %c0_16 = arith.constant 0 : index
    %8 = vector.load %arg1[%c0_13, %c1_14, %c0_15, %c0_16] : memref<4x10x10x6xf32, #tpu.memory_space<vmem>>, vector<4x8x8x6xf32>
    %9 = vector.shape_cast %8 : vector<4x8x8x6xf32> to vector<256x6xf32>
    %c0_17 = arith.constant 0 : index
    %c1_18 = arith.constant 1 : index
    %c1_19 = arith.constant 1 : index
    %c0_20 = arith.constant 0 : index
    %10 = vector.load %arg1[%c0_17, %c1_18, %c1_19, %c0_20] : memref<4x10x10x6xf32, #tpu.memory_space<vmem>>, vector<4x8x8x6xf32>
    %11 = vector.shape_cast %10 : vector<4x8x8x6xf32> to vector<256x6xf32>
    %c0_21 = arith.constant 0 : index
    %c1_22 = arith.constant 1 : index
    %c2_23 = arith.constant 2 : index
    %c0_24 = arith.constant 0 : index
    %12 = vector.load %arg1[%c0_21, %c1_22, %c2_23, %c0_24] : memref<4x10x10x6xf32, #tpu.memory_space<vmem>>, vector<4x8x8x6xf32>
    %13 = vector.shape_cast %12 : vector<4x8x8x6xf32> to vector<256x6xf32>
    %c0_25 = arith.constant 0 : index
    %c2_26 = arith.constant 2 : index
    %c0_27 = arith.constant 0 : index
    %c0_28 = arith.constant 0 : index
    %14 = vector.load %arg1[%c0_25, %c2_26, %c0_27, %c0_28] : memref<4x10x10x6xf32, #tpu.memory_space<vmem>>, vector<4x8x8x6xf32>
    %15 = vector.shape_cast %14 : vector<4x8x8x6xf32> to vector<256x6xf32>
    %c0_29 = arith.constant 0 : index
    %c2_30 = arith.constant 2 : index
    %c1_31 = arith.constant 1 : index
    %c0_32 = arith.constant 0 : index
    %16 = vector.load %arg1[%c0_29, %c2_30, %c1_31, %c0_32] : memref<4x10x10x6xf32, #tpu.memory_space<vmem>>, vector<4x8x8x6xf32>
    %17 = vector.shape_cast %16 : vector<4x8x8x6xf32> to vector<256x6xf32>
    %c0_33 = arith.constant 0 : index
    %c2_34 = arith.constant 2 : index
    %c2_35 = arith.constant 2 : index
    %c0_36 = arith.constant 0 : index
    %18 = vector.load %arg1[%c0_33, %c2_34, %c2_35, %c0_36] : memref<4x10x10x6xf32, #tpu.memory_space<vmem>>, vector<4x8x8x6xf32>
    %19 = vector.shape_cast %18 : vector<4x8x8x6xf32> to vector<256x6xf32>
    %20 = tpu.concatenate %3, %5, %7, %9, %11, %13, %15, %17, %19 in 1 : vector<256x6xf32>, vector<256x6xf32>, vector<256x6xf32>, vector<256x6xf32>, vector<256x6xf32>, vector<256x6xf32>, vector<256x6xf32>, vector<256x6xf32>, vector<256x6xf32> -> vector<256x54xf32>
    %c0_37 = arith.constant 0 : index
    %c0_38 = arith.constant 0 : index
    %21 = vector.load %arg2[%c0_37, %c0_38] : memref<54x32xf32, #tpu.memory_space<vmem>>, vector<54x32xf32>
    %cst_39 = arith.constant dense<0.000000e+00> : vector<256x32xf32>
    %22 = tpu.matmul %20, %21, %cst_39 {dimension_numbers = #tpu.dot_dimension_numbers<[1], [0], [0], [1], [0, 0, 1, 1], [], []>} : vector<256x54xf32>, vector<54x32xf32>, vector<256x32xf32> -> vector<256x32xf32>
    %c0_40 = arith.constant 0 : index
    %c0_41 = arith.constant 0 : index
    %23 = vector.load %arg3[%c0_40, %c0_41] : memref<1x32xf32, #tpu.memory_space<vmem>>, vector<1x32xf32>
    %24 = vector.broadcast %23 : vector<1x32xf32> to vector<256x32xf32>
    %25 = arith.addf %22, %24 : vector<256x32xf32>
    %cst_42 = arith.constant 0.000000e+00 : f32
    %26 = vector.broadcast %cst_42 : f32 to vector<256x32xf32>
    %27 = arith.maximumf %25, %26 : vector<256x32xf32>
    %28 = vector.shape_cast %27 : vector<256x32xf32> to vector<4x8x8x32xf32>
    %c0_43 = arith.constant 0 : index
    %c1_44 = arith.constant 1 : index
    %c1_45 = arith.constant 1 : index
    %c0_46 = arith.constant 0 : index
    %29 = vector.load %arg16[%c0_43, %c1_44, %c1_45, %c0_46] : memref<4x10x10x32xf32, #tpu.memory_space<vmem>>, vector<4x8x8x32xf32>
    tpu.vector_store %arg16[%c0_43, %c1_44, %c1_45, %c0_46], %28 {strides = array<i32>} : memref<4x10x10x32xf32, #tpu.memory_space<vmem>>, vector<4x8x8x32xf32>,
    %c0_47 = arith.constant 0 : index
    %c0_48 = arith.constant 0 : index
    %c0_49 = arith.constant 0 : index
    %c0_50 = arith.constant 0 : index
    %30 = vector.load %arg16[%c0_47, %c0_48, %c0_49, %c0_50] : memref<4x10x10x32xf32, #tpu.memory_space<vmem>>, vector<4x8x8x32xf32>
    %31 = vector.shape_cast %30 : vector<4x8x8x32xf32> to vector<256x32xf32>
    %c0_51 = arith.constant 0 : index
    %c0_52 = arith.constant 0 : index
    %c1_53 = arith.constant 1 : index
    %c0_54 = arith.constant 0 : index
    %32 = vector.load %arg16[%c0_51, %c0_52, %c1_53, %c0_54] : memref<4x10x10x32xf32, #tpu.memory_space<vmem>>, vector<4x8x8x32xf32>
    %33 = vector.shape_cast %32 : vector<4x8x8x32xf32> to vector<256x32xf32>
    %c0_55 = arith.constant 0 : index
    %c0_56 = arith.constant 0 : index
    %c2_57 = arith.constant 2 : index
    %c0_58 = arith.constant 0 : index
    %34 = vector.load %arg16[%c0_55, %c0_56, %c2_57, %c0_58] : memref<4x10x10x32xf32, #tpu.memory_space<vmem>>, vector<4x8x8x32xf32>
    %35 = vector.shape_cast %34 : vector<4x8x8x32xf32> to vector<256x32xf32>
    %c0_59 = arith.constant 0 : index
    %c1_60 = arith.constant 1 : index
    %c0_61 = arith.constant 0 : index
    %c0_62 = arith.constant 0 : index
    %36 = vector.load %arg16[%c0_59, %c1_60, %c0_61, %c0_62] : memref<4x10x10x32xf32, #tpu.memory_space<vmem>>, vector<4x8x8x32xf32>
    %37 = vector.shape_cast %36 : vector<4x8x8x32xf32> to vector<256x32xf32>
    %c0_63 = arith.constant 0 : index
    %c1_64 = arith.constant 1 : index
    %c1_65 = arith.constant 1 : index
    %c0_66 = arith.constant 0 : index
    %38 = vector.load %arg16[%c0_63, %c1_64, %c1_65, %c0_66] : memref<4x10x10x32xf32, #tpu.memory_space<vmem>>, vector<4x8x8x32xf32>
    %39 = vector.shape_cast %38 : vector<4x8x8x32xf32> to vector<256x32xf32>
    %c0_67 = arith.constant 0 : index
    %c1_68 = arith.constant 1 : index
    %c2_69 = arith.constant 2 : index
    %c0_70 = arith.constant 0 : index
    %40 = vector.load %arg16[%c0_67, %c1_68, %c2_69, %c0_70] : memref<4x10x10x32xf32, #tpu.memory_space<vmem>>, vector<4x8x8x32xf32>
    %41 = vector.shape_cast %40 : vector<4x8x8x32xf32> to vector<256x32xf32>
    %c0_71 = arith.constant 0 : index
    %c2_72 = arith.constant 2 : index
    %c0_73 = arith.constant 0 : index
    %c0_74 = arith.constant 0 : index
    %42 = vector.load %arg16[%c0_71, %c2_72, %c0_73, %c0_74] : memref<4x10x10x32xf32, #tpu.memory_space<vmem>>, vector<4x8x8x32xf32>
    %43 = vector.shape_cast %42 : vector<4x8x8x32xf32> to vector<256x32xf32>
    %c0_75 = arith.constant 0 : index
    %c2_76 = arith.constant 2 : index
    %c1_77 = arith.constant 1 : index
    %c0_78 = arith.constant 0 : index
    %44 = vector.load %arg16[%c0_75, %c2_76, %c1_77, %c0_78] : memref<4x10x10x32xf32, #tpu.memory_space<vmem>>, vector<4x8x8x32xf32>
    %45 = vector.shape_cast %44 : vector<4x8x8x32xf32> to vector<256x32xf32>
    %c0_79 = arith.constant 0 : index
    %c2_80 = arith.constant 2 : index
    %c2_81 = arith.constant 2 : index
    %c0_82 = arith.constant 0 : index
    %46 = vector.load %arg16[%c0_79, %c2_80, %c2_81, %c0_82] : memref<4x10x10x32xf32, #tpu.memory_space<vmem>>, vector<4x8x8x32xf32>
    %47 = vector.shape_cast %46 : vector<4x8x8x32xf32> to vector<256x32xf32>
    %48 = tpu.concatenate %31, %33, %35, %37, %39, %41, %43, %45, %47 in 1 : vector<256x32xf32>, vector<256x32xf32>, vector<256x32xf32>, vector<256x32xf32>, vector<256x32xf32>, vector<256x32xf32>, vector<256x32xf32>, vector<256x32xf32>, vector<256x32xf32> -> vector<256x288xf32>
    %c0_83 = arith.constant 0 : index
    %c0_84 = arith.constant 0 : index
    %c0_85 = arith.constant 0 : index
    %49 = vector.load %arg4[%c0_83, %c0_84, %c0_85] : memref<4x288x32xf32, #tpu.memory_space<vmem>>, vector<1x288x32xf32>
    %50 = vector.shape_cast %49 : vector<1x288x32xf32> to vector<288x32xf32>
    %cst_86 = arith.constant dense<0.000000e+00> : vector<256x32xf32>
    %51 = tpu.matmul %48, %50, %cst_86 {dimension_numbers = #tpu.dot_dimension_numbers<[1], [0], [0], [1], [0, 0, 1, 1], [], []>} : vector<256x288xf32>, vector<288x32xf32>, vector<256x32xf32> -> vector<256x32xf32>
    %c0_87 = arith.constant 0 : index
    %c0_88 = arith.constant 0 : index
    %c0_89 = arith.constant 0 : index
    %52 = vector.load %arg5[%c0_87, %c0_88, %c0_89] : memref<4x1x32xf32, #tpu.memory_space<vmem>>, vector<1x1x32xf32>
    %53 = vector.shape_cast %52 : vector<1x1x32xf32> to vector<1x32xf32>
    %54 = vector.broadcast %53 : vector<1x32xf32> to vector<256x32xf32>
    %55 = arith.addf %51, %54 : vector<256x32xf32>
    %cst_90 = arith.constant 0.000000e+00 : f32
    %56 = vector.broadcast %cst_90 : f32 to vector<256x32xf32>
    %57 = arith.maximumf %55, %56 : vector<256x32xf32>
    %58 = vector.shape_cast %57 : vector<256x32xf32> to vector<4x8x8x32xf32>
    %c0_91 = arith.constant 0 : index
    %c1_92 = arith.constant 1 : index
    %c1_93 = arith.constant 1 : index
    %c0_94 = arith.constant 0 : index
    %59 = vector.load %arg16[%c0_91, %c1_92, %c1_93, %c0_94] : memref<4x10x10x32xf32, #tpu.memory_space<vmem>>, vector<4x8x8x32xf32>
    tpu.vector_store %arg16[%c0_91, %c1_92, %c1_93, %c0_94], %58 {strides = array<i32>} : memref<4x10x10x32xf32, #tpu.memory_space<vmem>>, vector<4x8x8x32xf32>,
    %c0_95 = arith.constant 0 : index
    %c0_96 = arith.constant 0 : index
    %c0_97 = arith.constant 0 : index
    %c0_98 = arith.constant 0 : index
    %60 = vector.load %arg16[%c0_95, %c0_96, %c0_97, %c0_98] : memref<4x10x10x32xf32, #tpu.memory_space<vmem>>, vector<4x8x8x32xf32>
    %61 = vector.shape_cast %60 : vector<4x8x8x32xf32> to vector<256x32xf32>
    %c0_99 = arith.constant 0 : index
    %c0_100 = arith.constant 0 : index
    %c1_101 = arith.constant 1 : index
    %c0_102 = arith.constant 0 : index
    %62 = vector.load %arg16[%c0_99, %c0_100, %c1_101, %c0_102] : memref<4x10x10x32xf32, #tpu.memory_space<vmem>>, vector<4x8x8x32xf32>
    %63 = vector.shape_cast %62 : vector<4x8x8x32xf32> to vector<256x32xf32>
    %c0_103 = arith.constant 0 : index
    %c0_104 = arith.constant 0 : index
    %c2_105 = arith.constant 2 : index
    %c0_106 = arith.constant 0 : index
    %64 = vector.load %arg16[%c0_103, %c0_104, %c2_105, %c0_106] : memref<4x10x10x32xf32, #tpu.memory_space<vmem>>, vector<4x8x8x32xf32>
    %65 = vector.shape_cast %64 : vector<4x8x8x32xf32> to vector<256x32xf32>
    %c0_107 = arith.constant 0 : index
    %c1_108 = arith.constant 1 : index
    %c0_109 = arith.constant 0 : index
    %c0_110 = arith.constant 0 : index
    %66 = vector.load %arg16[%c0_107, %c1_108, %c0_109, %c0_110] : memref<4x10x10x32xf32, #tpu.memory_space<vmem>>, vector<4x8x8x32xf32>
    %67 = vector.shape_cast %66 : vector<4x8x8x32xf32> to vector<256x32xf32>
    %c0_111 = arith.constant 0 : index
    %c1_112 = arith.constant 1 : index
    %c1_113 = arith.constant 1 : index
    %c0_114 = arith.constant 0 : index
    %68 = vector.load %arg16[%c0_111, %c1_112, %c1_113, %c0_114] : memref<4x10x10x32xf32, #tpu.memory_space<vmem>>, vector<4x8x8x32xf32>
    %69 = vector.shape_cast %68 : vector<4x8x8x32xf32> to vector<256x32xf32>
    %c0_115 = arith.constant 0 : index
    %c1_116 = arith.constant 1 : index
    %c2_117 = arith.constant 2 : index
    %c0_118 = arith.constant 0 : index
    %70 = vector.load %arg16[%c0_115, %c1_116, %c2_117, %c0_118] : memref<4x10x10x32xf32, #tpu.memory_space<vmem>>, vector<4x8x8x32xf32>
    %71 = vector.shape_cast %70 : vector<4x8x8x32xf32> to vector<256x32xf32>
    %c0_119 = arith.constant 0 : index
    %c2_120 = arith.constant 2 : index
    %c0_121 = arith.constant 0 : index
    %c0_122 = arith.constant 0 : index
    %72 = vector.load %arg16[%c0_119, %c2_120, %c0_121, %c0_122] : memref<4x10x10x32xf32, #tpu.memory_space<vmem>>, vector<4x8x8x32xf32>
    %73 = vector.shape_cast %72 : vector<4x8x8x32xf32> to vector<256x32xf32>
    %c0_123 = arith.constant 0 : index
    %c2_124 = arith.constant 2 : index
    %c1_125 = arith.constant 1 : index
    %c0_126 = arith.constant 0 : index
    %74 = vector.load %arg16[%c0_123, %c2_124, %c1_125, %c0_126] : memref<4x10x10x32xf32, #tpu.memory_space<vmem>>, vector<4x8x8x32xf32>
    %75 = vector.shape_cast %74 : vector<4x8x8x32xf32> to vector<256x32xf32>
    %c0_127 = arith.constant 0 : index
    %c2_128 = arith.constant 2 : index
    %c2_129 = arith.constant 2 : index
    %c0_130 = arith.constant 0 : index
    %76 = vector.load %arg16[%c0_127, %c2_128, %c2_129, %c0_130] : memref<4x10x10x32xf32, #tpu.memory_space<vmem>>, vector<4x8x8x32xf32>
    %77 = vector.shape_cast %76 : vector<4x8x8x32xf32> to vector<256x32xf32>
    %78 = tpu.concatenate %61, %63, %65, %67, %69, %71, %73, %75, %77 in 1 : vector<256x32xf32>, vector<256x32xf32>, vector<256x32xf32>, vector<256x32xf32>, vector<256x32xf32>, vector<256x32xf32>, vector<256x32xf32>, vector<256x32xf32>, vector<256x32xf32> -> vector<256x288xf32>
    %c1_131 = arith.constant 1 : index
    %c0_132 = arith.constant 0 : index
    %c0_133 = arith.constant 0 : index
    %79 = vector.load %arg4[%c1_131, %c0_132, %c0_133] : memref<4x288x32xf32, #tpu.memory_space<vmem>>, vector<1x288x32xf32>
    %80 = vector.shape_cast %79 : vector<1x288x32xf32> to vector<288x32xf32>
    %cst_134 = arith.constant dense<0.000000e+00> : vector<256x32xf32>
    %81 = tpu.matmul %78, %80, %cst_134 {dimension_numbers = #tpu.dot_dimension_numbers<[1], [0], [0], [1], [0, 0, 1, 1], [], []>} : vector<256x288xf32>, vector<288x32xf32>, vector<256x32xf32> -> vector<256x32xf32>
    %c1_135 = arith.constant 1 : index
    %c0_136 = arith.constant 0 : index
    %c0_137 = arith.constant 0 : index
    %82 = vector.load %arg5[%c1_135, %c0_136, %c0_137] : memref<4x1x32xf32, #tpu.memory_space<vmem>>, vector<1x1x32xf32>
    %83 = vector.shape_cast %82 : vector<1x1x32xf32> to vector<1x32xf32>
    %84 = vector.broadcast %83 : vector<1x32xf32> to vector<256x32xf32>
    %85 = arith.addf %81, %84 : vector<256x32xf32>
    %cst_138 = arith.constant 0.000000e+00 : f32
    %86 = vector.broadcast %cst_138 : f32 to vector<256x32xf32>
    %87 = arith.maximumf %85, %86 : vector<256x32xf32>
    %88 = arith.addf %87, %27 : vector<256x32xf32>
    %cst_139 = arith.constant 0.000000e+00 : f32
    %89 = vector.broadcast %cst_139 : f32 to vector<256x32xf32>
    %90 = arith.maximumf %88, %89 : vector<256x32xf32>
    %91 = vector.shape_cast %90 : vector<256x32xf32> to vector<4x8x8x32xf32>
    %c0_140 = arith.constant 0 : index
    %c1_141 = arith.constant 1 : index
    %c1_142 = arith.constant 1 : index
    %c0_143 = arith.constant 0 : index
    %92 = vector.load %arg16[%c0_140, %c1_141, %c1_142, %c0_143] : memref<4x10x10x32xf32, #tpu.memory_space<vmem>>, vector<4x8x8x32xf32>
    tpu.vector_store %arg16[%c0_140, %c1_141, %c1_142, %c0_143], %91 {strides = array<i32>} : memref<4x10x10x32xf32, #tpu.memory_space<vmem>>, vector<4x8x8x32xf32>,
    %c0_144 = arith.constant 0 : index
    %c0_145 = arith.constant 0 : index
    %c0_146 = arith.constant 0 : index
    %c0_147 = arith.constant 0 : index
    %93 = vector.load %arg16[%c0_144, %c0_145, %c0_146, %c0_147] : memref<4x10x10x32xf32, #tpu.memory_space<vmem>>, vector<4x8x8x32xf32>
    %94 = vector.shape_cast %93 : vector<4x8x8x32xf32> to vector<256x32xf32>
    %c0_148 = arith.constant 0 : index
    %c0_149 = arith.constant 0 : index
    %c1_150 = arith.constant 1 : index
    %c0_151 = arith.constant 0 : index
    %95 = vector.load %arg16[%c0_148, %c0_149, %c1_150, %c0_151] : memref<4x10x10x32xf32, #tpu.memory_space<vmem>>, vector<4x8x8x32xf32>
    %96 = vector.shape_cast %95 : vector<4x8x8x32xf32> to vector<256x32xf32>
    %c0_152 = arith.constant 0 : index
    %c0_153 = arith.constant 0 : index
    %c2_154 = arith.constant 2 : index
    %c0_155 = arith.constant 0 : index
    %97 = vector.load %arg16[%c0_152, %c0_153, %c2_154, %c0_155] : memref<4x10x10x32xf32, #tpu.memory_space<vmem>>, vector<4x8x8x32xf32>
    %98 = vector.shape_cast %97 : vector<4x8x8x32xf32> to vector<256x32xf32>
    %c0_156 = arith.constant 0 : index
    %c1_157 = arith.constant 1 : index
    %c0_158 = arith.constant 0 : index
    %c0_159 = arith.constant 0 : index
    %99 = vector.load %arg16[%c0_156, %c1_157, %c0_158, %c0_159] : memref<4x10x10x32xf32, #tpu.memory_space<vmem>>, vector<4x8x8x32xf32>
    %100 = vector.shape_cast %99 : vector<4x8x8x32xf32> to vector<256x32xf32>
    %c0_160 = arith.constant 0 : index
    %c1_161 = arith.constant 1 : index
    %c1_162 = arith.constant 1 : index
    %c0_163 = arith.constant 0 : index
    %101 = vector.load %arg16[%c0_160, %c1_161, %c1_162, %c0_163] : memref<4x10x10x32xf32, #tpu.memory_space<vmem>>, vector<4x8x8x32xf32>
    %102 = vector.shape_cast %101 : vector<4x8x8x32xf32> to vector<256x32xf32>
    %c0_164 = arith.constant 0 : index
    %c1_165 = arith.constant 1 : index
    %c2_166 = arith.constant 2 : index
    %c0_167 = arith.constant 0 : index
    %103 = vector.load %arg16[%c0_164, %c1_165, %c2_166, %c0_167] : memref<4x10x10x32xf32, #tpu.memory_space<vmem>>, vector<4x8x8x32xf32>
    %104 = vector.shape_cast %103 : vector<4x8x8x32xf32> to vector<256x32xf32>
    %c0_168 = arith.constant 0 : index
    %c2_169 = arith.constant 2 : index
    %c0_170 = arith.constant 0 : index
    %c0_171 = arith.constant 0 : index
    %105 = vector.load %arg16[%c0_168, %c2_169, %c0_170, %c0_171] : memref<4x10x10x32xf32, #tpu.memory_space<vmem>>, vector<4x8x8x32xf32>
    %106 = vector.shape_cast %105 : vector<4x8x8x32xf32> to vector<256x32xf32>
    %c0_172 = arith.constant 0 : index
    %c2_173 = arith.constant 2 : index
    %c1_174 = arith.constant 1 : index
    %c0_175 = arith.constant 0 : index
    %107 = vector.load %arg16[%c0_172, %c2_173, %c1_174, %c0_175] : memref<4x10x10x32xf32, #tpu.memory_space<vmem>>, vector<4x8x8x32xf32>
    %108 = vector.shape_cast %107 : vector<4x8x8x32xf32> to vector<256x32xf32>
    %c0_176 = arith.constant 0 : index
    %c2_177 = arith.constant 2 : index
    %c2_178 = arith.constant 2 : index
    %c0_179 = arith.constant 0 : index
    %109 = vector.load %arg16[%c0_176, %c2_177, %c2_178, %c0_179] : memref<4x10x10x32xf32, #tpu.memory_space<vmem>>, vector<4x8x8x32xf32>
    %110 = vector.shape_cast %109 : vector<4x8x8x32xf32> to vector<256x32xf32>
    %111 = tpu.concatenate %94, %96, %98, %100, %102, %104, %106, %108, %110 in 1 : vector<256x32xf32>, vector<256x32xf32>, vector<256x32xf32>, vector<256x32xf32>, vector<256x32xf32>, vector<256x32xf32>, vector<256x32xf32>, vector<256x32xf32>, vector<256x32xf32> -> vector<256x288xf32>
    %c2_180 = arith.constant 2 : index
    %c0_181 = arith.constant 0 : index
    %c0_182 = arith.constant 0 : index
    %112 = vector.load %arg4[%c2_180, %c0_181, %c0_182] : memref<4x288x32xf32, #tpu.memory_space<vmem>>, vector<1x288x32xf32>
    %113 = vector.shape_cast %112 : vector<1x288x32xf32> to vector<288x32xf32>
    %cst_183 = arith.constant dense<0.000000e+00> : vector<256x32xf32>
    %114 = tpu.matmul %111, %113, %cst_183 {dimension_numbers = #tpu.dot_dimension_numbers<[1], [0], [0], [1], [0, 0, 1, 1], [], []>} : vector<256x288xf32>, vector<288x32xf32>, vector<256x32xf32> -> vector<256x32xf32>
    %c2_184 = arith.constant 2 : index
    %c0_185 = arith.constant 0 : index
    %c0_186 = arith.constant 0 : index
    %115 = vector.load %arg5[%c2_184, %c0_185, %c0_186] : memref<4x1x32xf32, #tpu.memory_space<vmem>>, vector<1x1x32xf32>
    %116 = vector.shape_cast %115 : vector<1x1x32xf32> to vector<1x32xf32>
    %117 = vector.broadcast %116 : vector<1x32xf32> to vector<256x32xf32>
    %118 = arith.addf %114, %117 : vector<256x32xf32>
    %cst_187 = arith.constant 0.000000e+00 : f32
    %119 = vector.broadcast %cst_187 : f32 to vector<256x32xf32>
    %120 = arith.maximumf %118, %119 : vector<256x32xf32>
    %121 = vector.shape_cast %120 : vector<256x32xf32> to vector<4x8x8x32xf32>
    %c0_188 = arith.constant 0 : index
    %c1_189 = arith.constant 1 : index
    %c1_190 = arith.constant 1 : index
    %c0_191 = arith.constant 0 : index
    %122 = vector.load %arg16[%c0_188, %c1_189, %c1_190, %c0_191] : memref<4x10x10x32xf32, #tpu.memory_space<vmem>>, vector<4x8x8x32xf32>
    tpu.vector_store %arg16[%c0_188, %c1_189, %c1_190, %c0_191], %121 {strides = array<i32>} : memref<4x10x10x32xf32, #tpu.memory_space<vmem>>, vector<4x8x8x32xf32>,
    %c0_192 = arith.constant 0 : index
    %c0_193 = arith.constant 0 : index
    %c0_194 = arith.constant 0 : index
    %c0_195 = arith.constant 0 : index
    %123 = vector.load %arg16[%c0_192, %c0_193, %c0_194, %c0_195] : memref<4x10x10x32xf32, #tpu.memory_space<vmem>>, vector<4x8x8x32xf32>
    %124 = vector.shape_cast %123 : vector<4x8x8x32xf32> to vector<256x32xf32>
    %c0_196 = arith.constant 0 : index
    %c0_197 = arith.constant 0 : index
    %c1_198 = arith.constant 1 : index
    %c0_199 = arith.constant 0 : index
    %125 = vector.load %arg16[%c0_196, %c0_197, %c1_198, %c0_199] : memref<4x10x10x32xf32, #tpu.memory_space<vmem>>, vector<4x8x8x32xf32>
    %126 = vector.shape_cast %125 : vector<4x8x8x32xf32> to vector<256x32xf32>
    %c0_200 = arith.constant 0 : index
    %c0_201 = arith.constant 0 : index
    %c2_202 = arith.constant 2 : index
    %c0_203 = arith.constant 0 : index
    %127 = vector.load %arg16[%c0_200, %c0_201, %c2_202, %c0_203] : memref<4x10x10x32xf32, #tpu.memory_space<vmem>>, vector<4x8x8x32xf32>
    %128 = vector.shape_cast %127 : vector<4x8x8x32xf32> to vector<256x32xf32>
    %c0_204 = arith.constant 0 : index
    %c1_205 = arith.constant 1 : index
    %c0_206 = arith.constant 0 : index
    %c0_207 = arith.constant 0 : index
    %129 = vector.load %arg16[%c0_204, %c1_205, %c0_206, %c0_207] : memref<4x10x10x32xf32, #tpu.memory_space<vmem>>, vector<4x8x8x32xf32>
    %130 = vector.shape_cast %129 : vector<4x8x8x32xf32> to vector<256x32xf32>
    %c0_208 = arith.constant 0 : index
    %c1_209 = arith.constant 1 : index
    %c1_210 = arith.constant 1 : index
    %c0_211 = arith.constant 0 : index
    %131 = vector.load %arg16[%c0_208, %c1_209, %c1_210, %c0_211] : memref<4x10x10x32xf32, #tpu.memory_space<vmem>>, vector<4x8x8x32xf32>
    %132 = vector.shape_cast %131 : vector<4x8x8x32xf32> to vector<256x32xf32>
    %c0_212 = arith.constant 0 : index
    %c1_213 = arith.constant 1 : index
    %c2_214 = arith.constant 2 : index
    %c0_215 = arith.constant 0 : index
    %133 = vector.load %arg16[%c0_212, %c1_213, %c2_214, %c0_215] : memref<4x10x10x32xf32, #tpu.memory_space<vmem>>, vector<4x8x8x32xf32>
    %134 = vector.shape_cast %133 : vector<4x8x8x32xf32> to vector<256x32xf32>
    %c0_216 = arith.constant 0 : index
    %c2_217 = arith.constant 2 : index
    %c0_218 = arith.constant 0 : index
    %c0_219 = arith.constant 0 : index
    %135 = vector.load %arg16[%c0_216, %c2_217, %c0_218, %c0_219] : memref<4x10x10x32xf32, #tpu.memory_space<vmem>>, vector<4x8x8x32xf32>
    %136 = vector.shape_cast %135 : vector<4x8x8x32xf32> to vector<256x32xf32>
    %c0_220 = arith.constant 0 : index
    %c2_221 = arith.constant 2 : index
    %c1_222 = arith.constant 1 : index
    %c0_223 = arith.constant 0 : index
    %137 = vector.load %arg16[%c0_220, %c2_221, %c1_222, %c0_223] : memref<4x10x10x32xf32, #tpu.memory_space<vmem>>, vector<4x8x8x32xf32>
    %138 = vector.shape_cast %137 : vector<4x8x8x32xf32> to vector<256x32xf32>
    %c0_224 = arith.constant 0 : index
    %c2_225 = arith.constant 2 : index
    %c2_226 = arith.constant 2 : index
    %c0_227 = arith.constant 0 : index
    %139 = vector.load %arg16[%c0_224, %c2_225, %c2_226, %c0_227] : memref<4x10x10x32xf32, #tpu.memory_space<vmem>>, vector<4x8x8x32xf32>
    %140 = vector.shape_cast %139 : vector<4x8x8x32xf32> to vector<256x32xf32>
    %141 = tpu.concatenate %124, %126, %128, %130, %132, %134, %136, %138, %140 in 1 : vector<256x32xf32>, vector<256x32xf32>, vector<256x32xf32>, vector<256x32xf32>, vector<256x32xf32>, vector<256x32xf32>, vector<256x32xf32>, vector<256x32xf32>, vector<256x32xf32> -> vector<256x288xf32>
    %c3 = arith.constant 3 : index
    %c0_228 = arith.constant 0 : index
    %c0_229 = arith.constant 0 : index
    %142 = vector.load %arg4[%c3, %c0_228, %c0_229] : memref<4x288x32xf32, #tpu.memory_space<vmem>>, vector<1x288x32xf32>
    %143 = vector.shape_cast %142 : vector<1x288x32xf32> to vector<288x32xf32>
    %cst_230 = arith.constant dense<0.000000e+00> : vector<256x32xf32>
    %144 = tpu.matmul %141, %143, %cst_230 {dimension_numbers = #tpu.dot_dimension_numbers<[1], [0], [0], [1], [0, 0, 1, 1], [], []>} : vector<256x288xf32>, vector<288x32xf32>, vector<256x32xf32> -> vector<256x32xf32>
    %c3_231 = arith.constant 3 : index
    %c0_232 = arith.constant 0 : index
    %c0_233 = arith.constant 0 : index
    %145 = vector.load %arg5[%c3_231, %c0_232, %c0_233] : memref<4x1x32xf32, #tpu.memory_space<vmem>>, vector<1x1x32xf32>
    %146 = vector.shape_cast %145 : vector<1x1x32xf32> to vector<1x32xf32>
    %147 = vector.broadcast %146 : vector<1x32xf32> to vector<256x32xf32>
    %148 = arith.addf %144, %147 : vector<256x32xf32>
    %cst_234 = arith.constant 0.000000e+00 : f32
    %149 = vector.broadcast %cst_234 : f32 to vector<256x32xf32>
    %150 = arith.maximumf %148, %149 : vector<256x32xf32>
    %151 = arith.addf %150, %90 : vector<256x32xf32>
    %cst_235 = arith.constant 0.000000e+00 : f32
    %152 = vector.broadcast %cst_235 : f32 to vector<256x32xf32>
    %153 = arith.maximumf %151, %152 : vector<256x32xf32>
    %c0_236 = arith.constant 0 : index
    %c0_237 = arith.constant 0 : index
    %154 = vector.load %arg6[%c0_236, %c0_237] : memref<3x32xf32, #tpu.memory_space<vmem>>, vector<3x32xf32>
    %155 = tpu.transpose %153, [1, 0] : vector<256x32xf32> -> vector<32x256xf32>
    %cst_238 = arith.constant dense<0.000000e+00> : vector<3x256xf32>
    %156 = tpu.matmul %154, %155, %cst_238 {dimension_numbers = #tpu.dot_dimension_numbers<[1], [0], [0], [1], [0, 0, 1, 1], [], []>} : vector<3x32xf32>, vector<32x256xf32>, vector<3x256xf32> -> vector<3x256xf32>
    %c0_239 = arith.constant 0 : index
    %c0_240 = arith.constant 0 : index
    %157 = vector.load %arg7[%c0_239, %c0_240] : memref<3x1xf32, #tpu.memory_space<vmem>>, vector<3x1xf32>
    %158 = vector.broadcast %157 : vector<3x1xf32> to vector<3x256xf32>
    %159 = arith.addf %156, %158 : vector<3x256xf32>
    %cst_241 = arith.constant 0.000000e+00 : f32
    %160 = vector.broadcast %cst_241 : f32 to vector<3x256xf32>
    %161 = arith.maximumf %159, %160 : vector<3x256xf32>
    %162 = vector.extract_strided_slice %161 {offsets = [0, 0], sizes = [1, 64], strides = [1, 1]} : vector<3x256xf32> to vector<1x64xf32>
    %163 = vector.extract_strided_slice %161 {offsets = [0, 64], sizes = [1, 64], strides = [1, 1]} : vector<3x256xf32> to vector<1x64xf32>
    %164 = vector.extract_strided_slice %161 {offsets = [0, 128], sizes = [1, 64], strides = [1, 1]} : vector<3x256xf32> to vector<1x64xf32>
    %165 = vector.extract_strided_slice %161 {offsets = [0, 192], sizes = [1, 64], strides = [1, 1]} : vector<3x256xf32> to vector<1x64xf32>
    %166 = tpu.concatenate %162, %163, %164, %165 in 0 : vector<1x64xf32>, vector<1x64xf32>, vector<1x64xf32>, vector<1x64xf32> -> vector<4x64xf32>
    %167 = vector.extract_strided_slice %161 {offsets = [1, 0], sizes = [1, 64], strides = [1, 1]} : vector<3x256xf32> to vector<1x64xf32>
    %168 = vector.extract_strided_slice %161 {offsets = [1, 64], sizes = [1, 64], strides = [1, 1]} : vector<3x256xf32> to vector<1x64xf32>
    %169 = vector.extract_strided_slice %161 {offsets = [1, 128], sizes = [1, 64], strides = [1, 1]} : vector<3x256xf32> to vector<1x64xf32>
    %170 = vector.extract_strided_slice %161 {offsets = [1, 192], sizes = [1, 64], strides = [1, 1]} : vector<3x256xf32> to vector<1x64xf32>
    %171 = tpu.concatenate %167, %168, %169, %170 in 0 : vector<1x64xf32>, vector<1x64xf32>, vector<1x64xf32>, vector<1x64xf32> -> vector<4x64xf32>
    %172 = tpu.concatenate %166, %171 in 1 : vector<4x64xf32>, vector<4x64xf32> -> vector<4x128xf32>
    %c0_242 = arith.constant 0 : index
    %c0_243 = arith.constant 0 : index
    %173 = vector.load %arg8[%c0_242, %c0_243] : memref<128x16xf32, #tpu.memory_space<vmem>>, vector<128x16xf32>
    %cst_244 = arith.constant dense<0.000000e+00> : vector<4x16xf32>
    %174 = tpu.matmul %172, %173, %cst_244 {dimension_numbers = #tpu.dot_dimension_numbers<[1], [0], [0], [1], [0, 0, 1, 1], [], []>} : vector<4x128xf32>, vector<128x16xf32>, vector<4x16xf32> -> vector<4x16xf32>
    %c0_245 = arith.constant 0 : index
    %c0_246 = arith.constant 0 : index
    %175 = vector.load %arg9[%c0_245, %c0_246] : memref<1x16xf32, #tpu.memory_space<vmem>>, vector<1x16xf32>
    %176 = vector.broadcast %175 : vector<1x16xf32> to vector<4x16xf32>
    %177 = arith.addf %174, %176 : vector<4x16xf32>
    %c0_247 = arith.constant 0 : index
    %c0_248 = arith.constant 0 : index
    %c0_249 = arith.constant 0 : index
    %178 = vector.load %arg14[%c0_247, %c0_248, %c0_249] : memref<1x4x16xf32, #tpu.memory_space<vmem>>, vector<1x4x16xf32>
    %179 = vector.shape_cast %178 : vector<1x4x16xf32> to vector<4x16xf32>
    %180 = vector.shape_cast %177 : vector<4x16xf32> to vector<1x4x16xf32>
    tpu.vector_store %arg14[%c0_247, %c0_248, %c0_249], %180 {strides = array<i32>} : memref<1x4x16xf32, #tpu.memory_space<vmem>>, vector<1x4x16xf32>,
    %181 = vector.extract_strided_slice %161 {offsets = [2, 0], sizes = [1, 64], strides = [1, 1]} : vector<3x256xf32> to vector<1x64xf32>
    %182 = vector.extract_strided_slice %161 {offsets = [2, 64], sizes = [1, 64], strides = [1, 1]} : vector<3x256xf32> to vector<1x64xf32>
    %183 = vector.extract_strided_slice %161 {offsets = [2, 128], sizes = [1, 64], strides = [1, 1]} : vector<3x256xf32> to vector<1x64xf32>
    %184 = vector.extract_strided_slice %161 {offsets = [2, 192], sizes = [1, 64], strides = [1, 1]} : vector<3x256xf32> to vector<1x64xf32>
    %185 = tpu.concatenate %181, %182, %183, %184 in 0 : vector<1x64xf32>, vector<1x64xf32>, vector<1x64xf32>, vector<1x64xf32> -> vector<4x64xf32>
    %c0_250 = arith.constant 0 : index
    %c0_251 = arith.constant 0 : index
    %186 = vector.load %arg10[%c0_250, %c0_251] : memref<64x256xf32, #tpu.memory_space<vmem>>, vector<64x256xf32>
    %cst_252 = arith.constant dense<0.000000e+00> : vector<4x256xf32>
    %187 = tpu.matmul %185, %186, %cst_252 {dimension_numbers = #tpu.dot_dimension_numbers<[1], [0], [0], [1], [0, 0, 1, 1], [], []>} : vector<4x64xf32>, vector<64x256xf32>, vector<4x256xf32> -> vector<4x256xf32>
    %c0_253 = arith.constant 0 : index
    %c0_254 = arith.constant 0 : index
    %188 = vector.load %arg11[%c0_253, %c0_254] : memref<1x256xf32, #tpu.memory_space<vmem>>, vector<1x256xf32>
    %189 = vector.broadcast %188 : vector<1x256xf32> to vector<4x256xf32>
    %190 = arith.addf %187, %189 : vector<4x256xf32>
    %cst_255 = arith.constant 0.000000e+00 : f32
    %191 = vector.broadcast %cst_255 : f32 to vector<4x256xf32>
    %192 = arith.maximumf %190, %191 : vector<4x256xf32>
    %c0_256 = arith.constant 0 : index
    %c0_257 = arith.constant 0 : index
    %193 = vector.load %arg12[%c0_256, %c0_257] : memref<256x1xf32, #tpu.memory_space<vmem>>, vector<256x1xf32>
    %cst_258 = arith.constant dense<0.000000e+00> : vector<4x1xf32>
    %194 = tpu.matmul %192, %193, %cst_258 {dimension_numbers = #tpu.dot_dimension_numbers<[1], [0], [0], [1], [0, 0, 1, 1], [], []>} : vector<4x256xf32>, vector<256x1xf32>, vector<4x1xf32> -> vector<4x1xf32>
    %c0_259 = arith.constant 0 : index
    %c0_260 = arith.constant 0 : index
    %195 = vector.load %arg13[%c0_259, %c0_260] : memref<1x1xf32, #tpu.memory_space<vmem>>, vector<1x1xf32>
    %196 = vector.broadcast %195 : vector<1x1xf32> to vector<4x1xf32>
    %197 = arith.addf %194, %196 : vector<4x1xf32>
    %198 = math.tanh %197 : vector<4x1xf32>
    %c0_261 = arith.constant 0 : index
    %c0_262 = arith.constant 0 : index
    %c0_263 = arith.constant 0 : index
    %199 = vector.load %arg15[%c0_261, %c0_262, %c0_263] : memref<1x4x1xf32, #tpu.memory_space<vmem>>, vector<1x4x1xf32>
    %200 = vector.shape_cast %199 : vector<1x4x1xf32> to vector<4x1xf32>
    %201 = vector.shape_cast %198 : vector<4x1xf32> to vector<1x4x1xf32>
    tpu.vector_store %arg15[%c0_261, %c0_262, %c0_263], %201 {strides = array<i32>} : memref<1x4x1xf32, #tpu.memory_space<vmem>>, vector<1x4x1xf32>,
    return
  }
  func.func @transform_0(%arg0: i32) -> (i32, i32, i32, i32) {
    %c0_i32 = arith.constant 0 : i32
    %c0_i32_0 = arith.constant 0 : i32
    %c0_i32_1 = arith.constant 0 : i32
    %c0_i32_2 = arith.constant 0 : i32
    return %arg0, %c0_i32, %c0_i32_0, %c0_i32_1 : i32, i32, i32, i32
  }
  func.func @transform_1(%arg0: i32) -> (i32, i32) {
    %c0_i32 = arith.constant 0 : i32
    %c0_i32_0 = arith.constant 0 : i32
    %c0_i32_1 = arith.constant 0 : i32
    return %c0_i32, %c0_i32_0 : i32, i32
  }
  func.func @transform_2(%arg0: i32) -> (i32, i32) {
    %c0_i32 = arith.constant 0 : i32
    %c0_i32_0 = arith.constant 0 : i32
    %c0_i32_1 = arith.constant 0 : i32
    return %c0_i32, %c0_i32_0 : i32, i32
  }
  func.func @transform_3(%arg0: i32) -> (i32, i32, i32) {
    %c0_i32 = arith.constant 0 : i32
    %c0_i32_0 = arith.constant 0 : i32
    %c0_i32_1 = arith.constant 0 : i32
    %c0_i32_2 = arith.constant 0 : i32
    return %c0_i32, %c0_i32_0, %c0_i32_1 : i32, i32, i32
  }
  func.func @transform_4(%arg0: i32) -> (i32, i32, i32) {
    %c0_i32 = arith.constant 0 : i32
    %c0_i32_0 = arith.constant 0 : i32
    %c0_i32_1 = arith.constant 0 : i32
    %c0_i32_2 = arith.constant 0 : i32
    return %c0_i32, %c0_i32_0, %c0_i32_1 : i32, i32, i32
  }
  func.func @transform_5(%arg0: i32) -> (i32, i32) {
    %c0_i32 = arith.constant 0 : i32
    %c0_i32_0 = arith.constant 0 : i32
    %c0_i32_1 = arith.constant 0 : i32
    return %c0_i32, %c0_i32_0 : i32, i32
  }
  func.func @transform_6(%arg0: i32) -> (i32, i32) {
    %c0_i32 = arith.constant 0 : i32
    %c0_i32_0 = arith.constant 0 : i32
    %c0_i32_1 = arith.constant 0 : i32
    return %c0_i32, %c0_i32_0 : i32, i32
  }
  func.func @transform_7(%arg0: i32) -> (i32, i32) {
    %c0_i32 = arith.constant 0 : i32
    %c0_i32_0 = arith.constant 0 : i32
    %c0_i32_1 = arith.constant 0 : i32
    return %c0_i32, %c0_i32_0 : i32, i32
  }
  func.func @transform_8(%arg0: i32) -> (i32, i32) {
    %c0_i32 = arith.constant 0 : i32
    %c0_i32_0 = arith.constant 0 : i32
    %c0_i32_1 = arith.constant 0 : i32
    return %c0_i32, %c0_i32_0 : i32, i32
  }
  func.func @transform_9(%arg0: i32) -> (i32, i32) {
    %c0_i32 = arith.constant 0 : i32
    %c0_i32_0 = arith.constant 0 : i32
    %c0_i32_1 = arith.constant 0 : i32
    return %c0_i32, %c0_i32_0 : i32, i32
  }
  func.func @transform_10(%arg0: i32) -> (i32, i32) {
    %c0_i32 = arith.constant 0 : i32
    %c0_i32_0 = arith.constant 0 : i32
    %c0_i32_1 = arith.constant 0 : i32
    return %c0_i32, %c0_i32_0 : i32, i32
  }
  func.func @transform_11(%arg0: i32) -> (i32, i32) {
    %c0_i32 = arith.constant 0 : i32
    %c0_i32_0 = arith.constant 0 : i32
    %c0_i32_1 = arith.constant 0 : i32
    return %c0_i32, %c0_i32_0 : i32, i32
  }
  func.func @transform_12(%arg0: i32) -> (i32, i32) {
    %c0_i32 = arith.constant 0 : i32
    %c0_i32_0 = arith.constant 0 : i32
    %c0_i32_1 = arith.constant 0 : i32
    return %c0_i32, %c0_i32_0 : i32, i32
  }
  func.func @transform_13(%arg0: i32) -> (i32, i32, i32) {
    %c0_i32 = arith.constant 0 : i32
    %c0_i32_0 = arith.constant 0 : i32
    %c0_i32_1 = arith.constant 0 : i32
    return %arg0, %c0_i32, %c0_i32_0 : i32, i32, i32
  }
  func.func @transform_14(%arg0: i32) -> (i32, i32, i32) {
    %c0_i32 = arith.constant 0 : i32
    %c0_i32_0 = arith.constant 0 : i32
    %c0_i32_1 = arith.constant 0 : i32
    return %arg0, %c0_i32, %c0_i32_0 : i32, i32, i32
  }
}

</mosaic_0001>

<bundles_post_ra>
// kernel: _lambda_.1
= control target key start
LH: loop header
LB: loop body
LE: loop exit
PB: predicated region body
PF: predicated region fallthrough
CT: control target
= control target key end

     0   :  { %s19682_s0 = inlined_call_operand.vmem [shape: f32[8,10,10,6], index: 0, kind: input, shape index: {}]   ;;  %s19683_s1 = inlined_call_operand.vmem [shape: f32[54,32], index: 1, kind: input, shape index: {}]   ;;  %s19684_s2 = inlined_call_operand.vmem [shape: f32[1,32], index: 2, kind: input, shape index: {}]   ;;  %s19685_s3 = inlined_call_operand.vmem [shape: f32[4,288,32], index: 3, kind: input, shape index: {}]   ;;  %s19686_s4 = inlined_call_operand.vmem [shape: f32[4,1,32], index: 4, kind: input, shape index: {}]   ;;  %s19687_s5 = inlined_call_operand.vmem [shape: f32[3,32], index: 5, kind: input, shape index: {}]   ;;  %s19688_s6 = inlined_call_operand.vmem [shape: f32[3,1], index: 6, kind: input, shape index: {}]   ;;  %s19689_s7 = inlined_call_operand.vmem [shape: f32[128,16], index: 7, kind: input, shape index: {}]   ;;  %s19690_s8 = inlined_call_operand.vmem [shape: f32[1,16], index: 8, kind: input, shape index: {}]   ;;  %s19691_s9 = inlined_call_operand.vmem [shape: f32[64,256], index: 9, kind: input, shape index: {}]   ;;  %s19692_s10 = inlined_call_operand.vmem [shape: f32[1,256], index: 10, kind: input, shape index: {}]   ;;  %s19693_s11 = inlined_call_operand.vmem [shape: f32[256,1], index: 11, kind: input, shape index: {}]   ;;  %s19694_s12 = inlined_call_operand.<no memory space> [shape: f32[1,1], index: 12, kind: input, shape index: {}]   ;;  %s19695_s13 = inlined_call_operand.hbm [shape: f32[2,4,16], index: 13, kind: output, shape index: {0}]   ;;  %s19696_s14 = inlined_call_operand.vmem [shape: f32[2,4,1], index: 14, kind: output, shape index: {1}]  }
   0x1   :  { %19808 = sst [smem:[#allocation48_spill]] %s19682_s0  ;;  %v20_v0 = vstv %s19694_s12 }
   0x2   :  { %19809 = sst [smem:[#allocation49_spill]] %s19683_s1  ;;  %21 = vst [vmem:[#allocation3] sm:$0x1] %v20_v0 }
   0x3   :  { %22 = vsyncpa [#allocation5], 0 }
   0x4   :  { %24 = vsyncpa [#allocation5 + $0x1], 0  ;;  %s14223_s15 = smov 0   ;;  %s14225_s16 = smov 0  }
   0x5   :  { %s14227_s17 = smov 0   ;;  %s14229_s18 = smov 0  }
   0x6 LB: > { %19810 = sst [smem:[#allocation7_spill]] %s14124_s17  ;;  %s14244_s12 = sadd.s32 4294967295, %s14128_s18   ;;  %s14128_s18 = sphi %s14229_s18, %s19979_s18   ;;  %s14124_s17 = sphi %s14227_s17, %s19981_s17   ;;  %s14120_s16 = sphi %s14225_s16, %s19983_s16   ;;  %s14116_s15 = sphi %s14223_s15, %s19982_s15  }
   0x7   : > { %s10899_s19 = sadd.s32 4294967294, %s14128_s18   ;;  %s14248_s20 = sadd.s32 1, %s14128_s18  }
   0x8   : > { %19811 = sst [smem:[#allocation8_spill]] %s14248_s20  ;;  %s315_s21 = sadd.s32 1, %s14124_s17 }
   0x9   : > { %s312_s22 = ssub.s32 %s14128_s18, %s14248_s20  ;;  %p325_p0 = scmp.ne.s32.totalorder %s14124_s17, %s14120_s16 }
   0xa   : > { %p313_p1 = scmp.eq.s32.totalorder %s312_s22, 0  ;;  %p326_p2 = scmp.eq.s32.totalorder %s14244_s12, 1 }
   0xb   : > { %p331_p3 = scmp.ne.s32.totalorder %s14120_s16, %s14116_s15  ;;  %p332_p4 = scmp.eq.s32.totalorder %s10899_s19, 1 }
   0xc   : > { %s14259_s23 = scalar_select %p313_p1, %s14124_s17, %s315_s21  }
   0xd   : > { %p14261_p5 = por %p326_p2, %p325_p0  ;;  %p14265_p6 = por %p332_p4, %p331_p3 }
   0xe   : > { %19812 = sst [smem:[#allocation9_spill]] %s14259_s23  ;;  %p10902_p7 = scmp.ge.s32.totalorder %s14128_s18, 1 }
   0xf   : > { %p422_p8 = scmp.lt.s32.totalorder %s14128_s18, 3 }
  0x11   : > { %p423_p9 = pnand %p10902_p7, %p422_p8 }
  0x13   : > { %426 = sbr.rel (%p423_p9) target bundleno = 3018 (0xbca), region = 72 }
  0x18   : > { %s10904_s26 = sshll.u32 %s14244_s12, 2  ;;  %s19815_s0 = sld [smem:[#allocation48_spill]]  ;;  %vm2255_vm0 = vcmask 1045504   ;;  %vm1880_vm1 = vcmask 48128   ;;  %vm1913_vm2 = vcmask 97280   ;;  %vm1946_vm3 = vcmask 146432  }
  0x19   : > { %p474_p10 = scmp.lt.s32.totalorder %s10904_s26, 7  ;;  %s19699_s19 = smov 12   ;;  %vm1979_vm4 = vcmask 195584   ;;  %vm2012_vm5 = vcmask 244736   ;;  %vm2045_vm6 = vcmask 293888   ;;  %vm2078_vm7 = vcmask 343040  }
  0x1a   : > { %s19703_s21 = smov 6   ;;  %s19697_s22 = smov 18   ;;  %vm2111_vm8 = vcmask 392192   ;;  %vm2158_vm9 = vcmask 441344   ;;  %vm484_vm10 = vcmask 261120   ;;  %vm486_vm11 = vcmask 254976  }
  0x1b   : > { %s19985_s26 = smov (!%p474_p10, %s10904_s26), 7  ;;  %s19816_s1 = sld [smem:[#allocation49_spill]]  ;;  %vm3638_vm12 = vcmask 523264   ;;  %vm3671_vm13 = vcmask 785408   ;;  %vm14143_vm14 = vmmov 0   ;;  %vm10449_vm15 = vcmask 1040384  }
  0x1c   : > { %s12070_s27 = smul.u32 160, %s19985_s26  ;;  %s19701_s26 = smov 24  }
  0x1d   : > { %s19707_s28 = smov 48   ;;  %s19820_s23 = smov 24  }
  0x1e   : > { %s14275_s30 = scalar_lea.vmem %s19815_s0, %s12070_s27  ;;  %s19705_s27 = smov 30  }
  0x1f   : > { %v630_v1 = vld [vmem:[%s14275_s30 + $0x2] sm:$0xff]  ;;  %v631_v3 = vld [vmem:[%s14275_s30 + $0x12] sm:$0xff]  ;;  %s19709_s0 = smov 36   ;;  %s19821_s29 = smov 30  }
  0x20   : > { %v598_v2 = vld [vmem:[%s14275_s30 + $0x1] sm:$0xff]  ;;  %1016 = vrot.lane.b32.xlu1 %v630_v1, %s19699_s19  ;;  %v599_v4 = vld [vmem:[%s14275_s30 + $0x11] sm:$0xff]  ;;  %s19824_s20 = smov 42  }
  0x21   : > { %888 = vrot.lane.b32.xlu0 %v598_v2, %s19703_s21  ;;  %v14286_v5 = vld [vmem:[%s14275_s30 + $0x20] sm:$0xff]  ;;  %v14289_v6 = vld [vmem:[%s14275_s30 + $0x10] sm:$0xff]  ;;  %v2149_v10 = vld [vmem:[%s19816_s1 + $0x28] sm:$0xff] }
  0x22   : > { %v10940_v7 = vld [vmem:[%s14275_s30 + $0x21] sm:$0xff]  ;;  %v2150_v8 = vld [vmem:[%s19816_s1 + $0x30] sm:$0x3f]  ;;  %v2147_v13 = vld [vmem:[%s19816_s1 + $0x18] sm:$0xff] }
  0x23   : > { %v10972_v9 = vld [vmem:[%s14275_s30 + $0x22] sm:$0xff]  ;;  %11685 = vmatprep.subr.msk.mxu1 %vm2255_vm0, %v2150_v8  ;;  %v601_v12 = vld [vmem:[%s14275_s30 + $0x31] sm:$0xff] }
  0x24   : > { %1018 = vrot.lane.b32.xlu1 %v631_v3, %s19699_s19  ;;  %11686 = vmatpush3.msk.msra.mxu1 %vm2255_vm0, %v2150_v8  ;;  %v2148_v11 = vld [vmem:[%s19816_s1 + $0x20] sm:$0xff]  ;;  %s19817_s19 = smov 12   ;;  %v14320_v14 = vld [vmem:[%s14275_s30 + $0x30] sm:$0xff]  ;;  %v2145_v16 = vld [vmem:[%s19816_s1 + $0x8] sm:$0xff]  ;;  %vm10453_vm0 = vcmask 1042432  }
  0x25   : > { %890 = vrot.lane.b32.xlu0 %v599_v4, %s19703_s21  ;;  %11687 = vmatprep.subr.mxu1 %v2149_v10  ;;  %v2146_v15 = vld [vmem:[%s19816_s1 + $0x10] sm:$0xff]  ;;  %v2144_v18 = vld [vmem:[%s19816_s1] sm:$0xff]  ;;  %s19822_s1 = smov 48  }
  0x26   : > { %11688 = vmatpush3.msra.mxu1 %v2149_v10  ;;  %v633_v17 = vld [vmem:[%s14275_s30 + $0x32] sm:$0xff]  ;;  %v14341_v19 = vld [vmem:[%s14275_s30 + $0x40] sm:$0xff] }
  0x27   : > { %11689 = vmatprep.subr.mxu1 %v2148_v11  ;;  %v10942_v20 = vld [vmem:[%s14275_s30 + $0x41] sm:$0xff]  ;;  %v14353_v22 = vld [vmem:[%s14275_s30 + $0x50] sm:$0xff] }
  0x28   : > { %1146 = vrot.lane.b32.xlu1 %v14286_v5, %s19697_s22  ;;  %11690 = vmatpush3.msra.mxu1 %v2148_v11  ;;  %v10974_v21 = vld [vmem:[%s14275_s30 + $0x42] sm:$0xff]  ;;  %v11038_v23 = vld [vmem:[%s14275_s30 + $0x51] sm:$0xff] }
  0x29   : > { %1144 = vrot.lane.b32.xlu0 %v14289_v6, %s19697_s22  ;;  %s19818_s22 = smov 6   ;;  %11691 = vmatprep.subr.mxu1 %v2147_v13  ;;  %v11070_v24 = vld [vmem:[%s14275_s30 + $0x52] sm:$0xff]  ;;  %v14370_v25 = vld [vmem:[%s14275_s30 + $0x60] sm:$0xff] }
  0x2a   : > { %11692 = vmatpush3.msra.mxu1 %v2147_v13  ;;  %v10944_v26 = vld [vmem:[%s14275_s30 + $0x61] sm:$0xff]  ;;  %v14383_v28 = vld [vmem:[%s14275_s30 + $0x70] sm:$0xff] }
  0x2b   : > { %11693 = vmatprep.subr.mxu1 %v2146_v15  ;;  %v10976_v27 = vld [vmem:[%s14275_s30 + $0x62] sm:$0xff]  ;;  %v11040_v29 = vld [vmem:[%s14275_s30 + $0x71] sm:$0xff] }
  0x2c   : > { %1274 = vrot.lane.b32.xlu1 %v10940_v7, %s19701_s26  ;;  %11694 = vmatpush3.msra.mxu1 %v2146_v15  ;;  %v11072_v30 = vld [vmem:[%s14275_s30 + $0x72] sm:$0xff]  ;;  %v10914_v31 = vld [vmem:[%s14275_s30 + $0x80] sm:$0xff] }
  0x2d   : > { %1272 = vrot.lane.b32.xlu0 %v599_v4, %s19701_s26  ;;  %s19712_s26 = smov 42   ;;  %11695 = vmatprep.subr.mxu1 %v2145_v16  ;;  %v10946_v32 = vld [vmem:[%s14275_s30 + $0x81] sm:$0xff]  ;;  %v11010_v34 = vld [vmem:[%s14275_s30 + $0x90] sm:$0xff] }
  0x2e   : > { %11696 = vmatpush3.msra.mxu1 %v2145_v16  ;;  %v10978_v33 = vld [vmem:[%s14275_s30 + $0x82] sm:$0xff]  ;;  %v11042_v37 = vld [vmem:[%s14275_s30 + $0x91] sm:$0xff] }
  0x2f   : > { %11697 = vmatprep.subr.mxu1 %v2144_v18  ;;  %v11074_v40 = vld [vmem:[%s14275_s30 + $0x92] sm:$0xff]  ;;  %v606_v44 = vld [vmem:[%s14275_s30 + $0xa1] sm:$0xff] }
  0x30   : > { %892 = vrot.lane.b32.xlu1 %v10940_v7, %s19703_s21  ;;  %s19819_s21 = smov 18   ;;  %11698 = vmatpush3.msra.mxu1 %v2144_v18  ;;  %v607_v43 = vld [vmem:[%s14275_s30 + $0xb1] sm:$0xff]  ;;  %v638_v48 = vld [vmem:[%s14275_s30 + $0xa2] sm:$0xff] }
  0x31   : > { %1400 = vrot.lane.b32.xlu0 %v631_v3, %s19705_s27  ;;  %v639_v47 = vld [vmem:[%s14275_s30 + $0xb2] sm:$0xff]  ;;  %v14433_v51 = vld [vmem:[%s14275_s30 + $0xc0] sm:$0xff] }
  0x32   : > { %v14436_v52 = vld [vmem:[%s14275_s30 + $0xb0] sm:$0xff]  ;;  %v10948_v55 = vld [vmem:[%s14275_s30 + $0xc1] sm:$0xff] }
  0x33   : > { %v566_v58 = vld [vmem:[%s14275_s30] sm:$0xff]  ;;  %v609_v8 = vld [vmem:[%s14275_s30 + $0xd1] sm:$0xff] }
  0x34   : > { %1528 = vrot.lane.b32.xlu1 %v14286_v5, %s19709_s0  ;;  %v10980_v63 = vld [vmem:[%s14275_s30 + $0xc2] sm:$0xff]  ;;  %v14473_v16 = vld [vmem:[%s14275_s30 + $0xd0] sm:$0xff] }
  0x35   : > { %1402 = vrot.lane.b32.xlu0 %v10972_v9, %s19705_s27 }
  0x38   : > { %1020 = vrot.lane.b32.xlu1 %v10972_v9, %s19817_s19 }
  0x39   : > { %894 = vrot.lane.b32.xlu0 %v601_v12, %s19818_s22 }
  0x3c   : > { %1656 = vrot.lane.b32.xlu1 %v10940_v7, %s19712_s26 }
  0x3d   : > { %1530 = vrot.lane.b32.xlu0 %v14320_v14, %s19709_s0 }
  0x40   : > { %1148 = vrot.lane.b32.xlu1 %v14320_v14, %s19819_s21 }
  0x41   : > { %1022 = vrot.lane.b32.xlu0 %v633_v17, %s19817_s19 }
  0x44   : > { %1784 = vrot.lane.b32.xlu1 %v10972_v9, %s19707_s28 }
  0x45   : > { %1658 = vrot.lane.b32.xlu0 %v601_v12, %s19712_s26 }
  0x48   : > { %1276 = vrot.lane.b32.xlu1 %v601_v12, %s19820_s23 }
  0x49   : > { %1150 = vrot.lane.b32.xlu0 %v14341_v19, %s19819_s21 }
  0x4c   : > { %1278 = vrot.lane.b32.xlu1 %v10942_v20, %s19820_s23 }
  0x4d   : > { %1786 = vrot.lane.b32.xlu0 %v633_v17, %s19707_s28 }
  0x50   : > { %1406 = vrot.lane.b32.xlu1 %v10974_v21, %s19821_s29 }
  0x51   : > { %1404 = vrot.lane.b32.xlu0 %v633_v17, %s19821_s29 }
  0x54   : > { %1534 = vrot.lane.b32.xlu1 %v14353_v22, %s19709_s0 }
  0x55   : > { %1532 = vrot.lane.b32.xlu0 %v14341_v19, %s19709_s0 }
  0x58   : > { %1662 = vrot.lane.b32.xlu1 %v11038_v23, %s19712_s26 }
  0x59   : > { %1660 = vrot.lane.b32.xlu0 %v10942_v20, %s19712_s26 }
  0x5c   : > { %896 = vrot.lane.b32.xlu1 %v10942_v20, %s19818_s22 }
  0x5d   : > { %1788 = vrot.lane.b32.xlu0 %v10974_v21, %s19707_s28 }
  0x60   : > { %898 = vrot.lane.b32.xlu1 %v11038_v23, %s19818_s22 }
  0x61   : > { %1790 = vrot.lane.b32.xlu0 %v11070_v24, %s19707_s28 }
  0x64   : > { %1026 = vrot.lane.b32.xlu1 %v11070_v24, %s19817_s19 }
  0x65   : > { %1024 = vrot.lane.b32.xlu0 %v10974_v21, %s19817_s19 }
  0x68   : > { %1154 = vrot.lane.b32.xlu1 %v14370_v25, %s19819_s21 }
  0x69   : > { %1152 = vrot.lane.b32.xlu0 %v14353_v22, %s19819_s21 }
  0x6c   : > { %1282 = vrot.lane.b32.xlu1 %v10944_v26, %s19820_s23 }
  0x6d   : > { %1280 = vrot.lane.b32.xlu0 %v11038_v23, %s19820_s23 }
  0x70   : > { %1410 = vrot.lane.b32.xlu1 %v10976_v27, %s19821_s29 }
  0x71   : > { %1408 = vrot.lane.b32.xlu0 %v11070_v24, %s19821_s29  ;;  %v641_v24 = vld [vmem:[%s14275_s30 + $0xd2] sm:$0xff] }
  0x74   : > { %1538 = vrot.lane.b32.xlu1 %v14383_v28, %s19709_s0 }
  0x75   : > { %1536 = vrot.lane.b32.xlu0 %v14370_v25, %s19709_s0 }
  0x78   : > { %1666 = vrot.lane.b32.xlu1 %v11040_v29, %s19712_s26 }
  0x79   : > { %1664 = vrot.lane.b32.xlu0 %v10944_v26, %s19712_s26 }
  0x7c   : > { %900 = vrot.lane.b32.xlu1 %v10944_v26, %s19818_s22 }
  0x7d   : > { %1792 = vrot.lane.b32.xlu0 %v10976_v27, %s19707_s28 }
  0x80   : > { %902 = vrot.lane.b32.xlu1 %v11040_v29, %s19818_s22 }
  0x81   : > { %1794 = vrot.lane.b32.xlu0 %v11072_v30, %s19707_s28 }
  0x84   : > { %1030 = vrot.lane.b32.xlu1 %v11072_v30, %s19817_s19 }
  0x85   : > { %1028 = vrot.lane.b32.xlu0 %v10976_v27, %s19817_s19 }
  0x88   : > { %1158 = vrot.lane.b32.xlu1 %v10914_v31, %s19819_s21 }
  0x89   : > { %1156 = vrot.lane.b32.xlu0 %v14383_v28, %s19819_s21 }
  0x8c   : > { %1286 = vrot.lane.b32.xlu1 %v10946_v32, %s19820_s23 }
  0x8d   : > { %1284 = vrot.lane.b32.xlu0 %v11040_v29, %s19820_s23 }
  0x90   : > { %1414 = vrot.lane.b32.xlu1 %v10978_v33, %s19821_s29 }
  0x91   : > { %1412 = vrot.lane.b32.xlu0 %v11072_v30, %s19821_s29 }
  0x92   : > { %v1017_v35 = vpop.permute.xlu1 %1016 }
  0x93   : > { %v889_v36 = vpop.permute.xlu0 %888 }
  0x94   : > { %1542 = vrot.lane.b32.xlu1 %v11010_v34, %s19709_s0  ;;  %v1881_v59 = vsel %vm1880_vm1, %v566_v58, %v889_v36 }
  0x95   : > { %1540 = vrot.lane.b32.xlu0 %v10914_v31, %s19709_s0  ;;  %v1914_v62 = vsel %vm1913_vm2, %v1881_v59, %v1017_v35 }
  0x96   : > { %v14413_v38 = vpop.permute.xlu1 %1018 }
  0x97   : > { %v891_v39 = vpop.permute.xlu0 %890 }
  0x98   : > { %1670 = vrot.lane.b32.xlu1 %v11042_v37, %s19712_s26  ;;  %v1882_v9 = vsel %vm1880_vm1, %v14289_v6, %v891_v39 }
  0x99   : > { %1668 = vrot.lane.b32.xlu0 %v10946_v32, %s19712_s26  ;;  %v1915_v15 = vsel %vm1913_vm2, %v1882_v9, %v14413_v38  ;;  %v10950_v38 = vld [vmem:[%s14275_s30 + $0xe1] sm:$0xff] }
  0x9a   : > { %v14418_v41 = vpop.permute.xlu1 %1146  ;;  %v14545_v9 = vld [vmem:[%s14275_s30 + $0x100] sm:$0xff] }
  0x9b   : > { %v1145_v42 = vpop.permute.xlu0 %1144  ;;  %v1948_v6 = vsel %vm1946_vm3, %v1915_v15, %v14418_v41  ;;  %v10952_v15 = vld [vmem:[%s14275_s30 + $0x101] sm:$0xff] }
  0x9c   : > { %1798 = vrot.lane.b32.xlu1 %v11074_v40, %s19707_s28  ;;  %v1947_v0 = vsel %vm1946_vm3, %v1914_v62, %v1145_v42 }
  0x9d   : > { %1796 = vrot.lane.b32.xlu0 %v10978_v33, %s19707_s28  ;;  %v14493_v33 = vld [vmem:[%s14275_s30 + $0xe0] sm:$0xff] }
  0x9e   : > { %v1275_v45 = vpop.permute.xlu1 %1274 }
  0x9f   : > { %v1273_v46 = vpop.permute.xlu0 %1272  ;;  %v1981_v20 = vsel %vm1979_vm4, %v1948_v6, %v1275_v45 }
  0xa0   : > { %906 = vrot.lane.b32.xlu1 %v607_v43, %s19818_s22  ;;  %v1980_v3 = vsel %vm1979_vm4, %v1947_v0, %v1273_v46  ;;  %v10982_v46 = vld [vmem:[%s14275_s30 + $0xe2] sm:$0xff] }
  0xa1   : > { %904 = vrot.lane.b32.xlu0 %v606_v44, %s19818_s22 }
  0xa2   : > { %v14428_v49 = vpop.permute.xlu1 %892 }
  0xa3   : > { %v1401_v50 = vpop.permute.xlu0 %1400  ;;  %v1883_v36 = vsel %vm1880_vm1, %v14286_v5, %v14428_v49 }
  0xa4   : > { %1034 = vrot.lane.b32.xlu1 %v639_v47, %s19817_s19  ;;  %v2013_v4 = vsel %vm2012_vm5, %v1980_v3, %v1401_v50 }
  0xa5   : > { %1032 = vrot.lane.b32.xlu0 %v638_v48, %s19817_s19 }
  0xa6   : > { %v1529_v53 = vpop.permute.xlu1 %1528 }
  0xa7   : > { %v1403_v54 = vpop.permute.xlu0 %1402  ;;  %v2046_v7 = vsel %vm2045_vm6, %v2013_v4, %v1529_v53 }
  0xa8   : > { %1162 = vrot.lane.b32.xlu1 %v14433_v51, %s19819_s21  ;;  %v2014_v21 = vsel %vm2012_vm5, %v1981_v20, %v1403_v54 }
  0xa9   : > { %1160 = vrot.lane.b32.xlu0 %v14436_v52, %s19819_s21 }
  0xaa   : > { %v14443_v56 = vpop.permute.xlu1 %1020 }
  0xab   : > { %v14445_v57 = vpop.permute.xlu0 %894  ;;  %v1916_v37 = vsel %vm1913_vm2, %v1883_v36, %v14443_v56  ;;  %v14525_v56 = vld [vmem:[%s14275_s30 + $0xf0] sm:$0xff] }
  0xac   : > { %1290 = vrot.lane.b32.xlu1 %v10948_v55, %s19820_s23  ;;  %v14580_v36 = vld [vmem:[%s14275_s30 + $0x110] sm:$0xff] }
  0xad   : > { %1288 = vrot.lane.b32.xlu0 %v607_v43, %s19820_s23  ;;  %v1884_v43 = vsel %vm1880_vm1, %v14320_v14, %v14445_v57 }
  0xae   : > { %v1657_v60 = vpop.permute.xlu1 %1656 }
  0xaf   : > { %v1531_v61 = vpop.permute.xlu0 %1530  ;;  %v2079_v10 = vsel %vm2078_vm7, %v2046_v7, %v1657_v60 }
  0xb0   : > { %908 = vrot.lane.b32.xlu1 %v10948_v55, %s19818_s22  ;;  %v2047_v23 = vsel %vm2045_vm6, %v2014_v21, %v1531_v61  ;;  %v11046_v61 = vld [vmem:[%s14275_s30 + $0xf1] sm:$0xff] }
  0xb1   : > { %1416 = vrot.lane.b32.xlu0 %v639_v47, %s19821_s29 }
  0xb2   : > { %v1149_v1 = vpop.permute.xlu1 %1148 }
  0xb3   : > { %v1023_v2 = vpop.permute.xlu0 %1022  ;;  %v1949_v39 = vsel %vm1946_vm3, %v1916_v37, %v1149_v1 }
  0xb4   : > { %1544 = vrot.lane.b32.xlu1 %v14433_v51, %s19709_s0  ;;  %v1917_v44 = vsel %vm1913_vm2, %v1884_v43, %v1023_v2  ;;  %v11078_v2 = vld [vmem:[%s14275_s30 + $0xf2] sm:$0xff] }
  0xb5   : > { %1418 = vrot.lane.b32.xlu0 %v10980_v63, %s19821_s29 }
  0xb6   : > { %v1785_v11 = vpop.permute.xlu1 %1784 }
  0xb7   : > { %v1659_v12 = vpop.permute.xlu0 %1658  ;;  %v2112_v13 = vsel %vm2111_vm8, %v2079_v10, %v1785_v11 }
  0xb8   : > { %1036 = vrot.lane.b32.xlu1 %v10980_v63, %s19817_s19  ;;  %11699 = vmatprep.mubr.msk.f32.mxu1 %vm2158_vm9, %v2112_v13  ;;  %v2080_v26 = vsel %vm2078_vm7, %v2047_v23, %v1659_v12 }
  0xb9   : > { %910 = vrot.lane.b32.xlu0 %v609_v8, %s19818_s22 }
  0xba   : > { %v1277_v17 = vpop.permute.xlu1 %1276 }
  0xbb   : > { %v1151_v18 = vpop.permute.xlu0 %1150  ;;  %v1982_v42 = vsel %vm1979_vm4, %v1949_v39, %v1277_v17 }
  0xbc   : > { %1672 = vrot.lane.b32.xlu1 %v10948_v55, %s19712_s26  ;;  %v1950_v47 = vsel %vm1946_vm3, %v1917_v44, %v1151_v18 }
  0xbd   : > { %1546 = vrot.lane.b32.xlu0 %v14473_v16, %s19709_s0 }
  0xbe   : > { %v1279_v27 = vpop.permute.xlu1 %1278 }
  0xbf   : > { %v1787_v29 = vpop.permute.xlu0 %1786  ;;  %v1983_v14 = vsel %vm1979_vm4, %v1950_v47, %v1279_v27 }
  0xc0   : > { %v2113_v30 = vsel %vm2111_vm8, %v2080_v26, %v1787_v29  ;;  %1164 = vrot.lane.b32.xlu1 %v14473_v16, %s19819_s21  ;;  %v14565_v26 = vld [vmem:[%s14275_s30 + $0x102] sm:$0xff] }
  0xc1   : > { %1038 = vrot.lane.b32.xlu0 %v641_v24, %s19817_s19  ;;  %11700 = vmatmul.mubr.msk.f32.vlgmr.msra.gmra.mxu1 %vm2158_vm9, %v2113_v30 }
  0xc2   : > { %v1407_v31 = vpop.permute.xlu1 %1406 }
  0xc3   : > { %v1405_v32 = vpop.permute.xlu0 %1404  ;;  %v2016_v54 = vsel %vm2012_vm5, %v1983_v14, %v1407_v31  ;;  %v10922_v14 = vld [vmem:[%s14275_s30 + $0x120] sm:$0xff] }
  0xc4   : > { %1800 = vrot.lane.b32.xlu1 %v10980_v63, %s19707_s28  ;;  %v2015_v5 = vsel %vm2012_vm5, %v1982_v42, %v1405_v32 }
  0xc5   : > { %1674 = vrot.lane.b32.xlu0 %v609_v8, %s19712_s26 }
  0xc6   : > { %v1535_v34 = vpop.permute.xlu1 %1534 }
  0xc7   : > { %v1533_v35 = vpop.permute.xlu0 %1532  ;;  %v2049_v55 = vsel %vm2045_vm6, %v2016_v54, %v1535_v34 }
  0xc8   : > { %1292 = vrot.lane.b32.xlu1 %v609_v8, %s19820_s23  ;;  %v2048_v45 = vsel %vm2045_vm6, %v2015_v5, %v1533_v35 }
  0xc9   : > { %1166 = vrot.lane.b32.xlu0 %v14493_v33, %s19819_s21 }
  0xca   : > { %v1663_v40 = vpop.permute.xlu1 %1662 }
  0xcb   : > { %v1661_v41 = vpop.permute.xlu0 %1660  ;;  %v2082_v57 = vsel %vm2078_vm7, %v2049_v55, %v1663_v40 }
  0xcc   : > { %1294 = vrot.lane.b32.xlu1 %v10950_v38, %s19820_s23  ;;  %v2081_v48 = vsel %vm2078_vm7, %v2048_v45, %v1661_v41  ;;  %v14592_v41 = vld [vmem:[%s14275_s30 + $0x111] sm:$0xff] }
  0xcd   : > { %1802 = vrot.lane.b32.xlu0 %v641_v24, %s19707_s28  ;;  %v14609_v45 = vld [vmem:[%s14275_s30 + $0x112] sm:$0xff] }
  0xce   : > { %v897_v49 = vpop.permute.xlu1 %896 }
  0xcf   : > { %v1789_v50 = vpop.permute.xlu0 %1788  ;;  %v1885_v12 = vsel %vm1880_vm1, %v14341_v19, %v897_v49 }
  0xd0   : > { %v2114_v53 = vsel %vm2111_vm8, %v2081_v48, %v1789_v50  ;;  %1422 = vrot.lane.b32.xlu1 %v10982_v46, %s19821_s29  ;;  %v19743_v48 = vmov 0.0  }
  0xd1   : > { %1420 = vrot.lane.b32.xlu0 %v641_v24, %s19821_s29  ;;  %11702 = vmatprep.mubr.msk.f32.mxu1 %vm2158_vm9, %v2114_v53  ;;  %490 = vst.msk [vmem:[#allocation2 + $0x20] sm:$0xff] %vm484_vm10, %v19743_v48  ;;  %485 = vst.msk [vmem:[#allocation2] sm:$0xff] %vm484_vm10, %v19743_v48 }
  0xd2   : > { %v899_v58 = vpop.permute.xlu1 %898  ;;  %491 = vst.msk [vmem:[#allocation2 + $0x28] sm:$0x3] %vm486_vm11, %v19743_v48  ;;  %487 = vst.msk [vmem:[#allocation2 + $0x8] sm:$0x3] %vm486_vm11, %v19743_v48  ;;  %3939 = vmatprep.subr.mxu1 %v19743_v48 }
  0xd3   : > { %v1791_v59 = vpop.permute.xlu0 %1790  ;;  %v1886_v21 = vsel %vm1880_vm1, %v14353_v22, %v899_v58  ;;  %488 = vst.msk [vmem:[#allocation2 + $0x10] sm:$0xff] %vm484_vm10, %v19743_v48  ;;  %492 = vst.msk [vmem:[#allocation2 + $0x30] sm:$0xff] %vm484_vm10, %v19743_v48 }
  0xd4   : > { %v2115_v60 = vsel %vm2111_vm8, %v2082_v57, %v1791_v59  ;;  %1550 = vrot.lane.b32.xlu1 %v14525_v56, %s19709_s0  ;;  %489 = vst.msk [vmem:[#allocation2 + $0x18] sm:$0x3] %vm486_vm11, %v19743_v48  ;;  %493 = vst.msk [vmem:[#allocation2 + $0x38] sm:$0x3] %vm486_vm11, %v19743_v48 }
  0xd5   : > { %1548 = vrot.lane.b32.xlu0 %v14493_v33, %s19709_s0  ;;  %11703 = vmatmul.mubr.msk.f32.gmra.mxu1 %vm2158_vm9, %v2115_v60  ;;  %494 = vst.msk [vmem:[#allocation2 + $0x40] sm:$0xff] %vm484_vm10, %v19743_v48  ;;  %496 = vst.msk [vmem:[#allocation2 + $0x50] sm:$0xff] %vm484_vm10, %v19743_v48  ;;  %v10954_v60 = vld [vmem:[%s14275_s30 + $0x121] sm:$0xff] }
  0xd6   : > { %v1027_v62 = vpop.permute.xlu1 %1026  ;;  %495 = vst.msk [vmem:[#allocation2 + $0x48] sm:$0x3] %vm486_vm11, %v19743_v48  ;;  %497 = vst.msk [vmem:[#allocation2 + $0x58] sm:$0x3] %vm486_vm11, %v19743_v48 }
  0xd7   : > { %v1025_v63 = vpop.permute.xlu0 %1024  ;;  %v1919_v23 = vsel %vm1913_vm2, %v1886_v21, %v1027_v62  ;;  %498 = vst.msk [vmem:[#allocation2 + $0x60] sm:$0xff] %vm484_vm10, %v19743_v48  ;;  %500 = vst.msk [vmem:[#allocation2 + $0x70] sm:$0xff] %vm484_vm10, %v19743_v48 }
  0xd8   : > { %1678 = vrot.lane.b32.xlu1 %v11046_v61, %s19712_s26  ;;  %v1918_v13 = vsel %vm1913_vm2, %v1885_v12, %v1025_v63  ;;  %499 = vst.msk [vmem:[#allocation2 + $0x68] sm:$0x3] %vm486_vm11, %v19743_v48  ;;  %501 = vst.msk [vmem:[#allocation2 + $0x78] sm:$0x3] %vm486_vm11, %v19743_v48 }
  0xd9   : > { %1676 = vrot.lane.b32.xlu0 %v10950_v38, %s19712_s26  ;;  %502 = vst.msk [vmem:[#allocation2 + $0x80] sm:$0xff] %vm484_vm10, %v19743_v48  ;;  %504 = vst.msk [vmem:[#allocation2 + $0x90] sm:$0xff] %vm484_vm10, %v19743_v48 }
  0xda   : > { %v1155_v0 = vpop.permute.xlu1 %1154  ;;  %503 = vst.msk [vmem:[#allocation2 + $0x88] sm:$0x3] %vm486_vm11, %v19743_v48  ;;  %505 = vst.msk [vmem:[#allocation2 + $0x98] sm:$0x3] %vm486_vm11, %v19743_v48 }
  0xdb   : > { %v1153_v1 = vpop.permute.xlu0 %1152  ;;  %v1952_v27 = vsel %vm1946_vm3, %v1919_v23, %v1155_v0  ;;  %506 = vst.msk [vmem:[#allocation2 + $0xa0] sm:$0xff] %vm484_vm10, %v19743_v48  ;;  %508 = vst.msk [vmem:[#allocation2 + $0xb0] sm:$0xff] %vm484_vm10, %v19743_v48  ;;  %v11082_v23 = vld [vmem:[%s14275_s30 + $0x132] sm:$0xff] }
  0xdc   : > { %912 = vrot.lane.b32.xlu1 %v10950_v38, %s19818_s22  ;;  %v1951_v6 = vsel %vm1946_vm3, %v1918_v13, %v1153_v1  ;;  %507 = vst.msk [vmem:[#allocation2 + $0xa8] sm:$0x3] %vm486_vm11, %v19743_v48  ;;  %509 = vst.msk [vmem:[#allocation2 + $0xb8] sm:$0x3] %vm486_vm11, %v19743_v48 }
  0xdd   : > { %1804 = vrot.lane.b32.xlu0 %v10982_v46, %s19707_s28  ;;  %510 = vst.msk [vmem:[#allocation2 + $0xc0] sm:$0xff] %vm484_vm10, %v19743_v48  ;;  %512 = vst.msk [vmem:[#allocation2 + $0xd0] sm:$0xff] %vm484_vm10, %v19743_v48 }
  0xde   : > { %v1283_v3 = vpop.permute.xlu1 %1282  ;;  %511 = vst.msk [vmem:[#allocation2 + $0xc8] sm:$0x3] %vm486_vm11, %v19743_v48  ;;  %513 = vst.msk [vmem:[#allocation2 + $0xd8] sm:$0x3] %vm486_vm11, %v19743_v48 }
  0xdf   : > { %v1281_v4 = vpop.permute.xlu0 %1280  ;;  %v1985_v31 = vsel %vm1979_vm4, %v1952_v27, %v1283_v3  ;;  %514 = vst.msk [vmem:[#allocation2 + $0xe0] sm:$0xff] %vm484_vm10, %v19743_v48  ;;  %516 = vst.msk [vmem:[#allocation2 + $0xf0] sm:$0xff] %vm484_vm10, %v19743_v48  ;;  %v3835_v27 = vld [vmem:[%s19685_s3 + $0x118] sm:$0xff] }
  0xe0   : > { %914 = vrot.lane.b32.xlu1 %v11046_v61, %s19818_s22  ;;  %v1984_v20 = vsel %vm1979_vm4, %v1951_v6, %v1281_v4  ;;  %515 = vst.msk [vmem:[#allocation2 + $0xe8] sm:$0x3] %vm486_vm11, %v19743_v48  ;;  %517 = vst.msk [vmem:[#allocation2 + $0xf8] sm:$0x3] %vm486_vm11, %v19743_v48  ;;  %v11018_v6 = vld [vmem:[%s14275_s30 + $0x130] sm:$0xff]  ;;  %11747 = vmatprep.subr.mxu0 %v3835_v27 }
  0xe1   : > { %1806 = vrot.lane.b32.xlu0 %v11078_v2, %s19707_s28  ;;  %518 = vst.msk [vmem:[#allocation2 + $0x100] sm:$0xff] %vm484_vm10, %v19743_v48  ;;  %520 = vst.msk [vmem:[#allocation2 + $0x110] sm:$0xff] %vm484_vm10, %v19743_v48  ;;  %11748 = vmatpush3.msra.mxu0 %v3835_v27  ;;  %v10958_v27 = vld [vmem:[%s14275_s30 + $0x181] sm:$0xff] }
  0xe2   : > { %v1411_v7 = vpop.permute.xlu1 %1410  ;;  %519 = vst.msk [vmem:[#allocation2 + $0x108] sm:$0x3] %vm486_vm11, %v19743_v48  ;;  %521 = vst.msk [vmem:[#allocation2 + $0x118] sm:$0x3] %vm486_vm11, %v19743_v48 }
  0xe3   : > { %v1409_v8 = vpop.permute.xlu0 %1408  ;;  %v2018_v34 = vsel %vm2012_vm5, %v1985_v31, %v1411_v7  ;;  %522 = vst.msk [vmem:[#allocation2 + $0x120] sm:$0xff] %vm484_vm10, %v19743_v48  ;;  %524 = vst.msk [vmem:[#allocation2 + $0x130] sm:$0xff] %vm484_vm10, %v19743_v48  ;;  %v10986_v7 = vld [vmem:[%s14275_s30 + $0x122] sm:$0xff] }
  0xe4   : > { %1042 = vrot.lane.b32.xlu1 %v11078_v2, %s19817_s19  ;;  %v2017_v19 = vsel %vm2012_vm5, %v1984_v20, %v1409_v8  ;;  %523 = vst.msk [vmem:[#allocation2 + $0x128] sm:$0x3] %vm486_vm11, %v19743_v48  ;;  %525 = vst.msk [vmem:[#allocation2 + $0x138] sm:$0x3] %vm486_vm11, %v19743_v48  ;;  %v11050_v20 = vld [vmem:[%s14275_s30 + $0x131] sm:$0xff] }
  0xe5   : > { %1040 = vrot.lane.b32.xlu0 %v10982_v46, %s19817_s19  ;;  %526 = vst.msk [vmem:[#allocation2 + $0x140] sm:$0xff] %vm484_vm10, %v19743_v48  ;;  %528 = vst.msk [vmem:[#allocation2 + $0x150] sm:$0xff] %vm484_vm10, %v19743_v48 }
  0xe6   : > { %v1539_v10 = vpop.permute.xlu1 %1538  ;;  %527 = vst.msk [vmem:[#allocation2 + $0x148] sm:$0x3] %vm486_vm11, %v19743_v48  ;;  %529 = vst.msk [vmem:[#allocation2 + $0x158] sm:$0x3] %vm486_vm11, %v19743_v48 }
  0xe7   : > { %v1537_v11 = vpop.permute.xlu0 %1536  ;;  %v2051_v35 = vsel %vm2045_vm6, %v2018_v34, %v1539_v10  ;;  %530 = vst.msk [vmem:[#allocation2 + $0x160] sm:$0xff] %vm484_vm10, %v19743_v48  ;;  %532 = vst.msk [vmem:[#allocation2 + $0x170] sm:$0xff] %vm484_vm10, %v19743_v48  ;;  %v3833_v34 = vld [vmem:[%s19685_s3 + $0x108] sm:$0xff] }
  0xe8   : > { %1170 = vrot.lane.b32.xlu1 %v14545_v9, %s19819_s21  ;;  %v2050_v24 = vsel %vm2045_vm6, %v2017_v19, %v1537_v11  ;;  %531 = vst.msk [vmem:[#allocation2 + $0x168] sm:$0x3] %vm486_vm11, %v19743_v48  ;;  %533 = vst.msk [vmem:[#allocation2 + $0x178] sm:$0x3] %vm486_vm11, %v19743_v48 }
  0xe9   : > { %1168 = vrot.lane.b32.xlu0 %v14525_v56, %s19819_s21  ;;  %534 = vst.msk [vmem:[#allocation2 + $0x180] sm:$0xff] %vm484_vm10, %v19743_v48  ;;  %536 = vst.msk [vmem:[#allocation2 + $0x190] sm:$0xff] %vm484_vm10, %v19743_v48 }
  0xea   : > { %v1667_v17 = vpop.permute.xlu1 %1666  ;;  %535 = vst.msk [vmem:[#allocation2 + $0x188] sm:$0x3] %vm486_vm11, %v19743_v48  ;;  %537 = vst.msk [vmem:[#allocation2 + $0x198] sm:$0x3] %vm486_vm11, %v19743_v48 }
  0xeb   : > { %v1665_v18 = vpop.permute.xlu0 %1664  ;;  %v2084_v37 = vsel %vm2078_vm7, %v2051_v35, %v1667_v17  ;;  %538 = vst.msk [vmem:[#allocation2 + $0x1a0] sm:$0xff] %vm484_vm10, %v19743_v48  ;;  %540 = vst.msk [vmem:[#allocation2 + $0x1b0] sm:$0xff] %vm484_vm10, %v19743_v48  ;;  %v647_v35 = vld [vmem:[%s14275_s30 + $0x152] sm:$0xff] }
  0xec   : > { %1298 = vrot.lane.b32.xlu1 %v10952_v15, %s19820_s23  ;;  %v2083_v29 = vsel %vm2078_vm7, %v2050_v24, %v1665_v18  ;;  %539 = vst.msk [vmem:[#allocation2 + $0x1a8] sm:$0x3] %vm486_vm11, %v19743_v48  ;;  %541 = vst.msk [vmem:[#allocation2 + $0x1b8] sm:$0x3] %vm486_vm11, %v19743_v48 }
  0xed   : > { %1296 = vrot.lane.b32.xlu0 %v11046_v61, %s19820_s23  ;;  %542 = vst.msk [vmem:[#allocation2 + $0x1c0] sm:$0xff] %vm484_vm10, %v19743_v48  ;;  %544 = vst.msk [vmem:[#allocation2 + $0x1d0] sm:$0xff] %vm484_vm10, %v19743_v48 }
  0xee   : > { %v14569_v30 = vpop.permute.xlu1 %900  ;;  %543 = vst.msk [vmem:[#allocation2 + $0x1c8] sm:$0x3] %vm486_vm11, %v19743_v48  ;;  %545 = vst.msk [vmem:[#allocation2 + $0x1d8] sm:$0x3] %vm486_vm11, %v19743_v48 }
  0xef   : > { %v1793_v22 = vpop.permute.xlu0 %1792  ;;  %546 = vst.msk [vmem:[#allocation2 + $0x1e0] sm:$0xff] %vm484_vm10, %v19743_v48  ;;  %548 = vst.msk [vmem:[#allocation2 + $0x1f0] sm:$0xff] %vm484_vm10, %v19743_v48  ;;  %v1887_v55 = vsel %vm1880_vm1, %v14370_v25, %v14569_v30  ;;  %v615_v30 = vld [vmem:[%s14275_s30 + $0x151] sm:$0xff] }
  0xf0   : > { %v2116_v32 = vsel %vm2111_vm8, %v2083_v29, %v1793_v22  ;;  %1426 = vrot.lane.b32.xlu1 %v14565_v26, %s19821_s29  ;;  %547 = vst.msk [vmem:[#allocation2 + $0x1e8] sm:$0x3] %vm486_vm11, %v19743_v48  ;;  %549 = vst.msk [vmem:[#allocation2 + $0x1f8] sm:$0x3] %vm486_vm11, %v19743_v48  ;;  %v3834_v29 = vld [vmem:[%s19685_s3 + $0x110] sm:$0xff]  ;;  %v614_v22 = vld [vmem:[%s14275_s30 + $0x141] sm:$0xff] }
  0xf1   : > { %1424 = vrot.lane.b32.xlu0 %v11078_v2, %s19821_s29  ;;  %11705 = vmatprep.mubr.msk.f32.mxu1 %vm2158_vm9, %v2116_v32  ;;  %550 = vst.msk [vmem:[#allocation2 + $0x200] sm:$0xff] %vm484_vm10, %v19743_v48  ;;  %552 = vst.msk [vmem:[#allocation2 + $0x210] sm:$0xff] %vm484_vm10, %v19743_v48 }
  0xf2   : > { %v14583_v38 = vpop.permute.xlu1 %902  ;;  %551 = vst.msk [vmem:[#allocation2 + $0x208] sm:$0x3] %vm486_vm11, %v19743_v48  ;;  %553 = vst.msk [vmem:[#allocation2 + $0x218] sm:$0x3] %vm486_vm11, %v19743_v48  ;;  %11749 = vmatprep.subr.mxu0 %v3834_v29 }
  0xf3   : > { %v1795_v39 = vpop.permute.xlu0 %1794  ;;  %554 = vst.msk [vmem:[#allocation2 + $0x220] sm:$0xff] %vm484_vm10, %v19743_v48  ;;  %556 = vst.msk [vmem:[#allocation2 + $0x230] sm:$0xff] %vm484_vm10, %v19743_v48  ;;  %v1888_v57 = vsel %vm1880_vm1, %v14383_v28, %v14583_v38  ;;  %11750 = vmatpush3.msra.mxu0 %v3834_v29 }
  0xf4   : > { %v2117_v40 = vsel %vm2111_vm8, %v2084_v37, %v1795_v39  ;;  %1554 = vrot.lane.b32.xlu1 %v14580_v36, %s19709_s0  ;;  %555 = vst.msk [vmem:[#allocation2 + $0x228] sm:$0x3] %vm486_vm11, %v19743_v48  ;;  %557 = vst.msk [vmem:[#allocation2 + $0x238] sm:$0x3] %vm486_vm11, %v19743_v48  ;;  %v646_v37 = vld [vmem:[%s14275_s30 + $0x142] sm:$0xff]  ;;  %11751 = vmatprep.subr.mxu0 %v3833_v34 }
  0xf5   : > { %1552 = vrot.lane.b32.xlu0 %v14545_v9, %s19709_s0  ;;  %11706 = vmatmul.mubr.msk.f32.gmra.mxu1 %vm2158_vm9, %v2117_v40  ;;  %558 = vst.msk [vmem:[#allocation2 + $0x240] sm:$0xff] %vm484_vm10, %v19743_v48  ;;  %560 = vst.msk [vmem:[#allocation2 + $0x250] sm:$0xff] %vm484_vm10, %v19743_v48  ;;  %v3832_v40 = vld [vmem:[%s19685_s3 + $0x100] sm:$0xff] }
  0xf6   : > { %v14594_v42 = vpop.permute.xlu1 %1030  ;;  %559 = vst.msk [vmem:[#allocation2 + $0x248] sm:$0x3] %vm486_vm11, %v19743_v48  ;;  %561 = vst.msk [vmem:[#allocation2 + $0x258] sm:$0x3] %vm486_vm11, %v19743_v48  ;;  %11752 = vmatpush3.msra.mxu0 %v3833_v34 }
  0xf7   : > { %v14596_v43 = vpop.permute.xlu0 %1028  ;;  %562 = vst.msk [vmem:[#allocation2 + $0x260] sm:$0xff] %vm484_vm10, %v19743_v48  ;;  %564 = vst.msk [vmem:[#allocation2 + $0x270] sm:$0xff] %vm484_vm10, %v19743_v48  ;;  %v1921_v58 = vsel %vm1913_vm2, %v1888_v57, %v14594_v42  ;;  %v14865_v42 = vld [vmem:[%s14275_s30 + $0x150] sm:$0xff]  ;;  %11753 = vmatprep.subr.mxu0 %v3832_v40 }
  0xf8   : > { %1682 = vrot.lane.b32.xlu1 %v14592_v41, %s19712_s26  ;;  %563 = vst.msk [vmem:[#allocation2 + $0x268] sm:$0x3] %vm486_vm11, %v19743_v48  ;;  %565 = vst.msk [vmem:[#allocation2 + $0x278] sm:$0x3] %vm486_vm11, %v19743_v48  ;;  %v1920_v59 = vsel %vm1913_vm2, %v1887_v55, %v14596_v43  ;;  %11754 = vmatpush3.msra.mxu0 %v3832_v40 }
  0xf9   : > { %1680 = vrot.lane.b32.xlu0 %v10952_v15, %s19712_s26  ;;  %5842 = vmatprep.subr.mxu0 %v19743_v48 }
  0xfa   : > { %v14601_v5 = vpop.permute.xlu1 %1158 }
  0xfb   : > { %v14603_v44 = vpop.permute.xlu0 %1156  ;;  %v1954_v25 = vsel %vm1946_vm3, %v1921_v58, %v14601_v5 }
  0xfc   : > { %916 = vrot.lane.b32.xlu1 %v10952_v15, %s19818_s22  ;;  %v1953_v61 = vsel %vm1946_vm3, %v1920_v59, %v14603_v44  ;;  %v10956_v44 = vld [vmem:[%s14275_s30 + $0x161] sm:$0xff] }
  0xfd   : > { %1808 = vrot.lane.b32.xlu0 %v14565_v26, %s19707_s28 }
  0xfe   : > { %v14611_v46 = vpop.permute.xlu1 %1286 }
  0xff   : > { %v14613_v47 = vpop.permute.xlu0 %1284  ;;  %v1987_v63 = vsel %vm1979_vm4, %v1954_v25, %v14611_v46 }
 0x100   : > { %918 = vrot.lane.b32.xlu1 %v14592_v41, %s19818_s22  ;;  %v1986_v0 = vsel %vm1979_vm4, %v1953_v61, %v14613_v47  ;;  %v574_v47 = vld [vmem:[%s14275_s30 + $0xa0] sm:$0xff]  ;;  %v617_v61 = vld [vmem:[%s14275_s30 + $0x171] sm:$0xff] }
 0x101   : > { %1810 = vrot.lane.b32.xlu0 %v14609_v45, %s19707_s28  ;;  %s19823_s28 = smov 36  }
 0x102   : > { %v1415_v49 = vpop.permute.xlu1 %1414 }
 0x103   : > { %v1413_v50 = vpop.permute.xlu0 %1412  ;;  %v2020_v1 = vsel %vm2012_vm5, %v1987_v63, %v1415_v49 }
 0x104   : > { %1046 = vrot.lane.b32.xlu1 %v14609_v45, %s19817_s19  ;;  %v2019_v2 = vsel %vm2012_vm5, %v1986_v0, %v1413_v50 }
 0x105   : > { %1044 = vrot.lane.b32.xlu0 %v14565_v26, %s19817_s19 }
 0x106   : > { %v1543_v53 = vpop.permute.xlu1 %1542 }
 0x107   : > { %v1541_v54 = vpop.permute.xlu0 %1540  ;;  %v2053_v3 = vsel %vm2045_vm6, %v2020_v1, %v1543_v53 }
 0x108   : > { %1174 = vrot.lane.b32.xlu1 %v10922_v14, %s19819_s21  ;;  %v2052_v4 = vsel %vm2045_vm6, %v2019_v2, %v1541_v54  ;;  %v10988_v54 = vld [vmem:[%s14275_s30 + $0x162] sm:$0xff] }
 0x109   : > { %1172 = vrot.lane.b32.xlu0 %v14580_v36, %s19819_s21 }
 0x10a   : > { %v1671_v28 = vpop.permute.xlu1 %1670 }
 0x10b   : > { %v1669_v62 = vpop.permute.xlu0 %1668  ;;  %v2086_v8 = vsel %vm2078_vm7, %v2053_v3, %v1671_v28  ;;  %v14902_v3 = vld [vmem:[%s14275_s30 + $0x170] sm:$0xff] }
 0x10c   : > { %1302 = vrot.lane.b32.xlu1 %v10954_v60, %s19820_s23  ;;  %v2085_v10 = vsel %vm2078_vm7, %v2052_v4, %v1669_v62 }
 0x10d   : > { %1300 = vrot.lane.b32.xlu0 %v14592_v41, %s19820_s23  ;;  %v14862_v41 = vld [vmem:[%s14275_s30 + $0x160] sm:$0xff] }
 0x10e   : > { %v1799_v11 = vpop.permute.xlu1 %1798 }
 0x10f   : > { %v1797_v12 = vpop.permute.xlu0 %1796  ;;  %v2119_v13 = vsel %vm2111_vm8, %v2086_v8, %v1799_v11 }
 0x110   : > { %v2118_v15 = vsel %vm2111_vm8, %v2085_v10, %v1797_v12  ;;  %1430 = vrot.lane.b32.xlu1 %v10986_v7, %s19821_s29  ;;  %v649_v12 = vld [vmem:[%s14275_s30 + $0x172] sm:$0xff] }
 0x111   : > { %1428 = vrot.lane.b32.xlu0 %v14609_v45, %s19821_s29  ;;  %11708 = vmatprep.mubr.msk.f32.mxu1 %vm2158_vm9, %v2118_v15 }
 0x112   : > { %11709 = vmatmul.mubr.msk.f32.gmra.mxu1 %vm2158_vm9, %v2119_v13  ;;  %v14825_v17 = vpop.permute.xlu1 %906 }
 0x113   : > { %v905_v18 = vpop.permute.xlu0 %904  ;;  %v1890_v1 = vsel %vm1880_vm1, %v14436_v52, %v14825_v17 }
 0x114   : > { %1558 = vrot.lane.b32.xlu1 %v11018_v6, %s19709_s0 }
 0x115   : > { %1556 = vrot.lane.b32.xlu0 %v10922_v14, %s19709_s0  ;;  %v1889_v14 = vsel %vm1880_vm1, %v574_v47, %v905_v18  ;;  %s14144_s0 = smov [#allocation4]  }
 0x116   : > { %v14830_v21 = vpop.permute.xlu1 %1034 }
 0x117   : > { %v1033_v19 = vpop.permute.xlu0 %1032  ;;  %v1923_v2 = vsel %vm1913_vm2, %v1890_v1, %v14830_v21  ;;  %v14922_v21 = vld [vmem:[%s14275_s30 + $0x180] sm:$0xff] }
 0x118   : > { %1686 = vrot.lane.b32.xlu1 %v11050_v20, %s19712_s26  ;;  %v1922_v53 = vsel %vm1913_vm2, %v1889_v14, %v1033_v19 }
 0x119   : > { %1684 = vrot.lane.b32.xlu0 %v10954_v60, %s19712_s26 }
 0x11a   : > { %v14835_v24 = vpop.permute.xlu1 %1162 }
 0x11b   : > { %v1161_v26 = vpop.permute.xlu0 %1160  ;;  %v1956_v4 = vsel %vm1946_vm3, %v1923_v2, %v14835_v24 }
 0x11c   : > { %1814 = vrot.lane.b32.xlu1 %v11082_v23, %s19822_s1  ;;  %v1955_v55 = vsel %vm1946_vm3, %v1922_v53, %v1161_v26  ;;  %v11054_v53 = vld [vmem:[%s14275_s30 + $0x191] sm:$0xff] }
 0x11d   : > { %1812 = vrot.lane.b32.xlu0 %v10986_v7, %s19822_s1 }
 0x11e   : > { %v1291_v31 = vpop.permute.xlu1 %1290 }
 0x11f   : > { %v1289_v32 = vpop.permute.xlu0 %1288  ;;  %v1989_v10 = vsel %vm1979_vm4, %v1956_v4, %v1291_v31  ;;  %v10960_v4 = vld [vmem:[%s14275_s30 + $0x1a1] sm:$0xff] }
 0x120   : > { %922 = vrot.lane.b32.xlu1 %v615_v30, %s19818_s22  ;;  %v1988_v59 = vsel %vm1979_vm4, %v1955_v55, %v1289_v32 }
 0x121   : > { %920 = vrot.lane.b32.xlu0 %v614_v22, %s19818_s22 }
 0x122   : > { %v14854_v38 = vpop.permute.xlu1 %908 }
 0x123   : > { %v1417_v39 = vpop.permute.xlu0 %1416  ;;  %v1891_v24 = vsel %vm1880_vm1, %v14433_v51, %v14854_v38 }
 0x124   : > { %1050 = vrot.lane.b32.xlu1 %v647_v35, %s19817_s19  ;;  %v2021_v60 = vsel %vm2012_vm5, %v1988_v59, %v1417_v39  ;;  %v11086_v59 = vld [vmem:[%s14275_s30 + $0x192] sm:$0xff] }
 0x125   : > { %1048 = vrot.lane.b32.xlu0 %v646_v37, %s19817_s19  ;;  %v10990_v37 = vld [vmem:[%s14275_s30 + $0x182] sm:$0xff] }
 0x126   : > { %v1545_v43 = vpop.permute.xlu1 %1544 }
 0x127   : > { %v1419_v5 = vpop.permute.xlu0 %1418  ;;  %v2054_v25 = vsel %vm2045_vm6, %v2021_v60, %v1545_v43 }
 0x128   : > { %1178 = vrot.lane.b32.xlu1 %v14862_v41, %s19819_s21  ;;  %v2022_v52 = vsel %vm2012_vm5, %v1989_v10, %v1419_v5 }
 0x129   : > { %1176 = vrot.lane.b32.xlu0 %v14865_v42, %s19819_s21 }
 0x12a   : > { %v1037_v45 = vpop.permute.xlu1 %1036 }
 0x12b   : > { %v14873_v46 = vpop.permute.xlu0 %910  ;;  %v1924_v26 = vsel %vm1913_vm2, %v1891_v24, %v1037_v45 }
 0x12c   : > { %1306 = vrot.lane.b32.xlu1 %v10956_v44, %s19820_s23  ;;  %v1892_v32 = vsel %vm1880_vm1, %v14473_v16, %v14873_v46  ;;  %v14953_v46 = vld [vmem:[%s14275_s30 + $0x190] sm:$0xff] }
 0x12d   : > { %1304 = vrot.lane.b32.xlu0 %v615_v30, %s19820_s23 }
 0x12e   : > { %v1673_v49 = vpop.permute.xlu1 %1672 }
 0x12f   : > { %v1547_v50 = vpop.permute.xlu0 %1546  ;;  %v2087_v28 = vsel %vm2078_vm7, %v2054_v25, %v1673_v49 }
 0x130   : > { %924 = vrot.lane.b32.xlu1 %v10956_v44, %s19818_s22  ;;  %v2055_v11 = vsel %vm2045_vm6, %v2022_v52, %v1547_v50 }
 0x131   : > { %1432 = vrot.lane.b32.xlu0 %v647_v35, %s19821_s29 }
 0x132   : > { %v1165_v57 = vpop.permute.xlu1 %1164 }
 0x133   : > { %v1039_v58 = vpop.permute.xlu0 %1038  ;;  %v1957_v29 = vsel %vm1946_vm3, %v1924_v26, %v1165_v57  ;;  %v15003_v26 = vld [vmem:[%s14275_s30 + $0x1b0] sm:$0xff] }
 0x134   : > { %1560 = vrot.lane.b32.xlu1 %v14862_v41, %s19823_s28  ;;  %v1925_v34 = vsel %vm1913_vm2, %v1892_v32, %v1039_v58 }
 0x135   : > { %1434 = vrot.lane.b32.xlu0 %v10988_v54, %s19821_s29 }
 0x136   : > { %v1801_v62 = vpop.permute.xlu1 %1800 }
 0x137   : > { %v1675_v63 = vpop.permute.xlu0 %1674  ;;  %v2120_v0 = vsel %vm2111_vm8, %v2087_v28, %v1801_v62  ;;  %v14973_v62 = vld [vmem:[%s14275_s30 + $0x1a0] sm:$0xff] }
 0x138   : > { %1052 = vrot.lane.b32.xlu1 %v10988_v54, %s19817_s19  ;;  %11711 = vmatprep.mubr.msk.f32.mxu1 %vm2158_vm9, %v2120_v0  ;;  %v2088_v13 = vsel %vm2078_vm7, %v2055_v11, %v1675_v63 }
 0x139   : > { %926 = vrot.lane.b32.xlu0 %v617_v61, %s19818_s22 }
 0x13a   : > { %v1293_v7 = vpop.permute.xlu1 %1292 }
 0x13b   : > { %v1167_v8 = vpop.permute.xlu0 %1166  ;;  %v1990_v31 = vsel %vm1979_vm4, %v1957_v29, %v1293_v7 }
 0x13c   : > { %1688 = vrot.lane.b32.xlu1 %v10956_v44, %s19712_s26  ;;  %v1958_v38 = vsel %vm1946_vm3, %v1925_v34, %v1167_v8 }
 0x13d   : > { %1562 = vrot.lane.b32.xlu0 %v14902_v3, %s19823_s28 }
 0x13e   : > { %v1295_v15 = vpop.permute.xlu1 %1294 }
 0x13f   : > { %v1803_v6 = vpop.permute.xlu0 %1802  ;;  %v1991_v16 = vsel %vm1979_vm4, %v1958_v38, %v1295_v15  ;;  %v10992_v15 = vld [vmem:[%s14275_s30 + $0x1a2] sm:$0xff] }
 0x140   : > { %v2121_v17 = vsel %vm2111_vm8, %v2088_v13, %v1803_v6  ;;  %1180 = vrot.lane.b32.xlu1 %v14902_v3, %s19819_s21 }
 0x141   : > { %1054 = vrot.lane.b32.xlu0 %v649_v12, %s19817_s19  ;;  %11712 = vmatmul.mubr.msk.f32.gmra.mxu1 %vm2158_vm9, %v2121_v17 }
 0x142   : > { %v1423_v18 = vpop.permute.xlu1 %1422 }
 0x143   : > { %v1421_v20 = vpop.permute.xlu0 %1420  ;;  %v2024_v44 = vsel %vm2012_vm5, %v1991_v16, %v1423_v18 }
 0x144   : > { %1816 = vrot.lane.b32.xlu1 %v10988_v54, %s19822_s1  ;;  %v2023_v51 = vsel %vm2012_vm5, %v1990_v31, %v1421_v20  ;;  %v11056_v31 = vld [vmem:[%s14275_s30 + $0x1b1] sm:$0xff] }
 0x145   : > { %1690 = vrot.lane.b32.xlu0 %v617_v61, %s19712_s26 }
 0x146   : > { %v1551_v19 = vpop.permute.xlu1 %1550 }
 0x147   : > { %v1549_v23 = vpop.permute.xlu0 %1548  ;;  %v2057_v45 = vsel %vm2045_vm6, %v2024_v44, %v1551_v19 }
 0x148   : > { %1308 = vrot.lane.b32.xlu1 %v617_v61, %s19820_s23  ;;  %v2056_v35 = vsel %vm2045_vm6, %v2023_v51, %v1549_v23 }
 0x149   : > { %1182 = vrot.lane.b32.xlu0 %v14922_v21, %s19819_s21 }
 0x14a   : > { %v1679_v30 = vpop.permute.xlu1 %1678 }
 0x14b   : > { %v1677_v22 = vpop.permute.xlu0 %1676  ;;  %v2090_v47 = vsel %vm2078_vm7, %v2057_v45, %v1679_v30 }
 0x14c   : > { %1310 = vrot.lane.b32.xlu1 %v10958_v27, %s19820_s23  ;;  %v2089_v39 = vsel %vm2078_vm7, %v2056_v35, %v1677_v22 }
 0x14d   : > { %1818 = vrot.lane.b32.xlu0 %v649_v12, %s19822_s1 }
 0x14e   : > { %v913_v40 = vpop.permute.xlu1 %912 }
 0x14f   : > { %v1805_v43 = vpop.permute.xlu0 %1804  ;;  %v1893_v1 = vsel %vm1880_vm1, %v14493_v33, %v913_v40  ;;  %v15021_v40 = vld [vmem:[%s19684_s2] ss:$0 sm:$0xff] }
 0x150   : > { %v2122_v5 = vsel %vm2111_vm8, %v2089_v39, %v1805_v43  ;;  %1438 = vrot.lane.b32.xlu1 %v10990_v37, %s19821_s29 }
 0x151   : > { %1436 = vrot.lane.b32.xlu0 %v649_v12, %s19821_s29  ;;  %11714 = vmatprep.mubr.msk.f32.mxu1 %vm2158_vm9, %v2122_v5 }
 0x152   : > { %v915_v49 = vpop.permute.xlu1 %914 }
 0x153   : > { %v1807_v50 = vpop.permute.xlu0 %1806  ;;  %v1894_v11 = vsel %vm1880_vm1, %v14525_v56, %v915_v49 }
 0x154   : > { %v2123_v14 = vsel %vm2111_vm8, %v2090_v47, %v1807_v50  ;;  %1566 = vrot.lane.b32.xlu1 %v14953_v46, %s19823_s28  ;;  %v10930_v50 = vld [vmem:[%s14275_s30 + $0x1c0] sm:$0xff] }
 0x155   : > { %1564 = vrot.lane.b32.xlu0 %v14922_v21, %s19823_s28  ;;  %11715 = vmatmul.mubr.msk.f32.gmra.mxu1 %vm2158_vm9, %v2123_v14 }
 0x156   : > { %v1043_v54 = vpop.permute.xlu1 %1042 }
 0x157   : > { %v1041_v55 = vpop.permute.xlu0 %1040  ;;  %v1927_v12 = vsel %vm1913_vm2, %v1894_v11, %v1043_v54 }
 0x158   : > { %1694 = vrot.lane.b32.xlu1 %v11054_v53, %s19712_s26  ;;  %v1926_v2 = vsel %vm1913_vm2, %v1893_v1, %v1041_v55 }
 0x159   : > { %1692 = vrot.lane.b32.xlu0 %v10958_v27, %s19712_s26 }
 0x15a   : > { %v1171_v57 = vpop.permute.xlu1 %1170 }
 0x15b   : > { %v1169_v58 = vpop.permute.xlu0 %1168  ;;  %v1960_v6 = vsel %vm1946_vm3, %v1927_v12, %v1171_v57 }
 0x15c   : > { %928 = vrot.lane.b32.xlu1 %v10958_v27, %s19818_s22  ;;  %v1959_v7 = vsel %vm1946_vm3, %v1926_v2, %v1169_v58 }
 0x15d   : > { %1820 = vrot.lane.b32.xlu0 %v10990_v37, %s19822_s1 }
 0x15e   : > { %v1299_v60 = vpop.permute.xlu1 %1298 }
 0x15f   : > { %v1297_v25 = vpop.permute.xlu0 %1296  ;;  %v1993_v56 = vsel %vm1979_vm4, %v1960_v6, %v1299_v60  ;;  %v10962_v60 = vld [vmem:[%s14275_s30 + $0x1c1] sm:$0xff] }
 0x160   : > { %930 = vrot.lane.b32.xlu1 %v11054_v53, %s19818_s22  ;;  %v1992_v52 = vsel %vm1979_vm4, %v1959_v7, %v1297_v25 }
 0x161   : > { %1822 = vrot.lane.b32.xlu0 %v11086_v59, %s19822_s1 }
 0x162   : > { %v1427_v61 = vpop.permute.xlu1 %1426 }
 0x163   : > { %v1425_v28 = vpop.permute.xlu0 %1424  ;;  %v2026_v23 = vsel %vm2012_vm5, %v1993_v56, %v1427_v61 }
 0x164   : > { %1058 = vrot.lane.b32.xlu1 %v11086_v59, %s19817_s19  ;;  %v2025_v33 = vsel %vm2012_vm5, %v1992_v52, %v1425_v28 }
 0x165   : > { %1056 = vrot.lane.b32.xlu0 %v10990_v37, %s19817_s19  ;;  %v11088_v37 = vld [vmem:[%s14275_s30 + $0x1b2] sm:$0xff] }
 0x166   : > { %v1555_v63 = vpop.permute.xlu1 %1554 }
 0x167   : > { %v1553_v0 = vpop.permute.xlu0 %1552  ;;  %v2059_v24 = vsel %vm2045_vm6, %v2026_v23, %v1555_v63 }
 0x168   : > { %1186 = vrot.lane.b32.xlu1 %v14973_v62, %s19819_s21  ;;  %v2058_v13 = vsel %vm2045_vm6, %v2025_v33, %v1553_v0 }
 0x169   : > { %1184 = vrot.lane.b32.xlu0 %v14953_v46, %s19819_s21 }
 0x16a   : > { %v1683_v8 = vpop.permute.xlu1 %1682 }
 0x16b   : > { %v1681_v10 = vpop.permute.xlu0 %1680  ;;  %v2092_v27 = vsel %vm2078_vm7, %v2059_v24, %v1683_v8  ;;  %v10994_v8 = vld [vmem:[%s14275_s30 + $0x1c2] sm:$0xff] }
 0x16c   : > { %1314 = vrot.lane.b32.xlu1 %v10960_v4, %s19820_s23  ;;  %v2091_v17 = vsel %vm2078_vm7, %v2058_v13, %v1681_v10 }
 0x16d   : > { %1312 = vrot.lane.b32.xlu0 %v11054_v53, %s19820_s23 }
 0x16e   : > { %v917_v18 = vpop.permute.xlu1 %916 }
 0x16f   : > { %v1809_v20 = vpop.permute.xlu0 %1808  ;;  %v1895_v55 = vsel %vm1880_vm1, %v14545_v9, %v917_v18 }
 0x170   : > { %v2124_v19 = vsel %vm2111_vm8, %v2091_v17, %v1809_v20  ;;  %1442 = vrot.lane.b32.xlu1 %v10992_v15, %s19821_s29  ;;  %v11058_v20 = vld [vmem:[%s14275_s30 + $0x1d1] sm:$0xff] }
 0x171   : > { %1440 = vrot.lane.b32.xlu0 %v11086_v59, %s19821_s29  ;;  %11717 = vmatprep.mubr.msk.f32.mxu1 %vm2158_vm9, %v2124_v19 }
 0x172   : > { %v919_v29 = vpop.permute.xlu1 %918 }
 0x173   : > { %v1811_v30 = vpop.permute.xlu0 %1810  ;;  %v1896_v57 = vsel %vm1880_vm1, %v14580_v36, %v919_v29 }
 0x174   : > { %v2125_v22 = vsel %vm2111_vm8, %v2092_v27, %v1811_v30  ;;  %1570 = vrot.lane.b32.xlu1 %v15003_v26, %s19823_s28  ;;  %v11090_v30 = vld [vmem:[%s14275_s30 + $0x1d2] sm:$0xff] }
 0x175   : > { %1568 = vrot.lane.b32.xlu0 %v14973_v62, %s19823_s28  ;;  %11718 = vmatmul.mubr.msk.f32.gmra.mxu1 %vm2158_vm9, %v2125_v22 }
 0x176   : > { %v1047_v32 = vpop.permute.xlu1 %1046 }
 0x177   : > { %v1045_v51 = vpop.permute.xlu0 %1044  ;;  %v1929_v58 = vsel %vm1913_vm2, %v1896_v57, %v1047_v32  ;;  %v10964_v57 = vld [vmem:[%s14275_s30 + $0x201] sm:$0xff] }
 0x178   : > { %1698 = vrot.lane.b32.xlu1 %v11056_v31, %s19712_s26  ;;  %v1928_v59 = vsel %vm1913_vm2, %v1895_v55, %v1045_v51  ;;  %v623_v51 = vld [vmem:[%s14275_s30 + $0x1f1] sm:$0xff] }
 0x179   : > { %1696 = vrot.lane.b32.xlu0 %v10960_v4, %s19712_s26  ;;  %v15128_v55 = vld [vmem:[%s14275_s30 + $0x1f0] sm:$0xff] }
 0x17a   : > { %v1175_v34 = vpop.permute.xlu1 %1174 }
 0x17b   : > { %v1173_v35 = vpop.permute.xlu0 %1172  ;;  %v1962_v9 = vsel %vm1946_vm3, %v1929_v58, %v1175_v34  ;;  %v622_v34 = vld [vmem:[%s14275_s30 + $0x1e1] sm:$0xff] }
 0x17c   : > { %932 = vrot.lane.b32.xlu1 %v10960_v4, %s19818_s22  ;;  %v1961_v25 = vsel %vm1946_vm3, %v1928_v59, %v1173_v35 }
 0x17d   : > { %1824 = vrot.lane.b32.xlu0 %v10992_v15, %s19822_s1 }
 0x17e   : > { %v1303_v38 = vpop.permute.xlu1 %1302 }
 0x17f   : > { %v1301_v39 = vpop.permute.xlu0 %1300  ;;  %v1995_v28 = vsel %vm1979_vm4, %v1962_v9, %v1303_v38  ;;  %v655_v38 = vld [vmem:[%s14275_s30 + $0x1f2] sm:$0xff] }
 0x180   : > { %934 = vrot.lane.b32.xlu1 %v11056_v31, %s19818_s22  ;;  %v1994_v63 = vsel %vm1979_vm4, %v1961_v25, %v1301_v39 }
 0x181   : > { %1826 = vrot.lane.b32.xlu0 %v11088_v37, %s19822_s1  ;;  %v11701_v43 = vpop.f32.mrf.mxu1 }
 0x182   : > { %v15026_v16 = vadd.f32 %v11701_v43, %v15021_v40  ;;  %v1431_v5 = vpop.permute.xlu1 %1430 }
 0x183   : > { %v1429_v44 = vpop.permute.xlu0 %1428  ;;  %v2325_v45 = vpop.f32.mrf.mxu1  ;;  %v2028_v0 = vsel %vm2012_vm5, %v1995_v28, %v1431_v5  ;;  %v654_v5 = vld [vmem:[%s14275_s30 + $0x1e2] sm:$0xff] }
 0x184   : > { %v19738_v47 = vmax.f32 %v15026_v16, 0.0  ;;  %v15030_v49 = vadd.f32 %v15021_v40, %v2325_v45  ;;  %1062 = vrot.lane.b32.xlu1 %v11088_v37, %s19817_s19  ;;  %v2027_v1 = vsel %vm2012_vm5, %v1994_v63, %v1429_v44 }
 0x185   : > { %1060 = vrot.lane.b32.xlu0 %v10992_v15, %s19817_s19  ;;  %v11026_v15 = vld [vmem:[%s14275_s30 + $0x1d0] sm:$0xff] }
 0x186   : > { %2518 = vst.msk [vmem:[#allocation2 + $0x21] sm:$0xff] %vm484_vm10, %v19738_v47  ;;  %v19739_v14 = vmax.f32 %v15030_v49, 0.0  ;;  %v1559_v53 = vpop.permute.xlu1 %1558 }
 0x187   : > { %v1557_v54 = vpop.permute.xlu0 %1556  ;;  %v2061_v2 = vsel %vm2045_vm6, %v2028_v0, %v1559_v53 }
 0x188   : > { %2517 = vst.msk [vmem:[#allocation2 + $0x11] sm:$0xff] %vm484_vm10, %v19739_v14  ;;  %1190 = vrot.lane.b32.xlu1 %v10930_v50, %s19819_s21  ;;  %v2060_v4 = vsel %vm2045_vm6, %v2027_v1, %v1557_v54  ;;  %v10996_v1 = vld [vmem:[%s14275_s30 + $0x202] sm:$0xff] }
 0x189   : > { %1188 = vrot.lane.b32.xlu0 %v15003_v26, %s19819_s21 }
 0x18a   : > { %v1687_v36 = vpop.permute.xlu1 %1686 }
 0x18b   : > { %v1685_v61 = vpop.permute.xlu0 %1684  ;;  %v2094_v10 = vsel %vm2078_vm7, %v2061_v2, %v1687_v36 }
 0x18c   : > { %1318 = vrot.lane.b32.xlu1 %v10962_v60, %s19820_s23  ;;  %v2093_v52 = vsel %vm2078_vm7, %v2060_v4, %v1685_v61 }
 0x18d   : > { %1316 = vrot.lane.b32.xlu0 %v11056_v31, %s19820_s23  ;;  %v15062_v7 = vld [vmem:[#allocation2 + $0x22] sm:$0xff] }
 0x18e   : > { %11755 = vmatprep.mubr.msk.f32.mxu0 %vm484_vm10, %v15062_v7  ;;  %v1815_v11 = vpop.permute.xlu1 %1814 }
 0x18f   : > { %v1813_v33 = vpop.permute.xlu0 %1812  ;;  %v2127_v12 = vsel %vm2111_vm8, %v2094_v10, %v1815_v11 }
 0x190   : > { %v2126_v13 = vsel %vm2111_vm8, %v2093_v52, %v1813_v33  ;;  %1446 = vrot.lane.b32.xlu1 %v10994_v8, %s19821_s29 }
 0x191   : > { %1444 = vrot.lane.b32.xlu0 %v11088_v37, %s19821_s29  ;;  %11720 = vmatprep.mubr.msk.f32.mxu1 %vm2158_vm9, %v2126_v13  ;;  %v625_v13 = vld [vmem:[%s14275_s30 + $0x211] sm:$0xff] }
 0x192   : > { %11721 = vmatmul.mubr.msk.f32.gmra.mxu1 %vm2158_vm9, %v2127_v12  ;;  %v15076_v6 = vpop.permute.xlu1 %922 }
 0x193   : > { %v921_v17 = vpop.permute.xlu0 %920 }
 0x194   : > { %1574 = vrot.lane.b32.xlu1 %v11026_v15, %s19823_s28 }
 0x195   : > { %1572 = vrot.lane.b32.xlu0 %v10930_v50, %s19823_s28  ;;  %v11704_v18 = vpop.f32.mrf.mxu1  ;;  %v15125_v50 = vld [vmem:[%s14275_s30 + $0x200] sm:$0xff] }
 0x196   : > { %v15082_v56 = vadd.f32 %v11704_v18, %v15021_v40  ;;  %v15084_v19 = vpop.permute.xlu1 %1050  ;;  %v1898_v18 = vsel %vm1880_vm1, %v14865_v42, %v15076_v6 }
 0x197   : > { %v1049_v23 = vpop.permute.xlu0 %1048  ;;  %v2335_v24 = vpop.f32.mrf.mxu1 }
 0x198   : > { %v19724_v27 = vmax.f32 %v15082_v56, 0.0  ;;  %v15088_v29 = vadd.f32 %v15021_v40, %v2335_v24  ;;  %1702 = vrot.lane.b32.xlu1 %v11058_v20, %s19712_s26  ;;  %v1931_v24 = vsel %vm1913_vm2, %v1898_v18, %v15084_v19 }
 0x199   : > { %1700 = vrot.lane.b32.xlu0 %v10962_v60, %s19712_s26  ;;  %v582_v60 = vld [vmem:[%s14275_s30 + $0x140] sm:$0xff] }
 0x19a   : > { %2520 = vst.msk [vmem:[#allocation2 + $0x41] sm:$0xff] %vm484_vm10, %v19724_v27  ;;  %v19725_v22 = vmax.f32 %v15088_v29, 0.0  ;;  %v15097_v31 = vpop.permute.xlu1 %1178  ;;  %v1897_v36 = vsel %vm1880_vm1, %v582_v60, %v921_v17 }
 0x19b   : > { %v1177_v32 = vpop.permute.xlu0 %1176  ;;  %v1930_v61 = vsel %vm1913_vm2, %v1897_v36, %v1049_v23  ;;  %v15211_v36 = vld [vmem:[%s14275_s30 + $0x220] sm:$0xff] }
 0x19c   : > { %2519 = vst.msk [vmem:[#allocation2 + $0x31] sm:$0xff] %vm484_vm10, %v19725_v22  ;;  %1830 = vrot.lane.b32.xlu1 %v11090_v30, %s19822_s1  ;;  %v1963_v28 = vsel %vm1946_vm3, %v1930_v61, %v1177_v32  ;;  %v1964_v30 = vsel %vm1946_vm3, %v1931_v24, %v15097_v31 }
 0x19d   : > { %1828 = vrot.lane.b32.xlu0 %v10994_v8, %s19822_s1 }
 0x19e   : > { %v15106_v35 = vpop.permute.xlu1 %1306 }
 0x19f   : > { %v1305_v37 = vpop.permute.xlu0 %1304 }
 0x1a0   : > { %938 = vrot.lane.b32.xlu1 %v623_v51, %s19818_s22  ;;  %v1996_v2 = vsel %vm1979_vm4, %v1963_v28, %v1305_v37 }
 0x1a1   : > { %936 = vrot.lane.b32.xlu0 %v622_v34, %s19818_s22  ;;  %v15119_v45 = vld [vmem:[#allocation2 + $0x42] sm:$0xff]  ;;  %v1997_v34 = vsel %vm1979_vm4, %v1964_v30, %v15106_v35 }
 0x1a2   : > { %v15111_v39 = vpop.permute.xlu1 %924 }
 0x1a3   : > { %v1433_v43 = vpop.permute.xlu0 %1432  ;;  %v15114_v44 = vld [vmem:[#allocation2 + $0x32] sm:$0xff]  ;;  %v1899_v61 = vsel %vm1880_vm1, %v14862_v41, %v15111_v39 }
 0x1a4   : > { %11756 = vmatmul.mubr.msk.f32.vlgmr.msra.gmra.mxu0 %vm484_vm10, %v15114_v44  ;;  %1066 = vrot.lane.b32.xlu1 %v655_v38, %s19817_s19  ;;  %v2029_v4 = vsel %vm2012_vm5, %v1996_v2, %v1433_v43 }
 0x1a5   : > { %1064 = vrot.lane.b32.xlu0 %v654_v5, %s19817_s19  ;;  %11758 = vmatprep.mubr.msk.f32.mxu0 %vm484_vm10, %v15119_v45  ;;  %v657_v5 = vld [vmem:[%s14275_s30 + $0x212] sm:$0xff] }
 0x1a6   : > { %v1561_v53 = vpop.permute.xlu1 %1560 }
 0x1a7   : > { %v1435_v54 = vpop.permute.xlu0 %1434  ;;  %v2062_v8 = vsel %vm2045_vm6, %v2029_v4, %v1561_v53 }
 0x1a8   : > { %1194 = vrot.lane.b32.xlu1 %v15125_v50, %s19819_s21  ;;  %v2030_v19 = vsel %vm2012_vm5, %v1997_v34, %v1435_v54 }
 0x1a9   : > { %1192 = vrot.lane.b32.xlu0 %v15128_v55, %s19819_s21 }
 0x1aa   : > { %v15135_v58 = vpop.permute.xlu1 %1052 }
 0x1ab   : > { %v15137_v59 = vpop.permute.xlu0 %926  ;;  %v1932_v28 = vsel %vm1913_vm2, %v1899_v61, %v15135_v58  ;;  %v10998_v58 = vld [vmem:[%s14275_s30 + $0x222] sm:$0xff] }
 0x1ac   : > { %1322 = vrot.lane.b32.xlu1 %v10964_v57, %s19820_s23  ;;  %v1900_v41 = vsel %vm1880_vm1, %v14902_v3, %v15137_v59  ;;  %v15245_v59 = vld [vmem:[%s14275_s30 + $0x230] sm:$0xff] }
 0x1ad   : > { %1320 = vrot.lane.b32.xlu0 %v623_v51, %s19820_s23  ;;  %v15181_v51 = vld [vmem:[%s14275_s30 + $0x210] sm:$0xff] }
 0x1ae   : > { %v1689_v9 = vpop.permute.xlu1 %1688 }
 0x1af   : > { %v1563_v25 = vpop.permute.xlu0 %1562  ;;  %v2095_v52 = vsel %vm2078_vm7, %v2062_v8, %v1689_v9 }
 0x1b0   : > { %940 = vrot.lane.b32.xlu1 %v10964_v57, %s19818_s22  ;;  %v2063_v31 = vsel %vm2045_vm6, %v2030_v19, %v1563_v25 }
 0x1b1   : > { %1448 = vrot.lane.b32.xlu0 %v655_v38, %s19821_s29 }
 0x1b2   : > { %v1181_v63 = vpop.permute.xlu1 %1180 }
 0x1b3   : > { %v15147_v0 = vpop.permute.xlu0 %1054  ;;  %v1965_v2 = vsel %vm1946_vm3, %v1932_v28, %v1181_v63  ;;  %v15287_v28 = vld [vmem:[%s14275_s30 + $0x232] sm:$0xff] }
 0x1b4   : > { %1576 = vrot.lane.b32.xlu1 %v15125_v50, %s19823_s28  ;;  %v1933_v63 = vsel %vm1913_vm2, %v1900_v41, %v15147_v0  ;;  %v2813_v41 = vld [vmem:[#allocation2 + $0x92] sm:$0xff] }
 0x1b5   : > { %1450 = vrot.lane.b32.xlu0 %v10996_v1, %s19821_s29  ;;  %v11707_v10 = vpop.f32.mrf.mxu1 }
 0x1b6   : > { %v15158_v11 = vadd.f32 %v11707_v10, %v15021_v40  ;;  %v1817_v33 = vpop.permute.xlu1 %1816 }
 0x1b7   : > { %v1691_v12 = vpop.permute.xlu0 %1690  ;;  %v2128_v15 = vsel %vm2111_vm8, %v2095_v52, %v1817_v33  ;;  %v2345_v17 = vpop.f32.mrf.mxu1 }
 0x1b8   : > { %v19722_v20 = vmax.f32 %v15158_v11, 0.0  ;;  %v15167_v23 = vadd.f32 %v15021_v40, %v2345_v17  ;;  %1068 = vrot.lane.b32.xlu1 %v10996_v1, %s19817_s19  ;;  %11723 = vmatprep.mubr.msk.f32.mxu1 %vm2158_vm9, %v2128_v15  ;;  %v2096_v37 = vsel %vm2078_vm7, %v2063_v31, %v1691_v12 }
 0x1b9   : > { %942 = vrot.lane.b32.xlu0 %v625_v13, %s19818_s22 }
 0x1ba   : > { %2522 = vst.msk [vmem:[#allocation2 + $0x61] sm:$0xff] %vm484_vm10, %v19722_v20  ;;  %v19723_v42 = vmax.f32 %v15167_v23, 0.0  ;;  %v1309_v6 = vpop.permute.xlu1 %1308 }
 0x1bb   : > { %v1183_v32 = vpop.permute.xlu0 %1182  ;;  %v1998_v10 = vsel %vm1979_vm4, %v1965_v2, %v1309_v6 }
 0x1bc   : > { %2521 = vst.msk [vmem:[#allocation2 + $0x51] sm:$0xff] %vm484_vm10, %v19723_v42  ;;  %1704 = vrot.lane.b32.xlu1 %v10964_v57, %s19712_s26  ;;  %v1966_v15 = vsel %vm1946_vm3, %v1933_v63, %v1183_v32  ;;  %v3812_v63 = vld [vmem:[%s19685_s3 + $0x60] sm:$0xff] }
 0x1bd   : > { %1578 = vrot.lane.b32.xlu0 %v15181_v51, %s19823_s28 }
 0x1be   : > { %v1311_v38 = vpop.permute.xlu1 %1310 }
 0x1bf   : > { %v1819_v43 = vpop.permute.xlu0 %1818  ;;  %v1999_v18 = vsel %vm1979_vm4, %v1966_v15, %v1311_v38 }
 0x1c0   : > { %v2129_v35 = vsel %vm2111_vm8, %v2096_v37, %v1819_v43  ;;  %1196 = vrot.lane.b32.xlu1 %v15181_v51, %s19819_s21  ;;  %v15265_v43 = vld [vmem:[%s14275_s30 + $0x231] sm:$0xff] }
 0x1c1   : > { %11724 = vmatmul.mubr.msk.f32.gmra.mxu1 %vm2158_vm9, %v2129_v35  ;;  %1070 = vrot.lane.b32.xlu0 %v657_v5, %s19817_s19  ;;  %v15205_v60 = vld [vmem:[#allocation2 + $0x62] sm:$0xff] }
 0x1c2   : > { %v1439_v53 = vpop.permute.xlu1 %1438 }
 0x1c3   : > { %v1437_v54 = vpop.permute.xlu0 %1436  ;;  %v15200_v57 = vld [vmem:[#allocation2 + $0x52] sm:$0xff]  ;;  %v2032_v3 = vsel %vm2012_vm5, %v1999_v18, %v1439_v53 }
 0x1c4   : > { %11759 = vmatmul.mubr.msk.f32.gmra.mxu0 %vm484_vm10, %v15200_v57  ;;  %1832 = vrot.lane.b32.xlu1 %v10996_v1, %s19822_s1  ;;  %v10966_v1 = vld [vmem:[%s14275_s30 + $0x221] sm:$0xff]  ;;  %v2031_v52 = vsel %vm2012_vm5, %v1998_v10, %v1437_v54  ;;  %v3810_v18 = vld [vmem:[%s19685_s3 + $0x50] sm:$0xff] }
 0x1c5   : > { %1706 = vrot.lane.b32.xlu0 %v625_v13, %s19712_s26  ;;  %11761 = vmatprep.mubr.msk.f32.mxu0 %vm484_vm10, %v15205_v60  ;;  %v3813_v10 = vld [vmem:[%s19685_s3 + $0x68] sm:$0xff]  ;;  %v2777_v20 = vld [vmem:[#allocation2 + $0x51] sm:$0xff] }
 0x1c6   : > { %v1567_v9 = vpop.permute.xlu1 %1566  ;;  %v2745_v42 = vld [vmem:[#allocation2 + $0x50] sm:$0xff] }
 0x1c7   : > { %v1565_v25 = vpop.permute.xlu0 %1564  ;;  %v2065_v0 = vsel %vm2045_vm6, %v2032_v3, %v1567_v9  ;;  %v15335_v3 = vld [vmem:[%s14275_s30 + $0x241] sm:$0xff] }
 0x1c8   : > { %1324 = vrot.lane.b32.xlu1 %v625_v13, %s19820_s23  ;;  %v2064_v39 = vsel %vm2045_vm6, %v2031_v52, %v1565_v25  ;;  %v3815_v25 = vld [vmem:[%s19685_s3 + $0x78] sm:$0xff] }
 0x1c9   : > { %1198 = vrot.lane.b32.xlu0 %v15211_v36, %s19819_s21  ;;  %3940 = vmatpush1.msra.mxu1 %v3815_v25  ;;  %v3807_v25 = vld [vmem:[%s19685_s3 + $0x38] sm:$0xff] }
 0x1ca   : > { %v1695_v4 = vpop.permute.xlu1 %1694  ;;  %3941 = vmatprep.subr.mxu1 %v19743_v48 }
 0x1cb   : > { %v1693_v8 = vpop.permute.xlu0 %1692  ;;  %v2098_v6 = vsel %vm2078_vm7, %v2065_v0, %v1695_v4  ;;  %v3814_v4 = vld [vmem:[%s19685_s3 + $0x70] sm:$0xff]  ;;  %v3809_v0 = vld [vmem:[%s19685_s3 + $0x48] sm:$0xff] }
 0x1cc   : > { %1326 = vrot.lane.b32.xlu1 %v10966_v1, %s19820_s23  ;;  %v2097_v33 = vsel %vm2078_vm7, %v2064_v39, %v1693_v8  ;;  %3942 = vmatpush1.msra.mxu1 %v3814_v4 }
 0x1cd   : > { %1834 = vrot.lane.b32.xlu0 %v657_v5, %s19822_s1  ;;  %3943 = vmatprep.subr.mxu1 %v19743_v48 }
 0x1ce   : > { %v15235_v12 = vpop.permute.xlu1 %928  ;;  %3944 = vmatpush1.msra.mxu1 %v3813_v10 }
 0x1cf   : > { %v1821_v13 = vpop.permute.xlu0 %1820  ;;  %3945 = vmatprep.subr.mxu1 %v19743_v48 }
 0x1d0   : > { %v2130_v17 = vsel %vm2111_vm8, %v2097_v33, %v1821_v13  ;;  %1454 = vrot.lane.b32.xlu1 %v10998_v58, %s19821_s29  ;;  %v15317_v33 = vld [vmem:[%s14275_s30 + $0x240] sm:$0xff]  ;;  %v3811_v13 = vld [vmem:[%s19685_s3 + $0x58] sm:$0xff]  ;;  %3946 = vmatpush1.msra.mxu1 %v3812_v63 }
 0x1d1   : > { %11726 = vmatprep.mubr.msk.f32.mxu1 %vm2158_vm9, %v2130_v17  ;;  %1452 = vrot.lane.b32.xlu0 %v657_v5, %s19821_s29 }
 0x1d2   : > { %v11710_v24 = vpop.f32.mrf.mxu1  ;;  %v15248_v30 = vpop.permute.xlu1 %930  ;;  %3947 = vmatprep.subr.mxu1 %v19743_v48 }
 0x1d3   : > { %v15252_v32 = vadd.f32 %v11710_v24, %v15021_v40  ;;  %v1823_v34 = vpop.permute.xlu0 %1822  ;;  %3948 = vmatpush1.msra.mxu1 %v3811_v13 }
 0x1d4   : > { %v2131_v19 = vsel %vm2111_vm8, %v2098_v6, %v1823_v34  ;;  %v2355_v31 = vpop.f32.mrf.mxu1  ;;  %1582 = vrot.lane.b32.xlu1 %v15245_v59, %s19823_s28  ;;  %3949 = vmatprep.subr.mxu1 %v19743_v48 }
 0x1d5   : > { %v19720_v37 = vmax.f32 %v15252_v32, 0.0  ;;  %v15259_v38 = vadd.f32 %v15021_v40, %v2355_v31  ;;  %1580 = vrot.lane.b32.xlu0 %v15211_v36, %s19823_s28  ;;  %11727 = vmatmul.mubr.msk.f32.gmra.mxu1 %vm2158_vm9, %v2131_v19  ;;  %v1902_v31 = vsel %vm1880_vm1, %v14953_v46, %v15248_v30 }
 0x1d6   : > { %v15267_v5 = vpop.permute.xlu1 %1058  ;;  %3950 = vmatpush1.msra.mxu1 %v3810_v18 }
 0x1d7   : > { %2524 = vst.msk [vmem:[#allocation2 + $0x81] sm:$0xff] %vm484_vm10, %v19720_v37  ;;  %v19721_v35 = vmax.f32 %v15259_v38, 0.0  ;;  %v1057_v53 = vpop.permute.xlu0 %1056  ;;  %3951 = vmatprep.subr.mxu1 %v19743_v48 }
 0x1d8   : > { %1710 = vrot.lane.b32.xlu1 %v15265_v43, %s19712_s26  ;;  %3952 = vmatpush1.msra.mxu1 %v3809_v0 }
 0x1d9   : > { %2523 = vst.msk [vmem:[#allocation2 + $0x71] sm:$0xff] %vm484_vm10, %v19721_v35  ;;  %1708 = vrot.lane.b32.xlu0 %v10966_v1, %s19712_s26  ;;  %3953 = vmatprep.subr.mxu1 %v19743_v48 }
 0x1da   : > { %v15279_v54 = vpop.permute.xlu1 %1186 }
 0x1db   : > { %v1185_v9 = vpop.permute.xlu0 %1184 }
 0x1dc   : > { %944 = vrot.lane.b32.xlu1 %v10966_v1, %s19818_s22 }
 0x1dd   : > { %1836 = vrot.lane.b32.xlu0 %v10998_v58, %s19822_s1 }
 0x1de   : > { %v1315_v61 = vpop.permute.xlu1 %1314  ;;  %v15301_v8 = vld [vmem:[#allocation2 + $0x82] sm:$0xff] }
 0x1df   : > { %v1313_v2 = vpop.permute.xlu0 %1312 }
 0x1e0   : > { %946 = vrot.lane.b32.xlu1 %v15265_v43, %s19818_s22  ;;  %v15295_v1 = vld [vmem:[#allocation2 + $0x72] sm:$0xff] }
 0x1e1   : > { %1838 = vrot.lane.b32.xlu0 %v15287_v28, %s19822_s1  ;;  %11762 = vmatmul.mubr.msk.f32.gmra.mxu0 %vm484_vm10, %v15295_v1 }
 0x1e2   : > { %11764 = vmatprep.mubr.msk.f32.mxu0 %vm484_vm10, %v15301_v8  ;;  %v1443_v52 = vpop.permute.xlu1 %1442 }
 0x1e3   : > { %v1441_v39 = vpop.permute.xlu0 %1440 }
 0x1e4   : > { %1074 = vrot.lane.b32.xlu1 %v15287_v28, %s19817_s19 }
 0x1e5   : > { %1072 = vrot.lane.b32.xlu0 %v10998_v58, %s19817_s19  ;;  %11765 = vmatmul.mubr.msk.f32.gmra.mxu0 %vm484_vm10, %v2813_v41  ;;  %v1901_v58 = vsel %vm1880_vm1, %v14922_v21, %v15235_v12  ;;  %v3808_v21 = vld [vmem:[%s19685_s3 + $0x40] sm:$0xff] }
 0x1e6   : > { %v1571_v15 = vpop.permute.xlu1 %1570  ;;  %v1934_v24 = vsel %vm1913_vm2, %v1901_v58, %v1057_v53  ;;  %3954 = vmatpush1.msra.mxu1 %v3808_v21  ;;  %v3804_v58 = vld [vmem:[%s19685_s3 + $0x20] sm:$0xff] }
 0x1e7   : > { %v1569_v17 = vpop.permute.xlu0 %1568  ;;  %v1967_v34 = vsel %vm1946_vm3, %v1934_v24, %v1185_v9  ;;  %v15357_v9 = vld [vmem:[%s14275_s30 + $0x242] sm:$0xff]  ;;  %3955 = vmatprep.subr.mxu1 %v19743_v48 }
 0x1e8   : > { %1202 = vrot.lane.b32.xlu1 %v15317_v33, %s19819_s21  ;;  %v2000_v12 = vsel %vm1979_vm4, %v1967_v34, %v1313_v2  ;;  %v1935_v2 = vsel %vm1913_vm2, %v1902_v31, %v15267_v5  ;;  %3956 = vmatpush1.msra.mxu1 %v3807_v25  ;;  %v3806_v5 = vld [vmem:[%s19685_s3 + $0x30] sm:$0xff]  ;;  %v3800_v31 = vld [vmem:[%s19685_s3] sm:$0xff] }
 0x1e9   : > { %1200 = vrot.lane.b32.xlu0 %v15245_v59, %s19819_s21  ;;  %v2033_v53 = vsel %vm2012_vm5, %v2000_v12, %v1441_v39  ;;  %v1968_v30 = vsel %vm1946_vm3, %v1935_v2, %v15279_v54  ;;  %v15384_v54 = vld [vmem:[%s14275_s30 + $0x250] sm:$0xff]  ;;  %3957 = vmatprep.subr.mxu1 %v19743_v48  ;;  %v3801_v12 = vld [vmem:[%s19685_s3 + $0x8] sm:$0xff] }
 0x1ea   : > { %v1699_v6 = vpop.permute.xlu1 %1698  ;;  %v2066_v4 = vsel %vm2045_vm6, %v2033_v53, %v1569_v17  ;;  %v2001_v41 = vsel %vm1979_vm4, %v1968_v30, %v1315_v61  ;;  %3958 = vmatpush1.msra.mxu1 %v3806_v5  ;;  %v3802_v34 = vld [vmem:[%s19685_s3 + $0x10] sm:$0xff]  ;;  %v3829_v5 = vld [vmem:[%s19685_s3 + $0xe8] sm:$0xff] }
 0x1eb   : > { %v1697_v19 = vpop.permute.xlu0 %1696  ;;  %v2034_v63 = vsel %vm2012_vm5, %v2001_v41, %v1443_v52  ;;  %v3805_v52 = vld [vmem:[%s19685_s3 + $0x28] sm:$0xff]  ;;  %3959 = vmatprep.subr.mxu1 %v19743_v48  ;;  %v15434_v25 = vld [vmem:[%s14275_s30 + $0x252] sm:$0xff] }
 0x1ec   : > { %1330 = vrot.lane.b32.xlu1 %v15335_v3, %s19820_s23  ;;  %v2067_v61 = vsel %vm2045_vm6, %v2034_v63, %v1571_v15  ;;  %v15402_v15 = vld [vmem:[%s14275_s30 + $0x251] sm:$0xff]  ;;  %3960 = vmatpush1.msra.mxu1 %v3805_v52 }
 0x1ed   : > { %1328 = vrot.lane.b32.xlu0 %v15265_v43, %s19820_s23  ;;  %v2099_v43 = vsel %vm2078_vm7, %v2066_v4, %v1697_v19  ;;  %v2100_v17 = vsel %vm2078_vm7, %v2067_v61, %v1699_v6  ;;  %3961 = vmatprep.subr.mxu1 %v19743_v48  ;;  %v3803_v6 = vld [vmem:[%s19685_s3 + $0x18] sm:$0xff]  ;;  %v3830_v30 = vld [vmem:[%s19685_s3 + $0xf0] sm:$0xff] }
 0x1ee   : > { %v15366_v46 = vpop.permute.xlu1 %932  ;;  %3962 = vmatpush1.msra.mxu1 %v3804_v58 }
 0x1ef   : > { %v1825_v10 = vpop.permute.xlu0 %1824  ;;  %3963 = vmatprep.subr.mxu1 %v19743_v48 }
 0x1f0   : > { %v2132_v39 = vsel %vm2111_vm8, %v2099_v43, %v1825_v10  ;;  %1458 = vrot.lane.b32.xlu1 %v15357_v9, %s19821_s29  ;;  %3964 = vmatpush1.msra.mxu1 %v3803_v6 }
 0x1f1   : > { %1456 = vrot.lane.b32.xlu0 %v15287_v28, %s19821_s29  ;;  %11729 = vmatprep.mubr.msk.f32.mxu1 %vm2158_vm9, %v2132_v39 }
 0x1f2   : > { %v15387_v13 = vpop.permute.xlu1 %934  ;;  %3965 = vmatprep.subr.mxu1 %v19743_v48 }
 0x1f3   : > { %v1827_v18 = vpop.permute.xlu0 %1826  ;;  %3966 = vmatpush1.msra.mxu1 %v3802_v34  ;;  %v1904_v6 = vsel %vm1880_vm1, %v15003_v26, %v15387_v13  ;;  %v1903_v34 = vsel %vm1880_vm1, %v14973_v62, %v15366_v46  ;;  %v3826_v26 = vld [vmem:[%s19685_s3 + $0xd0] sm:$0xff] }
 0x1f4   : > { %v2133_v28 = vsel %vm2111_vm8, %v2100_v17, %v1827_v18  ;;  %1586 = vrot.lane.b32.xlu1 %v15384_v54, %s19823_s28  ;;  %3967 = vmatprep.subr.mxu1 %v19743_v48  ;;  %v10938_v17 = vld [vmem:[%s14275_s30 + $0x260] sm:$0xff] }
 0x1f5   : > { %1584 = vrot.lane.b32.xlu0 %v15317_v33, %s19823_s28  ;;  %11730 = vmatmul.mubr.msk.f32.gmra.mxu1 %vm2158_vm9, %v2133_v28  ;;  %v3828_v18 = vld [vmem:[%s19685_s3 + $0xe0] sm:$0xff] }
 0x1f6   : > { %v1063_v0 = vpop.permute.xlu1 %1062  ;;  %3968 = vmatpush1.msra.mxu1 %v3801_v12 }
 0x1f7   : > { %v15407_v24 = vpop.permute.xlu0 %1060  ;;  %3969 = vmatprep.subr.mxu1 %v19743_v48  ;;  %v1937_v12 = vsel %vm1913_vm2, %v1904_v6, %v1063_v0  ;;  %v11034_v6 = vld [vmem:[%s14275_s30 + $0x270] sm:$0xff] }
 0x1f8   : > { %1714 = vrot.lane.b32.xlu1 %v15402_v15, %s19824_s20  ;;  %3970 = vmatpush1.msra.mxu1 %v3800_v31  ;;  %v10970_v31 = vld [vmem:[%s14275_s30 + $0x261] sm:$0xff]  ;;  %v1936_v13 = vsel %vm1913_vm2, %v1903_v34, %v15407_v24 }
 0x1f9   : > { %1712 = vrot.lane.b32.xlu0 %v15335_v3, %s19824_s20  ;;  %3971 = vmatprep.subr.mxu1 %v19743_v48 }
 0x1fa   : > { %v1191_v19 = vpop.permute.xlu1 %1190 }
 0x1fb   : > { %v1189_v21 = vpop.permute.xlu0 %1188 }
 0x1fc   : > { %948 = vrot.lane.b32.xlu1 %v15335_v3, %s19818_s22  ;;  %v3831_v3 = vld [vmem:[%s19685_s3 + $0xf8] sm:$0xff]  ;;  %v1969_v62 = vsel %vm1946_vm3, %v1936_v13, %v1189_v21 }
 0x1fd   : > { %1840 = vrot.lane.b32.xlu0 %v15357_v9, %s19822_s1  ;;  %3972 = vmatpush2.msra.mxu1 %v3831_v3  ;;  %v1970_v3 = vsel %vm1946_vm3, %v1937_v12, %v1191_v19  ;;  %v3823_v12 = vld [vmem:[%s19685_s3 + $0xb8] sm:$0xff] }
 0x1fe   : > { %v1319_v53 = vpop.permute.xlu1 %1318  ;;  %3973 = vmatprep.subr.mxu1 %v19743_v48 }
 0x1ff   : > { %v1317_v2 = vpop.permute.xlu0 %1316  ;;  %3974 = vmatpush2.msra.mxu1 %v3830_v30  ;;  %v2003_v46 = vsel %vm1979_vm4, %v1970_v3, %v1319_v53  ;;  %v3825_v30 = vld [vmem:[%s19685_s3 + $0xc8] sm:$0xff]  ;;  %v11066_v3 = vld [vmem:[%s14275_s30 + $0x271] sm:$0xff] }
 0x200   : > { %950 = vrot.lane.b32.xlu1 %v15402_v15, %s19818_s22  ;;  %3975 = vmatprep.subr.mxu1 %v19743_v48  ;;  %s464_s22 = sand.u32 1, %s14120_s16  }
 0x201   : > { %1842 = vrot.lane.b32.xlu0 %v15434_v25, %s19822_s1  ;;  %v11713_v4 = vpop.f32.mrf.mxu1  ;;  %3976 = vmatpush2.msra.mxu1 %v3829_v5  ;;  %v11002_v5 = vld [vmem:[%s14275_s30 + $0x262] sm:$0xff] }
 0x202   : > { %v15449_v43 = vadd.f32 %v11713_v4, %v15021_v40  ;;  %v1447_v10 = vpop.permute.xlu1 %1446  ;;  %3977 = vmatprep.subr.mxu1 %v19743_v48 }
 0x203   : > { %v1445_v41 = vpop.permute.xlu0 %1444  ;;  %v2365_v39 = vpop.f32.mrf.mxu1  ;;  %3978 = vmatpush2.msra.mxu1 %v3828_v18  ;;  %v2036_v24 = vsel %vm2012_vm5, %v2003_v46, %v1447_v10  ;;  %v3821_v46 = vld [vmem:[%s19685_s3 + $0xa8] sm:$0xff] }
 0x204   : > { %v19718_v63 = vmax.f32 %v15449_v43, 0.0  ;;  %v15457_v61 = vadd.f32 %v15021_v40, %v2365_v39  ;;  %1078 = vrot.lane.b32.xlu1 %v15434_v25, %s19817_s19  ;;  %3979 = vmatprep.subr.mxu1 %v19743_v48  ;;  %v2002_v39 = vsel %vm1979_vm4, %v1969_v62, %v1317_v2 }
 0x205   : > { %1076 = vrot.lane.b32.xlu0 %v15357_v9, %s19817_s19  ;;  %v3827_v9 = vld [vmem:[%s19685_s3 + $0xd8] sm:$0xff]  ;;  %v2035_v19 = vsel %vm2012_vm5, %v2002_v39, %v1445_v41 }
 0x206   : > { %2526 = vst.msk [vmem:[#allocation2 + $0xc1] sm:$0xff] %vm484_vm10, %v19718_v63  ;;  %v19719_v52 = vmax.f32 %v15457_v61, 0.0  ;;  %v1575_v28 = vpop.permute.xlu1 %1574  ;;  %3980 = vmatpush2.msra.mxu1 %v3827_v9 }
 0x207   : > { %v1573_v58 = vpop.permute.xlu0 %1572  ;;  %3981 = vmatprep.subr.mxu1 %v19743_v48  ;;  %v2069_v21 = vsel %vm2045_vm6, %v2036_v24, %v1575_v28  ;;  %v3820_v24 = vld [vmem:[%s19685_s3 + $0xa0] sm:$0xff] }
 0x208   : > { %2525 = vst.msk [vmem:[#allocation2 + $0xb1] sm:$0xff] %vm484_vm10, %v19719_v52  ;;  %1206 = vrot.lane.b32.xlu1 %v10938_v17, %s19819_s21  ;;  %3982 = vmatpush2.msra.mxu1 %v3826_v26  ;;  %v2068_v2 = vsel %vm2045_vm6, %v2035_v19, %v1573_v58  ;;  %v3824_v58 = vld [vmem:[%s19685_s3 + $0xc0] sm:$0xff]  ;;  %v11098_v19 = vld [vmem:[%s14275_s30 + $0x272] sm:$0xff] }
 0x209   : > { %1204 = vrot.lane.b32.xlu0 %v15384_v54, %s19819_s21  ;;  %3983 = vmatprep.subr.mxu1 %v19743_v48  ;;  %s14140_s21 = smov 32  }
 0x20a   : > { %v1703_v4 = vpop.permute.xlu1 %1702  ;;  %3984 = vmatpush2.msra.mxu1 %v3825_v30 }
 0x20b   : > { %v1701_v0 = vpop.permute.xlu0 %1700  ;;  %v2102_v10 = vsel %vm2078_vm7, %v2069_v21, %v1703_v4  ;;  %3985 = vmatprep.subr.mxu1 %v19743_v48 }
 0x20c   : > { %1334 = vrot.lane.b32.xlu1 %v10970_v31, %s19820_s23  ;;  %v2101_v41 = vsel %vm2078_vm7, %v2068_v2, %v1701_v0  ;;  %3986 = vmatpush2.msra.mxu1 %v3824_v58  ;;  %v3819_v2 = vld [vmem:[%s19685_s3 + $0x98] sm:$0xff] }
 0x20d   : > { %1332 = vrot.lane.b32.xlu0 %v15402_v15, %s19820_s23  ;;  %v15510_v53 = vld [vmem:[#allocation2 + $0xc2] sm:$0xff]  ;;  %3987 = vmatprep.subr.mxu1 %v19743_v48 }
 0x20e   : > { %11767 = vmatprep.mubr.msk.f32.mxu0 %vm484_vm10, %v15510_v53  ;;  %v1831_v18 = vpop.permute.xlu1 %1830  ;;  %3988 = vmatpush2.msra.mxu1 %v3823_v12 }
 0x20f   : > { %v2135_v28 = vsel %vm2111_vm8, %v2102_v10, %v1831_v18  ;;  %v1829_v15 = vpop.permute.xlu0 %1828  ;;  %3989 = vmatprep.subr.mxu1 %v19743_v48  ;;  %v2613_v18 = vld [vmem:[#allocation2 + $0x2] sm:$0xff] }
 0x210   : > { %v2134_v9 = vsel %vm2111_vm8, %v2101_v41, %v1829_v15  ;;  %1462 = vrot.lane.b32.xlu1 %v11002_v5, %s19821_s29  ;;  %v2581_v41 = vld [vmem:[#allocation2 + $0x1] sm:$0xff]  ;;  %v3818_v15 = vld [vmem:[%s19685_s3 + $0x90] sm:$0xff] }
 0x211   : > { %1460 = vrot.lane.b32.xlu0 %v15434_v25, %s19821_s29  ;;  %11732 = vmatprep.mubr.msk.f32.mxu1 %vm2158_vm9, %v2134_v9  ;;  %v3822_v25 = vld [vmem:[%s19685_s3 + $0xb0] sm:$0xff]  ;;  %s14139_s29 = smov 64  }
 0x212   : > { %11733 = vmatmul.mubr.msk.f32.gmra.mxu1 %vm2158_vm9, %v2135_v28  ;;  %v15531_v34 = vpop.permute.xlu1 %938  ;;  %v2709_v28 = vld [vmem:[#allocation2 + $0x12] sm:$0xff] }
 0x213   : > { %v15536_v26 = vpop.permute.xlu0 %936  ;;  %3990 = vmatpush2.msra.mxu1 %v3822_v25  ;;  %v12124_v25 = vpack.i.bf16 %v2581_v41, %v2709_v28  ;;  %v2775_v41 = vld [vmem:[#allocation2 + $0x31] sm:$0xff] }
 0x214   : > { %1590 = vrot.lane.b32.xlu1 %v11034_v6, %s19823_s28  ;;  %3991 = vmatprep.subr.mxu1 %v19743_v48  ;;  %v3817_v6 = vld [vmem:[%s19685_s3 + $0x88] sm:$0xff] }
 0x215   : > { %1588 = vrot.lane.b32.xlu0 %v10938_v17, %s19823_s28  ;;  %v11716_v13 = vpop.f32.mrf.mxu1  ;;  %3992 = vmatpush2.msra.mxu1 %v3821_v46  ;;  %s14141_s28 = smov 96  }
 0x216   : > { %v15546_v4 = vadd.f32 %v11716_v13, %v15021_v40  ;;  %v15548_v62 = vpop.permute.xlu1 %1066  ;;  %3993 = vmatprep.subr.mxu1 %v19743_v48  ;;  %v15594_v13 = vld [vmem:[#allocation2 + $0x11] sm:$0xff] }
 0x217   : > { %v15554_v0 = vpop.permute.xlu0 %1064  ;;  %v2375_v30 = vpop.f32.mrf.mxu1  ;;  %3994 = vmatpush2.msra.mxu1 %v3820_v24  ;;  %v12139_v24 = vpack.i.bf16 %v15594_v13, %v15062_v7 }
 0x218   : > { %v19716_v17 = vmax.f32 %v15546_v4, 0.0  ;;  %v15558_v39 = vadd.f32 %v15021_v40, %v2375_v30  ;;  %1718 = vrot.lane.b32.xlu1 %v11066_v3, %s19824_s20  ;;  %3995 = vmatprep.subr.mxu1 %v19743_v48  ;;  %v15597_v3 = vld [vmem:[#allocation2 + $0x10] sm:$0xff]  ;;  %v15606_v30 = vld [vmem:[#allocation2 + $0x21] sm:$0xff] }
 0x219   : > { %1716 = vrot.lane.b32.xlu0 %v10970_v31, %s19824_s20  ;;  %v2742_v31 = vld [vmem:[#allocation2 + $0x20] sm:$0xff]  ;;  %3996 = vmatpush2.msra.mxu1 %v3819_v2  ;;  %v12154_v37 = vpack.i.bf16 %v15606_v30, %v15114_v44  ;;  %s10796_s20 = scalar_lea.sflag [#allocation5], %s464_s22 }
 0x21a   : > { %2528 = vst.msk [vmem:[#allocation2 + $0xe1] sm:$0xff] %vm484_vm10, %v19716_v17  ;;  %v19717_v21 = vmax.f32 %v15558_v39, 0.0  ;;  %v15571_v40 = vpop.permute.xlu1 %1194  ;;  %v12129_v58 = vpack.i.bf16 %v2613_v18, %v2742_v31  ;;  %3997 = vmatprep.subr.mxu1 %v19743_v48  ;;  %v12134_v18 = vpack.i.bf16 %v15597_v3, %v15606_v30 }
 0x21b   : > { %v15577_v10 = vpop.permute.xlu0 %1192  ;;  %3998 = vmatpush2.msra.mxu1 %v3818_v15 }
 0x21c   : > { %2527 = vst.msk [vmem:[#allocation2 + $0xd1] sm:$0xff] %vm484_vm10, %v19717_v21  ;;  %1846 = vrot.lane.b32.xlu1 %v11098_v19, %s19822_s1  ;;  %3999 = vmatprep.subr.mxu1 %v19743_v48  ;;  %v2744_v21 = vld [vmem:[#allocation2 + $0x40] sm:$0xff] }
 0x21d   : > { %1844 = vrot.lane.b32.xlu0 %v11002_v5, %s19822_s1  ;;  %v3816_v5 = vld [vmem:[%s19685_s3 + $0x80] sm:$0xff]  ;;  %4000 = vmatpush2.msra.mxu1 %v3817_v6  ;;  %s10903_s1 = sshll.u32 %s464_s22, 2 }
 0x21e   : > { %v15588_v9 = vpop.permute.xlu1 %1322  ;;  %4001 = vmatprep.subr.mxu1 %v19743_v48 }
 0x21f   : > { %v1321_v12 = vpop.permute.xlu0 %1320  ;;  %4002 = vmatpush2.msra.mxu1 %v3816_v5 }
 0x220   : > { %12130 = vrot.lane.b32.xlu1 %v12129_v58, %s14139_s29  ;;  %v2743_v58 = vld [vmem:[#allocation2 + $0x30] sm:$0xff] }
 0x221   : > { %12125 = vrot.lane.b32.xlu0 %v12124_v25, %s14140_s21  ;;  %v15617_v15 = vld [vmem:[#allocation2 + $0xe2] sm:$0xff]  ;;  %v12149_v25 = vpack.i.bf16 %v2742_v31, %v2775_v41  ;;  %v12144_v5 = vpack.i.bf16 %v2709_v28, %v2743_v58 }
 0x222   : > { %v15604_v46 = vpop.permute.xlu1 %940  ;;  %v590_v31 = vld [vmem:[%s14275_s30 + $0x1e0] sm:$0xff]  ;;  %s466_s30 = scalar_lea.vmem [#allocation4], %s10903_s1  ;;  %s14072_s1 = sshll.u32 %s14144_s0, 4  ;;  %s14073_s1 = int_to_ptr.vmem [resolvable:$false] %s14072_s1 }
 0x223   : > { %v1449_v19 = vpop.permute.xlu0 %1448  ;;  %v15611_v2 = vld [vmem:[#allocation2 + $0xd2] sm:$0xff]  ;;  %s10813_s27 = sshll.u32 %s466_s30, 4  ;;  %s14074_s17 = scalar_lea.vmem %s14073_s1, 128  ;;  %s10814_s27 = int_to_ptr.vmem [resolvable:$true] %s10813_s27 }
 0x224   : > { %11768 = vmatmul.mubr.msk.f32.gmra.mxu0 %vm484_vm10, %v15611_v2  ;;  %12140 = vrot.lane.b32.xlu1 %v12139_v24, %s14140_s21  ;;  %v12159_v24 = vpack.i.bf16 %v15062_v7, %v2744_v21  ;;  %v1905_v7 = vsel %vm1880_vm1, %v590_v31, %v15536_v26  ;;  %v12174_v26 = vpack.i.bf16 %v15114_v44, %v2745_v42  ;;  %v2746_v31 = vld [vmem:[#allocation2 + $0x60] sm:$0xff]  ;;  %s14068_s19 = scalar_lea.vmem %s10814_s27, 64  ;;  %p14075_p0 = scmp.lt.s32.totalorder %s10814_s27, %s14073_s1 }
 0x225   : > { %11770 = vmatprep.mubr.msk.f32.mxu0 %vm484_vm10, %v15617_v15  ;;  %12135 = vrot.lane.b32.xlu0 %v12134_v18, %s14141_s28  ;;  %v2776_v18 = vld [vmem:[#allocation2 + $0x41] sm:$0xff]  ;;  %v1938_v27 = vsel %vm1913_vm2, %v1905_v7, %v15554_v0  ;;  %p14069_p11 = scmp.ne.s32.totalorder %s10814_s27, %s14068_s19  ;;  %p14076_p1 = scmp.lt.s32.totalorder %s14074_s17, %s14068_s19 }
 0x226   : > { %v1577_v6 = vpop.permute.xlu1 %1576 }
 0x227   : > { %v15623_v17 = vpop.permute.xlu0 %1450  ;;  %p14070_p12 = pnand %p14069_p11, %p14261_p5  ;;  %p14077_p2 = por %p14076_p1, %p14075_p0 }
 0x228   : > { %12150 = vrot.lane.b32.xlu1 %v12149_v25, %s14141_s28  ;;  %v12169_v25 = vpack.i.bf16 %v2775_v41, %v15119_v45  ;;  %v12179_v41 = vpack.i.bf16 %v2744_v21, %v2777_v20  ;;  %v15660_v21 = vld [vmem:[%s19684_s2] ss:$0 sm:$0xff] }
 0x229   : > { %12145 = vrot.lane.b32.xlu0 %v12144_v5, %s14139_s29  ;;  %v12164_v5 = vpack.i.bf16 %v2743_v58, %v2776_v18  ;;  %p14071_p13 = pneg %p14070_p12 }
 0x22a   : > { %v15627_v63 = vpop.permute.xlu1 %1068 }
 0x22b   : > { %v15630_v52 = vpop.permute.xlu0 %942  ;;  %p14078_p3 = pnand %p14077_p2, %p14071_p13 }
 0x22c   : > { %12160 = vrot.lane.b32.xlu1 %v12159_v24, %s14139_s29 }
 0x22d   : > { %12155 = vrot.lane.b32.xlu0 %v12154_v37, %s14140_s21  ;;  %v1971_v37 = vsel %vm1946_vm3, %v1938_v27, %v15577_v10 }
 0x22e   : > { %v1705_v28 = vpop.permute.xlu1 %1704  ;;  %v2004_v58 = vsel %vm1979_vm4, %v1971_v37, %v1321_v12  ;;  %v12189_v12 = vpack.i.bf16 %v15119_v45, %v2746_v31  ;;  %v12184_v37 = vpack.i.bf16 %v2776_v18, %v15200_v57 }
 0x22f   : > { %v1579_v35 = vpop.permute.xlu0 %1578 }
 0x230   : > { %12170 = vrot.lane.b32.xlu1 %v12169_v25, %s14140_s21  ;;  %v2037_v25 = vsel %vm2012_vm5, %v2004_v58, %v1449_v19  ;;  %v1906_v58 = vsel %vm1880_vm1, %v15128_v55, %v15531_v34  ;;  %v2779_v34 = vld [vmem:[#allocation2 + $0x71] sm:$0xff] }
 0x231   : > { %12165 = vrot.lane.b32.xlu0 %v12164_v5, %s14141_s28  ;;  %v2070_v0 = vsel %vm2045_vm6, %v2037_v25, %v1577_v6  ;;  %v1939_v45 = vsel %vm1913_vm2, %v1906_v58, %v15548_v62  ;;  %v2778_v25 = vld [vmem:[#allocation2 + $0x61] sm:$0xff]  ;;  %v2747_v62 = vld [vmem:[#allocation2 + $0x70] sm:$0xff] }
 0x232   : > { %v15646_v24 = vpop.permute.xlu1 %1196  ;;  %v2103_v27 = vsel %vm2078_vm7, %v2070_v0, %v1705_v28  ;;  %v12199_v0 = vpack.i.bf16 %v2777_v20, %v15205_v60  ;;  %v12194_v55 = vpack.i.bf16 %v2745_v42, %v2778_v25  ;;  %v12209_v42 = vpack.i.bf16 %v2746_v31, %v2779_v34 }
 0x233   : > { %v15649_v22 = vpop.permute.xlu0 %1070  ;;  %v12214_v31 = vpack.i.bf16 %v2778_v25, %v15295_v1  ;;  %v2749_v25 = vld [vmem:[#allocation2 + $0x90] sm:$0xff] }
 0x234   : > { %12180 = vrot.lane.b32.xlu1 %v12179_v41, %s14141_s28 }
 0x235   : > { %v11719_v5 = vpop.f32.mrf.mxu1  ;;  %12175 = vrot.lane.b32.xlu0 %v12174_v26, %s14139_s29 }
 0x236   : > { %v15663_v10 = vadd.f32 %v15660_v21, %v11719_v5  ;;  %v1833_v44 = vpop.permute.xlu1 %1832  ;;  %v1972_v5 = vsel %vm1946_vm3, %v1939_v45, %v15571_v40 }
 0x237   : > { %v2136_v19 = vsel %vm2111_vm8, %v2103_v27, %v1833_v44  ;;  %v1707_v7 = vpop.permute.xlu0 %1706  ;;  %v2385_v6 = vpop.f32.mrf.mxu1  ;;  %v2005_v44 = vsel %vm1979_vm4, %v1972_v5, %v15588_v9  ;;  %v12204_v9 = vpack.i.bf16 %v15200_v57, %v2747_v62  ;;  %v2780_v5 = vld [vmem:[#allocation2 + $0x81] sm:$0xff] }
 0x238   : > { %v19736_v41 = vmax.f32 %v15663_v10, 0.0  ;;  %v15670_v28 = vadd.f32 %v15660_v21, %v2385_v6  ;;  %11735 = vmatprep.mubr.msk.f32.mxu1 %vm2158_vm9, %v2136_v19  ;;  %12190 = vrot.lane.b32.xlu1 %v12189_v12, %s14139_s29  ;;  %v2038_v12 = vsel %vm2012_vm5, %v2005_v44, %v15623_v17  ;;  %v12224_v44 = vpack.i.bf16 %v2747_v62, %v2780_v5 }
 0x239   : > { %12185 = vrot.lane.b32.xlu0 %v12184_v37, %s14140_s21  ;;  %v2071_v20 = vsel %vm2045_vm6, %v2038_v12, %v1579_v35  ;;  %v2748_v37 = vld [vmem:[#allocation2 + $0x80] sm:$0xff]  ;;  %v2781_v12 = vld [vmem:[#allocation2 + $0x91] sm:$0xff]  ;;  %v12234_v62 = vpack.i.bf16 %v15295_v1, %v2749_v25 }
 0x23a   : > { %2530 = vst.msk [vmem:[#allocation2 + $0x101] sm:$0xff] %vm484_vm10, %v19736_v41  ;;  %v19737_v18 = vmax.f32 %v15670_v28, 0.0  ;;  %v1325_v26 = vpop.permute.xlu1 %1324  ;;  %v2104_v19 = vsel %vm2078_vm7, %v2071_v20, %v1707_v7  ;;  %v12219_v45 = vpack.i.bf16 %v15205_v60, %v2748_v37  ;;  %v12229_v60 = vpack.i.bf16 %v2779_v34, %v15301_v8  ;;  %v2590_v25 = vld [vmem:[#allocation2 + $0xb1] sm:$0xff] }
 0x23b   : > { %v1199_v27 = vpop.permute.xlu0 %1198  ;;  %v1907_v20 = vsel %vm1880_vm1, %v15125_v50, %v15604_v46  ;;  %v2589_v50 = vld [vmem:[#allocation2 + $0xa1] sm:$0xff]  ;;  %v2717_v46 = vld [vmem:[#allocation2 + $0xb2] sm:$0xff] }
 0x23c   : > { %2529 = vst.msk [vmem:[#allocation2 + $0xf1] sm:$0xff] %vm484_vm10, %v19737_v18  ;;  %12200 = vrot.lane.b32.xlu1 %v12199_v0, %s14140_s21 }
 0x23d   : > { %12195 = vrot.lane.b32.xlu0 %v12194_v55, %s14141_s28 }
 0x23e   : > { %v1327_v40 = vpop.permute.xlu1 %1326 }
 0x23f   : > { %v1835_v6 = vpop.permute.xlu0 %1834 }
 0x240   : > { %v2137_v58 = vsel %vm2111_vm8, %v2104_v19, %v1835_v6  ;;  %12210 = vrot.lane.b32.xlu1 %v12209_v42, %s14141_s28  ;;  %v1940_v42 = vsel %vm1913_vm2, %v1907_v20, %v15627_v63  ;;  %v12239_v6 = vpack.i.bf16 %v2748_v37, %v2781_v12  ;;  %v1908_v63 = vsel %vm1880_vm1, %v15181_v51, %v15630_v52 }
 0x241   : > { %11736 = vmatmul.mubr.msk.f32.gmra.mxu1 %vm2158_vm9, %v2137_v58  ;;  %12205 = vrot.lane.b32.xlu0 %v12204_v9, %s14139_s29  ;;  %v15709_v57 = vld [vmem:[#allocation2 + $0x102] sm:$0xff]  ;;  %v1973_v8 = vsel %vm1946_vm3, %v1940_v42, %v15646_v24  ;;  %v1941_v24 = vsel %vm1913_vm2, %v1908_v63, %v15649_v22  ;;  %v12244_v12 = vpack.i.bf16 %v2589_v50, %v2717_v46 }
 0x242   : > { %v1455_v17 = vpop.permute.xlu1 %1454  ;;  %v2621_v9 = vld [vmem:[#allocation2 + $0xa2] sm:$0xff]  ;;  %v1974_v5 = vsel %vm1946_vm3, %v1941_v24, %v1199_v27 }
 0x243   : > { %v1453_v35 = vpop.permute.xlu0 %1452  ;;  %v15704_v0 = vld [vmem:[#allocation2 + $0xf2] sm:$0xff]  ;;  %v2750_v58 = vld [vmem:[#allocation2 + $0xc0] sm:$0xff]  ;;  %v2007_v51 = vsel %vm1979_vm4, %v1974_v5, %v1327_v40 }
 0x244   : > { %11771 = vmatmul.mubr.msk.f32.gmra.mxu0 %vm484_vm10, %v15704_v0  ;;  %12220 = vrot.lane.b32.xlu1 %v12219_v45, %s14139_s29  ;;  %v2006_v45 = vsel %vm1979_vm4, %v1973_v8, %v1325_v26  ;;  %v12249_v26 = vpack.i.bf16 %v2621_v9, %v2750_v58  ;;  %v2040_v22 = vsel %vm2012_vm5, %v2007_v51, %v1455_v17  ;;  %v2782_v42 = vld [vmem:[#allocation2 + $0xc1] sm:$0xff]  ;;  %v2783_v17 = vld [vmem:[#allocation2 + $0xd1] sm:$0xff] }
 0x245   : > { %11773 = vmatprep.mubr.msk.f32.mxu0 %vm484_vm10, %v15709_v57  ;;  %12215 = vrot.lane.b32.xlu0 %v12214_v31, %s14140_s21  ;;  %v2039_v37 = vsel %vm2012_vm5, %v2006_v45, %v1453_v35  ;;  %v2653_v35 = vld [vmem:[#allocation2 + $0xb0] sm:$0xff]  ;;  %v2752_v5 = vld [vmem:[#allocation2 + $0xe0] sm:$0xff]  ;;  %v12289_v51 = vpack.i.bf16 %v2783_v17, %v15617_v15 }
 0x246   : > { %v1583_v7 = vpop.permute.xlu1 %1582 }
 0x247   : > { %v1581_v55 = vpop.permute.xlu0 %1580  ;;  %v2073_v27 = vsel %vm2045_vm6, %v2040_v22, %v1583_v7  ;;  %v2751_v7 = vld [vmem:[#allocation2 + $0xd0] sm:$0xff] }
 0x248   : > { %12230 = vrot.lane.b32.xlu1 %v12229_v60, %s14140_s21  ;;  %v2072_v1 = vsel %vm2045_vm6, %v2039_v37, %v1581_v55  ;;  %v12269_v37 = vpack.i.bf16 %v2750_v58, %v2783_v17  ;;  %v12279_v58 = vpack.i.bf16 %v15510_v53, %v2752_v5  ;;  %v2785_v22 = vld [vmem:[#allocation2 + $0xf1] sm:$0xff]  ;;  %v2754_v17 = vld [vmem:[#allocation2 + $0x100] sm:$0xff] }
 0x249   : > { %12225 = vrot.lane.b32.xlu0 %v12224_v44, %s14141_s28 }
 0x24a   : > { %v1711_v19 = vpop.permute.xlu1 %1710 }
 0x24b   : > { %v1709_v34 = vpop.permute.xlu0 %1708  ;;  %v2106_v40 = vsel %vm2078_vm7, %v2073_v27, %v1711_v19 }
 0x24c   : > { %12240 = vrot.lane.b32.xlu1 %v12239_v6, %s14141_s28  ;;  %v2105_v60 = vsel %vm2078_vm7, %v2072_v1, %v1709_v34  ;;  %v12259_v6 = vpack.i.bf16 %v2590_v25, %v15510_v53  ;;  %v2784_v25 = vld [vmem:[#allocation2 + $0xe1] sm:$0xff] }
 0x24d   : > { %12235 = vrot.lane.b32.xlu0 %v12234_v62, %s14139_s29  ;;  %v12254_v62 = vpack.i.bf16 %v2653_v35, %v2782_v42  ;;  %v12284_v35 = vpack.i.bf16 %v2751_v7, %v2784_v25 }
 0x24e   : > { %v15736_v31 = vpop.permute.xlu1 %944 }
 0x24f   : > { %v1837_v44 = vpop.permute.xlu0 %1836 }
 0x250   : > { %v2138_v52 = vsel %vm2111_vm8, %v2105_v60, %v1837_v44  ;;  %12250 = vrot.lane.b32.xlu1 %v12249_v26, %s14139_s29  ;;  %v12264_v26 = vpack.i.bf16 %v2717_v46, %v2751_v7 }
 0x251   : > { %11738 = vmatprep.mubr.msk.f32.mxu1 %vm2158_vm9, %v2138_v52  ;;  %12245 = vrot.lane.b32.xlu0 %v12244_v12, %s14140_s21  ;;  %v12274_v12 = vpack.i.bf16 %v2782_v42, %v15611_v2 }
 0x252   : > { %v11722_v55 = vpop.f32.mrf.mxu1  ;;  %v15747_v20 = vpop.permute.xlu1 %946 }
 0x253   : > { %v15752_v8 = vadd.f32 %v15660_v21, %v11722_v55  ;;  %v1839_v34 = vpop.permute.xlu0 %1838  ;;  %v2753_v55 = vld [vmem:[#allocation2 + $0xf0] sm:$0xff] }
 0x254   : > { %v2139_v9 = vsel %vm2111_vm8, %v2106_v40, %v1839_v34  ;;  %v2395_v45 = vpop.f32.mrf.mxu1  ;;  %12260 = vrot.lane.b32.xlu1 %v12259_v6, %s14140_s21  ;;  %v12299_v6 = vpack.i.bf16 %v2752_v5, %v2785_v22  ;;  %v2821_v40 = vld [vmem:[#allocation2 + $0x132] sm:$0xff] }
 0x255   : > { %v19733_v50 = vmax.f32 %v15752_v8, 0.0  ;;  %v15758_v63 = vadd.f32 %v15660_v21, %v2395_v45  ;;  %11739 = vmatmul.mubr.msk.f32.gmra.mxu1 %vm2158_vm9, %v2139_v9  ;;  %12255 = vrot.lane.b32.xlu0 %v12254_v62, %s14141_s28  ;;  %v12294_v62 = vpack.i.bf16 %v15611_v2, %v2753_v55  ;;  %v12309_v45 = vpack.i.bf16 %v15617_v15, %v2754_v17 }
 0x256   : > { %v1075_v19 = vpop.permute.xlu1 %1074 }
 0x257   : > { %2532 = vst.msk [vmem:[#allocation2 + $0x121] sm:$0xff] %vm484_vm10, %v19733_v50  ;;  %v19735_v24 = vmax.f32 %v15758_v63, 0.0  ;;  %v1073_v1 = vpop.permute.xlu0 %1072 }
 0x258   : > { %12270 = vrot.lane.b32.xlu1 %v12269_v37, %s14141_s28  ;;  %v12304_v37 = vpack.i.bf16 %v2784_v25, %v15704_v0 }
 0x259   : > { %2531 = vst.msk [vmem:[#allocation2 + $0x111] sm:$0xff] %vm484_vm10, %v19735_v24  ;;  %12265 = vrot.lane.b32.xlu0 %v12264_v26, %s14139_s29  ;;  %v1909_v26 = vsel %vm1880_vm1, %v15211_v36, %v15736_v31  ;;  %v1910_v36 = vsel %vm1880_vm1, %v15245_v59, %v15747_v20 }
 0x25a   : > { %v1203_v60 = vpop.permute.xlu1 %1202  ;;  %v1942_v2 = vsel %vm1913_vm2, %v1909_v26, %v1073_v1  ;;  %v1943_v1 = vsel %vm1913_vm2, %v1910_v36, %v1075_v19 }
 0x25b   : > { %v1201_v44 = vpop.permute.xlu0 %1200 }
 0x25c   : > { %12280 = vrot.lane.b32.xlu1 %v12279_v58, %s14139_s29  ;;  %v2786_v58 = vld [vmem:[#allocation2 + $0x101] sm:$0xff] }
 0x25d   : > { %12275 = vrot.lane.b32.xlu0 %v12274_v12, %s14140_s21  ;;  %v12319_v12 = vpack.i.bf16 %v2785_v22, %v15709_v57 }
 0x25e   : > { %v1331_v46 = vpop.permute.xlu1 %1330  ;;  %v15782_v53 = vld [vmem:[#allocation2 + $0x122] sm:$0xff] }
 0x25f   : > { %v1329_v52 = vpop.permute.xlu0 %1328  ;;  %v2756_v26 = vld [vmem:[#allocation2 + $0x120] sm:$0xff] }
 0x260   : > { %v15776_v27 = vld [vmem:[#allocation2 + $0x112] sm:$0xff]  ;;  %12290 = vrot.lane.b32.xlu1 %v12289_v51, %s14140_s21  ;;  %v1975_v51 = vsel %vm1946_vm3, %v1942_v2, %v1201_v44 }
 0x261   : > { %11774 = vmatmul.mubr.msk.f32.gmra.mxu0 %vm484_vm10, %v15776_v27  ;;  %12285 = vrot.lane.b32.xlu0 %v12284_v35, %s14141_s28  ;;  %v12314_v35 = vpack.i.bf16 %v2753_v55, %v2786_v58  ;;  %v2008_v25 = vsel %vm1979_vm4, %v1975_v51, %v1329_v52 }
 0x262   : > { %11776 = vmatprep.mubr.msk.f32.mxu0 %vm484_vm10, %v15782_v53  ;;  %v1459_v42 = vpop.permute.xlu1 %1458 }
 0x263   : > { %v1457_v34 = vpop.permute.xlu0 %1456 }
 0x264   : > { %12300 = vrot.lane.b32.xlu1 %v12299_v6, %s14141_s28  ;;  %v2787_v6 = vld [vmem:[#allocation2 + $0x111] sm:$0xff]  ;;  %v2041_v31 = vsel %vm2012_vm5, %v2008_v25, %v1457_v34 }
 0x265   : > { %12295 = vrot.lane.b32.xlu0 %v12294_v62, %s14139_s29  ;;  %11777 = vmatmul.mubr.msk.f32.gmra.mxu0 %vm484_vm10, %v2821_v40  ;;  %v2755_v40 = vld [vmem:[#allocation2 + $0x110] sm:$0xff]  ;;  %v12329_v55 = vpack.i.bf16 %v2754_v17, %v2787_v6  ;;  %v1976_v62 = vsel %vm1946_vm3, %v1943_v1, %v1203_v60  ;;  %v12339_v17 = vpack.i.bf16 %v15709_v57, %v2756_v26 }
 0x266   : > { %v1587_v9 = vpop.permute.xlu1 %1586  ;;  %v2009_v59 = vsel %vm1979_vm4, %v1976_v62, %v1331_v46  ;;  %v12334_v46 = vpack.i.bf16 %v2786_v58, %v15776_v27  ;;  %v2789_v57 = vld [vmem:[#allocation2 + $0x131] sm:$0xff] }
 0x267   : > { %v1585_v7 = vpop.permute.xlu0 %1584  ;;  %v2042_v19 = vsel %vm2012_vm5, %v2009_v59, %v1459_v42 }
 0x268   : > { %12310 = vrot.lane.b32.xlu1 %v12309_v45, %s14139_s29  ;;  %v2074_v44 = vsel %vm2045_vm6, %v2041_v31, %v1585_v7  ;;  %v2075_v60 = vsel %vm2045_vm6, %v2042_v19, %v1587_v9  ;;  %v12349_v9 = vpack.i.bf16 %v2787_v6, %v15782_v53 }
 0x269   : > { %12305 = vrot.lane.b32.xlu0 %v12304_v37, %s14140_s21  ;;  %v12324_v37 = vpack.i.bf16 %v15704_v0, %v2755_v40 }
 0x26a   : > { %v1715_v5 = vpop.permute.xlu1 %1714 }
 0x26b   : > { %v1713_v15 = vpop.permute.xlu0 %1712  ;;  %v2108_v0 = vsel %vm2078_vm7, %v2075_v60, %v1715_v5  ;;  %v2757_v5 = vld [vmem:[#allocation2 + $0x130] sm:$0xff] }
 0x26c   : > { %12320 = vrot.lane.b32.xlu1 %v12319_v12, %s14140_s21  ;;  %v2107_v52 = vsel %vm2078_vm7, %v2074_v44, %v1713_v15  ;;  %v2788_v12 = vld [vmem:[#allocation2 + $0x121] sm:$0xff]  ;;  %v12354_v36 = vpack.i.bf16 %v15776_v27, %v2757_v5 }
 0x26d   : > { %12315 = vrot.lane.b32.xlu0 %v12314_v35, %s14141_s28  ;;  %v12344_v15 = vpack.i.bf16 %v2755_v40, %v2788_v12  ;;  %v12359_v35 = vpack.i.bf16 %v2756_v26, %v2789_v57 }
 0x26e   : > { %v949_v22 = vpop.permute.xlu1 %948 }
 0x26f   : > { %v1841_v45 = vpop.permute.xlu0 %1840  ;;  %v1911_v59 = vsel %vm1880_vm1, %v15317_v33, %v949_v22  ;;  %v2597_v22 = vld [vmem:[#allocation2 + $0x141] sm:$0xff] }
 0x270   : > { %v2140_v20 = vsel %vm2111_vm8, %v2107_v52, %v1841_v45  ;;  %12330 = vrot.lane.b32.xlu1 %v12329_v55, %s14141_s28 }
 0x271   : > { %11741 = vmatprep.mubr.msk.f32.mxu1 %vm2158_vm9, %v2140_v20  ;;  %12325 = vrot.lane.b32.xlu0 %v12324_v37, %s14139_s29 }
 0x272   : > { %v951_v34 = vpop.permute.xlu1 %950 }
 0x273   : > { %v1843_v7 = vpop.permute.xlu0 %1842  ;;  %v1912_v26 = vsel %vm1880_vm1, %v15384_v54, %v951_v34  ;;  %vm10451_vm1 = vcmask 1041408  }
 0x274   : > { %v2141_v2 = vsel %vm2111_vm8, %v2108_v0, %v1843_v7  ;;  %12340 = vrot.lane.b32.xlu1 %v12339_v17, %s14139_s29  ;;  %v2629_v0 = vld [vmem:[#allocation2 + $0x142] sm:$0xff] }
 0x275   : > { %11742 = vmatmul.mubr.msk.f32.gmra.mxu1 %vm2158_vm9, %v2141_v2  ;;  %12335 = vrot.lane.b32.xlu0 %v12334_v46, %s14140_s21 }
 0x276   : > { %v1079_v42 = vpop.permute.xlu1 %1078 }
 0x277   : > { %v1077_v51 = vpop.permute.xlu0 %1076  ;;  %v1945_v20 = vsel %vm1913_vm2, %v1912_v26, %v1079_v42 }
 0x278   : > { %12350 = vrot.lane.b32.xlu1 %v12349_v9, %s14140_s21  ;;  %v1944_v19 = vsel %vm1913_vm2, %v1911_v59, %v1077_v51  ;;  %vm10566_vm2 = vcmask 125952  }
 0x279   : > { %12345 = vrot.lane.b32.xlu0 %v12344_v15, %s14141_s28 }
 0x27a   : > { %v1207_v58 = vpop.permute.xlu1 %1206 }
 0x27b   : > { %v1205_v25 = vpop.permute.xlu0 %1204  ;;  %v1978_v60 = vsel %vm1946_vm3, %v1945_v20, %v1207_v58 }
 0x27c   : > { %12360 = vrot.lane.b32.xlu1 %v12359_v35, %s14141_s28  ;;  %v1977_v7 = vsel %vm1946_vm3, %v1944_v19, %v1205_v25 }
 0x27d   : > { %12355 = vrot.lane.b32.xlu0 %v12354_v36, %s14139_s29 }
 0x27e   : > { %v1335_v31 = vpop.permute.xlu1 %1334 }
 0x27f   : > { %v1333_v1 = vpop.permute.xlu0 %1332  ;;  %v2011_v46 = vsel %vm1979_vm4, %v1978_v60, %v1335_v31 }
 0x280   : > { %v2010_v12 = vsel %vm1979_vm4, %v1977_v7, %v1333_v1 }
 0x281   : > { %v11725_v53 = vpop.f32.mrf.mxu1 }
 0x282   : > { %v15833_v6 = vadd.f32 %v15660_v21, %v11725_v53  ;;  %v1463_v40 = vpop.permute.xlu1 %1462 }
 0x283   : > { %v2405_v44 = vpop.f32.mrf.mxu1  ;;  %v1461_v62 = vpop.permute.xlu0 %1460  ;;  %v2044_v54 = vsel %vm2012_vm5, %v2011_v46, %v1463_v40 }
 0x284   : > { %v19730_v55 = vmax.f32 %v15833_v6, 0.0  ;;  %v15837_v52 = vadd.f32 %v15660_v21, %v2405_v44  ;;  %v2043_v42 = vsel %vm2012_vm5, %v2010_v12, %v1461_v62 }
 0x286   : > { %2534 = vst.msk [vmem:[#allocation2 + $0x161] sm:$0xff] %vm484_vm10, %v19730_v55  ;;  %v19731_v27 = vmax.f32 %v15837_v52, 0.0  ;;  %v1591_v45 = vpop.permute.xlu1 %1590 }
 0x287   : > { %v1589_v37 = vpop.permute.xlu0 %1588  ;;  %v2077_v9 = vsel %vm2045_vm6, %v2044_v54, %v1591_v45 }
 0x288   : > { %2533 = vst.msk [vmem:[#allocation2 + $0x151] sm:$0xff] %vm484_vm10, %v19731_v27  ;;  %v2076_v15 = vsel %vm2045_vm6, %v2043_v42, %v1589_v37  ;;  %v2549_v37 = vld [vmem:[#allocation2] sm:$0xff] }
 0x28a   : > { %v1719_v17 = vpop.permute.xlu1 %1718 }
 0x28b   : > { %v1717_v2 = vpop.permute.xlu0 %1716  ;;  %v2110_v57 = vsel %vm2078_vm7, %v2077_v9, %v1719_v17 }
 0x28c   : > { %v2109_v25 = vsel %vm2078_vm7, %v2076_v15, %v1717_v2 }
 0x28d   : > { %v15857_v34 = vld [vmem:[#allocation2 + $0x162] sm:$0xff] }
 0x28e   : > { %v15859_v33 = vld [vmem:[#allocation2 + $0x160] sm:$0xff]  ;;  %11779 = vmatprep.mubr.msk.f32.mxu0 %vm484_vm10, %v15857_v34  ;;  %v1847_v5 = vpop.permute.xlu1 %1846 }
 0x28f   : > { %v12369_v51 = vpack.i.bf16 %v2629_v0, %v15859_v33  ;;  %v15868_v58 = vld [vmem:[#allocation2 + $0x152] sm:$0xff]  ;;  %v2143_v36 = vsel %vm2111_vm8, %v2110_v57, %v1847_v5  ;;  %v1845_v31 = vpop.permute.xlu0 %1844  ;;  %v15884_v45 = vld [vmem:[#allocation2 + $0x161] sm:$0xff] }
 0x290   : > { %v15870_v35 = vld [vmem:[#allocation2 + $0x151] sm:$0xff]  ;;  %v12364_v1 = vpack.i.bf16 %v2597_v22, %v15868_v58  ;;  %v2142_v53 = vsel %vm2111_vm8, %v2109_v25, %v1845_v31 }
 0x291   : > { %12370 = vrot.lane.b32.xlu1 %v12369_v51, %s14139_s29  ;;  %v15877_v40 = vld [vmem:[#allocation2 + $0x150] sm:$0xff]  ;;  %11744 = vmatprep.mubr.msk.f32.mxu1 %vm2158_vm9, %v2142_v53  ;;  %v12379_v44 = vpack.i.bf16 %v15870_v35, %v15857_v34 }
 0x292   : > { %12365 = vrot.lane.b32.xlu0 %v12364_v1, %s14140_s21  ;;  %11745 = vmatmul.mubr.msk.f32.gmra.mxu1 %vm2158_vm9, %v2143_v36  ;;  %v12131_v62 = vpop.permute.xlu1 %12130  ;;  %v12374_v59 = vpack.i.bf16 %v15877_v40, %v15884_v45 }
 0x293   : > { %v12126_v26 = vpop.permute.xlu0 %12125  ;;  %v12133_v60 = vunpack.i.h.bf16 %v12131_v62  ;;  %v12132_v17 = vunpack.i.l.bf16 %v12131_v62 }
 0x294   : > { %v12128_v20 = vunpack.i.h.bf16 %v12126_v26  ;;  %v12127_v19 = vunpack.i.l.bf16 %v12126_v26 }
 0x295   : > { %12380 = vrot.lane.b32.xlu1 %v12379_v44, %s14140_s21  ;;  %v11728_v0 = vpop.f32.mrf.mxu1 }
 0x296   : > { %12375 = vrot.lane.b32.xlu0 %v12374_v59, %s14141_s28  ;;  %v3606_v7 = vsel %vm484_vm10, %v2549_v37, %v12128_v20  ;;  %v15892_v46 = vadd.f32 %v15660_v21, %v11728_v0  ;;  %v12141_v2 = vpop.permute.xlu1 %12140  ;;  %v3704_v12 = vsel %vm484_vm10, %v15594_v13, %v12127_v19 }
 0x297   : > { %v2415_v54 = vpop.f32.mrf.mxu1  ;;  %v12136_v22 = vpop.permute.xlu0 %12135  ;;  %v12143_v57 = vunpack.i.h.bf16 %v12141_v2  ;;  %v12142_v5 = vunpack.i.l.bf16 %v12141_v2  ;;  %v3736_v25 = vsel %vm3638_vm12, %v3704_v12, %v12132_v17  ;;  %v3639_v36 = vsel %vm3638_vm12, %v3606_v7, %v12133_v60 }
 0x298   : > { %v19728_v42 = vmax.f32 %v15892_v46, 0.0  ;;  %v15898_v9 = vadd.f32 %v15660_v21, %v2415_v54  ;;  %v12138_v51 = vunpack.i.h.bf16 %v12136_v22  ;;  %v12137_v15 = vunpack.i.l.bf16 %v12136_v22 }
 0x299   : > { %v3705_v20 = vsel %vm484_vm10, %v15606_v30, %v12142_v5  ;;  %v3607_v19 = vsel %vm484_vm10, %v15597_v3, %v12143_v57  ;;  %v2679_v30 = vld [vmem:[#allocation2 + $0x31] sm:$0xff]  ;;  %v2551_v5 = vld [vmem:[#allocation2 + $0x20] sm:$0xff] }
 0x29a   : > { %2536 = vst.msk [vmem:[#allocation2 + $0x181] sm:$0xff] %vm484_vm10, %v19728_v42  ;;  %v19729_v13 = vmax.f32 %v15898_v9, 0.0  ;;  %v3768_v31 = vsel %vm3671_vm13, %v3736_v25, %v12137_v15  ;;  %v12151_v1 = vpop.permute.xlu1 %12150  ;;  %v3672_v53 = vsel %vm3671_vm13, %v3639_v36, %v12138_v51 }
 0x29b   : > { %4003 = vmatprep.mubr.f32.mxu1 %v3768_v31  ;;  %v12146_v44 = vpop.permute.xlu0 %12145  ;;  %v12153_v62 = vunpack.i.h.bf16 %v12151_v1  ;;  %v12152_v37 = vunpack.i.l.bf16 %v12151_v1 }
 0x29c   : > { %2535 = vst.msk [vmem:[#allocation2 + $0x171] sm:$0xff] %vm484_vm10, %v19729_v13  ;;  %v12148_v26 = vunpack.i.h.bf16 %v12146_v44  ;;  %v12147_v59 = vunpack.i.l.bf16 %v12146_v44  ;;  %4004 = vmatmul.mubr.f32.vlgmr.msra.gmra.mxu1 %v3672_v53 }
 0x29e   : > { %v12161_v60 = vpop.permute.xlu1 %12160  ;;  %v3737_v17 = vsel %vm3638_vm12, %v3705_v20, %v12147_v59  ;;  %v3640_v0 = vsel %vm3638_vm12, %v3607_v19, %v12148_v26 }
 0x29f   : > { %v12156_v7 = vpop.permute.xlu0 %12155  ;;  %v3769_v2 = vsel %vm3671_vm13, %v3737_v17, %v12152_v37  ;;  %v3673_v12 = vsel %vm3671_vm13, %v3640_v0, %v12153_v62  ;;  %v12163_v51 = vunpack.i.h.bf16 %v12161_v60  ;;  %v12162_v15 = vunpack.i.l.bf16 %v12161_v60 }
 0x2a0   : > { %v12158_v54 = vunpack.i.h.bf16 %v12156_v7  ;;  %v12157_v22 = vunpack.i.l.bf16 %v12156_v7  ;;  %4008 = vmatprep.mubr.f32.mxu1 %v3769_v2 }
 0x2a1   : > { %4009 = vmatmul.mubr.f32.gmra.mxu1 %v3673_v12  ;;  %v15927_v37 = vld [vmem:[#allocation2 + $0x182] sm:$0xff] }
 0x2a2   : > { %v12171_v25 = vpop.permute.xlu1 %12170  ;;  %v3706_v3 = vsel %vm484_vm10, %v2679_v30, %v12157_v22  ;;  %v3608_v57 = vsel %vm484_vm10, %v2551_v5, %v12158_v54  ;;  %v15936_v0 = vld [vmem:[#allocation2 + $0x180] sm:$0xff] }
 0x2a3   : > { %v12166_v36 = vpop.permute.xlu0 %12165  ;;  %v15921_v31 = vld [vmem:[#allocation2 + $0x172] sm:$0xff]  ;;  %v12173_v20 = vunpack.i.h.bf16 %v12171_v25  ;;  %v12172_v19 = vunpack.i.l.bf16 %v12171_v25  ;;  %v3738_v60 = vsel %vm3638_vm12, %v3706_v3, %v12162_v15  ;;  %v3641_v17 = vsel %vm3638_vm12, %v3608_v57, %v12163_v51  ;;  %v2680_v5 = vld [vmem:[#allocation2 + $0x41] sm:$0xff] }
 0x2a4   : > { %v2759_v1 = vld [vmem:[#allocation2 + $0x170] sm:$0xff]  ;;  %v12168_v44 = vunpack.i.h.bf16 %v12166_v36  ;;  %v12167_v62 = vunpack.i.l.bf16 %v12166_v36  ;;  %11780 = vmatmul.mubr.msk.f32.gmra.mxu0 %vm484_vm10, %v15921_v31  ;;  %v12394_v51 = vpack.i.bf16 %v15884_v45, %v15921_v31  ;;  %v12399_v15 = vpack.i.bf16 %v15857_v34, %v15936_v0 }
 0x2a5   : > { %v15923_v53 = vld [vmem:[#allocation2 + $0x171] sm:$0xff]  ;;  %v12384_v26 = vpack.i.bf16 %v15868_v58, %v2759_v1  ;;  %11782 = vmatprep.mubr.msk.f32.mxu0 %vm484_vm10, %v15927_v37  ;;  %v3707_v3 = vsel %vm484_vm10, %v2680_v5, %v12172_v19 }
 0x2a6   : > { %v12389_v59 = vpack.i.bf16 %v15859_v33, %v15923_v53  ;;  %v12181_v7 = vpop.permute.xlu1 %12180  ;;  %v3770_v58 = vsel %vm3671_vm13, %v3738_v60, %v12167_v62  ;;  %v3674_v33 = vsel %vm3671_vm13, %v3641_v17, %v12168_v44  ;;  %v2552_v25 = vld [vmem:[#allocation2 + $0x30] sm:$0xff]  ;;  %v15954_v60 = vld [vmem:[#allocation2 + $0x181] sm:$0xff] }
 0x2a7   : > { %12385 = vrot.lane.b32.xlu0 %v12384_v26, %s14139_s29  ;;  %v12176_v2 = vpop.permute.xlu0 %12175  ;;  %v12183_v12 = vunpack.i.h.bf16 %v12181_v7  ;;  %v12182_v54 = vunpack.i.l.bf16 %v12181_v7  ;;  %4013 = vmatprep.mubr.f32.mxu1 %v3770_v58  ;;  %v3609_v57 = vsel %vm484_vm10, %v2552_v25, %v12173_v20  ;;  %v12404_v20 = vpack.i.bf16 %v2759_v1, %v15954_v60 }
 0x2a8   : > { %12390 = vrot.lane.b32.xlu1 %v12389_v59, %s14141_s28  ;;  %v12178_v22 = vunpack.i.h.bf16 %v12176_v2  ;;  %v12177_v30 = vunpack.i.l.bf16 %v12176_v2  ;;  %4014 = vmatmul.mubr.f32.gmra.mxu1 %v3674_v33  ;;  %v12409_v7 = vpack.i.bf16 %v15923_v53, %v15927_v37  ;;  %v2681_v2 = vld [vmem:[#allocation2 + $0x51] sm:$0xff] }
 0x2aa   : > { %v12191_v36 = vpop.permute.xlu1 %12190  ;;  %v3739_v44 = vsel %vm3638_vm12, %v3707_v3, %v12177_v30  ;;  %v3642_v62 = vsel %vm3638_vm12, %v3609_v57, %v12178_v22  ;;  %v2553_v22 = vld [vmem:[#allocation2 + $0x40] sm:$0xff] }
 0x2ab   : > { %12395 = vrot.lane.b32.xlu0 %v12394_v51, %s14140_s21  ;;  %v12186_v26 = vpop.permute.xlu0 %12185  ;;  %v3771_v59 = vsel %vm3671_vm13, %v3739_v44, %v12182_v54  ;;  %v3675_v34 = vsel %vm3671_vm13, %v3642_v62, %v12183_v12  ;;  %v12193_v58 = vunpack.i.h.bf16 %v12191_v36  ;;  %v12192_v33 = vunpack.i.l.bf16 %v12191_v36 }
 0x2ac   : > { %12400 = vrot.lane.b32.xlu1 %v12399_v15, %s14139_s29  ;;  %v12188_v17 = vunpack.i.h.bf16 %v12186_v26  ;;  %v12187_v19 = vunpack.i.l.bf16 %v12186_v26  ;;  %4018 = vmatprep.mubr.f32.mxu1 %v3771_v59 }
 0x2ad   : > { %4019 = vmatmul.mubr.f32.gmra.mxu1 %v3675_v34 }
 0x2ae   : > { %v12201_v12 = vpop.permute.xlu1 %12200  ;;  %v3708_v54 = vsel %vm484_vm10, %v2681_v2, %v12187_v19  ;;  %v3610_v30 = vsel %vm484_vm10, %v2553_v22, %v12188_v17 }
 0x2af   : > { %12405 = vrot.lane.b32.xlu0 %v12404_v20, %s14141_s28  ;;  %v12196_v51 = vpop.permute.xlu0 %12195  ;;  %v12203_v5 = vunpack.i.h.bf16 %v12201_v12  ;;  %v12202_v25 = vunpack.i.l.bf16 %v12201_v12  ;;  %v3740_v3 = vsel %vm3638_vm12, %v3708_v54, %v12192_v33  ;;  %v3643_v57 = vsel %vm3638_vm12, %v3610_v30, %v12193_v58  ;;  %v2682_v20 = vld [vmem:[#allocation2 + $0x61] sm:$0xff] }
 0x2b0   : > { %12410 = vrot.lane.b32.xlu1 %v12409_v7, %s14140_s21  ;;  %v12198_v15 = vunpack.i.h.bf16 %v12196_v51  ;;  %v12197_v1 = vunpack.i.l.bf16 %v12196_v51  ;;  %v2554_v7 = vld [vmem:[#allocation2 + $0x50] sm:$0xff] }
 0x2b1   : > { %v3709_v22 = vsel %vm484_vm10, %v2682_v20, %v12202_v25  ;;  %v3611_v33 = vsel %vm484_vm10, %v2554_v7, %v12203_v5 }
 0x2b2   : > { %v12211_v36 = vpop.permute.xlu1 %12210  ;;  %v3772_v44 = vsel %vm3671_vm13, %v3740_v3, %v12197_v1  ;;  %v3676_v62 = vsel %vm3671_vm13, %v3643_v57, %v12198_v15 }
 0x2b3   : > { %v12206_v26 = vpop.permute.xlu0 %12205  ;;  %v12213_v59 = vunpack.i.h.bf16 %v12211_v36  ;;  %v12212_v34 = vunpack.i.l.bf16 %v12211_v36  ;;  %4023 = vmatprep.mubr.f32.mxu1 %v3772_v44 }
 0x2b4   : > { %v12208_v19 = vunpack.i.h.bf16 %v12206_v26  ;;  %v12207_v17 = vunpack.i.l.bf16 %v12206_v26  ;;  %4024 = vmatmul.mubr.f32.gmra.mxu1 %v3676_v62  ;;  %v2683_v26 = vld [vmem:[#allocation2 + $0x71] sm:$0xff] }
 0x2b5   : > { %v11731_v2 = vpop.f32.mrf.mxu1 }
 0x2b6   : > { %v15970_v58 = vadd.f32 %v15660_v21, %v11731_v2  ;;  %v12221_v12 = vpop.permute.xlu1 %12220  ;;  %v3741_v54 = vsel %vm3638_vm12, %v3709_v22, %v12207_v17  ;;  %v3644_v30 = vsel %vm3638_vm12, %v3611_v33, %v12208_v19  ;;  %v2555_v17 = vld [vmem:[#allocation2 + $0x60] sm:$0xff] }
 0x2b7   : > { %v2425_v51 = vpop.f32.mrf.mxu1  ;;  %v12216_v15 = vpop.permute.xlu0 %12215  ;;  %v3773_v1 = vsel %vm3671_vm13, %v3741_v54, %v12212_v34  ;;  %v3677_v3 = vsel %vm3671_vm13, %v3644_v30, %v12213_v59  ;;  %v12223_v44 = vunpack.i.h.bf16 %v12221_v12  ;;  %v12222_v62 = vunpack.i.l.bf16 %v12221_v12 }
 0x2b8   : > { %v19726_v57 = vmax.f32 %v15970_v58, 0.0  ;;  %v15978_v25 = vadd.f32 %v15660_v21, %v2425_v51  ;;  %v12218_v5 = vunpack.i.h.bf16 %v12216_v15  ;;  %v12217_v36 = vunpack.i.l.bf16 %v12216_v15  ;;  %4028 = vmatprep.mubr.f32.mxu1 %v3773_v1 }
 0x2b9   : > { %4029 = vmatmul.mubr.f32.gmra.mxu1 %v3677_v3 }
 0x2ba   : > { %2538 = vst.msk [vmem:[#allocation2 + $0x1a1] sm:$0xff] %vm484_vm10, %v19726_v57  ;;  %v19727_v34 = vmax.f32 %v15978_v25, 0.0  ;;  %v12231_v59 = vpop.permute.xlu1 %12230  ;;  %v3710_v19 = vsel %vm484_vm10, %v2683_v26, %v12217_v36  ;;  %v3612_v21 = vsel %vm484_vm10, %v2555_v17, %v12218_v5  ;;  %v2684_v17 = vld [vmem:[#allocation2 + $0x81] sm:$0xff] }
 0x2bb   : > { %v12226_v20 = vpop.permute.xlu0 %12225  ;;  %v12233_v22 = vunpack.i.h.bf16 %v12231_v59  ;;  %v12232_v33 = vunpack.i.l.bf16 %v12231_v59  ;;  %v3742_v12 = vsel %vm3638_vm12, %v3710_v19, %v12222_v62  ;;  %v3645_v54 = vsel %vm3638_vm12, %v3612_v21, %v12223_v44 }
 0x2bc   : > { %2537 = vst.msk [vmem:[#allocation2 + $0x191] sm:$0xff] %vm484_vm10, %v19727_v34  ;;  %v12228_v7 = vunpack.i.h.bf16 %v12226_v20  ;;  %v12227_v2 = vunpack.i.l.bf16 %v12226_v20  ;;  %v2556_v20 = vld [vmem:[#allocation2 + $0x70] sm:$0xff] }
 0x2bd   : > { %v3711_v59 = vsel %vm484_vm10, %v2684_v17, %v12232_v33  ;;  %v3613_v62 = vsel %vm484_vm10, %v2556_v20, %v12233_v22  ;;  %v2685_v20 = vld [vmem:[#allocation2 + $0xb1] sm:$0xff] }
 0x2be   : > { %v12241_v30 = vpop.permute.xlu1 %12240  ;;  %v3774_v51 = vsel %vm3671_vm13, %v3742_v12, %v12227_v2  ;;  %v3678_v15 = vsel %vm3671_vm13, %v3645_v54, %v12228_v7  ;;  %v2557_v2 = vld [vmem:[#allocation2 + $0xa0] sm:$0xff] }
 0x2bf   : > { %v12236_v1 = vpop.permute.xlu0 %12235  ;;  %v12243_v3 = vunpack.i.h.bf16 %v12241_v30  ;;  %v12242_v5 = vunpack.i.l.bf16 %v12241_v30  ;;  %4033 = vmatprep.mubr.f32.mxu1 %v3774_v51 }
 0x2c0   : > { %v12238_v36 = vunpack.i.h.bf16 %v12236_v1  ;;  %v12237_v26 = vunpack.i.l.bf16 %v12236_v1  ;;  %4034 = vmatmul.mubr.f32.gmra.mxu1 %v3678_v15 }
 0x2c1   : > { %v16007_v22 = vld [vmem:[#allocation2 + $0x1a2] sm:$0xff] }
 0x2c2   : > { %v12251_v19 = vpop.permute.xlu1 %12250  ;;  %v3743_v44 = vsel %vm3638_vm12, %v3711_v59, %v12237_v26  ;;  %v3646_v21 = vsel %vm3638_vm12, %v3613_v62, %v12238_v36  ;;  %v16015_v17 = vld [vmem:[#allocation2 + $0x1a0] sm:$0xff] }
 0x2c3   : > { %v12246_v7 = vpop.permute.xlu0 %12245  ;;  %v3775_v12 = vsel %vm3671_vm13, %v3743_v44, %v12242_v5  ;;  %v15998_v54 = vld [vmem:[#allocation2 + $0x192] sm:$0xff]  ;;  %v3679_v30 = vsel %vm3671_vm13, %v3646_v21, %v12243_v3  ;;  %v12253_v26 = vunpack.i.h.bf16 %v12251_v19  ;;  %v12252_v3 = vunpack.i.l.bf16 %v12251_v19 }
 0x2c4   : > { %v16001_v51 = vld [vmem:[#allocation2 + $0x190] sm:$0xff]  ;;  %v12248_v33 = vunpack.i.h.bf16 %v12246_v7  ;;  %v12247_v1 = vunpack.i.l.bf16 %v12246_v7  ;;  %4038 = vmatprep.mubr.f32.mxu1 %v3775_v12  ;;  %11783 = vmatmul.mubr.msk.f32.gmra.mxu0 %vm484_vm10, %v15998_v54  ;;  %v12424_v19 = vpack.i.bf16 %v15954_v60, %v15998_v54  ;;  %v12429_v12 = vpack.i.bf16 %v15927_v37, %v16015_v17  ;;  %v16031_v37 = vld [vmem:[#allocation2 + $0x1a1] sm:$0xff] }
 0x2c5   : > { %v16003_v15 = vld [vmem:[#allocation2 + $0x191] sm:$0xff]  ;;  %v12414_v36 = vpack.i.bf16 %v15921_v31, %v16001_v51  ;;  %4039 = vmatmul.mubr.f32.gmra.mxu1 %v3679_v30  ;;  %11785 = vmatprep.mubr.msk.f32.mxu0 %vm484_vm10, %v16007_v22 }
 0x2c6   : > { %v12419_v5 = vpack.i.bf16 %v15936_v0, %v16003_v15  ;;  %v12261_v59 = vpop.permute.xlu1 %12260  ;;  %v3712_v62 = vsel %vm484_vm10, %v2685_v20, %v12247_v1  ;;  %v3614_v31 = vsel %vm484_vm10, %v2557_v2, %v12248_v33 }
 0x2c7   : > { %12415 = vrot.lane.b32.xlu0 %v12414_v36, %s14139_s29  ;;  %v12256_v44 = vpop.permute.xlu0 %12255  ;;  %v12263_v30 = vunpack.i.h.bf16 %v12261_v59  ;;  %v12262_v57 = vunpack.i.l.bf16 %v12261_v59  ;;  %v3744_v36 = vsel %vm3638_vm12, %v3712_v62, %v12252_v3  ;;  %v12439_v3 = vpack.i.bf16 %v16003_v15, %v16007_v22  ;;  %v2686_v62 = vld [vmem:[#allocation2 + $0xc1] sm:$0xff] }
 0x2c8   : > { %12420 = vrot.lane.b32.xlu1 %v12419_v5, %s14141_s28  ;;  %v12258_v21 = vunpack.i.h.bf16 %v12256_v44  ;;  %v12257_v7 = vunpack.i.l.bf16 %v12256_v44  ;;  %v3647_v5 = vsel %vm3638_vm12, %v3614_v31, %v12253_v26  ;;  %v12434_v26 = vpack.i.bf16 %v16001_v51, %v16031_v37  ;;  %v2558_v31 = vld [vmem:[#allocation2 + $0xb0] sm:$0xff] }
 0x2ca   : > { %v12271_v2 = vpop.permute.xlu1 %12270  ;;  %v3776_v33 = vsel %vm3671_vm13, %v3744_v36, %v12257_v7  ;;  %v3680_v1 = vsel %vm3671_vm13, %v3647_v5, %v12258_v21  ;;  %v3713_v7 = vsel %vm484_vm10, %v2686_v62, %v12262_v57  ;;  %v3615_v21 = vsel %vm484_vm10, %v2558_v31, %v12263_v30  ;;  %v2687_v30 = vld [vmem:[#allocation2 + $0xd1] sm:$0xff] }
 0x2cb   : > { %12425 = vrot.lane.b32.xlu0 %v12424_v19, %s14140_s21  ;;  %v12266_v20 = vpop.permute.xlu0 %12265  ;;  %v12273_v44 = vunpack.i.h.bf16 %v12271_v2  ;;  %v12272_v34 = vunpack.i.l.bf16 %v12271_v2  ;;  %4043 = vmatprep.mubr.f32.mxu1 %v3776_v33 }
 0x2cc   : > { %12430 = vrot.lane.b32.xlu1 %v12429_v12, %s14139_s29  ;;  %v12268_v59 = vunpack.i.h.bf16 %v12266_v20  ;;  %v12267_v42 = vunpack.i.l.bf16 %v12266_v20  ;;  %4044 = vmatmul.mubr.f32.gmra.mxu1 %v3680_v1 }
 0x2ce   : > { %v12281_v19 = vpop.permute.xlu1 %12280  ;;  %v3745_v12 = vsel %vm3638_vm12, %v3713_v7, %v12267_v42  ;;  %v3648_v36 = vsel %vm3638_vm12, %v3615_v21, %v12268_v59 }
 0x2cf   : > { %12435 = vrot.lane.b32.xlu0 %v12434_v26, %s14141_s28  ;;  %v12276_v5 = vpop.permute.xlu0 %12275  ;;  %v3777_v2 = vsel %vm3671_vm13, %v3745_v12, %v12272_v34  ;;  %v3681_v33 = vsel %vm3671_vm13, %v3648_v36, %v12273_v44  ;;  %v12283_v57 = vunpack.i.h.bf16 %v12281_v19  ;;  %v12282_v62 = vunpack.i.l.bf16 %v12281_v19  ;;  %v2559_v26 = vld [vmem:[#allocation2 + $0xc0] sm:$0xff] }
 0x2d0   : > { %12440 = vrot.lane.b32.xlu1 %v12439_v3, %s14140_s21  ;;  %v12278_v1 = vunpack.i.h.bf16 %v12276_v5  ;;  %v12277_v20 = vunpack.i.l.bf16 %v12276_v5  ;;  %4048 = vmatprep.mubr.f32.mxu1 %v3777_v2  ;;  %v16050_v34 = vld [vmem:[%s19684_s2] ss:$0 sm:$0xff] }
 0x2d1   : > { %4049 = vmatmul.mubr.f32.gmra.mxu1 %v3681_v33 }
 0x2d2   : > { %v11734_v31 = vpop.f32.mrf.mxu1  ;;  %v12291_v3 = vpop.permute.xlu1 %12290  ;;  %v3714_v13 = vsel %vm484_vm10, %v2687_v30, %v12277_v20  ;;  %v3616_v42 = vsel %vm484_vm10, %v2559_v26, %v12278_v1 }
 0x2d3   : > { %v16053_v44 = vadd.f32 %v16050_v34, %v11734_v31  ;;  %v12286_v59 = vpop.permute.xlu0 %12285  ;;  %v12293_v19 = vunpack.i.h.bf16 %v12291_v3  ;;  %v12292_v12 = vunpack.i.l.bf16 %v12291_v3  ;;  %v3746_v33 = vsel %vm3638_vm12, %v3714_v13, %v12282_v62  ;;  %v2688_v13 = vld [vmem:[#allocation2 + $0xe1] sm:$0xff] }
 0x2d4   : > { %v12288_v7 = vunpack.i.h.bf16 %v12286_v59  ;;  %v12287_v21 = vunpack.i.l.bf16 %v12286_v59  ;;  %v2435_v36 = vpop.f32.mrf.mxu1  ;;  %v3649_v1 = vsel %vm3638_vm12, %v3616_v42, %v12283_v57  ;;  %v2560_v57 = vld [vmem:[#allocation2 + $0xd0] sm:$0xff] }
 0x2d5   : > { %v19732_v5 = vmax.f32 %v16053_v44, 0.0  ;;  %v16057_v2 = vadd.f32 %v16050_v34, %v2435_v36  ;;  %v3715_v62 = vsel %vm484_vm10, %v2688_v13, %v12292_v12  ;;  %v3617_v42 = vsel %vm484_vm10, %v2560_v57, %v12293_v19  ;;  %v2561_v12 = vld [vmem:[#allocation2 + $0xe0] sm:$0xff] }
 0x2d6   : > { %v12301_v20 = vpop.permute.xlu1 %12300  ;;  %v3778_v30 = vsel %vm3671_vm13, %v3746_v33, %v12287_v21  ;;  %v3682_v26 = vsel %vm3671_vm13, %v3649_v1, %v12288_v7 }
 0x2d7   : > { %2540 = vst.msk [vmem:[#allocation2 + $0x1c1] sm:$0xff] %vm484_vm10, %v19732_v5  ;;  %v19734_v31 = vmax.f32 %v16057_v2, 0.0  ;;  %v12296_v3 = vpop.permute.xlu0 %12295  ;;  %v12303_v59 = vunpack.i.h.bf16 %v12301_v20  ;;  %v12302_v55 = vunpack.i.l.bf16 %v12301_v20  ;;  %4053 = vmatprep.mubr.f32.mxu1 %v3778_v30 }
 0x2d8   : > { %v12298_v36 = vunpack.i.h.bf16 %v12296_v3  ;;  %v12297_v27 = vunpack.i.l.bf16 %v12296_v3  ;;  %4054 = vmatmul.mubr.f32.gmra.mxu1 %v3682_v26 }
 0x2d9   : > { %2539 = vst.msk [vmem:[#allocation2 + $0x1b1] sm:$0xff] %vm484_vm10, %v19734_v31  ;;  %v2689_v31 = vld [vmem:[#allocation2 + $0xf1] sm:$0xff] }
 0x2da   : > { %v12311_v7 = vpop.permute.xlu1 %12310  ;;  %v3747_v21 = vsel %vm3638_vm12, %v3715_v62, %v12297_v27  ;;  %v3650_v33 = vsel %vm3638_vm12, %v3617_v42, %v12298_v36 }
 0x2db   : > { %v12306_v1 = vpop.permute.xlu0 %12305  ;;  %v3779_v20 = vsel %vm3671_vm13, %v3747_v21, %v12302_v55  ;;  %v3683_v30 = vsel %vm3671_vm13, %v3650_v33, %v12303_v59  ;;  %v12313_v5 = vunpack.i.h.bf16 %v12311_v7  ;;  %v12312_v50 = vunpack.i.l.bf16 %v12311_v7 }
 0x2dc   : > { %v12308_v26 = vunpack.i.h.bf16 %v12306_v1  ;;  %v12307_v3 = vunpack.i.l.bf16 %v12306_v1  ;;  %4058 = vmatprep.mubr.f32.mxu1 %v3779_v20 }
 0x2dd   : > { %4059 = vmatmul.mubr.f32.gmra.mxu1 %v3683_v30 }
 0x2de   : > { %v12321_v13 = vpop.permute.xlu1 %12320  ;;  %v3716_v19 = vsel %vm484_vm10, %v2689_v31, %v12307_v3  ;;  %v3618_v27 = vsel %vm484_vm10, %v2561_v12, %v12308_v26  ;;  %v2828_v7 = vld [vmem:[#allocation2 + $0x1c2] sm:$0xff] }
 0x2df   : > { %v12316_v57 = vpop.permute.xlu0 %12315  ;;  %v12323_v42 = vunpack.i.h.bf16 %v12321_v13  ;;  %v12322_v55 = vunpack.i.l.bf16 %v12321_v13  ;;  %v3748_v20 = vsel %vm3638_vm12, %v3716_v19, %v12312_v50  ;;  %v3651_v30 = vsel %vm3638_vm12, %v3618_v27, %v12313_v5  ;;  %v2764_v26 = vld [vmem:[#allocation2 + $0x1c0] sm:$0xff]  ;;  %v2562_v27 = vld [vmem:[#allocation2 + $0xf0] sm:$0xff] }
 0x2e0   : > { %v12318_v36 = vunpack.i.h.bf16 %v12316_v57  ;;  %v12317_v62 = vunpack.i.l.bf16 %v12316_v57  ;;  %v16078_v21 = vld [vmem:[#allocation2 + $0x1b2] sm:$0xff]  ;;  %v12459_v5 = vpack.i.bf16 %v16007_v22, %v2764_v26  ;;  %v2690_v19 = vld [vmem:[#allocation2 + $0x101] sm:$0xff] }
 0x2e1   : > { %v16080_v59 = vld [vmem:[#allocation2 + $0x1b0] sm:$0xff]  ;;  %11786 = vmatmul.mubr.msk.f32.gmra.mxu0 %vm484_vm10, %v16078_v21 }
 0x2e2   : > { %v16082_v33 = vld [vmem:[#allocation2 + $0x1b1] sm:$0xff]  ;;  %v12444_v31 = vpack.i.bf16 %v15998_v54, %v16080_v59  ;;  %11788 = vmatprep.mubr.msk.f32.mxu0 %vm484_vm10, %v2828_v7  ;;  %v12331_v3 = vpop.permute.xlu1 %12330  ;;  %v3780_v12 = vsel %vm3671_vm13, %v3748_v20, %v12317_v62  ;;  %v3684_v13 = vsel %vm3671_vm13, %v3651_v30, %v12318_v36  ;;  %v12454_v62 = vpack.i.bf16 %v16031_v37, %v16078_v21 }
 0x2e3   : > { %v12449_v1 = vpack.i.bf16 %v16015_v17, %v16082_v33  ;;  %v2829_v57 = vld [vmem:[#allocation2 + $0x1d2] sm:$0xff]  ;;  %v12326_v24 = vpop.permute.xlu0 %12325  ;;  %v12333_v54 = vunpack.i.h.bf16 %v12331_v3  ;;  %v12332_v41 = vunpack.i.l.bf16 %v12331_v3  ;;  %4063 = vmatprep.mubr.f32.mxu1 %v3780_v12  ;;  %v3717_v36 = vsel %vm484_vm10, %v2690_v19, %v12322_v55 }
 0x2e4   : > { %12445 = vrot.lane.b32.xlu0 %v12444_v31, %s14139_s29  ;;  %v12328_v18 = vunpack.i.h.bf16 %v12326_v24  ;;  %v12327_v50 = vunpack.i.l.bf16 %v12326_v24  ;;  %4064 = vmatmul.mubr.f32.gmra.mxu1 %v3684_v13  ;;  %v3619_v31 = vsel %vm484_vm10, %v2562_v27, %v12323_v42  ;;  %v16109_v42 = vld [vmem:[#allocation2 + $0x1c1] sm:$0xff]  ;;  %v2765_v27 = vld [vmem:[#allocation2 + $0x1d0] sm:$0xff] }
 0x2e5   : > { %12450 = vrot.lane.b32.xlu1 %v12449_v1, %s14141_s28  ;;  %11789 = vmatmul.mubr.msk.f32.gmra.mxu0 %vm484_vm10, %v2829_v57  ;;  %v2563_v13 = vld [vmem:[#allocation2 + $0x100] sm:$0xff] }
 0x2e6   : > { %v12341_v1 = vpop.permute.xlu1 %12340  ;;  %v3749_v20 = vsel %vm3638_vm12, %v3717_v36, %v12327_v50  ;;  %v3652_v24 = vsel %vm3638_vm12, %v3619_v31, %v12328_v18  ;;  %v12464_v18 = vpack.i.bf16 %v16080_v59, %v16109_v42  ;;  %v12469_v50 = vpack.i.bf16 %v16082_v33, %v2828_v7 }
 0x2e7   : > { %v12336_v22 = vpop.permute.xlu0 %12335  ;;  %v3781_v30 = vsel %vm3671_vm13, %v3749_v20, %v12332_v41  ;;  %v3685_v3 = vsel %vm3671_vm13, %v3652_v24, %v12333_v54  ;;  %v12343_v57 = vunpack.i.h.bf16 %v12341_v1  ;;  %v12342_v19 = vunpack.i.l.bf16 %v12341_v1 }
 0x2e8   : > { %12455 = vrot.lane.b32.xlu0 %v12454_v62, %s14140_s21  ;;  %v12338_v12 = vunpack.i.h.bf16 %v12336_v22  ;;  %v12337_v55 = vunpack.i.l.bf16 %v12336_v22  ;;  %4068 = vmatprep.mubr.f32.mxu1 %v3781_v30  ;;  %v2691_v62 = vld [vmem:[#allocation2 + $0x111] sm:$0xff]  ;;  %v12474_v24 = vpack.i.bf16 %v16078_v21, %v2765_v27  ;;  %v2692_v27 = vld [vmem:[#allocation2 + $0x121] sm:$0xff] }
 0x2e9   : > { %12460 = vrot.lane.b32.xlu1 %v12459_v5, %s14139_s29  ;;  %4069 = vmatmul.mubr.f32.gmra.mxu1 %v3685_v3  ;;  %v2797_v5 = vld [vmem:[#allocation2 + $0x1d1] sm:$0xff] }
 0x2ea   : > { %v12351_v41 = vpop.permute.xlu1 %12350  ;;  %v3718_v54 = vsel %vm484_vm10, %v2691_v62, %v12337_v55  ;;  %v3620_v36 = vsel %vm484_vm10, %v2563_v13, %v12338_v12  ;;  %v12479_v22 = vpack.i.bf16 %v2764_v26, %v2797_v5  ;;  %v2564_v5 = vld [vmem:[#allocation2 + $0x110] sm:$0xff] }
 0x2eb   : > { %v12346_v31 = vpop.permute.xlu0 %12345  ;;  %v12353_v30 = vunpack.i.h.bf16 %v12351_v41  ;;  %v12352_v7 = vunpack.i.l.bf16 %v12351_v41  ;;  %v3750_v3 = vsel %vm3638_vm12, %v3718_v54, %v12342_v19  ;;  %v3653_v47 = vsel %vm3638_vm12, %v3620_v36, %v12343_v57 }
 0x2ec   : > { %12465 = vrot.lane.b32.xlu0 %v12464_v18, %s14141_s28  ;;  %v12348_v1 = vunpack.i.h.bf16 %v12346_v31  ;;  %v12347_v20 = vunpack.i.l.bf16 %v12346_v31 }
 0x2ed   : > { %12470 = vrot.lane.b32.xlu1 %v12469_v50, %s14140_s21  ;;  %v3719_v57 = vsel %vm484_vm10, %v2692_v27, %v12352_v7  ;;  %v3621_v19 = vsel %vm484_vm10, %v2564_v5, %v12353_v30 }
 0x2ee   : > { %v12361_v14 = vpop.permute.xlu1 %12360  ;;  %v3782_v55 = vsel %vm3671_vm13, %v3750_v3, %v12347_v20  ;;  %v3686_v12 = vsel %vm3671_vm13, %v3653_v47, %v12348_v1  ;;  %v2565_v3 = vld [vmem:[#allocation2 + $0x140] sm:$0xff] }
 0x2ef   : > { %v12356_v13 = vpop.permute.xlu0 %12355  ;;  %v12363_v18 = vunpack.i.h.bf16 %v12361_v14  ;;  %v12362_v50 = vunpack.i.l.bf16 %v12361_v14  ;;  %4073 = vmatprep.mubr.f32.mxu1 %v3782_v55 }
 0x2f0   : > { %12475 = vrot.lane.b32.xlu0 %v12474_v24, %s14139_s29  ;;  %v12358_v21 = vunpack.i.h.bf16 %v12356_v13  ;;  %v12357_v26 = vunpack.i.l.bf16 %v12356_v13  ;;  %4074 = vmatmul.mubr.f32.gmra.mxu1 %v3686_v12 }
 0x2f1   : > { %12480 = vrot.lane.b32.xlu1 %v12479_v22, %s14141_s28 }
 0x2f2   : > { %v3751_v62 = vsel %vm3638_vm12, %v3719_v57, %v12357_v26  ;;  %v3654_v47 = vsel %vm3638_vm12, %v3621_v19, %v12358_v21 }
 0x2f3   : > { %v3783_v41 = vsel %vm3671_vm13, %v3751_v62, %v12362_v50  ;;  %v3687_v54 = vsel %vm3671_vm13, %v3654_v47, %v12363_v18 }
 0x2f4   : > { %4078 = vmatprep.mubr.f32.mxu1 %v3783_v41 }
 0x2f5   : > { %4079 = vmatmul.mubr.f32.gmra.mxu1 %v3687_v54  ;;  %v2605_v54 = vld [vmem:[#allocation2 + $0x1e1] sm:$0xff] }
 0x301   : > { %v11737_v14 = vpop.f32.mrf.mxu1 }
 0x302   : > { %v16132_v36 = vadd.f32 %v16050_v34, %v11737_v14 }
 0x303   : > { %v2445_v31 = vpop.f32.mrf.mxu1  ;;  %v12371_v24 = vpop.permute.xlu1 %12370 }
 0x304   : > { %v12366_v1 = vpop.permute.xlu0 %12365  ;;  %v19741_v20 = vmax.f32 %v16132_v36, 0.0  ;;  %v16136_v22 = vadd.f32 %v16050_v34, %v2445_v31  ;;  %v12373_v13 = vunpack.i.h.bf16 %v12371_v24  ;;  %v12372_v18 = vunpack.i.l.bf16 %v12371_v24 }
 0x305   : > { %v12368_v30 = vunpack.i.h.bf16 %v12366_v1  ;;  %v12367_v7 = vunpack.i.l.bf16 %v12366_v1 }
 0x306   : > { %2542 = vst.msk [vmem:[#allocation2 + $0x201] sm:$0xff] %vm484_vm10, %v19741_v20  ;;  %v19742_v55 = vmax.f32 %v16136_v22, 0.0 }
 0x307   : > { %v3720_v12 = vsel %vm484_vm10, %v15870_v35, %v12367_v7  ;;  %v3622_v21 = vsel %vm484_vm10, %v2565_v3, %v12368_v30  ;;  %v2637_v35 = vld [vmem:[#allocation2 + $0x1e2] sm:$0xff]  ;;  %v12381_v3 = vpop.permute.xlu1 %12380 }
 0x308   : > { %v12376_v50 = vpop.permute.xlu0 %12375  ;;  %2541 = vst.msk [vmem:[#allocation2 + $0x1f1] sm:$0xff] %vm484_vm10, %v19742_v55  ;;  %v3752_v5 = vsel %vm3638_vm12, %v3720_v12, %v12372_v18  ;;  %v3655_v57 = vsel %vm3638_vm12, %v3622_v21, %v12373_v13  ;;  %v12382_v21 = vunpack.i.l.bf16 %v12381_v3 }
 0x309   : > { %v12378_v26 = vunpack.i.h.bf16 %v12376_v50  ;;  %v12377_v27 = vunpack.i.l.bf16 %v12376_v50  ;;  %v12383_v50 = vunpack.i.h.bf16 %v12381_v3 }
 0x30a   : > { %v3721_v3 = vsel %vm484_vm10, %v15884_v45, %v12382_v21 }
 0x30b   : > { %v3784_v19 = vsel %vm3671_vm13, %v3752_v5, %v12377_v27  ;;  %v3688_v62 = vsel %vm3671_vm13, %v3655_v57, %v12378_v26 }
 0x30c   : > { %4083 = vmatprep.mubr.f32.mxu1 %v3784_v19 }
 0x30d   : > { %4084 = vmatmul.mubr.f32.gmra.mxu1 %v3688_v62  ;;  %v16152_v47 = vld [vmem:[#allocation2 + $0x202] sm:$0xff] }
 0x30e   : > { %v16154_v41 = vld [vmem:[#allocation2 + $0x200] sm:$0xff]  ;;  %11791 = vmatprep.mubr.msk.f32.mxu0 %vm484_vm10, %v16152_v47 }
 0x30f   : > { %v12489_v14 = vpack.i.bf16 %v2637_v35, %v16154_v41  ;;  %v16159_v31 = vld [vmem:[#allocation2 + $0x1f2] sm:$0xff]  ;;  %v16170_v12 = vld [vmem:[#allocation2 + $0x201] sm:$0xff] }
 0x310   : > { %v16161_v1 = vld [vmem:[#allocation2 + $0x1f1] sm:$0xff]  ;;  %v12484_v24 = vpack.i.bf16 %v2605_v54, %v16159_v31 }
 0x311   : > { %12490 = vrot.lane.b32.xlu1 %v12489_v14, %s14139_s29  ;;  %v16165_v30 = vld [vmem:[#allocation2 + $0x1f0] sm:$0xff]  ;;  %v12499_v7 = vpack.i.bf16 %v16161_v1, %v16152_v47 }
 0x312   : > { %12485 = vrot.lane.b32.xlu0 %v12484_v24, %s14140_s21  ;;  %v12494_v13 = vpack.i.bf16 %v16165_v30, %v16170_v12 }
 0x315   : > { %12500 = vrot.lane.b32.xlu1 %v12499_v7, %s14140_s21  ;;  %v11740_v18 = vpop.f32.mrf.mxu1 }
 0x316   : > { %v16176_v26 = vadd.f32 %v16050_v34, %v11740_v18  ;;  %12495 = vrot.lane.b32.xlu0 %v12494_v13, %s14141_s28  ;;  %v3623_v13 = vsel %vm484_vm10, %v15877_v40, %v12383_v50  ;;  %v2567_v40 = vld [vmem:[#allocation2 + $0x160] sm:$0xff] }
 0x317   : > { %v2455_v27 = vpop.f32.mrf.mxu1 }
 0x318   : > { %19825 = vst [vmem:[#allocation10_spill] sm:$0xff] %v16176_v26  ;;  %v19740_v5 = vmax.f32 %v16176_v26, 0.0  ;;  %v16181_v57 = vadd.f32 %v16050_v34, %v2455_v27 }
 0x319   : > { %v12386_v19 = vpop.permute.xlu0 %12385 }
 0x31a   : > { %19826 = vst [vmem:[#allocation11_spill] sm:$0xff] %v16181_v57  ;;  %v12391_v62 = vpop.permute.xlu1 %12390  ;;  %v12388_v35 = vunpack.i.h.bf16 %v12386_v19  ;;  %v12387_v54 = vunpack.i.l.bf16 %v12386_v19  ;;  %2544 = vst.msk [vmem:[#allocation2 + $0x221] sm:$0xff] %vm484_vm10, %v19740_v5  ;;  %v19745_v7 = vmax.f32 %v16181_v57, 0.0 }
 0x31b   : > { %v12393_v14 = vunpack.i.h.bf16 %v12391_v62  ;;  %v12392_v24 = vunpack.i.l.bf16 %v12391_v62 }
 0x31c   : > { %v3753_v18 = vsel %vm3638_vm12, %v3721_v3, %v12387_v54  ;;  %v3656_v27 = vsel %vm3638_vm12, %v3623_v13, %v12388_v35  ;;  %2543 = vst.msk [vmem:[#allocation2 + $0x211] sm:$0xff] %vm484_vm10, %v19745_v7 }
 0x31d   : > { %v12396_v19 = vpop.permute.xlu0 %12395  ;;  %v3785_v5 = vsel %vm3671_vm13, %v3753_v18, %v12392_v24  ;;  %v3689_v20 = vsel %vm3671_vm13, %v3656_v27, %v12393_v14 }
 0x31e   : > { %v12401_v62 = vpop.permute.xlu1 %12400  ;;  %v12398_v55 = vunpack.i.h.bf16 %v12396_v19  ;;  %v12397_v48 = vunpack.i.l.bf16 %v12396_v19  ;;  %4088 = vmatprep.mubr.f32.mxu1 %v3785_v5 }
 0x31f   : > { %v12403_v45 = vunpack.i.h.bf16 %v12401_v62  ;;  %v12402_v21 = vunpack.i.l.bf16 %v12401_v62  ;;  %4089 = vmatmul.mubr.f32.gmra.mxu1 %v3689_v20 }
 0x320   : > { %v3722_v50 = vsel %vm484_vm10, %v15923_v53, %v12397_v48  ;;  %v3624_v35 = vsel %vm484_vm10, %v2567_v40, %v12398_v55 }
 0x321   : > { %v12406_v54 = vpop.permute.xlu0 %12405  ;;  %v3754_v7 = vsel %vm3638_vm12, %v3722_v50, %v12402_v21  ;;  %v3657_v24 = vsel %vm3638_vm12, %v3624_v35, %v12403_v45  ;;  %v16211_v48 = vld [vmem:[#allocation2 + $0x222] sm:$0xff]  ;;  %v11181_v21 = vld [vmem:[%s19685_s3 + $0x198] sm:$0xff]  ;;  %v11180_v50 = vld [vmem:[%s19685_s3 + $0x190] sm:$0xff] }
 0x322   : > { %v12408_v3 = vunpack.i.h.bf16 %v12406_v54  ;;  %v12407_v13 = vunpack.i.l.bf16 %v12406_v54  ;;  %5843 = vmatpush1.msra.mxu0 %v11181_v21  ;;  %v12411_v40 = vpop.permute.xlu1 %12410  ;;  %v11179_v54 = vld [vmem:[%s19685_s3 + $0x188] sm:$0xff] }
 0x323   : > { %v16204_v18 = vld [vmem:[#allocation2 + $0x212] sm:$0xff] }
 0x324   : > { %v3786_v14 = vsel %vm3671_vm13, %v3754_v7, %v12407_v13  ;;  %v3690_v5 = vsel %vm3671_vm13, %v3657_v24, %v12408_v3  ;;  %v2767_v20 = vld [vmem:[#allocation2 + $0x210] sm:$0xff]  ;;  %11792 = vmatmul.mubr.msk.f32.gmra.mxu0 %vm484_vm10, %v16204_v18  ;;  %v16218_v7 = vld [vmem:[#allocation2 + $0x220] sm:$0xff]  ;;  %v12514_v19 = vpack.i.bf16 %v16170_v12, %v16204_v18  ;;  %v12413_v3 = vunpack.i.h.bf16 %v12411_v40 }
 0x325   : > { %v16207_v27 = vld [vmem:[#allocation2 + $0x211] sm:$0xff]  ;;  %4093 = vmatprep.mubr.f32.mxu1 %v3786_v14  ;;  %v12504_v53 = vpack.i.bf16 %v16159_v31, %v2767_v20  ;;  %11794 = vmatprep.mubr.msk.f32.mxu0 %vm484_vm10, %v16211_v48  ;;  %v12519_v62 = vpack.i.bf16 %v16152_v47, %v16218_v7  ;;  %v19827_v47 = vmov 0.0   ;;  %v12412_v13 = vunpack.i.l.bf16 %v12411_v40 }
 0x326   : > { %v12509_v55 = vpack.i.bf16 %v16154_v41, %v16207_v27  ;;  %4094 = vmatmul.mubr.f32.gmra.mxu1 %v3690_v5  ;;  %v16228_v41 = vld [vmem:[#allocation2 + $0x221] sm:$0xff]  ;;  %v12529_v45 = vpack.i.bf16 %v16207_v27, %v16211_v48  ;;  %5844 = vmatprep.subr.mxu0 %v19827_v47  ;;  %v2568_v40 = vld [vmem:[#allocation2 + $0x170] sm:$0xff] }
 0x327   : > { %12505 = vrot.lane.b32.xlu0 %v12504_v53, %s14139_s29  ;;  %v12524_v31 = vpack.i.bf16 %v2767_v20, %v16228_v41  ;;  %5845 = vmatpush1.msra.mxu0 %v11180_v50  ;;  %v11178_v5 = vld [vmem:[%s19685_s3 + $0x180] sm:$0xff]  ;;  %v11177_v50 = vld [vmem:[%s19685_s3 + $0x178] sm:$0xff] }
 0x328   : > { %12510 = vrot.lane.b32.xlu1 %v12509_v55, %s14141_s28  ;;  %5846 = vmatprep.subr.mxu0 %v19827_v47 }
 0x329   : > { %5847 = vmatpush1.msra.mxu0 %v11179_v54  ;;  %v3723_v54 = vsel %vm484_vm10, %v15954_v60, %v12412_v13  ;;  %v11175_v13 = vld [vmem:[%s19685_s3 + $0x168] sm:$0xff] }
 0x32a   : > { %5848 = vmatprep.subr.mxu0 %v19827_v47 }
 0x32b   : > { %12515 = vrot.lane.b32.xlu0 %v12514_v19, %s14140_s21  ;;  %5849 = vmatpush1.msra.mxu0 %v11178_v5 }
 0x32c   : > { %12520 = vrot.lane.b32.xlu1 %v12519_v62, %s14139_s29  ;;  %5850 = vmatprep.subr.mxu0 %v19827_v47 }
 0x32d   : > { %5851 = vmatpush1.msra.mxu0 %v11177_v50 }
 0x32e   : > { %5852 = vmatprep.subr.mxu0 %v19827_v47 }
 0x32f   : > { %12525 = vrot.lane.b32.xlu0 %v12524_v31, %s14141_s28 }
 0x330   : > { %12530 = vrot.lane.b32.xlu1 %v12529_v45, %s14140_s21 }
 0x335   : > { %v11743_v35 = vpop.f32.mrf.mxu1 }
 0x336   : > { %v16247_v24 = vadd.f32 %v16050_v34, %v11743_v35 }
 0x337   : > { %v2465_v14 = vpop.f32.mrf.mxu1 }
 0x338   : > { %19828 = vst [vmem:[#allocation12_spill] sm:$0xff] %v16247_v24  ;;  %v19746_v20 = vmax.f32 %v16247_v24, 0.0  ;;  %v16255_v53 = vadd.f32 %v16050_v34, %v2465_v14  ;;  %v3625_v14 = vsel %vm484_vm10, %v2568_v40, %v12413_v3  ;;  %v11174_v40 = vld [vmem:[%s19685_s3 + $0x160] sm:$0xff] }
 0x339   : > { %v12416_v55 = vpop.permute.xlu0 %12415 }
 0x33a   : > { %19829 = vst [vmem:[#allocation13_spill] sm:$0xff] %v16255_v53  ;;  %v12421_v19 = vpop.permute.xlu1 %12420  ;;  %v12418_v62 = vunpack.i.h.bf16 %v12416_v55  ;;  %v12417_v31 = vunpack.i.l.bf16 %v12416_v55  ;;  %2546 = vst.msk [vmem:[#allocation2 + $0x241] sm:$0xff] %vm484_vm10, %v19746_v20  ;;  %v19750_v35 = vmax.f32 %v16255_v53, 0.0 }
 0x33b   : > { %v12423_v45 = vunpack.i.h.bf16 %v12421_v19  ;;  %v12422_v21 = vunpack.i.l.bf16 %v12421_v19  ;;  %v11176_v19 = vld [vmem:[%s19685_s3 + $0x170] sm:$0xff] }
 0x33c   : > { %v3755_v5 = vsel %vm3638_vm12, %v3723_v54, %v12417_v31  ;;  %v3658_v55 = vsel %vm3638_vm12, %v3625_v14, %v12418_v62  ;;  %2545 = vst.msk [vmem:[#allocation2 + $0x231] sm:$0xff] %vm484_vm10, %v19750_v35  ;;  %5853 = vmatpush1.msra.mxu0 %v11176_v19 }
 0x33d   : > { %v12426_v20 = vpop.permute.xlu0 %12425  ;;  %v3787_v60 = vsel %vm3671_vm13, %v3755_v5, %v12422_v21  ;;  %v3691_v3 = vsel %vm3671_vm13, %v3658_v55, %v12423_v45  ;;  %5854 = vmatprep.subr.mxu0 %v19827_v47 }
 0x33e   : > { %v12431_v24 = vpop.permute.xlu1 %12430  ;;  %v12428_v62 = vunpack.i.h.bf16 %v12426_v20  ;;  %v12427_v31 = vunpack.i.l.bf16 %v12426_v20  ;;  %4098 = vmatprep.mubr.f32.mxu1 %v3787_v60  ;;  %5855 = vmatpush1.msra.mxu0 %v11175_v13  ;;  %v11173_v20 = vld [vmem:[%s19685_s3 + $0x158] sm:$0xff] }
 0x33f   : > { %v12433_v50 = vunpack.i.h.bf16 %v12431_v24  ;;  %v12432_v54 = vunpack.i.l.bf16 %v12431_v24  ;;  %4099 = vmatmul.mubr.f32.gmra.mxu1 %v3691_v3  ;;  %5856 = vmatprep.subr.mxu0 %v19827_v47 }
 0x340   : > { %v3724_v45 = vsel %vm484_vm10, %v16003_v15, %v12427_v31  ;;  %v3626_v21 = vsel %vm484_vm10, %v15936_v0, %v12428_v62  ;;  %5857 = vmatpush1.msra.mxu0 %v11174_v40 }
 0x341   : > { %v12436_v14 = vpop.permute.xlu0 %12435  ;;  %5858 = vmatprep.subr.mxu0 %v19827_v47  ;;  %v3756_v24 = vsel %vm3638_vm12, %v3724_v45, %v12432_v54  ;;  %v3659_v19 = vsel %vm3638_vm12, %v3626_v21, %v12433_v50  ;;  %v16306_v62 = vld [vmem:[#allocation2 + $0x242] sm:$0xff]  ;;  %v11172_v50 = vld [vmem:[%s19685_s3 + $0x150] sm:$0xff] }
 0x342   : > { %v12438_v5 = vunpack.i.h.bf16 %v12436_v14  ;;  %v12437_v55 = vunpack.i.l.bf16 %v12436_v14  ;;  %5859 = vmatpush1.msra.mxu0 %v11173_v20  ;;  %v16316_v54 = vld [vmem:[#allocation2 + $0x240] sm:$0xff]  ;;  %v11169_v14 = vld [vmem:[%s19685_s3 + $0x138] sm:$0xff] }
 0x343   : > { %v16298_v0 = vld [vmem:[#allocation2 + $0x232] sm:$0xff]  ;;  %5860 = vmatprep.subr.mxu0 %v19827_v47  ;;  %v12549_v45 = vpack.i.bf16 %v16211_v48, %v16316_v54  ;;  %v11170_v21 = vld [vmem:[%s19685_s3 + $0x140] sm:$0xff] }
 0x344   : > { %v3788_v15 = vsel %vm3671_vm13, %v3756_v24, %v12437_v55  ;;  %v3692_v60 = vsel %vm3671_vm13, %v3659_v19, %v12438_v5  ;;  %v2769_v3 = vld [vmem:[#allocation2 + $0x230] sm:$0xff]  ;;  %11795 = vmatmul.mubr.msk.f32.gmra.mxu0 %vm484_vm10, %v16298_v0  ;;  %v16333_v20 = vld [vmem:[#allocation2 + $0x241] sm:$0xff]  ;;  %v12441_v55 = vpop.permute.xlu1 %12440 }
 0x345   : > { %v16301_v13 = vld [vmem:[#allocation2 + $0x231] sm:$0xff]  ;;  %4103 = vmatprep.mubr.f32.mxu1 %v3788_v15  ;;  %v12534_v31 = vpack.i.bf16 %v16204_v18, %v2769_v3  ;;  %11797 = vmatprep.mubr.msk.f32.mxu0 %vm484_vm10, %v16306_v62  ;;  %v11171_v18 = vld [vmem:[%s19685_s3 + $0x148] sm:$0xff]  ;;  %v11166_v15 = vld [vmem:[%s19685_s3 + $0x120] sm:$0xff] }
 0x346   : > { %v12539_v40 = vpack.i.bf16 %v16218_v7, %v16301_v13  ;;  %4104 = vmatmul.mubr.f32.gmra.mxu1 %v3692_v60  ;;  %5861 = vmatpush1.msra.mxu0 %v11172_v50  ;;  %v12544_v7 = vpack.i.bf16 %v16228_v41, %v16298_v0  ;;  %v12554_v41 = vpack.i.bf16 %v2769_v3, %v16333_v20  ;;  %v11168_v5 = vld [vmem:[%s19685_s3 + $0x130] sm:$0xff]  ;;  %v11167_v24 = vld [vmem:[%s19685_s3 + $0x128] sm:$0xff]  ;;  %v12443_v60 = vunpack.i.h.bf16 %v12441_v55  ;;  %v11197_v50 = vld [vmem:[%s19685_s3 + $0x218] sm:$0xff] }
 0x347   : > { %12535 = vrot.lane.b32.xlu0 %v12534_v31, %s14139_s29  ;;  %5862 = vmatprep.subr.mxu0 %v19827_v47  ;;  %v12559_v48 = vpack.i.bf16 %v16301_v13, %v16306_v62  ;;  %v12442_v3 = vunpack.i.l.bf16 %v12441_v55  ;;  %v11196_v55 = vld [vmem:[%s19685_s3 + $0x210] sm:$0xff] }
 0x348   : > { %12540 = vrot.lane.b32.xlu1 %v12539_v40, %s14141_s28  ;;  %5863 = vmatpush1.msra.mxu0 %v11171_v18 }
 0x349   : > { %5864 = vmatprep.subr.mxu0 %v19827_v47 }
 0x34a   : > { %5865 = vmatpush1.msra.mxu0 %v11170_v21 }
 0x34b   : > { %12545 = vrot.lane.b32.xlu0 %v12544_v7, %s14140_s21  ;;  %5866 = vmatprep.subr.mxu0 %v19827_v47 }
 0x34c   : > { %12550 = vrot.lane.b32.xlu1 %v12549_v45, %s14139_s29  ;;  %5867 = vmatpush1.msra.mxu0 %v11169_v14 }
 0x34d   : > { %5868 = vmatprep.subr.mxu0 %v19827_v47 }
 0x34e   : > { %5869 = vmatpush1.msra.mxu0 %v11168_v5 }
 0x34f   : > { %12555 = vrot.lane.b32.xlu0 %v12554_v41, %s14141_s28  ;;  %5870 = vmatprep.subr.mxu0 %v19827_v47 }
 0x350   : > { %12560 = vrot.lane.b32.xlu1 %v12559_v48, %s14140_s21  ;;  %5871 = vmatpush1.msra.mxu0 %v11167_v24  ;;  %v3725_v24 = vsel %vm484_vm10, %v16031_v37, %v12442_v3 }
 0x351   : > { %5872 = vmatprep.subr.mxu0 %v19827_v47 }
 0x352   : > { %v11746_v19 = vpop.f32.mrf.mxu1  ;;  %5873 = vmatpush1.msra.mxu0 %v11166_v15 }
 0x353   : > { %v16357_v31 = vadd.f32 %v16050_v34, %v11746_v19  ;;  %5874 = vmatprep.subr.mxu0 %v19827_v47  ;;  %v3627_v19 = vsel %vm484_vm10, %v16001_v51, %v12443_v60  ;;  %v16390_v60 = vpop.f32.mrf.mxu0 }
 0x354   : > { %v2475_v40 = vpop.f32.mrf.mxu1  ;;  %5875 = vmatpush2.msra.mxu0 %v11197_v50 }
 0x355   : > { %19830 = vst [vmem:[#allocation14_spill] sm:$0xff] %v16357_v31  ;;  %v19748_v18 = vmax.f32 %v16357_v31, 0.0  ;;  %v16365_v7 = vadd.f32 %v16050_v34, %v2475_v40  ;;  %5876 = vmatprep.subr.mxu0 %v19827_v47 }
 0x356   : > { %v12446_v45 = vpop.permute.xlu0 %12445  ;;  %5877 = vmatpush2.msra.mxu0 %v11196_v55 }
 0x357   : > { %19831 = vst [vmem:[#allocation15_spill] sm:$0xff] %v16365_v7  ;;  %v12451_v21 = vpop.permute.xlu1 %12450  ;;  %v12448_v41 = vunpack.i.h.bf16 %v12446_v45  ;;  %v12447_v48 = vunpack.i.l.bf16 %v12446_v45  ;;  %2548 = vst.msk [vmem:[#allocation2 + $0x261] sm:$0xff] %vm484_vm10, %v19748_v18  ;;  %v19749_v34 = vmax.f32 %v16365_v7, 0.0  ;;  %v11195_v45 = vld [vmem:[%s19685_s3 + $0x208] sm:$0xff]  ;;  %5878 = vmatprep.subr.mxu0 %v19827_v47 }
 0x358   : > { %v12453_v14 = vunpack.i.h.bf16 %v12451_v21  ;;  %v12452_v5 = vunpack.i.l.bf16 %v12451_v21  ;;  %5879 = vmatpush2.msra.mxu0 %v11195_v45 }
 0x359   : > { %v3757_v15 = vsel %vm3638_vm12, %v3725_v24, %v12447_v48  ;;  %v3660_v40 = vsel %vm3638_vm12, %v3627_v19, %v12448_v41  ;;  %2547 = vst.msk [vmem:[#allocation2 + $0x251] sm:$0xff] %vm484_vm10, %v19749_v34  ;;  %v16395_v24 = vld [vmem:[%s19686_s4] ss:$0 sm:$0xff]  ;;  %5880 = vmatprep.subr.mxu0 %v19827_v47 }
 0x35a   : > { %v12456_v21 = vpop.permute.xlu0 %12455  ;;  %v3789_v3 = vsel %vm3671_vm13, %v3757_v15, %v12452_v5  ;;  %v3693_v51 = vsel %vm3671_vm13, %v3660_v40, %v12453_v14  ;;  %v11194_v5 = vld [vmem:[%s19685_s3 + $0x200] sm:$0xff]  ;;  %v11193_v40 = vld [vmem:[%s19685_s3 + $0x1f8] sm:$0xff] }
 0x35b   : > { %v12461_v37 = vpop.permute.xlu1 %12460  ;;  %v12458_v50 = vunpack.i.h.bf16 %v12456_v21  ;;  %v12457_v41 = vunpack.i.l.bf16 %v12456_v21  ;;  %4108 = vmatprep.mubr.f32.mxu1 %v3789_v3  ;;  %5881 = vmatpush2.msra.mxu0 %v11194_v5 }
 0x35c   : > { %v12462_v48 = vunpack.i.l.bf16 %v12461_v37  ;;  %v12463_v19 = vunpack.i.h.bf16 %v12461_v37  ;;  %4109 = vmatmul.mubr.f32.gmra.mxu1 %v3693_v51  ;;  %v4005_v14 = vpop.f32.mrf.mxu1  ;;  %v4230_v37 = vpop.f32.mrf.mxu0  ;;  %5882 = vmatprep.subr.mxu0 %v19827_v47 }
 0x35d   : > { %v3726_v55 = vsel %vm484_vm10, %v16082_v33, %v12457_v41  ;;  %v3628_v15 = vsel %vm484_vm10, %v16015_v17, %v12458_v50  ;;  %v4006_v21 = vadd.f32 %v16395_v24, %v4005_v14  ;;  %5883 = vmatpush2.msra.mxu0 %v11193_v40  ;;  %v11192_v40 = vld [vmem:[%s19685_s3 + $0x1f0] sm:$0xff] }
 0x35e   : > { %v12466_v3 = vpop.permute.xlu0 %12465  ;;  %v4007_v34 = vpop.f32.mrf.mxu1  ;;  %v3758_v33 = vsel %vm3638_vm12, %v3726_v55, %v12462_v48  ;;  %v3661_v35 = vsel %vm3638_vm12, %v3628_v15, %v12463_v19  ;;  %5884 = vmatprep.subr.mxu0 %v19827_v47  ;;  %v2836_v19 = vld [vmem:[#allocation2 + $0x262] sm:$0xff] }
 0x35f   : > { %v12471_v18 = vpop.permute.xlu1 %12470  ;;  %v12468_v45 = vunpack.i.h.bf16 %v12466_v3  ;;  %v12467_v51 = vunpack.i.l.bf16 %v12466_v3  ;;  %v4231_v17 = vadd.f32 %v4230_v37, %v4006_v21  ;;  %v16428_v15 = vld [vmem:[#allocation2 + $0x260] sm:$0xff]  ;;  %5885 = vmatpush2.msra.mxu0 %v11192_v40 }
 0x360   : > { %v12473_v50 = vunpack.i.h.bf16 %v12471_v18  ;;  %v12472_v41 = vunpack.i.l.bf16 %v12471_v18  ;;  %v16413_v31 = vld [vmem:[#allocation2 + $0x252] sm:$0xff]  ;;  %5886 = vmatprep.subr.mxu0 %v19827_v47  ;;  %v2708_v53 = vld [vmem:[#allocation2 + $0x261] sm:$0xff] }
 0x361   : > { %v3790_v14 = vsel %vm3671_vm13, %v3758_v33, %v12467_v51  ;;  %v3694_v5 = vsel %vm3671_vm13, %v3661_v35, %v12468_v45  ;;  %v16417_v7 = vld [vmem:[#allocation2 + $0x250] sm:$0xff]  ;;  %v4389_v34 = vmax.f32 %v4231_v17, 0.0  ;;  %11798 = vmatmul.mubr.msk.f32.gmra.mxu0 %vm484_vm10, %v16413_v31  ;;  %v4010_v33 = vpop.f32.mrf.mxu1 }
 0x362   : > { %v16419_v3 = vld [vmem:[#allocation2 + $0x251] sm:$0xff]  ;;  %v12476_v18 = vpop.permute.xlu0 %12475  ;;  %4113 = vmatprep.mubr.f32.mxu1 %v3790_v14  ;;  %v12564_v55 = vpack.i.bf16 %v16298_v0, %v16417_v7  ;;  %11800 = vmatprep.mubr.msk.f32.mxu0 %vm484_vm10, %v2836_v19  ;;  %v4011_v0 = vadd.f32 %v16395_v24, %v4010_v33  ;;  %v3629_v14 = vsel %vm484_vm10, %v16080_v59, %v12473_v50 }
 0x363   : > { %v12481_v48 = vpop.permute.xlu1 %12480  ;;  %v12569_v35 = vpack.i.bf16 %v16316_v54, %v16419_v3  ;;  %v12478_v21 = vunpack.i.h.bf16 %v12476_v18  ;;  %v12477_v37 = vunpack.i.l.bf16 %v12476_v18  ;;  %4114 = vmatmul.mubr.f32.gmra.mxu1 %v3694_v5  ;;  %v2837_v17 = vld [vmem:[#allocation2 + $0x272] sm:$0xff]  ;;  %4421 = vst.msk [vmem:[#allocation2 + $0x11] sm:$0xff] %vm484_vm10, %v4389_v34  ;;  %v3727_v54 = vsel %vm484_vm10, %v16109_v42, %v12472_v41  ;;  %v11191_v5 = vld [vmem:[%s19685_s3 + $0x1e8] sm:$0xff]  ;;  %v4012_v18 = vpop.f32.mrf.mxu1 }
 0x364   : > { %v12483_v45 = vunpack.i.h.bf16 %v12481_v48  ;;  %v12482_v51 = vunpack.i.l.bf16 %v12481_v48  ;;  %12565 = vrot.lane.b32.xlu0 %v12564_v55, %s14139_s29  ;;  %v12574_v34 = vpack.i.bf16 %v16333_v20, %v16413_v31  ;;  %v12579_v55 = vpack.i.bf16 %v16306_v62, %v16428_v15  ;;  %v11760_v41 = vpop.f32.mrf.mxu0  ;;  %5887 = vmatpush2.msra.mxu0 %v11191_v5  ;;  %v11190_v62 = vld [vmem:[%s19685_s3 + $0x1e0] sm:$0xff]  ;;  %v11201_v20 = vld [vmem:[%s19685_s3 + $0x238] sm:$0xff]  ;;  %v2580_v26 = vld [vmem:[#allocation2 + $0x250] sm:$0xff] }
 0x365   : > { %12570 = vrot.lane.b32.xlu1 %v12569_v35, %s14141_s28  ;;  %v3759_v48 = vsel %vm3638_vm12, %v3727_v54, %v12477_v37  ;;  %v3662_v35 = vsel %vm3638_vm12, %v3629_v14, %v12478_v21  ;;  %v4236_v42 = vadd.f32 %v16390_v60, %v4011_v0  ;;  %11801 = vmatmul.mubr.msk.f32.gmra.mxu0 %vm484_vm10, %v2837_v17  ;;  %v2804_v21 = vld [vmem:[#allocation2 + $0x261] sm:$0xff]  ;;  %v11189_v33 = vld [vmem:[%s19685_s3 + $0x1d8] sm:$0xff]  ;;  %v11200_v17 = vld [vmem:[%s19685_s3 + $0x230] sm:$0xff] }
 0x366   : > { %v3791_v59 = vsel %vm3671_vm13, %v3759_v48, %v12482_v51  ;;  %v3695_v50 = vsel %vm3671_vm13, %v3662_v35, %v12483_v45  ;;  %5888 = vmatprep.subr.mxu0 %v19827_v47  ;;  %v12584_v45 = vpack.i.bf16 %v16417_v7, %v2804_v21  ;;  %v12589_v51 = vpack.i.bf16 %v16419_v3, %v2836_v19  ;;  %v4240_v0 = vpop.f32.mrf.mxu0  ;;  %v2773_v14 = vld [vmem:[#allocation2 + $0x270] sm:$0xff]  ;;  %v11199_v19 = vld [vmem:[%s19685_s3 + $0x228] sm:$0xff] }
 0x367   : > { %4118 = vmatprep.mubr.f32.mxu1 %v3791_v59  ;;  %v4390_v60 = vmax.f32 %v4236_v42, 0.0  ;;  %5889 = vmatpush2.msra.mxu0 %v11190_v62  ;;  %v2805_v5 = vld [vmem:[#allocation2 + $0x271] sm:$0xff]  ;;  %v4485_v35 = vld [vmem:[#allocation2 + $0x1] sm:$0xff] }
 0x368   : > { %12575 = vrot.lane.b32.xlu0 %v12574_v34, %s14140_s21  ;;  %4119 = vmatmul.mubr.f32.gmra.mxu1 %v3695_v50  ;;  %v4015_v40 = vpop.f32.mrf.mxu1  ;;  %v11188_v3 = vld [vmem:[%s19685_s3 + $0x1d0] sm:$0xff]  ;;  %v12594_v34 = vpack.i.bf16 %v16413_v31, %v2773_v14  ;;  %v4517_v42 = vld [vmem:[#allocation2 + $0x2] sm:$0xff] }
 0x369   : > { %12580 = vrot.lane.b32.xlu1 %v12579_v55, %s14139_s29  ;;  %4422 = vst.msk [vmem:[#allocation2 + $0x21] sm:$0xff] %vm484_vm10, %v4390_v60  ;;  %v4016_v37 = vadd.f32 %v16395_v24, %v4015_v40  ;;  %11803 = vmatprep.subr.mxu1 %v11201_v20  ;;  %v12599_v55 = vpack.i.bf16 %v16428_v15, %v2805_v5  ;;  %v11187_v62 = vld [vmem:[%s19685_s3 + $0x1c8] sm:$0xff]  ;;  %v11198_v31 = vld [vmem:[%s19685_s3 + $0x220] sm:$0xff] }
 0x36a   : > { %v4017_v54 = vpop.f32.mrf.mxu1  ;;  %5890 = vmatprep.subr.mxu0 %v19827_v47  ;;  %11804 = vmatpush3.msra.mxu1 %v11201_v20  ;;  %v4613_v50 = vld [vmem:[#allocation2 + $0x12] sm:$0xff] }
 0x36b   : > { %v4241_v7 = vadd.f32 %v4240_v0, %v4016_v37  ;;  %5891 = vmatpush2.msra.mxu0 %v11189_v33  ;;  %11805 = vmatprep.subr.mxu1 %v11200_v17  ;;  %v12604_v40 = vpack.i.bf16 %v4485_v35, %v4613_v50  ;;  %v11186_v37 = vld [vmem:[%s19685_s3 + $0x1c0] sm:$0xff]  ;;  %v4549_v54 = vld [vmem:[#allocation2 + $0x10] sm:$0xff] }
 0x36c   : > { %12585 = vrot.lane.b32.xlu0 %v12584_v45, %s14141_s28  ;;  %5892 = vmatprep.subr.mxu0 %v19827_v47  ;;  %v11763_v45 = vpop.f32.mrf.mxu0  ;;  %v4486_v14 = vld [vmem:[#allocation2 + $0x11] sm:$0xff] }
 0x36d   : > { %12590 = vrot.lane.b32.xlu1 %v12589_v51, %s14140_s21  ;;  %v4391_v18 = vmax.f32 %v4241_v7, 0.0  ;;  %v4020_v48 = vpop.f32.mrf.mxu1  ;;  %11806 = vmatpush3.msra.mxu1 %v11200_v17 }
 0x36e   : > { %v4021_v59 = vadd.f32 %v16395_v24, %v4020_v48  ;;  %5893 = vmatpush2.msra.mxu0 %v11188_v3  ;;  %11807 = vmatprep.subr.mxu1 %v11199_v19 }
 0x36f   : > { %4423 = vst.msk [vmem:[#allocation2 + $0x31] sm:$0xff] %vm484_vm10, %v4391_v18  ;;  %v4022_v15 = vpop.f32.mrf.mxu1  ;;  %5894 = vmatprep.subr.mxu0 %v19827_v47  ;;  %11808 = vmatpush3.msra.mxu1 %v11199_v19  ;;  %v4250_v19 = vpop.f32.mrf.mxu0 }
 0x370   : > { %12595 = vrot.lane.b32.xlu0 %v12594_v34, %s14139_s29  ;;  %v4246_v20 = vadd.f32 %v11760_v41, %v4021_v59  ;;  %v4645_v60 = vld [vmem:[#allocation2 + $0x20] sm:$0xff]  ;;  %5895 = vmatpush2.msra.mxu0 %v11187_v62  ;;  %v11185_v41 = vld [vmem:[%s19685_s3 + $0x1b8] sm:$0xff]  ;;  %v11183_v15 = vld [vmem:[%s19685_s3 + $0x1a8] sm:$0xff] }
 0x371   : > { %12600 = vrot.lane.b32.xlu1 %v12599_v55, %s14141_s28  ;;  %v12609_v21 = vpack.i.bf16 %v4517_v42, %v4645_v60  ;;  %11809 = vmatprep.subr.mxu1 %v11198_v31  ;;  %v4677_v33 = vld [vmem:[#allocation2 + $0x21] sm:$0xff]  ;;  %v11184_v55 = vld [vmem:[%s19685_s3 + $0x1b0] sm:$0xff] }
 0x372   : > { %v4392_v51 = vmax.f32 %v4246_v20, 0.0  ;;  %v4614_v17 = vld [vmem:[#allocation2 + $0x22] sm:$0xff]  ;;  %5896 = vmatprep.subr.mxu0 %v19827_v47  ;;  %11810 = vmatpush3.msra.mxu1 %v11198_v31  ;;  %v12614_v7 = vpack.i.bf16 %v4549_v54, %v4677_v33 }
 0x373   : > { %5897 = vmatpush2.msra.mxu0 %v11186_v37  ;;  %12006 = vmatprep.subr.mxu1 %v19827_v47  ;;  %v12619_v3 = vpack.i.bf16 %v4486_v14, %v4614_v17 }
 0x374   : > { %12605 = vrot.lane.b32.xlu0 %v12604_v40, %s14140_s21  ;;  %4424 = vst.msk [vmem:[#allocation2 + $0x41] sm:$0xff] %vm484_vm10, %v4392_v51  ;;  %v4025_v0 = vpop.f32.mrf.mxu1  ;;  %5898 = vmatprep.subr.mxu0 %v19827_v47 }
 0x375   : > { %12610 = vrot.lane.b32.xlu1 %v12609_v21, %s14139_s29  ;;  %v4026_v5 = vadd.f32 %v16395_v24, %v4025_v0  ;;  %5899 = vmatpush2.msra.mxu0 %v11185_v41  ;;  %v11766_v0 = vpop.f32.mrf.mxu0 }
 0x376   : > { %v4027_v18 = vpop.f32.mrf.mxu1  ;;  %v4646_v48 = vld [vmem:[#allocation2 + $0x30] sm:$0xff]  ;;  %5900 = vmatprep.subr.mxu0 %v19827_v47 }
 0x377   : > { %v4678_v34 = vld [vmem:[#allocation2 + $0x31] sm:$0xff]  ;;  %v4251_v35 = vadd.f32 %v4250_v19, %v4026_v5  ;;  %v12624_v62 = vpack.i.bf16 %v4613_v50, %v4646_v48  ;;  %5901 = vmatpush2.msra.mxu0 %v11184_v55  ;;  %v11182_v50 = vld [vmem:[%s19685_s3 + $0x1a0] sm:$0xff] }
 0x378   : > { %12615 = vrot.lane.b32.xlu0 %v12614_v7, %s14141_s28  ;;  %v12629_v31 = vpack.i.bf16 %v4645_v60, %v4678_v34  ;;  %v4615_v40 = vld [vmem:[#allocation2 + $0x32] sm:$0xff]  ;;  %5902 = vmatprep.subr.mxu0 %v19827_v47 }
 0x379   : > { %12620 = vrot.lane.b32.xlu1 %v12619_v3, %s14140_s21  ;;  %v4393_v42 = vmax.f32 %v4251_v35, 0.0  ;;  %v4030_v59 = vpop.f32.mrf.mxu1  ;;  %5903 = vmatpush2.msra.mxu0 %v11183_v15  ;;  %v12634_v41 = vpack.i.bf16 %v4677_v33, %v4615_v40  ;;  %v4260_v3 = vpop.f32.mrf.mxu0 }
 0x37a   : > { %v4031_v20 = vadd.f32 %v16395_v24, %v4030_v59  ;;  %5904 = vmatprep.subr.mxu0 %v19827_v47 }
 0x37b   : > { %4425 = vst.msk [vmem:[#allocation2 + $0x51] sm:$0xff] %vm484_vm10, %v4393_v42  ;;  %v4032_v21 = vpop.f32.mrf.mxu1  ;;  %v4647_v37 = vld [vmem:[#allocation2 + $0x40] sm:$0xff]  ;;  %5905 = vmatpush2.msra.mxu0 %v11182_v50 }
 0x37c   : > { %12625 = vrot.lane.b32.xlu0 %v12624_v62, %s14139_s29  ;;  %v4256_v60 = vadd.f32 %v11763_v45, %v4031_v20  ;;  %v12639_v51 = vpack.i.bf16 %v4614_v17, %v4647_v37  ;;  %v4616_v14 = vld [vmem:[#allocation2 + $0x42] sm:$0xff]  ;;  %7809 = vmatprep.subr.mxu0 %v19827_v47 }
 0x37d   : > { %12630 = vrot.lane.b32.xlu1 %v12629_v31, %s14141_s28  ;;  %v4679_v5 = vld [vmem:[#allocation2 + $0x41] sm:$0xff]  ;;  %v12649_v17 = vpack.i.bf16 %v4678_v34, %v4616_v14 }
 0x37e   : > { %v4394_v54 = vmax.f32 %v4256_v60, 0.0  ;;  %v12644_v33 = vpack.i.bf16 %v4646_v48, %v4679_v5  ;;  %v2573_v62 = vld [vmem:[#allocation2 + $0x1e0] sm:$0xff] }
 0x380   : > { %12635 = vrot.lane.b32.xlu0 %v12634_v41, %s14140_s21  ;;  %4426 = vst.msk [vmem:[#allocation2 + $0x61] sm:$0xff] %vm484_vm10, %v4394_v54  ;;  %v4035_v7 = vpop.f32.mrf.mxu1 }
 0x381   : > { %12640 = vrot.lane.b32.xlu1 %v12639_v51, %s14139_s29  ;;  %v4036_v45 = vadd.f32 %v16395_v24, %v4035_v7 }
 0x382   : > { %v4037_v19 = vpop.f32.mrf.mxu1  ;;  %v4680_v18 = vld [vmem:[#allocation2 + $0x51] sm:$0xff] }
 0x383   : > { %v4648_v55 = vld [vmem:[#allocation2 + $0x50] sm:$0xff]  ;;  %v4261_v35 = vadd.f32 %v4260_v3, %v4036_v45  ;;  %v12659_v59 = vpack.i.bf16 %v4647_v37, %v4680_v18  ;;  %v12491_v15 = vpop.permute.xlu1 %12490 }
 0x384   : > { %12645 = vrot.lane.b32.xlu0 %v12644_v33, %s14141_s28  ;;  %v12486_v42 = vpop.permute.xlu0 %12485  ;;  %v12654_v60 = vpack.i.bf16 %v4615_v40, %v4648_v55  ;;  %v16537_v34 = vld [vmem:[#allocation2 + $0x52] sm:$0xff]  ;;  %v12493_v7 = vunpack.i.h.bf16 %v12491_v15  ;;  %v12492_v45 = vunpack.i.l.bf16 %v12491_v15 }
 0x385   : > { %12650 = vrot.lane.b32.xlu1 %v12649_v17, %s14140_s21  ;;  %v4395_v31 = vmax.f32 %v4261_v35, 0.0  ;;  %v12488_v20 = vunpack.i.h.bf16 %v12486_v42  ;;  %v12487_v21 = vunpack.i.l.bf16 %v12486_v42  ;;  %v4040_v50 = vpop.f32.mrf.mxu1  ;;  %v12664_v35 = vpack.i.bf16 %v4679_v5, %v16537_v34  ;;  %v11769_v42 = vpop.f32.mrf.mxu0 }
 0x386   : > { %v4041_v48 = vadd.f32 %v16395_v24, %v4040_v50 }
 0x387   : > { %4427 = vst.msk [vmem:[#allocation2 + $0x71] sm:$0xff] %vm484_vm10, %v4395_v31  ;;  %v4042_v51 = vpop.f32.mrf.mxu1  ;;  %v4649_v41 = vld [vmem:[#allocation2 + $0x60] sm:$0xff]  ;;  %v3728_v37 = vsel %vm484_vm10, %v16161_v1, %v12487_v21  ;;  %v3630_v54 = vsel %vm484_vm10, %v2573_v62, %v12488_v20  ;;  %v4270_v21 = vpop.f32.mrf.mxu0 }
 0x388   : > { %12655 = vrot.lane.b32.xlu0 %v12654_v60, %s14139_s29  ;;  %v4266_v40 = vadd.f32 %v11766_v0, %v4041_v48  ;;  %v12496_v17 = vpop.permute.xlu0 %12495  ;;  %v12669_v33 = vpack.i.bf16 %v4616_v14, %v4649_v41  ;;  %v3663_v50 = vsel %vm3638_vm12, %v3630_v54, %v12493_v7  ;;  %v16548_v60 = vld [vmem:[#allocation2 + $0x62] sm:$0xff] }
 0x389   : > { %12660 = vrot.lane.b32.xlu1 %v12659_v59, %s14141_s28  ;;  %v12498_v3 = vunpack.i.h.bf16 %v12496_v17  ;;  %v12497_v19 = vunpack.i.l.bf16 %v12496_v17  ;;  %v3760_v59 = vsel %vm3638_vm12, %v3728_v37, %v12492_v45  ;;  %v4681_v1 = vld [vmem:[#allocation2 + $0x61] sm:$0xff]  ;;  %v12679_v15 = vpack.i.bf16 %v4680_v18, %v16548_v60  ;;  %v12501_v18 = vpop.permute.xlu1 %12500 }
 0x38a   : > { %v4396_v31 = vmax.f32 %v4266_v40, 0.0  ;;  %v12674_v20 = vpack.i.bf16 %v4648_v55, %v4681_v1 }
 0x38b   : > { %v3792_v0 = vsel %vm3671_vm13, %v3760_v59, %v12497_v19  ;;  %v3696_v14 = vsel %vm3671_vm13, %v3663_v50, %v12498_v3 }
 0x38c   : > { %12665 = vrot.lane.b32.xlu0 %v12664_v35, %s14140_s21  ;;  %4428 = vst.msk [vmem:[#allocation2 + $0x81] sm:$0xff] %vm484_vm10, %v4396_v31  ;;  %v4045_v5 = vpop.f32.mrf.mxu1  ;;  %4123 = vmatprep.mubr.f32.mxu1 %v3792_v0  ;;  %v12503_v0 = vunpack.i.h.bf16 %v12501_v18 }
 0x38d   : > { %12670 = vrot.lane.b32.xlu1 %v12669_v33, %s14139_s29  ;;  %v4046_v62 = vadd.f32 %v16395_v24, %v4045_v5  ;;  %4124 = vmatmul.mubr.f32.gmra.mxu1 %v3696_v14  ;;  %v12502_v14 = vunpack.i.l.bf16 %v12501_v18  ;;  %v4684_v18 = vld [vmem:[#allocation2 + $0x91] sm:$0xff] }
 0x38e   : > { %v4047_v48 = vpop.f32.mrf.mxu1  ;;  %v4682_v51 = vld [vmem:[#allocation2 + $0x71] sm:$0xff] }
 0x38f   : > { %v4650_v37 = vld [vmem:[#allocation2 + $0x70] sm:$0xff]  ;;  %v4271_v54 = vadd.f32 %v4270_v21, %v4046_v62  ;;  %v12689_v40 = vpack.i.bf16 %v4649_v41, %v4682_v51  ;;  %v11772_v62 = vpop.f32.mrf.mxu0 }
 0x390   : > { %12675 = vrot.lane.b32.xlu0 %v12674_v20, %s14141_s28  ;;  %v12684_v17 = vpack.i.bf16 %v16537_v34, %v4650_v37  ;;  %v16561_v3 = vld [vmem:[#allocation2 + $0x72] sm:$0xff] }
 0x391   : > { %12680 = vrot.lane.b32.xlu1 %v12679_v15, %s14140_s21  ;;  %v4397_v7 = vmax.f32 %v4271_v54, 0.0  ;;  %v4050_v45 = vpop.f32.mrf.mxu1  ;;  %v12694_v41 = vpack.i.bf16 %v4681_v1, %v16561_v3 }
 0x392   : > { %v4051_v33 = vadd.f32 %v16395_v24, %v4050_v45 }
 0x393   : > { %4429 = vst.msk [vmem:[#allocation2 + $0xb1] sm:$0xff] %vm484_vm10, %v4397_v7  ;;  %v4052_v55 = vpop.f32.mrf.mxu1  ;;  %v4651_v19 = vld [vmem:[#allocation2 + $0x80] sm:$0xff] }
 0x394   : > { %12685 = vrot.lane.b32.xlu0 %v12684_v17, %s14139_s29  ;;  %v4276_v35 = vadd.f32 %v11769_v42, %v4051_v33  ;;  %v12699_v31 = vpack.i.bf16 %v16548_v60, %v4651_v19  ;;  %v16568_v59 = vld [vmem:[#allocation2 + $0x82] sm:$0xff]  ;;  %v3729_v17 = vsel %vm484_vm10, %v16170_v12, %v12502_v14  ;;  %v3631_v33 = vsel %vm484_vm10, %v16165_v30, %v12503_v0  ;;  %v4652_v55 = vld [vmem:[#allocation2 + $0x90] sm:$0xff] }
 0x395   : > { %12690 = vrot.lane.b32.xlu1 %v12689_v40, %s14141_s28  ;;  %v4683_v50 = vld [vmem:[#allocation2 + $0x81] sm:$0xff]  ;;  %v12709_v42 = vpack.i.bf16 %v4682_v51, %v16568_v59 }
 0x396   : > { %v4398_v5 = vmax.f32 %v4276_v35, 0.0  ;;  %v12704_v21 = vpack.i.bf16 %v4650_v37, %v4683_v50  ;;  %v4280_v35 = vpop.f32.mrf.mxu0 }
 0x398   : > { %12695 = vrot.lane.b32.xlu0 %v12694_v41, %s14140_s21  ;;  %4430 = vst.msk [vmem:[#allocation2 + $0xc1] sm:$0xff] %vm484_vm10, %v4398_v5  ;;  %v4055_v45 = vpop.f32.mrf.mxu1 }
 0x399   : > { %12700 = vrot.lane.b32.xlu1 %v12699_v31, %s14139_s29  ;;  %v12506_v15 = vpop.permute.xlu0 %12505  ;;  %v4056_v40 = vadd.f32 %v16395_v24, %v4055_v45  ;;  %v4525_v45 = vld [vmem:[#allocation2 + $0xa2] sm:$0xff] }
 0x39a   : > { %v12511_v20 = vpop.permute.xlu1 %12510  ;;  %v12508_v48 = vunpack.i.h.bf16 %v12506_v15  ;;  %v12507_v1 = vunpack.i.l.bf16 %v12506_v15  ;;  %v4057_v31 = vpop.f32.mrf.mxu1 }
 0x39b   : > { %v12513_v54 = vunpack.i.h.bf16 %v12511_v20  ;;  %v12512_v7 = vunpack.i.l.bf16 %v12511_v20  ;;  %v4281_v41 = vadd.f32 %v4280_v35, %v4056_v40  ;;  %v12719_v20 = vpack.i.bf16 %v4651_v19, %v4684_v18  ;;  %v4493_v40 = vld [vmem:[#allocation2 + $0xa1] sm:$0xff] }
 0x39c   : > { %12705 = vrot.lane.b32.xlu0 %v12704_v21, %s14141_s28  ;;  %v3761_v51 = vsel %vm3638_vm12, %v3729_v17, %v12507_v1  ;;  %v3664_v37 = vsel %vm3638_vm12, %v3631_v33, %v12508_v48  ;;  %v4621_v17 = vld [vmem:[#allocation2 + $0xb2] sm:$0xff] }
 0x39d   : > { %12710 = vrot.lane.b32.xlu1 %v12709_v42, %s14140_s21  ;;  %v12516_v50 = vpop.permute.xlu0 %12515  ;;  %v3793_v12 = vsel %vm3671_vm13, %v3761_v51, %v12512_v7  ;;  %v3697_v14 = vsel %vm3671_vm13, %v3664_v37, %v12513_v54  ;;  %v4060_v15 = vpop.f32.mrf.mxu1  ;;  %v12714_v42 = vpack.i.bf16 %v16561_v3, %v4652_v55  ;;  %v4399_v21 = vmax.f32 %v4281_v41, 0.0  ;;  %v14054_v7 = vld [vmem:[#allocation2 + $0x200] sm:$0xff] }
 0x39e   : > { %v12521_v5 = vpop.permute.xlu1 %12520  ;;  %v12518_v30 = vunpack.i.h.bf16 %v12516_v50  ;;  %v12517_v0 = vunpack.i.l.bf16 %v12516_v50  ;;  %4128 = vmatprep.mubr.f32.mxu1 %v3793_v12  ;;  %v4061_v48 = vadd.f32 %v16395_v24, %v4060_v15  ;;  %v12724_v50 = vpack.i.bf16 %v4493_v40, %v4621_v17 }
 0x39f   : > { %v12523_v31 = vunpack.i.h.bf16 %v12521_v5  ;;  %v12522_v1 = vunpack.i.l.bf16 %v12521_v5  ;;  %4129 = vmatmul.mubr.f32.gmra.mxu1 %v3697_v14  ;;  %v4062_v33 = vpop.f32.mrf.mxu1  ;;  %v4653_v54 = vld [vmem:[#allocation2 + $0xc0] sm:$0xff]  ;;  %4431 = vst.msk [vmem:[#allocation2 + $0xd1] sm:$0xff] %vm484_vm10, %v4399_v21 }
 0x3a0   : > { %12715 = vrot.lane.b32.xlu0 %v12714_v42, %s14139_s29  ;;  %v3730_v19 = vsel %vm484_vm10, %v16207_v27, %v12517_v0  ;;  %v3632_v18 = vsel %vm484_vm10, %v14054_v7, %v12518_v30  ;;  %v4286_v55 = vadd.f32 %v11772_v62, %v4061_v48  ;;  %v12729_v51 = vpack.i.bf16 %v4525_v45, %v4653_v54  ;;  %v16595_v15 = vld [vmem:[#allocation2 + $0xc2] sm:$0xff]  ;;  %v11775_v27 = vpop.f32.mrf.mxu0  ;;  %v4494_v0 = vld [vmem:[#allocation2 + $0xb1] sm:$0xff] }
 0x3a1   : > { %12720 = vrot.lane.b32.xlu1 %v12719_v20, %s14141_s28  ;;  %v12526_v35 = vpop.permute.xlu0 %12525  ;;  %v3762_v12 = vsel %vm3638_vm12, %v3730_v19, %v12522_v1  ;;  %v3665_v14 = vsel %vm3638_vm12, %v3632_v18, %v12523_v31  ;;  %v4685_v20 = vld [vmem:[#allocation2 + $0xc1] sm:$0xff]  ;;  %v4557_v42 = vld [vmem:[#allocation2 + $0xb0] sm:$0xff]  ;;  %v12739_v21 = vpack.i.bf16 %v4494_v0, %v16595_v15 }
 0x3a2   : > { %v12528_v37 = vunpack.i.h.bf16 %v12526_v35  ;;  %v12527_v41 = vunpack.i.l.bf16 %v12526_v35  ;;  %v4400_v5 = vmax.f32 %v4286_v55, 0.0  ;;  %v12734_v31 = vpack.i.bf16 %v4557_v42, %v4685_v20  ;;  %v4290_v48 = vpop.f32.mrf.mxu0 }
 0x3a4   : > { %12725 = vrot.lane.b32.xlu0 %v12724_v50, %s14140_s21  ;;  %v3794_v62 = vsel %vm3671_vm13, %v3762_v12, %v12527_v41  ;;  %v3698_v30 = vsel %vm3671_vm13, %v3665_v14, %v12528_v37  ;;  %4432 = vst.msk [vmem:[#allocation2 + $0xe1] sm:$0xff] %vm484_vm10, %v4400_v5  ;;  %v4065_v45 = vpop.f32.mrf.mxu1 }
 0x3a5   : > { %12730 = vrot.lane.b32.xlu1 %v12729_v51, %s14139_s29  ;;  %4133 = vmatprep.mubr.f32.mxu1 %v3794_v62  ;;  %v4066_v1 = vadd.f32 %v16395_v24, %v4065_v45 }
 0x3a6   : > { %4134 = vmatmul.mubr.f32.gmra.mxu1 %v3698_v30  ;;  %v4067_v40 = vpop.f32.mrf.mxu1  ;;  %v4686_v33 = vld [vmem:[#allocation2 + $0xd1] sm:$0xff] }
 0x3a7   : > { %v4654_v19 = vld [vmem:[#allocation2 + $0xd0] sm:$0xff]  ;;  %v4291_v7 = vadd.f32 %v4290_v48, %v4066_v1  ;;  %v12749_v55 = vpack.i.bf16 %v4653_v54, %v4686_v33  ;;  %v11778_v54 = vpop.f32.mrf.mxu0  ;;  %v12531_v1 = vpop.permute.xlu1 %12530 }
 0x3a8   : > { %12735 = vrot.lane.b32.xlu0 %v12734_v31, %s14141_s28  ;;  %v12744_v35 = vpack.i.bf16 %v4621_v17, %v4654_v19  ;;  %v16607_v41 = vld [vmem:[#allocation2 + $0xd2] sm:$0xff] }
 0x3a9   : > { %12740 = vrot.lane.b32.xlu1 %v12739_v21, %s14140_s21  ;;  %v4070_v18 = vpop.f32.mrf.mxu1  ;;  %v4401_v51 = vmax.f32 %v4291_v7, 0.0  ;;  %v12754_v62 = vpack.i.bf16 %v4685_v20, %v16607_v41 }
 0x3aa   : > { %v4071_v37 = vadd.f32 %v16395_v24, %v4070_v18 }
 0x3ab   : > { %v4072_v50 = vpop.f32.mrf.mxu1  ;;  %v4655_v5 = vld [vmem:[#allocation2 + $0xe0] sm:$0xff]  ;;  %4433 = vst.msk [vmem:[#allocation2 + $0xf1] sm:$0xff] %vm484_vm10, %v4401_v51 }
 0x3ac   : > { %12745 = vrot.lane.b32.xlu0 %v12744_v35, %s14139_s29  ;;  %v4296_v12 = vadd.f32 %v11775_v27, %v4071_v37  ;;  %v12759_v14 = vpack.i.bf16 %v16595_v15, %v4655_v5  ;;  %v16614_v30 = vld [vmem:[#allocation2 + $0xe2] sm:$0xff]  ;;  %v4300_v27 = vpop.f32.mrf.mxu0 }
 0x3ad   : > { %12750 = vrot.lane.b32.xlu1 %v12749_v55, %s14141_s28  ;;  %v4687_v0 = vld [vmem:[#allocation2 + $0xe1] sm:$0xff]  ;;  %v12769_v45 = vpack.i.bf16 %v4686_v33, %v16614_v30  ;;  %v12533_v33 = vunpack.i.h.bf16 %v12531_v1 }
 0x3ae   : > { %v4402_v17 = vmax.f32 %v4296_v12, 0.0  ;;  %v12764_v21 = vpack.i.bf16 %v4654_v19, %v4687_v0  ;;  %v12532_v19 = vunpack.i.l.bf16 %v12531_v1 }
 0x3b0   : > { %12755 = vrot.lane.b32.xlu0 %v12754_v62, %s14140_s21  ;;  %4434 = vst.msk [vmem:[#allocation2 + $0x101] sm:$0xff] %vm484_vm10, %v4402_v17  ;;  %v4075_v42 = vpop.f32.mrf.mxu1 }
 0x3b1   : > { %12760 = vrot.lane.b32.xlu1 %v12759_v14, %s14139_s29  ;;  %v4076_v31 = vadd.f32 %v16395_v24, %v4075_v42 }
 0x3b2   : > { %v4077_v20 = vpop.f32.mrf.mxu1  ;;  %v4688_v48 = vld [vmem:[#allocation2 + $0xf1] sm:$0xff] }
 0x3b3   : > { %v4656_v40 = vld [vmem:[#allocation2 + $0xf0] sm:$0xff]  ;;  %v4301_v7 = vadd.f32 %v4300_v27, %v4076_v31  ;;  %v12779_v55 = vpack.i.bf16 %v4655_v5, %v4688_v48  ;;  %v2704_v20 = vld [vmem:[#allocation2 + $0x221] sm:$0xff] }
 0x3b4   : > { %12765 = vrot.lane.b32.xlu0 %v12764_v21, %s14141_s28  ;;  %v12774_v35 = vpack.i.bf16 %v16607_v41, %v4656_v40  ;;  %v16624_v51 = vld [vmem:[#allocation2 + $0xf2] sm:$0xff] }
 0x3b5   : > { %12770 = vrot.lane.b32.xlu1 %v12769_v45, %s14140_s21  ;;  %v4080_v18 = vpop.f32.mrf.mxu1  ;;  %v4403_v37 = vmax.f32 %v4301_v7, 0.0  ;;  %v12784_v45 = vpack.i.bf16 %v4687_v0, %v16624_v51  ;;  %v2576_v7 = vld [vmem:[#allocation2 + $0x210] sm:$0xff] }
 0x3b6   : > { %v4081_v50 = vadd.f32 %v16395_v24, %v4080_v18 }
 0x3b7   : > { %v4082_v12 = vpop.f32.mrf.mxu1  ;;  %v4657_v14 = vld [vmem:[#allocation2 + $0x100] sm:$0xff]  ;;  %4435 = vst.msk [vmem:[#allocation2 + $0x111] sm:$0xff] %vm484_vm10, %v4403_v37 }
 0x3b8   : > { %12775 = vrot.lane.b32.xlu0 %v12774_v35, %s14139_s29  ;;  %v4306_v62 = vadd.f32 %v11778_v54, %v4081_v50  ;;  %v12789_v42 = vpack.i.bf16 %v16614_v30, %v4657_v14  ;;  %v3633_v35 = vsel %vm484_vm10, %v2576_v7, %v12533_v33  ;;  %v16634_v12 = vld [vmem:[#allocation2 + $0x102] sm:$0xff] }
 0x3b9   : > { %12780 = vrot.lane.b32.xlu1 %v12779_v55, %s14141_s28  ;;  %v12536_v17 = vpop.permute.xlu0 %12535  ;;  %v3731_v55 = vsel %vm484_vm10, %v2704_v20, %v12532_v19  ;;  %v4689_v54 = vld [vmem:[#allocation2 + $0x101] sm:$0xff]  ;;  %v12799_v20 = vpack.i.bf16 %v4688_v48, %v16634_v12 }
 0x3ba   : > { %v12541_v5 = vpop.permute.xlu1 %12540  ;;  %v12538_v21 = vunpack.i.h.bf16 %v12536_v17  ;;  %v12537_v27 = vunpack.i.l.bf16 %v12536_v17  ;;  %v4404_v18 = vmax.f32 %v4306_v62, 0.0 }
 0x3bb   : > { %v12543_v31 = vunpack.i.h.bf16 %v12541_v5  ;;  %v12542_v1 = vunpack.i.l.bf16 %v12541_v5 }
 0x3bc   : > { %12785 = vrot.lane.b32.xlu0 %v12784_v45, %s14140_s21  ;;  %v3763_v0 = vsel %vm3638_vm12, %v3731_v55, %v12537_v27  ;;  %v3666_v37 = vsel %vm3638_vm12, %v3633_v35, %v12538_v21  ;;  %4436 = vst.msk [vmem:[#allocation2 + $0x121] sm:$0xff] %vm484_vm10, %v4404_v18  ;;  %v2577_v27 = vld [vmem:[#allocation2 + $0x220] sm:$0xff] }
 0x3bd   : > { %12790 = vrot.lane.b32.xlu1 %v12789_v42, %s14139_s29  ;;  %v12546_v50 = vpop.permute.xlu0 %12545  ;;  %v3795_v62 = vsel %vm3671_vm13, %v3763_v0, %v12542_v1  ;;  %v3699_v19 = vsel %vm3671_vm13, %v3666_v37, %v12543_v31  ;;  %v12794_v42 = vpack.i.bf16 %v4656_v40, %v4689_v54 }
 0x3be   : > { %v12551_v17 = vpop.permute.xlu1 %12550  ;;  %v12548_v33 = vunpack.i.h.bf16 %v12546_v50  ;;  %v12547_v5 = vunpack.i.l.bf16 %v12546_v50  ;;  %4138 = vmatprep.mubr.f32.mxu1 %v3795_v62  ;;  %v4690_v21 = vld [vmem:[#allocation2 + $0x111] sm:$0xff] }
 0x3bf   : > { %v12553_v7 = vunpack.i.h.bf16 %v12551_v17  ;;  %v12552_v45 = vunpack.i.l.bf16 %v12551_v17  ;;  %4139 = vmatmul.mubr.f32.gmra.mxu1 %v3699_v19  ;;  %v4658_v18 = vld [vmem:[#allocation2 + $0x110] sm:$0xff]  ;;  %v12809_v48 = vpack.i.bf16 %v4657_v14, %v4690_v21 }
 0x3c0   : > { %12795 = vrot.lane.b32.xlu0 %v12794_v42, %s14141_s28  ;;  %v3732_v1 = vsel %vm484_vm10, %v16301_v13, %v12547_v5  ;;  %v3634_v31 = vsel %vm484_vm10, %v2577_v27, %v12548_v33  ;;  %v12804_v40 = vpack.i.bf16 %v16624_v51, %v4658_v18  ;;  %v16652_v17 = vld [vmem:[#allocation2 + $0x112] sm:$0xff] }
 0x3c1   : > { %12800 = vrot.lane.b32.xlu1 %v12799_v20, %s14140_s21  ;;  %v12556_v55 = vpop.permute.xlu0 %12555  ;;  %v3764_v37 = vsel %vm3638_vm12, %v3732_v1, %v12552_v45  ;;  %v3667_v50 = vsel %vm3638_vm12, %v3634_v31, %v12553_v7  ;;  %v12814_v33 = vpack.i.bf16 %v4689_v54, %v16652_v17  ;;  %v16665_v45 = vpop.f32.mrf.mxu0  ;;  %v4692_v27 = vld [vmem:[#allocation2 + $0x131] sm:$0xff] }
 0x3c2   : > { %v12558_v35 = vunpack.i.h.bf16 %v12556_v55  ;;  %v12557_v0 = vunpack.i.l.bf16 %v12556_v55  ;;  %v4660_v1 = vld [vmem:[#allocation2 + $0x130] sm:$0xff] }
 0x3c3   : > { %v4659_v19 = vld [vmem:[#allocation2 + $0x120] sm:$0xff] }
 0x3c4   : > { %12805 = vrot.lane.b32.xlu0 %v12804_v40, %s14139_s29  ;;  %v3796_v13 = vsel %vm3671_vm13, %v3764_v37, %v12557_v0  ;;  %v3700_v62 = vsel %vm3671_vm13, %v3667_v50, %v12558_v35  ;;  %v12819_v14 = vpack.i.bf16 %v16634_v12, %v4659_v19  ;;  %v16660_v5 = vld [vmem:[#allocation2 + $0x122] sm:$0xff]  ;;  %v12839_v55 = vpack.i.bf16 %v4659_v19, %v4692_v27  ;;  %v4310_v0 = vpop.f32.mrf.mxu0 }
 0x3c5   : > { %12810 = vrot.lane.b32.xlu1 %v12809_v48, %s14141_s28  ;;  %4143 = vmatprep.mubr.f32.mxu1 %v3796_v13  ;;  %v4691_v20 = vld [vmem:[#allocation2 + $0x121] sm:$0xff]  ;;  %v12829_v42 = vpack.i.bf16 %v4690_v21, %v16660_v5  ;;  %v12834_v35 = vpack.i.bf16 %v16652_v17, %v4660_v1  ;;  %v12561_v21 = vpop.permute.xlu1 %12560 }
 0x3c6   : > { %4144 = vmatmul.mubr.f32.gmra.mxu1 %v3700_v62  ;;  %v12824_v7 = vpack.i.bf16 %v4658_v18, %v4691_v20  ;;  %v12563_v37 = vunpack.i.h.bf16 %v12561_v21  ;;  %v12562_v50 = vunpack.i.l.bf16 %v12561_v21  ;;  %v2706_v20 = vld [vmem:[#allocation2 + $0x241] sm:$0xff] }
 0x3c8   : > { %12815 = vrot.lane.b32.xlu0 %v12814_v33, %s14140_s21 }
 0x3c9   : > { %12820 = vrot.lane.b32.xlu1 %v12819_v14, %s14139_s29 }
 0x3cc   : > { %12825 = vrot.lane.b32.xlu0 %v12824_v7, %s14141_s28  ;;  %v3733_v7 = vsel %vm484_vm10, %v2706_v20, %v12562_v50 }
 0x3cd   : > { %12830 = vrot.lane.b32.xlu1 %v12829_v42, %s14140_s21  ;;  %v4085_v31 = vpop.f32.mrf.mxu1  ;;  %v2578_v42 = vld [vmem:[#allocation2 + $0x230] sm:$0xff] }
 0x3ce   : > { %v4086_v54 = vadd.f32 %v16395_v24, %v4085_v31  ;;  %v3635_v27 = vsel %vm484_vm10, %v2578_v42, %v12563_v37 }
 0x3cf   : > { %v4087_v48 = vpop.f32.mrf.mxu1 }
 0x3d0   : > { %v4311_v40 = vadd.f32 %v4310_v0, %v4086_v54  ;;  %12835 = vrot.lane.b32.xlu0 %v12834_v35, %s14139_s29  ;;  %v4501_v54 = vld [vmem:[#allocation2 + $0x141] sm:$0xff] }
 0x3d1   : > { %12840 = vrot.lane.b32.xlu1 %v12839_v55, %s14141_s28 }
 0x3d2   : > { %v4405_v18 = vmax.f32 %v4311_v40, 0.0 }
 0x3d4   : > { %4437 = vst.msk [vmem:[#allocation2 + $0x151] sm:$0xff] %vm484_vm10, %v4405_v18 }
 0x3d6   : > { %v12566_v13 = vpop.permute.xlu0 %12565 }
 0x3d7   : > { %v12571_v62 = vpop.permute.xlu1 %12570  ;;  %v12568_v14 = vunpack.i.h.bf16 %v12566_v13  ;;  %v12567_v24 = vunpack.i.l.bf16 %v12566_v13 }
 0x3d8   : > { %v12573_v19 = vunpack.i.h.bf16 %v12571_v62  ;;  %v12572_v33 = vunpack.i.l.bf16 %v12571_v62  ;;  %v2707_v62 = vld [vmem:[#allocation2 + $0x251] sm:$0xff] }
 0x3d9   : > { %v3765_v1 = vsel %vm3638_vm12, %v3733_v7, %v12567_v24  ;;  %v3668_v31 = vsel %vm3638_vm12, %v3635_v27, %v12568_v14  ;;  %v2579_v24 = vld [vmem:[#allocation2 + $0x240] sm:$0xff] }
 0x3da   : > { %v12576_v55 = vpop.permute.xlu0 %12575  ;;  %v3797_v0 = vsel %vm3671_vm13, %v3765_v1, %v12572_v33  ;;  %v3701_v48 = vsel %vm3671_vm13, %v3668_v31, %v12573_v19 }
 0x3db   : > { %v12581_v35 = vpop.permute.xlu1 %12580  ;;  %v12578_v40 = vunpack.i.h.bf16 %v12576_v55  ;;  %v12577_v21 = vunpack.i.l.bf16 %v12576_v55  ;;  %4148 = vmatprep.mubr.f32.mxu1 %v3797_v0  ;;  %v16680_v13 = vld [vmem:[#allocation2 + $0x152] sm:$0xff] }
 0x3dc   : > { %v12582_v18 = vunpack.i.l.bf16 %v12581_v35  ;;  %v12583_v50 = vunpack.i.h.bf16 %v12581_v35  ;;  %4149 = vmatmul.mubr.f32.gmra.mxu1 %v3701_v48  ;;  %v12844_v37 = vpack.i.bf16 %v4501_v54, %v16680_v13  ;;  %v16690_v54 = vld [vmem:[%s19686_s4] ss:$0 sm:$0xff] }
 0x3dd   : > { %v3734_v14 = vsel %vm484_vm10, %v2707_v62, %v12577_v21  ;;  %v3636_v20 = vsel %vm484_vm10, %v2579_v24, %v12578_v40 }
 0x3de   : > { %v12586_v42 = vpop.permute.xlu0 %12585  ;;  %12845 = vrot.lane.b32.xlu0 %v12844_v37, %s14140_s21  ;;  %v3766_v1 = vsel %vm3638_vm12, %v3734_v14, %v12582_v18  ;;  %v3669_v0 = vsel %vm3638_vm12, %v3636_v20, %v12583_v50 }
 0x3df   : > { %v12591_v33 = vpop.permute.xlu1 %12590  ;;  %v12588_v19 = vunpack.i.h.bf16 %v12586_v42  ;;  %v12587_v7 = vunpack.i.l.bf16 %v12586_v42  ;;  %v4090_v27 = vpop.f32.mrf.mxu1 }
 0x3e0   : > { %v12593_v31 = vunpack.i.h.bf16 %v12591_v33  ;;  %v12592_v55 = vunpack.i.l.bf16 %v12591_v33  ;;  %v4091_v35 = vadd.f32 %v16690_v54, %v4090_v27  ;;  %v16697_v27 = vpop.f32.mrf.mxu0 }
 0x3e1   : > { %v4092_v48 = vpop.f32.mrf.mxu1  ;;  %v3798_v40 = vsel %vm3671_vm13, %v3766_v1, %v12587_v7  ;;  %v3702_v21 = vsel %vm3671_vm13, %v3669_v0, %v12588_v19  ;;  %v4453_v1 = vld [vmem:[#allocation2] sm:$0xff] }
 0x3e2   : > { %v4316_v37 = vadd.f32 %v16665_v45, %v4091_v35  ;;  %v12596_v62 = vpop.permute.xlu0 %12595  ;;  %4153 = vmatprep.mubr.f32.mxu1 %v3798_v40  ;;  %v3735_v20 = vsel %vm484_vm10, %v2708_v53, %v12592_v55  ;;  %v3637_v7 = vsel %vm484_vm10, %v2580_v26, %v12593_v31  ;;  %v4320_v26 = vpop.f32.mrf.mxu0 }
 0x3e3   : > { %v12601_v18 = vpop.permute.xlu1 %12600  ;;  %v12598_v24 = vunpack.i.h.bf16 %v12596_v62  ;;  %v12597_v14 = vunpack.i.l.bf16 %v12596_v62  ;;  %4154 = vmatmul.mubr.f32.gmra.mxu1 %v3702_v21 }
 0x3e4   : > { %v12603_v42 = vunpack.i.h.bf16 %v12601_v18  ;;  %v12602_v33 = vunpack.i.l.bf16 %v12601_v18  ;;  %v4406_v50 = vmax.f32 %v4316_v37, 0.0 }
 0x3e5   : > { %v3767_v19 = vsel %vm3638_vm12, %v3735_v20, %v12597_v14  ;;  %v3670_v45 = vsel %vm3638_vm12, %v3637_v7, %v12598_v24  ;;  %v4709_v24 = vld [vmem:[#allocation2 + $0x22] sm:$0xff]  ;;  %v4581_v14 = vld [vmem:[#allocation2 + $0x11] sm:$0xff] }
 0x3e6   : > { %4438 = vst.msk [vmem:[#allocation2 + $0x161] sm:$0xff] %vm484_vm10, %v4406_v50  ;;  %v12606_v35 = vpop.permute.xlu0 %12605  ;;  %v4095_v0 = vpop.f32.mrf.mxu1  ;;  %v3799_v48 = vsel %vm3671_vm13, %v3767_v19, %v12602_v33  ;;  %v3703_v40 = vsel %vm3671_vm13, %v3670_v45, %v12603_v42 }
 0x3e7   : > { %v12608_v21 = vunpack.i.h.bf16 %v12606_v35  ;;  %v12607_v62 = vunpack.i.l.bf16 %v12606_v35  ;;  %v4096_v37 = vadd.f32 %v16690_v54, %v4095_v0  ;;  %v12611_v53 = vpop.permute.xlu1 %12610  ;;  %4158 = vmatprep.mubr.f32.mxu1 %v3799_v48  ;;  %v4710_v0 = vld [vmem:[#allocation2 + $0x32] sm:$0xff]  ;;  %v4533_v48 = vld [vmem:[#allocation2 + $0x142] sm:$0xff] }
 0x3e8   : > { %v12613_v31 = vunpack.i.h.bf16 %v12611_v53  ;;  %v12612_v55 = vunpack.i.l.bf16 %v12611_v53  ;;  %v4097_v18 = vpop.f32.mrf.mxu1  ;;  %4159 = vmatmul.mubr.f32.gmra.mxu1 %v3703_v40  ;;  %v4711_v40 = vld [vmem:[#allocation2 + $0x42] sm:$0xff] }
 0x3e9   : > { %v5509_v50 = vsel %vm484_vm10, %v4453_v1, %v12608_v21  ;;  %v4321_v20 = vadd.f32 %v4320_v26, %v4096_v37  ;;  %11811 = vmatprep.mubr.msk.f32.mxu1 %vm484_vm10, %v4709_v24  ;;  %v5605_v42 = vsel %vm484_vm10, %v4581_v14, %v12607_v62  ;;  %v16717_v26 = vld [vmem:[#allocation2 + $0x150] sm:$0xff] }
 0x3ea   : > { %v12616_v33 = vpop.permute.xlu0 %12615  ;;  %v5637_v18 = vsel %vm3638_vm12, %v5605_v42, %v12612_v55  ;;  %v5541_v1 = vsel %vm3638_vm12, %v5509_v50, %v12613_v31 }
 0x3eb   : > { %v4407_v7 = vmax.f32 %v4321_v20, 0.0  ;;  %v12618_v19 = vunpack.i.h.bf16 %v12616_v33  ;;  %v12617_v45 = vunpack.i.l.bf16 %v12616_v33  ;;  %v12621_v35 = vpop.permute.xlu1 %12620  ;;  %v4582_v33 = vld [vmem:[#allocation2 + $0x21] sm:$0xff] }
 0x3ec   : > { %v12623_v57 = vunpack.i.h.bf16 %v12621_v35  ;;  %v12622_v53 = vunpack.i.l.bf16 %v12621_v35  ;;  %11812 = vmatmul.mubr.msk.f32.vlgmr.msra.gmra.mxu1 %vm484_vm10, %v4710_v0 }
 0x3ed   : > { %4439 = vst.msk [vmem:[#allocation2 + $0x171] sm:$0xff] %vm484_vm10, %v4407_v7  ;;  %11814 = vmatprep.mubr.msk.f32.mxu1 %vm484_vm10, %v4711_v40  ;;  %v5669_v21 = vsel %vm3671_vm13, %v5637_v18, %v12617_v45  ;;  %v5573_v62 = vsel %vm3671_vm13, %v5541_v1, %v12618_v19  ;;  %v4661_v37 = vld [vmem:[#allocation2 + $0x160] sm:$0xff]  ;;  %v4454_v7 = vld [vmem:[#allocation2 + $0x10] sm:$0xff] }
 0x3ee   : > { %v16719_v24 = vld [vmem:[#allocation2 + $0x161] sm:$0xff]  ;;  %v12626_v14 = vpop.permute.xlu0 %12625  ;;  %5906 = vmatprep.mubr.f32.mxu0 %v5669_v21  ;;  %v12849_v20 = vpack.i.bf16 %v4533_v48, %v4661_v37  ;;  %v5606_v19 = vsel %vm484_vm10, %v4582_v33, %v12622_v53  ;;  %v5510_v0 = vsel %vm484_vm10, %v4454_v7, %v12623_v57  ;;  %v4716_v7 = vld [vmem:[#allocation2 + $0x92] sm:$0xff] }
 0x3ef   : > { %v12854_v55 = vpack.i.bf16 %v16717_v26, %v16719_v24  ;;  %v12628_v31 = vunpack.i.h.bf16 %v12626_v14  ;;  %v12627_v50 = vunpack.i.l.bf16 %v12626_v14  ;;  %v12631_v42 = vpop.permute.xlu1 %12630  ;;  %5907 = vmatmul.mubr.f32.vlgmr.msra.gmra.mxu0 %v5573_v62  ;;  %v16728_v48 = vld [vmem:[#allocation2 + $0x162] sm:$0xff]  ;;  %v16737_v62 = vld [vmem:[#allocation2 + $0x151] sm:$0xff] }
 0x3f0   : > { %v12633_v45 = vunpack.i.h.bf16 %v12631_v42  ;;  %v12632_v35 = vunpack.i.l.bf16 %v12631_v42  ;;  %11815 = vmatmul.mubr.msk.f32.gmra.mxu1 %vm484_vm10, %v16537_v34  ;;  %12850 = vrot.lane.b32.xlu1 %v12849_v20, %s14139_s29  ;;  %v12859_v20 = vpack.i.bf16 %v16737_v62, %v16728_v48  ;;  %v4583_v42 = vld [vmem:[#allocation2 + $0x31] sm:$0xff] }
 0x3f1   : > { %12855 = vrot.lane.b32.xlu0 %v12854_v55, %s14141_s28  ;;  %11817 = vmatprep.mubr.msk.f32.mxu1 %vm484_vm10, %v16548_v60  ;;  %v5638_v40 = vsel %vm3638_vm12, %v5606_v19, %v12627_v50  ;;  %v5542_v18 = vsel %vm3638_vm12, %v5510_v0, %v12628_v31  ;;  %v4455_v19 = vld [vmem:[#allocation2 + $0x20] sm:$0xff] }
 0x3f2   : > { %v12636_v1 = vpop.permute.xlu0 %12635  ;;  %v5670_v34 = vsel %vm3671_vm13, %v5638_v40, %v12632_v35  ;;  %v5574_v21 = vsel %vm3671_vm13, %v5542_v18, %v12633_v45 }
 0x3f3   : > { %v12641_v53 = vpop.permute.xlu1 %12640  ;;  %v12638_v57 = vunpack.i.h.bf16 %v12636_v1  ;;  %v12637_v14 = vunpack.i.l.bf16 %v12636_v1  ;;  %5911 = vmatprep.mubr.f32.mxu0 %v5670_v34 }
 0x3f4   : > { %v12643_v55 = vunpack.i.h.bf16 %v12641_v53  ;;  %v12642_v60 = vunpack.i.l.bf16 %v12641_v53  ;;  %5912 = vmatmul.mubr.f32.gmra.mxu0 %v5574_v21  ;;  %11818 = vmatmul.mubr.msk.f32.gmra.mxu1 %vm484_vm10, %v16561_v3  ;;  %v16743_v31 = vld [vmem:[#allocation2 + $0x170] sm:$0xff] }
 0x3f5   : > { %v16745_v50 = vld [vmem:[#allocation2 + $0x171] sm:$0xff]  ;;  %12860 = vrot.lane.b32.xlu1 %v12859_v20, %s14140_s21  ;;  %11820 = vmatprep.mubr.msk.f32.mxu1 %vm484_vm10, %v16568_v59  ;;  %v12864_v33 = vpack.i.bf16 %v16680_v13, %v16743_v31  ;;  %v5607_v35 = vsel %vm484_vm10, %v4583_v42, %v12637_v14  ;;  %v5511_v40 = vsel %vm484_vm10, %v4455_v19, %v12638_v57 }
 0x3f6   : > { %v12869_v45 = vpack.i.bf16 %v4661_v37, %v16745_v50  ;;  %v12646_v3 = vpop.permute.xlu0 %12645  ;;  %v16754_v0 = vld [vmem:[#allocation2 + $0x172] sm:$0xff]  ;;  %v5639_v13 = vsel %vm3638_vm12, %v5607_v35, %v12642_v60  ;;  %v5543_v37 = vsel %vm3638_vm12, %v5511_v40, %v12643_v55  ;;  %v4584_v55 = vld [vmem:[#allocation2 + $0x41] sm:$0xff] }
 0x3f7   : > { %v12651_v18 = vpop.permute.xlu1 %12650  ;;  %v12648_v1 = vunpack.i.h.bf16 %v12646_v3  ;;  %v12647_v34 = vunpack.i.l.bf16 %v12646_v3  ;;  %12865 = vrot.lane.b32.xlu0 %v12864_v33, %s14139_s29  ;;  %v12874_v57 = vpack.i.bf16 %v16719_v24, %v16754_v0  ;;  %v4456_v60 = vld [vmem:[#allocation2 + $0x30] sm:$0xff] }
 0x3f8   : > { %v12653_v59 = vunpack.i.h.bf16 %v12651_v18  ;;  %v12652_v21 = vunpack.i.l.bf16 %v12651_v18  ;;  %11821 = vmatmul.mubr.msk.f32.gmra.mxu1 %vm484_vm10, %v4716_v7 }
 0x3f9   : > { %12870 = vrot.lane.b32.xlu1 %v12869_v45, %s14141_s28  ;;  %11823 = vmatprep.mubr.msk.f32.mxu1 %vm484_vm10, %v16595_v15  ;;  %v5671_v53 = vsel %vm3671_vm13, %v5639_v13, %v12647_v34  ;;  %v5575_v14 = vsel %vm3671_vm13, %v5543_v37, %v12648_v1 }
 0x3fa   : > { %v12656_v20 = vpop.permute.xlu0 %12655  ;;  %5916 = vmatprep.mubr.f32.mxu0 %v5671_v53  ;;  %v5608_v15 = vsel %vm484_vm10, %v4584_v55, %v12652_v21  ;;  %v5512_v19 = vsel %vm484_vm10, %v4456_v60, %v12653_v59 }
 0x3fb   : > { %v12661_v42 = vpop.permute.xlu1 %12660  ;;  %v12658_v33 = vunpack.i.h.bf16 %v12656_v20  ;;  %v12657_v7 = vunpack.i.l.bf16 %v12656_v20  ;;  %12875 = vrot.lane.b32.xlu0 %v12874_v57, %s14140_s21  ;;  %5917 = vmatmul.mubr.f32.gmra.mxu0 %v5575_v14  ;;  %v4457_v14 = vld [vmem:[#allocation2 + $0x40] sm:$0xff] }
 0x3fc   : > { %v12663_v45 = vunpack.i.h.bf16 %v12661_v42  ;;  %v12662_v35 = vunpack.i.l.bf16 %v12661_v42  ;;  %11824 = vmatmul.mubr.msk.f32.gmra.mxu1 %vm484_vm10, %v16607_v41 }
 0x3fd   : > { %11826 = vmatprep.mubr.msk.f32.mxu1 %vm484_vm10, %v16614_v30  ;;  %v5640_v3 = vsel %vm3638_vm12, %v5608_v15, %v12657_v7  ;;  %v5544_v40 = vsel %vm3638_vm12, %v5512_v19, %v12658_v33  ;;  %v4585_v30 = vld [vmem:[#allocation2 + $0x51] sm:$0xff]  ;;  %v16788_v19 = vpop.f32.mrf.mxu0 }
 0x3fe   : > { %v12666_v18 = vpop.permute.xlu0 %12665  ;;  %v5672_v1 = vsel %vm3671_vm13, %v5640_v3, %v12662_v35  ;;  %v5576_v34 = vsel %vm3671_vm13, %v5544_v40, %v12663_v45 }
 0x3ff   : > { %v12671_v13 = vpop.permute.xlu1 %12670  ;;  %v12668_v37 = vunpack.i.h.bf16 %v12666_v18  ;;  %v12667_v53 = vunpack.i.l.bf16 %v12666_v18  ;;  %v4100_v41 = vpop.f32.mrf.mxu1  ;;  %5921 = vmatprep.mubr.f32.mxu0 %v5672_v1  ;;  %v4724_v1 = vld [vmem:[#allocation2 + $0x132] sm:$0xff] }
 0x400   : > { %v12673_v21 = vunpack.i.h.bf16 %v12671_v13  ;;  %v12672_v57 = vunpack.i.l.bf16 %v12671_v13  ;;  %v4101_v59 = vadd.f32 %v16690_v54, %v4100_v41  ;;  %5922 = vmatmul.mubr.f32.gmra.mxu0 %v5576_v34  ;;  %11827 = vmatmul.mubr.msk.f32.gmra.mxu1 %vm484_vm10, %v16624_v51 }
 0x401   : > { %v4102_v20 = vpop.f32.mrf.mxu1  ;;  %11829 = vmatprep.mubr.msk.f32.mxu1 %vm484_vm10, %v16634_v12  ;;  %v5609_v42 = vsel %vm484_vm10, %v4585_v30, %v12667_v53  ;;  %v5513_v33 = vsel %vm484_vm10, %v4457_v14, %v12668_v37 }
 0x402   : > { %v4326_v7 = vadd.f32 %v16697_v27, %v4101_v59  ;;  %v12676_v55 = vpop.permute.xlu0 %12675  ;;  %v5641_v15 = vsel %vm3638_vm12, %v5609_v42, %v12672_v57  ;;  %v5545_v12 = vsel %vm3638_vm12, %v5513_v33, %v12673_v21  ;;  %v4586_v21 = vld [vmem:[#allocation2 + $0x61] sm:$0xff]  ;;  %v4458_v57 = vld [vmem:[#allocation2 + $0x50] sm:$0xff]  ;;  %v4330_v59 = vpop.f32.mrf.mxu0 }
 0x403   : > { %v12681_v60 = vpop.permute.xlu1 %12680  ;;  %v12678_v45 = vunpack.i.h.bf16 %v12676_v55  ;;  %v12677_v35 = vunpack.i.l.bf16 %v12676_v55 }
 0x404   : > { %v4408_v51 = vmax.f32 %v4326_v7, 0.0  ;;  %v12683_v3 = vunpack.i.h.bf16 %v12681_v60  ;;  %v12682_v40 = vunpack.i.l.bf16 %v12681_v60  ;;  %11830 = vmatmul.mubr.msk.f32.gmra.mxu1 %vm484_vm10, %v16652_v17 }
 0x405   : > { %11832 = vmatprep.mubr.msk.f32.mxu1 %vm484_vm10, %v16660_v5  ;;  %v5673_v27 = vsel %vm3671_vm13, %v5641_v15, %v12677_v35  ;;  %v5577_v18 = vsel %vm3671_vm13, %v5545_v12, %v12678_v45 }
 0x406   : > { %4440 = vst.msk [vmem:[#allocation2 + $0x181] sm:$0xff] %vm484_vm10, %v4408_v51  ;;  %v4105_v34 = vpop.f32.mrf.mxu1  ;;  %v12686_v13 = vpop.permute.xlu0 %12685  ;;  %5926 = vmatprep.mubr.f32.mxu0 %v5673_v27  ;;  %v5610_v20 = vsel %vm484_vm10, %v4586_v21, %v12682_v40  ;;  %v5514_v42 = vsel %vm484_vm10, %v4458_v57, %v12683_v3 }
 0x407   : > { %v4106_v37 = vadd.f32 %v16690_v54, %v4105_v34  ;;  %v12691_v53 = vpop.permute.xlu1 %12690  ;;  %v12688_v41 = vunpack.i.h.bf16 %v12686_v13  ;;  %v12687_v17 = vunpack.i.l.bf16 %v12686_v13  ;;  %5927 = vmatmul.mubr.f32.gmra.mxu0 %v5577_v18  ;;  %v4587_v18 = vld [vmem:[#allocation2 + $0x71] sm:$0xff] }
 0x408   : > { %v12693_v5 = vunpack.i.h.bf16 %v12691_v53  ;;  %v12692_v30 = vunpack.i.l.bf16 %v12691_v53  ;;  %v4107_v14 = vpop.f32.mrf.mxu1  ;;  %11833 = vmatmul.mubr.msk.f32.gmra.mxu1 %vm484_vm10, %v4724_v1  ;;  %v4459_v1 = vld [vmem:[#allocation2 + $0x60] sm:$0xff] }
 0x409   : > { %v4331_v33 = vadd.f32 %v4330_v59, %v4106_v37  ;;  %11835 = vmatprep.mubr.msk.f32.mxu1 %vm484_vm10, %v16728_v48  ;;  %v5642_v7 = vsel %vm3638_vm12, %v5610_v20, %v12687_v17  ;;  %v5546_v55 = vsel %vm3638_vm12, %v5514_v42, %v12688_v41 }
 0x40a   : > { %v12696_v60 = vpop.permute.xlu0 %12695  ;;  %v5674_v45 = vsel %vm3671_vm13, %v5642_v7, %v12692_v30  ;;  %v5578_v35 = vsel %vm3671_vm13, %v5546_v55, %v12693_v5 }
 0x40b   : > { %v4409_v15 = vmax.f32 %v4331_v33, 0.0  ;;  %v12701_v51 = vpop.permute.xlu1 %12700  ;;  %v12698_v12 = vunpack.i.h.bf16 %v12696_v60  ;;  %v12697_v27 = vunpack.i.l.bf16 %v12696_v60  ;;  %5931 = vmatprep.mubr.f32.mxu0 %v5674_v45 }
 0x40c   : > { %v12703_v40 = vunpack.i.h.bf16 %v12701_v51  ;;  %v12702_v3 = vunpack.i.l.bf16 %v12701_v51  ;;  %5932 = vmatmul.mubr.f32.gmra.mxu0 %v5578_v35  ;;  %11836 = vmatmul.mubr.msk.f32.gmra.mxu1 %vm484_vm10, %v16754_v0  ;;  %v4460_v51 = vld [vmem:[#allocation2 + $0x70] sm:$0xff] }
 0x40d   : > { %4441 = vst.msk [vmem:[#allocation2 + $0x191] sm:$0xff] %vm484_vm10, %v4409_v15  ;;  %v16811_v34 = vld [vmem:[#allocation2 + $0x182] sm:$0xff]  ;;  %v5611_v53 = vsel %vm484_vm10, %v4587_v18, %v12697_v27  ;;  %v5515_v41 = vsel %vm484_vm10, %v4459_v1, %v12698_v12 }
 0x40e   : > { %v16813_v13 = vld [vmem:[#allocation2 + $0x180] sm:$0xff]  ;;  %11838 = vmatprep.mubr.msk.f32.mxu1 %vm484_vm10, %v16811_v34  ;;  %v12706_v17 = vpop.permute.xlu0 %12705  ;;  %v5643_v42 = vsel %vm3638_vm12, %v5611_v53, %v12702_v3  ;;  %v5547_v33 = vsel %vm3638_vm12, %v5515_v41, %v12703_v40 }
 0x40f   : > { %v16815_v37 = vld [vmem:[#allocation2 + $0x181] sm:$0xff]  ;;  %v12879_v21 = vpack.i.bf16 %v16728_v48, %v16813_v13  ;;  %v12711_v59 = vpop.permute.xlu1 %12710  ;;  %v12708_v5 = vunpack.i.h.bf16 %v12706_v17  ;;  %v12707_v30 = vunpack.i.l.bf16 %v12706_v17 }
 0x410   : > { %v12884_v57 = vpack.i.bf16 %v16743_v31, %v16815_v37  ;;  %v12713_v14 = vunpack.i.h.bf16 %v12711_v59  ;;  %v12712_v20 = vunpack.i.l.bf16 %v12711_v59  ;;  %v12889_v31 = vpack.i.bf16 %v16745_v50, %v16811_v34  ;;  %v4588_v15 = vld [vmem:[#allocation2 + $0x81] sm:$0xff] }
 0x411   : > { %12880 = vrot.lane.b32.xlu1 %v12879_v21, %s14139_s29  ;;  %v5675_v7 = vsel %vm3671_vm13, %v5643_v42, %v12707_v30  ;;  %v5579_v48 = vsel %vm3671_vm13, %v5547_v33, %v12708_v5 }
 0x412   : > { %12885 = vrot.lane.b32.xlu0 %v12884_v57, %s14141_s28  ;;  %v12716_v55 = vpop.permute.xlu0 %12715  ;;  %5936 = vmatprep.mubr.f32.mxu0 %v5675_v7  ;;  %v5612_v18 = vsel %vm484_vm10, %v4588_v15, %v12712_v20  ;;  %v5516_v53 = vsel %vm484_vm10, %v4460_v51, %v12713_v14  ;;  %v4461_v20 = vld [vmem:[#allocation2 + $0xa0] sm:$0xff] }
 0x413   : > { %v12721_v60 = vpop.permute.xlu1 %12720  ;;  %v12718_v45 = vunpack.i.h.bf16 %v12716_v55  ;;  %v12717_v35 = vunpack.i.l.bf16 %v12716_v55  ;;  %5937 = vmatmul.mubr.f32.gmra.mxu0 %v5579_v48  ;;  %v4589_v48 = vld [vmem:[#allocation2 + $0xb1] sm:$0xff] }
 0x414   : > { %v12723_v12 = vunpack.i.h.bf16 %v12721_v60  ;;  %v12722_v27 = vunpack.i.l.bf16 %v12721_v60  ;;  %v16834_v40 = vld [vmem:[#allocation2 + $0x192] sm:$0xff] }
 0x415   : > { %12890 = vrot.lane.b32.xlu1 %v12889_v31, %s14140_s21  ;;  %v16836_v3 = vld [vmem:[#allocation2 + $0x190] sm:$0xff]  ;;  %11839 = vmatmul.mubr.msk.f32.gmra.mxu1 %vm484_vm10, %v16834_v40  ;;  %v5644_v17 = vsel %vm3638_vm12, %v5612_v18, %v12717_v35  ;;  %v5548_v57 = vsel %vm3638_vm12, %v5516_v53, %v12718_v45  ;;  %v12904_v55 = vpack.i.bf16 %v16815_v37, %v16834_v40 }
 0x416   : > { %v16839_v1 = vld [vmem:[#allocation2 + $0x191] sm:$0xff]  ;;  %v12894_v41 = vpack.i.bf16 %v16754_v0, %v16836_v3  ;;  %v12726_v59 = vpop.permute.xlu0 %12725  ;;  %v5676_v5 = vsel %vm3671_vm13, %v5644_v17, %v12722_v27  ;;  %v5580_v30 = vsel %vm3671_vm13, %v5548_v57, %v12723_v12 }
 0x417   : > { %v12899_v21 = vpack.i.bf16 %v16813_v13, %v16839_v1  ;;  %v12731_v14 = vpop.permute.xlu1 %12730  ;;  %v12728_v42 = vunpack.i.h.bf16 %v12726_v59  ;;  %v12727_v33 = vunpack.i.l.bf16 %v12726_v59  ;;  %5941 = vmatprep.mubr.f32.mxu0 %v5676_v5 }
 0x418   : > { %12895 = vrot.lane.b32.xlu0 %v12894_v41, %s14139_s29  ;;  %v12733_v0 = vunpack.i.h.bf16 %v12731_v14  ;;  %v12732_v7 = vunpack.i.l.bf16 %v12731_v14  ;;  %5942 = vmatmul.mubr.f32.gmra.mxu0 %v5580_v30 }
 0x419   : > { %12900 = vrot.lane.b32.xlu1 %v12899_v21, %s14141_s28  ;;  %v5613_v31 = vsel %vm484_vm10, %v4589_v48, %v12727_v33  ;;  %v5517_v60 = vsel %vm484_vm10, %v4461_v20, %v12728_v42  ;;  %v4590_v33 = vld [vmem:[#allocation2 + $0xc1] sm:$0xff]  ;;  %v4462_v48 = vld [vmem:[#allocation2 + $0xb0] sm:$0xff] }
 0x41a   : > { %v12736_v45 = vpop.permute.xlu0 %12735  ;;  %v5645_v53 = vsel %vm3638_vm12, %v5613_v31, %v12732_v7  ;;  %v5549_v41 = vsel %vm3638_vm12, %v5517_v60, %v12733_v0  ;;  %v11790_v60 = vpop.f32.mrf.mxu0 }
 0x41b   : > { %v12741_v35 = vpop.permute.xlu1 %12740  ;;  %v12738_v15 = vunpack.i.h.bf16 %v12736_v45  ;;  %v12737_v51 = vunpack.i.l.bf16 %v12736_v45 }
 0x41c   : > { %12905 = vrot.lane.b32.xlu0 %v12904_v55, %s14140_s21  ;;  %v12743_v12 = vunpack.i.h.bf16 %v12741_v35  ;;  %v12742_v27 = vunpack.i.l.bf16 %v12741_v35  ;;  %v4110_v18 = vpop.f32.mrf.mxu1 }
 0x41d   : > { %v4111_v17 = vadd.f32 %v16690_v54, %v4110_v18  ;;  %v5677_v21 = vsel %vm3671_vm13, %v5645_v53, %v12737_v51  ;;  %v5581_v57 = vsel %vm3671_vm13, %v5549_v41, %v12738_v15 }
 0x41e   : > { %v4112_v59 = vpop.f32.mrf.mxu1  ;;  %v12746_v5 = vpop.permute.xlu0 %12745  ;;  %5946 = vmatprep.mubr.f32.mxu0 %v5677_v21  ;;  %v5614_v0 = vsel %vm484_vm10, %v4590_v33, %v12742_v27  ;;  %v5518_v31 = vsel %vm484_vm10, %v4462_v48, %v12743_v12 }
 0x41f   : > { %v4336_v30 = vadd.f32 %v16788_v19, %v4111_v17  ;;  %v12751_v20 = vpop.permute.xlu1 %12750  ;;  %v12748_v14 = vunpack.i.h.bf16 %v12746_v5  ;;  %v12747_v42 = vunpack.i.l.bf16 %v12746_v5  ;;  %5947 = vmatmul.mubr.f32.gmra.mxu0 %v5581_v57  ;;  %v4591_v59 = vld [vmem:[#allocation2 + $0xd1] sm:$0xff]  ;;  %v4463_v5 = vld [vmem:[#allocation2 + $0xc0] sm:$0xff] }
 0x420   : > { %v12753_v7 = vunpack.i.h.bf16 %v12751_v20  ;;  %v12752_v55 = vunpack.i.l.bf16 %v12751_v20 }
 0x421   : > { %v4410_v45 = vmax.f32 %v4336_v30, 0.0  ;;  %v5646_v35 = vsel %vm3638_vm12, %v5614_v0, %v12747_v42  ;;  %v5550_v15 = vsel %vm3638_vm12, %v5518_v31, %v12748_v14  ;;  %v4340_v30 = vpop.f32.mrf.mxu0 }
 0x422   : > { %v12756_v51 = vpop.permute.xlu0 %12755  ;;  %v5678_v19 = vsel %vm3671_vm13, %v5646_v35, %v12752_v55  ;;  %v5582_v18 = vsel %vm3671_vm13, %v5550_v15, %v12753_v7 }
 0x423   : > { %4442 = vst.msk [vmem:[#allocation2 + $0x1a1] sm:$0xff] %vm484_vm10, %v4410_v45  ;;  %v12761_v53 = vpop.permute.xlu1 %12760  ;;  %v12758_v41 = vunpack.i.h.bf16 %v12756_v51  ;;  %v12757_v17 = vunpack.i.l.bf16 %v12756_v51  ;;  %v4115_v21 = vpop.f32.mrf.mxu1  ;;  %5951 = vmatprep.mubr.f32.mxu0 %v5678_v19 }
 0x424   : > { %v12763_v27 = vunpack.i.h.bf16 %v12761_v53  ;;  %v12762_v12 = vunpack.i.l.bf16 %v12761_v53  ;;  %v4116_v57 = vadd.f32 %v16690_v54, %v4115_v21  ;;  %5952 = vmatmul.mubr.f32.gmra.mxu0 %v5582_v18 }
 0x425   : > { %v4117_v20 = vpop.f32.mrf.mxu1  ;;  %v5615_v14 = vsel %vm484_vm10, %v4591_v59, %v12757_v17  ;;  %v5519_v42 = vsel %vm484_vm10, %v4463_v5, %v12758_v41  ;;  %v4592_v17 = vld [vmem:[#allocation2 + $0xe1] sm:$0xff] }
 0x426   : > { %v4341_v33 = vadd.f32 %v4340_v30, %v4116_v57  ;;  %v12766_v48 = vpop.permute.xlu0 %12765  ;;  %v5647_v31 = vsel %vm3638_vm12, %v5615_v14, %v12762_v12  ;;  %v5551_v51 = vsel %vm3638_vm12, %v5519_v42, %v12763_v27 }
 0x427   : > { %v12771_v7 = vpop.permute.xlu1 %12770  ;;  %v12768_v55 = vunpack.i.h.bf16 %v12766_v48  ;;  %v12767_v0 = vunpack.i.l.bf16 %v12766_v48  ;;  %v4464_v48 = vld [vmem:[#allocation2 + $0xd0] sm:$0xff] }
 0x428   : > { %v4411_v45 = vmax.f32 %v4341_v33, 0.0  ;;  %v12773_v35 = vunpack.i.h.bf16 %v12771_v7  ;;  %v12772_v15 = vunpack.i.l.bf16 %v12771_v7  ;;  %v4120_v19 = vpop.f32.mrf.mxu1 }
 0x429   : > { %v5679_v18 = vsel %vm3671_vm13, %v5647_v31, %v12767_v0  ;;  %v5583_v53 = vsel %vm3671_vm13, %v5551_v51, %v12768_v55  ;;  %v4121_v41 = vadd.f32 %v16690_v54, %v4120_v19 }
 0x42a   : > { %4443 = vst.msk [vmem:[#allocation2 + $0x1b1] sm:$0xff] %vm484_vm10, %v4411_v45  ;;  %v12776_v21 = vpop.permute.xlu0 %12775  ;;  %5956 = vmatprep.mubr.f32.mxu0 %v5679_v18  ;;  %v16881_v57 = vld [vmem:[#allocation2 + $0x1a2] sm:$0xff]  ;;  %v5616_v27 = vsel %vm484_vm10, %v4592_v17, %v12772_v15  ;;  %v4122_v5 = vpop.f32.mrf.mxu1  ;;  %v5520_v31 = vsel %vm484_vm10, %v4464_v48, %v12773_v35 }
 0x42b   : > { %v16883_v12 = vld [vmem:[#allocation2 + $0x1a0] sm:$0xff]  ;;  %v12781_v30 = vpop.permute.xlu1 %12780  ;;  %v12778_v20 = vunpack.i.h.bf16 %v12776_v21  ;;  %v12777_v14 = vunpack.i.l.bf16 %v12776_v21  ;;  %5957 = vmatmul.mubr.f32.gmra.mxu0 %v5583_v53  ;;  %11841 = vmatprep.mubr.msk.f32.mxu1 %vm484_vm10, %v16881_v57  ;;  %v4346_v7 = vadd.f32 %v11790_v60, %v4121_v41  ;;  %v12919_v35 = vpack.i.bf16 %v16839_v1, %v16881_v57 }
 0x42c   : > { %v16885_v59 = vld [vmem:[#allocation2 + $0x1a1] sm:$0xff]  ;;  %v12909_v42 = vpack.i.bf16 %v16811_v34, %v16883_v12  ;;  %v12783_v55 = vunpack.i.h.bf16 %v12781_v30  ;;  %v12782_v0 = vunpack.i.l.bf16 %v12781_v30 }
 0x42d   : > { %v12914_v33 = vpack.i.bf16 %v16836_v3, %v16885_v59  ;;  %v5648_v45 = vsel %vm3638_vm12, %v5616_v27, %v12777_v14  ;;  %v5552_v15 = vsel %vm3638_vm12, %v5520_v31, %v12778_v20  ;;  %v4412_v51 = vmax.f32 %v4346_v7, 0.0  ;;  %v4593_v27 = vld [vmem:[#allocation2 + $0xf1] sm:$0xff]  ;;  %v4465_v5 = vld [vmem:[#allocation2 + $0xe0] sm:$0xff] }
 0x42e   : > { %12910 = vrot.lane.b32.xlu1 %v12909_v42, %s14139_s29  ;;  %v12786_v19 = vpop.permute.xlu0 %12785  ;;  %v5680_v34 = vsel %vm3671_vm13, %v5648_v45, %v12782_v0  ;;  %v5584_v18 = vsel %vm3671_vm13, %v5552_v15, %v12783_v55 }
 0x42f   : > { %12915 = vrot.lane.b32.xlu0 %v12914_v33, %s14141_s28  ;;  %v12791_v53 = vpop.permute.xlu1 %12790  ;;  %v12788_v60 = vunpack.i.h.bf16 %v12786_v19  ;;  %v12787_v17 = vunpack.i.l.bf16 %v12786_v19  ;;  %5961 = vmatprep.mubr.f32.mxu0 %v5680_v34  ;;  %4444 = vst.msk [vmem:[#allocation2 + $0x1c1] sm:$0xff] %vm484_vm10, %v4412_v51 }
 0x430   : > { %v12793_v41 = vunpack.i.h.bf16 %v12791_v53  ;;  %v12792_v21 = vunpack.i.l.bf16 %v12791_v53  ;;  %5962 = vmatmul.mubr.f32.gmra.mxu0 %v5584_v18 }
 0x431   : > { %v16905_v30 = vld [vmem:[#allocation2 + $0x1b2] sm:$0xff]  ;;  %v5617_v42 = vsel %vm484_vm10, %v4593_v27, %v12787_v17  ;;  %v5521_v33 = vsel %vm484_vm10, %v4465_v5, %v12788_v60  ;;  %v4594_v17 = vld [vmem:[#allocation2 + $0x101] sm:$0xff] }
 0x432   : > { %12920 = vrot.lane.b32.xlu1 %v12919_v35, %s14140_s21  ;;  %v16907_v20 = vld [vmem:[#allocation2 + $0x1b0] sm:$0xff]  ;;  %11842 = vmatmul.mubr.msk.f32.gmra.mxu1 %vm484_vm10, %v16905_v30  ;;  %v12796_v48 = vpop.permute.xlu0 %12795  ;;  %v5649_v19 = vsel %vm3638_vm12, %v5617_v42, %v12792_v21  ;;  %v5553_v34 = vsel %vm3638_vm12, %v5521_v33, %v12793_v41  ;;  %v12934_v60 = vpack.i.bf16 %v16885_v59, %v16905_v30 }
 0x433   : > { %v16909_v14 = vld [vmem:[#allocation2 + $0x1b1] sm:$0xff]  ;;  %v12924_v7 = vpack.i.bf16 %v16834_v40, %v16907_v20  ;;  %v12801_v0 = vpop.permute.xlu1 %12800  ;;  %v12798_v31 = vunpack.i.h.bf16 %v12796_v48  ;;  %v12797_v45 = vunpack.i.l.bf16 %v12796_v48 }
 0x434   : > { %v12929_v55 = vpack.i.bf16 %v16883_v12, %v16909_v14  ;;  %v12803_v15 = vunpack.i.h.bf16 %v12801_v0  ;;  %v12802_v51 = vunpack.i.l.bf16 %v12801_v0  ;;  %v4466_v35 = vld [vmem:[#allocation2 + $0xf0] sm:$0xff] }
 0x435   : > { %12925 = vrot.lane.b32.xlu0 %v12924_v7, %s14139_s29  ;;  %v5681_v18 = vsel %vm3671_vm13, %v5649_v19, %v12797_v45  ;;  %v5585_v40 = vsel %vm3671_vm13, %v5553_v34, %v12798_v31  ;;  %v4732_v27 = vld [vmem:[#allocation2 + $0x1d2] sm:$0xff] }
 0x436   : > { %12930 = vrot.lane.b32.xlu1 %v12929_v55, %s14141_s28  ;;  %v12806_v53 = vpop.permute.xlu0 %12805  ;;  %5966 = vmatprep.mubr.f32.mxu0 %v5681_v18  ;;  %v4731_v21 = vld [vmem:[#allocation2 + $0x1c2] sm:$0xff]  ;;  %v5618_v42 = vsel %vm484_vm10, %v4594_v17, %v12802_v51  ;;  %v5522_v45 = vsel %vm484_vm10, %v4466_v35, %v12803_v15  ;;  %v4668_v15 = vld [vmem:[#allocation2 + $0x1d0] sm:$0xff] }
 0x437   : > { %v12811_v5 = vpop.permute.xlu1 %12810  ;;  %v12808_v48 = vunpack.i.h.bf16 %v12806_v53  ;;  %v12807_v7 = vunpack.i.l.bf16 %v12806_v53  ;;  %5967 = vmatmul.mubr.f32.gmra.mxu0 %v5585_v40  ;;  %v4667_v41 = vld [vmem:[#allocation2 + $0x1c0] sm:$0xff]  ;;  %11844 = vmatprep.mubr.msk.f32.mxu1 %vm484_vm10, %v4731_v21 }
 0x438   : > { %v16928_v33 = vld [vmem:[#allocation2 + $0x1c1] sm:$0xff]  ;;  %v12813_v55 = vunpack.i.h.bf16 %v12811_v5  ;;  %v12812_v0 = vunpack.i.l.bf16 %v12811_v5  ;;  %v12939_v31 = vpack.i.bf16 %v16881_v57, %v4667_v41  ;;  %11845 = vmatmul.mubr.msk.f32.gmra.mxu1 %vm484_vm10, %v4732_v27  ;;  %v12949_v27 = vpack.i.bf16 %v16909_v14, %v4731_v21 }
 0x439   : > { %12935 = vrot.lane.b32.xlu0 %v12934_v60, %s14140_s21  ;;  %v5650_v19 = vsel %vm3638_vm12, %v5618_v42, %v12807_v7  ;;  %v5554_v34 = vsel %vm3638_vm12, %v5522_v45, %v12808_v48  ;;  %v12944_v40 = vpack.i.bf16 %v16907_v20, %v16928_v33  ;;  %v4700_v48 = vld [vmem:[#allocation2 + $0x1d1] sm:$0xff]  ;;  %v4467_v42 = vld [vmem:[#allocation2 + $0x100] sm:$0xff]  ;;  %v12954_v45 = vpack.i.bf16 %v16905_v30, %v4668_v15 }
 0x43a   : > { %12940 = vrot.lane.b32.xlu1 %v12939_v31, %s14139_s29  ;;  %v12816_v51 = vpop.permute.xlu0 %12815  ;;  %v5682_v18 = vsel %vm3671_vm13, %v5650_v19, %v12812_v0  ;;  %v5586_v53 = vsel %vm3671_vm13, %v5554_v34, %v12813_v55  ;;  %v4595_v7 = vld [vmem:[#allocation2 + $0x111] sm:$0xff] }
 0x43b   : > { %v12821_v60 = vpop.permute.xlu1 %12820  ;;  %v12818_v57 = vunpack.i.h.bf16 %v12816_v51  ;;  %v12817_v17 = vunpack.i.l.bf16 %v12816_v51  ;;  %5971 = vmatprep.mubr.f32.mxu0 %v5682_v18  ;;  %v12959_v18 = vpack.i.bf16 %v4667_v41, %v4700_v48  ;;  %v4596_v41 = vld [vmem:[#allocation2 + $0x121] sm:$0xff]  ;;  %v4468_v48 = vld [vmem:[#allocation2 + $0x110] sm:$0xff] }
 0x43c   : > { %v12823_v35 = vunpack.i.h.bf16 %v12821_v60  ;;  %v12822_v5 = vunpack.i.l.bf16 %v12821_v60  ;;  %5972 = vmatmul.mubr.f32.gmra.mxu0 %v5586_v53 }
 0x43d   : > { %12945 = vrot.lane.b32.xlu0 %v12944_v40, %s14141_s28  ;;  %v5619_v0 = vsel %vm484_vm10, %v4595_v7, %v12817_v17  ;;  %v5523_v31 = vsel %vm484_vm10, %v4467_v42, %v12818_v57 }
 0x43e   : > { %12950 = vrot.lane.b32.xlu1 %v12949_v27, %s14140_s21  ;;  %v12826_v55 = vpop.permute.xlu0 %12825  ;;  %v5651_v21 = vsel %vm3638_vm12, %v5619_v0, %v12822_v5  ;;  %v5555_v60 = vsel %vm3638_vm12, %v5523_v31, %v12823_v35 }
 0x43f   : > { %v12831_v19 = vpop.permute.xlu1 %12830  ;;  %v12828_v34 = vunpack.i.h.bf16 %v12826_v55  ;;  %v12827_v51 = vunpack.i.l.bf16 %v12826_v55 }
 0x440   : > { %v12833_v40 = vunpack.i.h.bf16 %v12831_v19  ;;  %v12832_v53 = vunpack.i.l.bf16 %v12831_v19 }
 0x441   : > { %12955 = vrot.lane.b32.xlu0 %v12954_v45, %s14139_s29  ;;  %v5683_v17 = vsel %vm3671_vm13, %v5651_v21, %v12827_v51  ;;  %v5587_v57 = vsel %vm3671_vm13, %v5555_v60, %v12828_v34  ;;  %v11793_v34 = vpop.f32.mrf.mxu0 }
 0x442   : > { %12960 = vrot.lane.b32.xlu1 %v12959_v18, %s14141_s28  ;;  %v12836_v27 = vpop.permute.xlu0 %12835  ;;  %5976 = vmatprep.mubr.f32.mxu0 %v5683_v17  ;;  %v5620_v5 = vsel %vm484_vm10, %v4596_v41, %v12832_v53  ;;  %v5524_v35 = vsel %vm484_vm10, %v4468_v48, %v12833_v40  ;;  %v4509_v40 = vld [vmem:[#allocation2 + $0x1e1] sm:$0xff] }
 0x443   : > { %v12841_v30 = vpop.permute.xlu1 %12840  ;;  %v12838_v15 = vunpack.i.h.bf16 %v12836_v27  ;;  %v12837_v7 = vunpack.i.l.bf16 %v12836_v27  ;;  %5977 = vmatmul.mubr.f32.gmra.mxu0 %v5587_v57  ;;  %v4350_v21 = vpop.f32.mrf.mxu0 }
 0x444   : > { %v12843_v42 = vunpack.i.h.bf16 %v12841_v30  ;;  %v12842_v55 = vunpack.i.l.bf16 %v12841_v30 }
 0x445   : > { %v5652_v0 = vsel %vm3638_vm12, %v5620_v5, %v12837_v7  ;;  %v5556_v31 = vsel %vm3638_vm12, %v5524_v35, %v12838_v15 }
 0x446   : > { %v5684_v45 = vsel %vm3671_vm13, %v5652_v0, %v12842_v55  ;;  %v5588_v19 = vsel %vm3671_vm13, %v5556_v31, %v12843_v42  ;;  %v4469_v55 = vld [vmem:[#allocation2 + $0x140] sm:$0xff] }
 0x447   : > { %5981 = vmatprep.mubr.f32.mxu0 %v5684_v45 }
 0x448   : > { %5982 = vmatmul.mubr.f32.gmra.mxu0 %v5588_v19 }
 0x44d   : > { %v4125_v51 = vpop.f32.mrf.mxu1 }
 0x44e   : > { %v4126_v18 = vadd.f32 %v16690_v54, %v4125_v51  ;;  %v16969_v51 = vpop.f32.mrf.mxu0 }
 0x44f   : > { %v4127_v60 = vpop.f32.mrf.mxu1 }
 0x450   : > { %v4351_v17 = vadd.f32 %v4350_v21, %v4126_v18  ;;  %v12846_v57 = vpop.permute.xlu0 %12845 }
 0x451   : > { %v12847_v15 = vunpack.i.l.bf16 %v12846_v57  ;;  %v12848_v41 = vunpack.i.h.bf16 %v12846_v57 }
 0x452   : > { %v4413_v53 = vmax.f32 %v4351_v17, 0.0 }
 0x453   : > { %v5621_v19 = vsel %vm484_vm10, %v16737_v62, %v12847_v15  ;;  %v5525_v17 = vsel %vm484_vm10, %v4469_v55, %v12848_v41 }
 0x454   : > { %4445 = vst.msk [vmem:[#allocation2 + $0x1f1] sm:$0xff] %vm484_vm10, %v4413_v53 }
 0x45b   : > { %v16962_v27 = vld [vmem:[#allocation2 + $0x1f2] sm:$0xff] }
 0x45c   : > { %v12964_v30 = vpack.i.bf16 %v4509_v40, %v16962_v27 }
 0x45e   : > { %12965 = vrot.lane.b32.xlu0 %v12964_v30, %s14140_s21 }
 0x45f   : > { %v4130_v7 = vpop.f32.mrf.mxu1 }
 0x460   : > { %v4131_v48 = vadd.f32 %v16690_v54, %v4130_v7  ;;  %v4360_v7 = vpop.f32.mrf.mxu0 }
 0x461   : > { %v4132_v42 = vpop.f32.mrf.mxu1 }
 0x462   : > { %v4356_v5 = vadd.f32 %v11793_v34, %v4131_v48  ;;  %v12851_v35 = vpop.permute.xlu1 %12850 }
 0x463   : > { %v12853_v0 = vunpack.i.h.bf16 %v12851_v35  ;;  %v12852_v31 = vunpack.i.l.bf16 %v12851_v35  ;;  %v12856_v45 = vpop.permute.xlu0 %12855 }
 0x464   : > { %v4414_v18 = vmax.f32 %v4356_v5, 0.0  ;;  %v12858_v21 = vunpack.i.h.bf16 %v12856_v45  ;;  %v12857_v60 = vunpack.i.l.bf16 %v12856_v45 }
 0x465   : > { %v5653_v53 = vsel %vm3638_vm12, %v5621_v19, %v12852_v31  ;;  %v5557_v40 = vsel %vm3638_vm12, %v5525_v17, %v12853_v0 }
 0x466   : > { %4446 = vst.msk [vmem:[#allocation2 + $0x201] sm:$0xff] %vm484_vm10, %v4414_v18  ;;  %v4135_v34 = vpop.f32.mrf.mxu1  ;;  %v5685_v57 = vsel %vm3671_vm13, %v5653_v53, %v12857_v60  ;;  %v5589_v30 = vsel %vm3671_vm13, %v5557_v40, %v12858_v21  ;;  %v4541_v53 = vld [vmem:[#allocation2 + $0x1e2] sm:$0xff] }
 0x467   : > { %v4136_v62 = vadd.f32 %v16690_v54, %v4135_v34  ;;  %v12861_v15 = vpop.permute.xlu1 %12860  ;;  %5986 = vmatprep.mubr.f32.mxu0 %v5685_v57 }
 0x468   : > { %v12863_v48 = vunpack.i.h.bf16 %v12861_v15  ;;  %v12862_v42 = vunpack.i.l.bf16 %v12861_v15  ;;  %v4137_v5 = vpop.f32.mrf.mxu1  ;;  %5987 = vmatmul.mubr.f32.gmra.mxu0 %v5589_v30 }
 0x469   : > { %v4361_v41 = vadd.f32 %v4360_v7, %v4136_v62  ;;  %v12866_v55 = vpop.permute.xlu0 %12865  ;;  %v4510_v7 = vld [vmem:[#allocation2 + $0x1f1] sm:$0xff] }
 0x46a   : > { %v12868_v35 = vunpack.i.h.bf16 %v12866_v55  ;;  %v12867_v0 = vunpack.i.l.bf16 %v12866_v55  ;;  %v5622_v19 = vsel %vm484_vm10, %v16719_v24, %v12862_v42  ;;  %v5526_v18 = vsel %vm484_vm10, %v16717_v26, %v12863_v48  ;;  %v4573_v24 = vld [vmem:[#allocation2 + $0x1f0] sm:$0xff] }
 0x46b   : > { %v4415_v31 = vmax.f32 %v4361_v41, 0.0  ;;  %v12871_v45 = vpop.permute.xlu1 %12870 }
 0x46c   : > { %v12873_v54 = vunpack.i.h.bf16 %v12871_v45  ;;  %v12872_v21 = vunpack.i.l.bf16 %v12871_v45  ;;  %v5654_v60 = vsel %vm3638_vm12, %v5622_v19, %v12867_v0  ;;  %v5558_v17 = vsel %vm3638_vm12, %v5526_v18, %v12868_v35 }
 0x46d   : > { %4447 = vst.msk [vmem:[#allocation2 + $0x211] sm:$0xff] %vm484_vm10, %v4415_v31  ;;  %v16985_v40 = vld [vmem:[#allocation2 + $0x202] sm:$0xff]  ;;  %v12876_v31 = vpop.permute.xlu0 %12875 }
 0x46e   : > { %v4669_v34 = vld [vmem:[#allocation2 + $0x200] sm:$0xff]  ;;  %v5686_v30 = vsel %vm3671_vm13, %v5654_v60, %v12872_v21  ;;  %11847 = vmatprep.mubr.msk.f32.mxu1 %vm484_vm10, %v16985_v40  ;;  %v5590_v26 = vsel %vm3671_vm13, %v5558_v17, %v12873_v54  ;;  %v12979_v48 = vpack.i.bf16 %v4510_v7, %v16985_v40  ;;  %v12878_v19 = vunpack.i.h.bf16 %v12876_v31 }
 0x46f   : > { %v4701_v57 = vld [vmem:[#allocation2 + $0x201] sm:$0xff]  ;;  %5991 = vmatprep.mubr.f32.mxu0 %v5686_v30  ;;  %v12969_v62 = vpack.i.bf16 %v4541_v53, %v4669_v34  ;;  %v12877_v18 = vunpack.i.l.bf16 %v12876_v31  ;;  %v17013_v54 = vld [vmem:[%s19686_s4] ss:$0 sm:$0xff] }
 0x470   : > { %v12974_v15 = vpack.i.bf16 %v4573_v24, %v4701_v57  ;;  %5992 = vmatmul.mubr.f32.gmra.mxu0 %v5590_v26  ;;  %v4471_v24 = vld [vmem:[#allocation2 + $0x160] sm:$0xff] }
 0x471   : > { %12970 = vrot.lane.b32.xlu1 %v12969_v62, %s14139_s29  ;;  %v17017_v62 = vpop.f32.mrf.mxu0  ;;  %v5623_v7 = vsel %vm484_vm10, %v16745_v50, %v12877_v18 }
 0x472   : > { %12975 = vrot.lane.b32.xlu0 %v12974_v15, %s14141_s28 }
 0x474   : > { %v16994_v42 = vld [vmem:[#allocation2 + $0x212] sm:$0xff] }
 0x475   : > { %v16996_v5 = vld [vmem:[#allocation2 + $0x210] sm:$0xff]  ;;  %12980 = vrot.lane.b32.xlu1 %v12979_v48, %s14140_s21  ;;  %11848 = vmatmul.mubr.msk.f32.gmra.mxu1 %vm484_vm10, %v16994_v42  ;;  %v12994_v0 = vpack.i.bf16 %v4701_v57, %v16994_v42  ;;  %v5527_v48 = vsel %vm484_vm10, %v4471_v24, %v12878_v19 }
 0x476   : > { %v16998_v41 = vld [vmem:[#allocation2 + $0x211] sm:$0xff]  ;;  %v12984_v55 = vpack.i.bf16 %v16962_v27, %v16996_v5 }
 0x477   : > { %v12989_v35 = vpack.i.bf16 %v4669_v34, %v16998_v41  ;;  %v11250_v19 = vld [vmem:[%s19685_s3 + $0x2b0] sm:$0xff] }
 0x478   : > { %12985 = vrot.lane.b32.xlu0 %v12984_v55, %s14139_s29  ;;  %v11251_v55 = vld [vmem:[%s19685_s3 + $0x2b8] sm:$0xff] }
 0x479   : > { %12990 = vrot.lane.b32.xlu1 %v12989_v35, %s14141_s28  ;;  %7810 = vmatpush1.msra.mxu0 %v11251_v55 }
 0x47a   : > { %12038 = vmatpush1.msra.mxu1 %v11251_v55  ;;  %7811 = vmatprep.subr.mxu0 %v19827_v47 }
 0x47b   : > { %12007 = vmatprep.subr.mxu1 %v19827_v47  ;;  %7812 = vmatpush1.msra.mxu0 %v11250_v19 }
 0x47c   : > { %12995 = vrot.lane.b32.xlu0 %v12994_v0, %s14140_s21  ;;  %7813 = vmatprep.subr.mxu0 %v19827_v47 }
 0x47d   : > { %12039 = vmatpush1.msra.mxu1 %v11250_v19 }
 0x47e   : > { %12008 = vmatprep.subr.mxu1 %v19827_v47 }
 0x47f   : > { %v4140_v45 = vpop.f32.mrf.mxu1 }
 0x480   : > { %v4141_v27 = vadd.f32 %v17013_v54, %v4140_v45 }
 0x481   : > { %v4142_v21 = vpop.f32.mrf.mxu1 }
 0x482   : > { %v4366_v60 = vadd.f32 %v16969_v51, %v4141_v27 }
 0x483   : > { %v12881_v17 = vpop.permute.xlu1 %12880 }
 0x484   : > { %v12886_v53 = vpop.permute.xlu0 %12885  ;;  %v12883_v34 = vunpack.i.h.bf16 %v12881_v17  ;;  %v12882_v57 = vunpack.i.l.bf16 %v12881_v17  ;;  %v4416_v15 = vmax.f32 %v4366_v60, 0.0  ;;  %v4370_v60 = vpop.f32.mrf.mxu0 }
 0x485   : > { %v12888_v30 = vunpack.i.h.bf16 %v12886_v53  ;;  %v12887_v26 = vunpack.i.l.bf16 %v12886_v53  ;;  %v11249_v53 = vld [vmem:[%s19685_s3 + $0x2a8] sm:$0xff] }
 0x486   : > { %v5655_v51 = vsel %vm3638_vm12, %v5623_v7, %v12882_v57  ;;  %v5559_v35 = vsel %vm3638_vm12, %v5527_v48, %v12883_v34  ;;  %4448 = vst.msk [vmem:[#allocation2 + $0x221] sm:$0xff] %vm484_vm10, %v4416_v15  ;;  %v4145_v0 = vpop.f32.mrf.mxu1  ;;  %7814 = vmatpush1.msra.mxu0 %v11249_v53  ;;  %v4472_v7 = vld [vmem:[#allocation2 + $0x170] sm:$0xff]  ;;  %v11248_v48 = vld [vmem:[%s19685_s3 + $0x2a0] sm:$0xff]  ;;  %12040 = vmatpush1.msra.mxu1 %v11249_v53 }
 0x487   : > { %v12891_v31 = vpop.permute.xlu1 %12890  ;;  %v5687_v45 = vsel %vm3671_vm13, %v5655_v51, %v12887_v26  ;;  %v5591_v50 = vsel %vm3671_vm13, %v5559_v35, %v12888_v30  ;;  %v4146_v18 = vadd.f32 %v17013_v54, %v4145_v0  ;;  %7815 = vmatprep.subr.mxu0 %v19827_v47  ;;  %12009 = vmatprep.subr.mxu1 %v19827_v47  ;;  %v11246_v53 = vld [vmem:[%s19685_s3 + $0x290] sm:$0xff] }
 0x488   : > { %v12893_v27 = vunpack.i.h.bf16 %v12891_v31  ;;  %v12892_v21 = vunpack.i.l.bf16 %v12891_v31  ;;  %5996 = vmatprep.mubr.f32.mxu0 %v5687_v45  ;;  %v4147_v17 = vpop.f32.mrf.mxu1  ;;  %7816 = vmatpush1.msra.mxu0 %v11248_v48  ;;  %v11247_v45 = vld [vmem:[%s19685_s3 + $0x298] sm:$0xff] }
 0x489   : > { %5997 = vmatmul.mubr.f32.gmra.mxu0 %v5591_v50  ;;  %v4371_v34 = vadd.f32 %v4370_v60, %v4146_v18  ;;  %7817 = vmatprep.subr.mxu0 %v19827_v47 }
 0x48a   : > { %v12896_v57 = vpop.permute.xlu0 %12895  ;;  %v5624_v15 = vsel %vm484_vm10, %v16815_v37, %v12892_v21  ;;  %v5528_v0 = vsel %vm484_vm10, %v4472_v7, %v12893_v27  ;;  %7818 = vmatpush1.msra.mxu0 %v11247_v45  ;;  %12041 = vmatpush1.msra.mxu1 %v11248_v48  ;;  %v11242_v7 = vld [vmem:[%s19685_s3 + $0x270] sm:$0xff] }
 0x48b   : > { %v12898_v30 = vunpack.i.h.bf16 %v12896_v57  ;;  %v12897_v26 = vunpack.i.l.bf16 %v12896_v57  ;;  %v12901_v24 = vpop.permute.xlu1 %12900  ;;  %v4417_v55 = vmax.f32 %v4371_v34, 0.0  ;;  %7819 = vmatprep.subr.mxu0 %v19827_v47  ;;  %v11245_v34 = vld [vmem:[%s19685_s3 + $0x288] sm:$0xff]  ;;  %12010 = vmatprep.subr.mxu1 %v19827_v47  ;;  %v11243_v57 = vld [vmem:[%s19685_s3 + $0x278] sm:$0xff] }
 0x48c   : > { %v12903_v51 = vunpack.i.h.bf16 %v12901_v24  ;;  %v12902_v35 = vunpack.i.l.bf16 %v12901_v24  ;;  %7820 = vmatpush1.msra.mxu0 %v11246_v53  ;;  %12042 = vmatpush1.msra.mxu1 %v11247_v45 }
 0x48d   : > { %v5656_v31 = vsel %vm3638_vm12, %v5624_v15, %v12897_v26  ;;  %v5560_v37 = vsel %vm3638_vm12, %v5528_v0, %v12898_v30  ;;  %4449 = vst.msk [vmem:[#allocation2 + $0x231] sm:$0xff] %vm484_vm10, %v4417_v55  ;;  %v17057_v19 = vld [vmem:[#allocation2 + $0x222] sm:$0xff]  ;;  %7821 = vmatprep.subr.mxu0 %v19827_v47  ;;  %12011 = vmatprep.subr.mxu1 %v19827_v47  ;;  %v17118_v0 = vld [vmem:[%s19685_s3 + $0x258] sm:$0xff] }
 0x48e   : > { %v5688_v50 = vsel %vm3671_vm13, %v5656_v31, %v12902_v35  ;;  %v5592_v18 = vsel %vm3671_vm13, %v5560_v37, %v12903_v51  ;;  %v4671_v27 = vld [vmem:[#allocation2 + $0x220] sm:$0xff]  ;;  %11850 = vmatprep.mubr.msk.f32.mxu1 %vm484_vm10, %v17057_v19  ;;  %7822 = vmatpush1.msra.mxu0 %v11245_v34  ;;  %v12906_v55 = vpop.permute.xlu0 %12905 }
 0x48f   : > { %v4703_v21 = vld [vmem:[#allocation2 + $0x221] sm:$0xff]  ;;  %6001 = vmatprep.mubr.f32.mxu0 %v5688_v50  ;;  %v12999_v60 = vpack.i.bf16 %v16985_v40, %v4671_v27  ;;  %v13009_v40 = vpack.i.bf16 %v16998_v41, %v17057_v19  ;;  %7823 = vmatprep.subr.mxu0 %v19827_v47  ;;  %v12908_v31 = vunpack.i.h.bf16 %v12906_v55  ;;  %v12907_v37 = vunpack.i.l.bf16 %v12906_v55 }
 0x490   : > { %v13004_v17 = vpack.i.bf16 %v16996_v5, %v4703_v21  ;;  %6002 = vmatmul.mubr.f32.gmra.mxu0 %v5592_v18  ;;  %v11244_v5 = vld [vmem:[%s19685_s3 + $0x280] sm:$0xff]  ;;  %12043 = vmatpush1.msra.mxu1 %v11246_v53  ;;  %v17126_v18 = vld [vmem:[%s19685_s3 + $0x250] sm:$0xff] }
 0x491   : > { %13000 = vrot.lane.b32.xlu1 %v12999_v60, %s14139_s29  ;;  %7824 = vmatpush1.msra.mxu0 %v11244_v5  ;;  %v11240_v51 = vld [vmem:[%s19685_s3 + $0x260] sm:$0xff] }
 0x492   : > { %13005 = vrot.lane.b32.xlu0 %v13004_v17, %s14141_s28  ;;  %7825 = vmatprep.subr.mxu0 %v19827_v47 }
 0x493   : > { %7826 = vmatpush1.msra.mxu0 %v11243_v57  ;;  %12012 = vmatprep.subr.mxu1 %v19827_v47 }
 0x494   : > { %v17085_v30 = vld [vmem:[#allocation2 + $0x232] sm:$0xff]  ;;  %7827 = vmatprep.subr.mxu0 %v19827_v47  ;;  %12044 = vmatpush1.msra.mxu1 %v11245_v34 }
 0x495   : > { %13010 = vrot.lane.b32.xlu1 %v13009_v40, %s14140_s21  ;;  %v17087_v26 = vld [vmem:[#allocation2 + $0x230] sm:$0xff]  ;;  %11851 = vmatmul.mubr.msk.f32.gmra.mxu1 %vm484_vm10, %v17085_v30  ;;  %v13024_v48 = vpack.i.bf16 %v4703_v21, %v17085_v30 }
 0x496   : > { %v17089_v41 = vld [vmem:[#allocation2 + $0x231] sm:$0xff]  ;;  %v13014_v24 = vpack.i.bf16 %v16994_v42, %v17087_v26  ;;  %v11241_v42 = vld [vmem:[%s19685_s3 + $0x268] sm:$0xff]  ;;  %7828 = vmatpush1.msra.mxu0 %v11242_v7  ;;  %12013 = vmatprep.subr.mxu1 %v19827_v47 }
 0x497   : > { %v13019_v15 = vpack.i.bf16 %v4671_v27, %v17089_v41  ;;  %7829 = vmatprep.subr.mxu0 %v19827_v47  ;;  %12045 = vmatpush1.msra.mxu1 %v11244_v5  ;;  %v17135_v5 = vld [vmem:[%s19685_s3 + $0x248] sm:$0xff] }
 0x498   : > { %13015 = vrot.lane.b32.xlu0 %v13014_v24, %s14139_s29  ;;  %7830 = vmatpush1.msra.mxu0 %v11241_v42 }
 0x499   : > { %13020 = vrot.lane.b32.xlu1 %v13019_v15, %s14141_s28  ;;  %7831 = vmatprep.subr.mxu0 %v19827_v47  ;;  %v5625_v15 = vsel %vm484_vm10, %v16839_v1, %v12907_v37 }
 0x49a   : > { %7832 = vmatpush1.msra.mxu0 %v11240_v51  ;;  %12014 = vmatprep.subr.mxu1 %v19827_v47 }
 0x49b   : > { %7833 = vmatprep.subr.mxu0 %v19827_v47  ;;  %12046 = vmatpush1.msra.mxu1 %v11243_v57  ;;  %v5529_v57 = vsel %vm484_vm10, %v16813_v13, %v12908_v31  ;;  %v17154_v13 = vld [vmem:[%s19685_s3 + $0x240] sm:$0xff] }
 0x49c   : > { %13025 = vrot.lane.b32.xlu0 %v13024_v48, %s14140_s21  ;;  %v4150_v35 = vpop.f32.mrf.mxu1  ;;  %7834 = vmatpush1.msra.mxu0 %v17118_v0 }
 0x49d   : > { %v4151_v45 = vadd.f32 %v17013_v54, %v4150_v35  ;;  %7835 = vmatprep.subr.mxu0 %v19827_v47  ;;  %12015 = vmatprep.subr.mxu1 %v19827_v47 }
 0x49e   : > { %v4152_v50 = vpop.f32.mrf.mxu1  ;;  %7836 = vmatpush1.msra.mxu0 %v17126_v18  ;;  %12047 = vmatpush1.msra.mxu1 %v11242_v7 }
 0x49f   : > { %v4376_v27 = vadd.f32 %v17017_v62, %v4151_v45  ;;  %v11802_v62 = vpop.f32.mrf.mxu0  ;;  %7837 = vmatprep.subr.mxu0 %v19827_v47  ;;  %12016 = vmatprep.subr.mxu1 %v19827_v47 }
 0x4a0   : > { %v12911_v21 = vpop.permute.xlu1 %12910  ;;  %7838 = vmatpush1.msra.mxu0 %v17135_v5  ;;  %12048 = vmatpush1.msra.mxu1 %v11241_v42 }
 0x4a1   : > { %v12916_v60 = vpop.permute.xlu0 %12915  ;;  %v12913_v17 = vunpack.i.h.bf16 %v12911_v21  ;;  %v12912_v53 = vunpack.i.l.bf16 %v12911_v21  ;;  %v4418_v24 = vmax.f32 %v4376_v27, 0.0  ;;  %7839 = vmatprep.subr.mxu0 %v19827_v47  ;;  %v4380_v27 = vpop.f32.mrf.mxu0  ;;  %12017 = vmatprep.subr.mxu1 %v19827_v47 }
 0x4a2   : > { %v12918_v34 = vunpack.i.h.bf16 %v12916_v60  ;;  %v12917_v40 = vunpack.i.l.bf16 %v12916_v60  ;;  %v17161_v60 = vld [vmem:[%s19685_s3 + $0x338] sm:$0xff]  ;;  %7840 = vmatpush1.msra.mxu0 %v17154_v13  ;;  %12049 = vmatpush1.msra.mxu1 %v11240_v51 }
 0x4a3   : > { %v5657_v48 = vsel %vm3638_vm12, %v5625_v15, %v12912_v53  ;;  %v5561_v55 = vsel %vm3638_vm12, %v5529_v57, %v12913_v17  ;;  %4450 = vst.msk [vmem:[#allocation2 + $0x241] sm:$0xff] %vm484_vm10, %v4418_v24  ;;  %v4155_v35 = vpop.f32.mrf.mxu1  ;;  %7841 = vmatprep.subr.mxu0 %v19827_v47  ;;  %v17171_v15 = vld [vmem:[%s19685_s3 + $0x330] sm:$0xff]  ;;  %12018 = vmatprep.subr.mxu1 %v19827_v47 }
 0x4a4   : > { %v12921_v45 = vpop.permute.xlu1 %12920  ;;  %v5689_v1 = vsel %vm3671_vm13, %v5657_v48, %v12917_v40  ;;  %v5593_v37 = vsel %vm3671_vm13, %v5561_v55, %v12918_v34  ;;  %v4156_v7 = vadd.f32 %v17013_v54, %v4155_v35  ;;  %7842 = vmatpush2.msra.mxu0 %v17161_v60  ;;  %12050 = vmatpush1.msra.mxu1 %v17118_v0 }
 0x4a5   : > { %v12923_v31 = vunpack.i.h.bf16 %v12921_v45  ;;  %v12922_v50 = vunpack.i.l.bf16 %v12921_v45  ;;  %6006 = vmatprep.mubr.f32.mxu0 %v5689_v1  ;;  %v4157_v21 = vpop.f32.mrf.mxu1  ;;  %7843 = vmatprep.subr.mxu0 %v19827_v47 }
 0x4a6   : > { %6007 = vmatmul.mubr.f32.gmra.mxu0 %v5593_v37  ;;  %v4381_v17 = vadd.f32 %v4380_v27, %v4156_v7  ;;  %v17185_v37 = vld [vmem:[%s19685_s3 + $0x328] sm:$0xff]  ;;  %12019 = vmatprep.subr.mxu1 %v19827_v47 }
 0x4a7   : > { %v12926_v53 = vpop.permute.xlu0 %12925  ;;  %v5626_v24 = vsel %vm484_vm10, %v16885_v59, %v12922_v50  ;;  %v5530_v51 = vsel %vm484_vm10, %v16836_v3, %v12923_v31  ;;  %7844 = vmatpush2.msra.mxu0 %v17171_v15  ;;  %12051 = vmatpush1.msra.mxu1 %v17126_v18  ;;  %v17209_v18 = vld [vmem:[%s19685_s3 + $0x320] sm:$0xff] }
 0x4a8   : > { %v12928_v42 = vunpack.i.h.bf16 %v12926_v53  ;;  %v12927_v34 = vunpack.i.l.bf16 %v12926_v53  ;;  %v12931_v40 = vpop.permute.xlu1 %12930  ;;  %v4419_v57 = vmax.f32 %v4381_v17, 0.0  ;;  %v4160_v35 = vpop.f32.mrf.mxu1  ;;  %7845 = vmatprep.subr.mxu0 %v19827_v47  ;;  %12020 = vmatprep.subr.mxu1 %v19827_v47 }
 0x4a9   : > { %v12933_v48 = vunpack.i.h.bf16 %v12931_v40  ;;  %v12932_v55 = vunpack.i.l.bf16 %v12931_v40  ;;  %v4161_v59 = vadd.f32 %v17013_v54, %v4160_v35  ;;  %7846 = vmatpush2.msra.mxu0 %v17185_v37  ;;  %12052 = vmatpush1.msra.mxu1 %v17135_v5 }
 0x4aa   : > { %v5658_v45 = vsel %vm3638_vm12, %v5626_v24, %v12927_v34  ;;  %v5562_v1 = vsel %vm3638_vm12, %v5530_v51, %v12928_v42  ;;  %4451 = vst.msk [vmem:[#allocation2 + $0x251] sm:$0xff] %vm484_vm10, %v4419_v57  ;;  %v4162_v3 = vpop.f32.mrf.mxu1  ;;  %v17189_v0 = vld [vmem:[#allocation2 + $0x242] sm:$0xff]  ;;  %7847 = vmatprep.subr.mxu0 %v19827_v47  ;;  %v17229_v51 = vld [vmem:[%s19685_s3 + $0x318] sm:$0xff]  ;;  %12021 = vmatprep.subr.mxu1 %v19827_v47 }
 0x4ab   : > { %v12936_v7 = vpop.permute.xlu0 %12935  ;;  %v5690_v54 = vsel %vm3671_vm13, %v5658_v45, %v12932_v55  ;;  %v5594_v31 = vsel %vm3671_vm13, %v5562_v1, %v12933_v48  ;;  %v17193_v50 = vld [vmem:[#allocation2 + $0x240] sm:$0xff]  ;;  %v4386_v21 = vadd.f32 %v11802_v62, %v4161_v59  ;;  %11853 = vmatprep.mubr.msk.f32.mxu1 %vm484_vm10, %v17189_v0  ;;  %v13039_v1 = vpack.i.bf16 %v17089_v41, %v17189_v0 }
 0x4ac   : > { %v17195_v27 = vld [vmem:[#allocation2 + $0x241] sm:$0xff]  ;;  %v12938_v17 = vunpack.i.h.bf16 %v12936_v7  ;;  %v12937_v53 = vunpack.i.l.bf16 %v12936_v7  ;;  %6011 = vmatprep.mubr.f32.mxu0 %v5690_v54  ;;  %v13029_v42 = vpack.i.bf16 %v17057_v19, %v17193_v50  ;;  %v12941_v34 = vpop.permute.xlu1 %12940  ;;  %v17211_v48 = vpop.f32.mrf.mxu1  ;;  %7848 = vmatpush2.msra.mxu0 %v17209_v18 }
 0x4ad   : > { %6012 = vmatmul.mubr.f32.gmra.mxu0 %v5594_v31  ;;  %v13034_v40 = vpack.i.bf16 %v17087_v26, %v17195_v27  ;;  %v4420_v62 = vmax.f32 %v4386_v21, 0.0  ;;  %v12943_v24 = vunpack.i.h.bf16 %v12941_v34  ;;  %v12942_v57 = vunpack.i.l.bf16 %v12941_v34  ;;  %v17217_v19 = vld [vmem:[%s19686_s4 + $0x1] ss:$0 sm:$0xff]  ;;  %7849 = vmatprep.subr.mxu0 %v19827_v47  ;;  %v17243_v31 = vld [vmem:[%s19685_s3 + $0x310] sm:$0xff] }
 0x4ae   : > { %13030 = vrot.lane.b32.xlu1 %v13029_v42, %s14139_s29  ;;  %v5627_v26 = vsel %vm484_vm10, %v16909_v14, %v12937_v53  ;;  %v5531_v35 = vsel %vm484_vm10, %v16883_v12, %v12938_v17  ;;  %v6133_v41 = vpop.f32.mrf.mxu1  ;;  %7850 = vmatpush2.msra.mxu0 %v17229_v51 }
 0x4af   : > { %13035 = vrot.lane.b32.xlu0 %v13034_v40, %s14141_s28  ;;  %v12946_v55 = vpop.permute.xlu0 %12945  ;;  %4452 = vst.msk [vmem:[#allocation2 + $0x261] sm:$0xff] %vm484_vm10, %v4420_v62  ;;  %v5908_v14 = vpop.f32.mrf.mxu0  ;;  %v5659_v7 = vsel %vm3638_vm12, %v5627_v26, %v12942_v57  ;;  %v5563_v54 = vsel %vm3638_vm12, %v5531_v35, %v12943_v24  ;;  %7851 = vmatprep.subr.mxu0 %v19827_v47 }
 0x4b0   : > { %v12948_v59 = vunpack.i.h.bf16 %v12946_v55  ;;  %v12947_v45 = vunpack.i.l.bf16 %v12946_v55  ;;  %v5909_v12 = vadd.f32 %v17217_v19, %v5908_v14  ;;  %v12951_v3 = vpop.permute.xlu1 %12950  ;;  %7852 = vmatpush2.msra.mxu0 %v17243_v31  ;;  %12053 = vmatpush1.msra.mxu1 %v17154_v13 }
 0x4b1   : > { %v12953_v21 = vunpack.i.h.bf16 %v12951_v3  ;;  %v12952_v17 = vunpack.i.l.bf16 %v12951_v3  ;;  %v5910_v53 = vpop.f32.mrf.mxu0  ;;  %v17247_v42 = vld [vmem:[#allocation2 + $0x252] sm:$0xff]  ;;  %7853 = vmatprep.subr.mxu0 %v19827_v47  ;;  %12022 = vmatprep.subr.mxu1 %v19827_v47 }
 0x4b2   : > { %13040 = vrot.lane.b32.xlu1 %v13039_v1, %s14140_s21  ;;  %v5691_v34 = vsel %vm3671_vm13, %v5659_v7, %v12947_v45  ;;  %v5595_v40 = vsel %vm3671_vm13, %v5563_v54, %v12948_v59  ;;  %v4674_v62 = vld [vmem:[#allocation2 + $0x250] sm:$0xff]  ;;  %v6134_v57 = vadd.f32 %v6133_v41, %v5909_v12  ;;  %11854 = vmatmul.mubr.msk.f32.gmra.mxu1 %vm484_vm10, %v17247_v42  ;;  %v17263_v59 = vld [vmem:[%s19685_s3 + $0x308] sm:$0xff]  ;;  %v19832_v53 = vmax.f32 %v15030_v49, 0.0 }
 0x4b3   : > { %v17251_v24 = vld [vmem:[#allocation2 + $0x251] sm:$0xff]  ;;  %v12956_v5 = vpop.permute.xlu0 %12955  ;;  %6016 = vmatprep.mubr.f32.mxu0 %v5691_v34  ;;  %v13044_v26 = vpack.i.bf16 %v17085_v30, %v4674_v62  ;;  %v5628_v30 = vsel %vm484_vm10, %v16928_v33, %v12952_v17  ;;  %7854 = vmatpush2.msra.mxu0 %v17263_v59 }
 0x4b4   : > { %v13049_v55 = vpack.i.bf16 %v17193_v50, %v17251_v24  ;;  %v12958_v35 = vunpack.i.h.bf16 %v12956_v5  ;;  %v12957_v45 = vunpack.i.l.bf16 %v12956_v5  ;;  %6017 = vmatmul.mubr.f32.gmra.mxu0 %v5595_v40  ;;  %v6292_v14 = vmax.f32 %v6134_v57, 0.0  ;;  %v12961_v1 = vpop.permute.xlu1 %12960  ;;  %v5913_v12 = vpop.f32.mrf.mxu0  ;;  %7855 = vmatprep.subr.mxu0 %v19827_v47 }
 0x4b5   : > { %13045 = vrot.lane.b32.xlu0 %v13044_v26, %s14139_s29  ;;  %v5532_v50 = vsel %vm484_vm10, %v16907_v20, %v12953_v21  ;;  %v12963_v3 = vunpack.i.h.bf16 %v12961_v1  ;;  %v12962_v7 = vunpack.i.l.bf16 %v12961_v1  ;;  %v5914_v54 = vadd.f32 %v17217_v19, %v5913_v12  ;;  %v17305_v1 = vld [vmem:[%s19685_s3 + $0x2f8] sm:$0xff]  ;;  %12054 = vmatpush2.msra.mxu1 %v17161_v60 }
 0x4b6   : > { %13050 = vrot.lane.b32.xlu1 %v13049_v55, %s14141_s28  ;;  %v5660_v41 = vsel %vm3638_vm12, %v5628_v30, %v12957_v45  ;;  %v17277_v34 = vadd.f32 %v6292_v14, %v19832_v53  ;;  %v5915_v33 = vpop.f32.mrf.mxu0  ;;  %v4739_v17 = vld [vmem:[#allocation2 + $0x262] sm:$0xff]  ;;  %v13054_v20 = vpack.i.bf16 %v17195_v27, %v17247_v42  ;;  %v5564_v21 = vsel %vm3638_vm12, %v5532_v50, %v12958_v35  ;;  %v4740_v45 = vld [vmem:[#allocation2 + $0x272] sm:$0xff] }
 0x4b7   : > { %v4675_v40 = vld [vmem:[#allocation2 + $0x260] sm:$0xff]  ;;  %v6139_v57 = vadd.f32 %v17211_v48, %v5914_v54  ;;  %v5692_v5 = vsel %vm3671_vm13, %v5660_v41, %v12962_v7  ;;  %11856 = vmatprep.mubr.msk.f32.mxu1 %vm484_vm10, %v4739_v17  ;;  %v5596_v49 = vsel %vm3671_vm13, %v5564_v21, %v12963_v3  ;;  %v11816_v48 = vpop.f32.mrf.mxu1  ;;  %v19834_v12 = vmax.f32 %v15026_v16, 0.0  ;;  %v4676_v7 = vld [vmem:[#allocation2 + $0x270] sm:$0xff]  ;;  %12023 = vmatprep.subr.mxu1 %v19827_v47 }
 0x4b8   : > { %19833 = vst [vmem:[#allocation16_spill] sm:$0xff] %v17277_v34  ;;  %v13059_v26 = vpack.i.bf16 %v17189_v0, %v4675_v40  ;;  %v4707_v55 = vld [vmem:[#allocation2 + $0x261] sm:$0xff]  ;;  %v19756_v27 = vmax.f32 %v17277_v34, 0.0  ;;  %6021 = vmatprep.mubr.f32.mxu0 %v5692_v5  ;;  %11857 = vmatmul.mubr.msk.f32.gmra.mxu1 %vm484_vm10, %v4740_v45  ;;  %v13069_v3 = vpack.i.bf16 %v17251_v24, %v4739_v17  ;;  %v4708_v54 = vld [vmem:[#allocation2 + $0x271] sm:$0xff]  ;;  %v19836_v60 = vmax.f32 %v15088_v29, 0.0 }
 0x4b9   : > { %13055 = vrot.lane.b32.xlu0 %v13054_v20, %s14140_s21  ;;  %v17294_v35 = vld [vmem:[%s19685_s3 + $0x300] sm:$0xff]  ;;  %v6293_v14 = vmax.f32 %v6139_v57, 0.0  ;;  %6022 = vmatmul.mubr.f32.gmra.mxu0 %v5596_v49  ;;  %v13064_v0 = vpack.i.bf16 %v4674_v62, %v4707_v55  ;;  %v17320_v16 = vld [vmem:[%s19685_s3 + $0x2f0] sm:$0xff]  ;;  %v6143_v41 = vpop.f32.mrf.mxu1  ;;  %v13074_v33 = vpack.i.bf16 %v17247_v42, %v4676_v7  ;;  %v17330_v17 = vld [vmem:[%s19685_s3 + $0x2e8] sm:$0xff]  ;;  %v13079_v20 = vpack.i.bf16 %v4675_v40, %v4708_v54 }
 0x4ba   : > { %13060 = vrot.lane.b32.xlu1 %v13059_v26, %s14139_s29  ;;  %6388 = vst.msk [vmem:[#allocation2 + $0x11] sm:$0xff] %vm484_vm10, %v19756_v27  ;;  %7856 = vmatpush2.msra.mxu0 %v17294_v35  ;;  %v6452_v21 = vld [vmem:[#allocation2 + $0x1] sm:$0xff]  ;;  %v19838_v54 = vmax.f32 %v15082_v56, 0.0 }
 0x4bb   : > { %v17309_v30 = vadd.f32 %v6293_v14, %v19834_v12  ;;  %v5918_v50 = vpop.f32.mrf.mxu0  ;;  %7857 = vmatprep.subr.mxu0 %v19827_v47  ;;  %v17343_v5 = vld [vmem:[%s19685_s3 + $0x2e0] sm:$0xff]  ;;  %v17359_v14 = vld [vmem:[%s19685_s3 + $0x2d8] sm:$0xff]  ;;  %12055 = vmatpush2.msra.mxu1 %v17171_v15 }
 0x4bc   : > { %v5919_v62 = vadd.f32 %v17217_v19, %v5918_v50  ;;  %7858 = vmatpush2.msra.mxu0 %v17305_v1  ;;  %v6484_v12 = vld [vmem:[#allocation2 + $0x2] sm:$0xff]  ;;  %v17370_v50 = vld [vmem:[%s19685_s3 + $0x2d0] sm:$0xff]  ;;  %12024 = vmatprep.subr.mxu1 %v19827_v47 }
 0x4bd   : > { %19835 = vst [vmem:[#allocation17_spill] sm:$0xff] %v17309_v30  ;;  %13065 = vrot.lane.b32.xlu0 %v13064_v0, %s14141_s28  ;;  %v19757_v24 = vmax.f32 %v17309_v30, 0.0  ;;  %v5920_v53 = vpop.f32.mrf.mxu0  ;;  %7859 = vmatprep.subr.mxu0 %v19827_v47 }
 0x4be   : > { %13070 = vrot.lane.b32.xlu1 %v13069_v3, %s14140_s21  ;;  %v6144_v13 = vadd.f32 %v6143_v41, %v5919_v62  ;;  %7860 = vmatpush2.msra.mxu0 %v17320_v16  ;;  %v11819_v3 = vpop.f32.mrf.mxu1 }
 0x4bf   : > { %6389 = vst.msk [vmem:[#allocation2 + $0x21] sm:$0xff] %vm484_vm10, %v19757_v24  ;;  %7861 = vmatprep.subr.mxu0 %v19827_v47  ;;  %12056 = vmatpush2.msra.mxu1 %v17185_v37 }
 0x4c0   : > { %v6294_v42 = vmax.f32 %v6144_v13, 0.0  ;;  %v5923_v57 = vpop.f32.mrf.mxu0  ;;  %7862 = vmatpush2.msra.mxu0 %v17330_v17  ;;  %12025 = vmatprep.subr.mxu1 %v19827_v47  ;;  %v6153_v56 = vpop.f32.mrf.mxu1 }
 0x4c1   : > { %13075 = vrot.lane.b32.xlu0 %v13074_v33, %s14139_s29  ;;  %v5924_v49 = vadd.f32 %v17217_v19, %v5923_v57  ;;  %v17347_v40 = vld [vmem:[#allocation2 + $0x12] sm:$0xff]  ;;  %7863 = vmatprep.subr.mxu0 %v19827_v47 }
 0x4c2   : > { %13080 = vrot.lane.b32.xlu1 %v13079_v20, %s14141_s28  ;;  %v17352_v26 = vadd.f32 %v6294_v42, %v19836_v60  ;;  %v5925_v55 = vpop.f32.mrf.mxu0  ;;  %v13084_v45 = vpack.i.bf16 %v6452_v21, %v17347_v40  ;;  %7864 = vmatpush2.msra.mxu0 %v17343_v5  ;;  %v6516_v15 = vld [vmem:[#allocation2 + $0x10] sm:$0xff]  ;;  %v17387_v20 = vld [vmem:[%s19685_s3 + $0x2c8] sm:$0xff] }
 0x4c3   : > { %v6149_v0 = vadd.f32 %v11816_v48, %v5924_v49  ;;  %7865 = vmatprep.subr.mxu0 %v19827_v47  ;;  %v17398_v49 = vld [vmem:[%s19685_s3 + $0x2c0] sm:$0xff]  ;;  %v6453_v55 = vld [vmem:[#allocation2 + $0x11] sm:$0xff]  ;;  %12057 = vmatpush2.msra.mxu1 %v17209_v18 }
 0x4c4   : > { %19837 = vst [vmem:[#allocation18_spill] sm:$0xff] %v17352_v26  ;;  %v19758_v29 = vmax.f32 %v17352_v26, 0.0  ;;  %7866 = vmatpush2.msra.mxu0 %v17359_v14  ;;  %12026 = vmatprep.subr.mxu1 %v19827_v47 }
 0x4c5   : > { %13085 = vrot.lane.b32.xlu0 %v13084_v45, %s14140_s21  ;;  %v6295_v7 = vmax.f32 %v6149_v0, 0.0  ;;  %7867 = vmatprep.subr.mxu0 %v19827_v47 }
 0x4c6   : > { %6390 = vst.msk [vmem:[#allocation2 + $0x31] sm:$0xff] %vm484_vm10, %v19758_v29  ;;  %v6644_v48 = vld [vmem:[#allocation2 + $0x21] sm:$0xff]  ;;  %7868 = vmatpush2.msra.mxu0 %v17370_v50  ;;  %12058 = vmatpush2.msra.mxu1 %v17229_v51 }
 0x4c7   : > { %v6612_v62 = vld [vmem:[#allocation2 + $0x20] sm:$0xff]  ;;  %v17381_v41 = vadd.f32 %v6295_v7, %v19838_v54  ;;  %v5928_v53 = vpop.f32.mrf.mxu0  ;;  %v13094_v13 = vpack.i.bf16 %v6516_v15, %v6644_v48  ;;  %7869 = vmatprep.subr.mxu0 %v19827_v47  ;;  %12027 = vmatprep.subr.mxu1 %v19827_v47  ;;  %v19840_v54 = vmax.f32 %v15167_v23, 0.0 }
 0x4c8   : > { %v13089_v33 = vpack.i.bf16 %v6484_v12, %v6612_v62  ;;  %v5929_v21 = vadd.f32 %v17217_v19, %v5928_v53  ;;  %v6581_v42 = vld [vmem:[#allocation2 + $0x22] sm:$0xff]  ;;  %7870 = vmatpush2.msra.mxu0 %v17387_v20  ;;  %12059 = vmatpush2.msra.mxu1 %v17243_v31 }
 0x4c9   : > { %19839 = vst [vmem:[#allocation19_spill] sm:$0xff] %v17381_v41  ;;  %v19759_v37 = vmax.f32 %v17381_v41, 0.0  ;;  %13095 = vrot.lane.b32.xlu0 %v13094_v13, %s14141_s28  ;;  %v5930_v57 = vpop.f32.mrf.mxu0  ;;  %v13099_v45 = vpack.i.bf16 %v6453_v55, %v6581_v42  ;;  %7871 = vmatprep.subr.mxu0 %v19827_v47 }
 0x4ca   : > { %13090 = vrot.lane.b32.xlu1 %v13089_v33, %s14139_s29  ;;  %v6154_v60 = vadd.f32 %v6153_v56, %v5929_v21  ;;  %7872 = vmatpush2.msra.mxu0 %v17398_v49 }
 0x4cb   : > { %6391 = vst.msk [vmem:[#allocation2 + $0x41] sm:$0xff] %vm484_vm10, %v19759_v37  ;;  %12028 = vmatprep.subr.mxu1 %v19827_v47 }
 0x4cc   : > { %v6296_v0 = vmax.f32 %v6154_v60, 0.0  ;;  %v5933_v12 = vpop.f32.mrf.mxu0  ;;  %12060 = vmatpush2.msra.mxu1 %v17263_v59  ;;  %v11822_v60 = vpop.f32.mrf.mxu1 }
 0x4cd   : > { %v5934_v7 = vadd.f32 %v17217_v19, %v5933_v12  ;;  %v6613_v18 = vld [vmem:[#allocation2 + $0x30] sm:$0xff]  ;;  %12029 = vmatprep.subr.mxu1 %v19827_v47 }
 0x4ce   : > { %13100 = vrot.lane.b32.xlu1 %v13099_v45, %s14140_s21  ;;  %v6645_v15 = vld [vmem:[#allocation2 + $0x31] sm:$0xff]  ;;  %v17414_v53 = vadd.f32 %v6296_v0, %v19840_v54  ;;  %v5935_v13 = vpop.f32.mrf.mxu0  ;;  %v13104_v33 = vpack.i.bf16 %v17347_v40, %v6613_v18  ;;  %12061 = vmatpush2.msra.mxu1 %v17294_v35 }
 0x4cf   : > { %v13109_v21 = vpack.i.bf16 %v6612_v62, %v6645_v15  ;;  %v6159_v56 = vadd.f32 %v11819_v3, %v5934_v7  ;;  %v6582_v51 = vld [vmem:[#allocation2 + $0x32] sm:$0xff]  ;;  %v19842_v3 = vmax.f32 %v15158_v11, 0.0  ;;  %12030 = vmatprep.subr.mxu1 %v19827_v47 }
 0x4d0   : > { %19841 = vst [vmem:[#allocation20_spill] sm:$0xff] %v17414_v53  ;;  %v19760_v57 = vmax.f32 %v17414_v53, 0.0  ;;  %13105 = vrot.lane.b32.xlu0 %v13104_v33, %s14139_s29  ;;  %v13114_v31 = vpack.i.bf16 %v6644_v48, %v6582_v51  ;;  %12062 = vmatpush2.msra.mxu1 %v17305_v1  ;;  %v6163_v48 = vpop.f32.mrf.mxu1 }
 0x4d1   : > { %v6297_v23 = vmax.f32 %v6159_v56, 0.0  ;;  %12031 = vmatprep.subr.mxu1 %v19827_v47 }
 0x4d2   : > { %13110 = vrot.lane.b32.xlu1 %v13109_v21, %s14141_s28  ;;  %6392 = vst.msk [vmem:[#allocation2 + $0x51] sm:$0xff] %vm484_vm10, %v19760_v57  ;;  %v6614_v40 = vld [vmem:[#allocation2 + $0x40] sm:$0xff]  ;;  %12063 = vmatpush2.msra.mxu1 %v17320_v16  ;;  %v19844_v16 = vmax.f32 %v15259_v38, 0.0  ;;  %v17462_v38 = vld [vmem:[%s19685_s3 + $0x358] sm:$0xff] }
 0x4d3   : > { %v17430_v62 = vadd.f32 %v6297_v23, %v19842_v3  ;;  %v5938_v55 = vpop.f32.mrf.mxu0  ;;  %v13119_v59 = vpack.i.bf16 %v6581_v42, %v6614_v40  ;;  %v6646_v45 = vld [vmem:[#allocation2 + $0x41] sm:$0xff]  ;;  %12032 = vmatprep.subr.mxu1 %v19827_v47  ;;  %11859 = vmatprep.subr.mxu0 %v17462_v38 }
 0x4d4   : > { %v5939_v0 = vadd.f32 %v17217_v19, %v5938_v55  ;;  %13115 = vrot.lane.b32.xlu0 %v13114_v31, %s14140_s21  ;;  %v6583_v12 = vld [vmem:[#allocation2 + $0x42] sm:$0xff]  ;;  %v13124_v42 = vpack.i.bf16 %v6613_v18, %v6646_v45  ;;  %12064 = vmatpush2.msra.mxu1 %v17330_v17 }
 0x4d5   : > { %19843 = vst [vmem:[#allocation21_spill] sm:$0xff] %v17430_v62  ;;  %v19761_v7 = vmax.f32 %v17430_v62, 0.0  ;;  %v5940_v35 = vpop.f32.mrf.mxu0  ;;  %v13129_v54 = vpack.i.bf16 %v6645_v15, %v6583_v12  ;;  %12033 = vmatprep.subr.mxu1 %v19827_v47 }
 0x4d6   : > { %13120 = vrot.lane.b32.xlu1 %v13119_v59, %s14139_s29  ;;  %v6164_v11 = vadd.f32 %v6163_v48, %v5939_v0  ;;  %12065 = vmatpush2.msra.mxu1 %v17343_v5  ;;  %v12966_v5 = vpop.permute.xlu0 %12965  ;;  %v19846_v0 = vmax.f32 %v15252_v32, 0.0 }
 0x4d7   : > { %6393 = vst.msk [vmem:[#allocation2 + $0x61] sm:$0xff] %vm484_vm10, %v19761_v7  ;;  %12034 = vmatprep.subr.mxu1 %v19827_v47 }
 0x4d8   : > { %v6298_v1 = vmax.f32 %v6164_v11, 0.0  ;;  %v5943_v13 = vpop.f32.mrf.mxu0  ;;  %13125 = vrot.lane.b32.xlu0 %v13124_v42, %s14141_s28  ;;  %12066 = vmatpush2.msra.mxu1 %v17359_v14 }
 0x4d9   : > { %v5944_v33 = vadd.f32 %v17217_v19, %v5943_v13  ;;  %v6615_v18 = vld [vmem:[#allocation2 + $0x50] sm:$0xff]  ;;  %12035 = vmatprep.subr.mxu1 %v19827_v47  ;;  %v12967_v13 = vunpack.i.l.bf16 %v12966_v5 }
 0x4da   : > { %13130 = vrot.lane.b32.xlu1 %v13129_v54, %s14140_s21  ;;  %v6647_v21 = vld [vmem:[#allocation2 + $0x51] sm:$0xff]  ;;  %v17451_v56 = vadd.f32 %v6298_v1, %v19844_v16  ;;  %v5945_v15 = vpop.f32.mrf.mxu0  ;;  %v13134_v23 = vpack.i.bf16 %v6582_v51, %v6615_v18  ;;  %v11825_v51 = vpop.f32.mrf.mxu1  ;;  %12067 = vmatpush2.msra.mxu1 %v17370_v50  ;;  %v12968_v1 = vunpack.i.h.bf16 %v12966_v5  ;;  %v4477_v16 = vld [vmem:[#allocation2 + $0x1e0] sm:$0xff] }
 0x4db   : > { %v13139_v31 = vpack.i.bf16 %v6614_v40, %v6647_v21  ;;  %v6169_v3 = vadd.f32 %v11822_v60, %v5944_v33  ;;  %v17454_v55 = vld [vmem:[#allocation2 + $0x52] sm:$0xff]  ;;  %12036 = vmatprep.subr.mxu1 %v19827_v47 }
 0x4dc   : > { %19845 = vst [vmem:[#allocation22_spill] sm:$0xff] %v17451_v56  ;;  %v19764_v17 = vmax.f32 %v17451_v56, 0.0  ;;  %13135 = vrot.lane.b32.xlu0 %v13134_v23, %s14139_s29  ;;  %v13144_v60 = vpack.i.bf16 %v6646_v45, %v17454_v55  ;;  %v6173_v45 = vpop.f32.mrf.mxu1  ;;  %12068 = vmatpush2.msra.mxu1 %v17387_v20 }
 0x4dd   : > { %v6299_v40 = vmax.f32 %v6169_v3, 0.0  ;;  %12037 = vmatprep.subr.mxu1 %v19827_v47 }
 0x4de   : > { %13140 = vrot.lane.b32.xlu1 %v13139_v31, %s14141_s28  ;;  %6394 = vst.msk [vmem:[#allocation2 + $0x71] sm:$0xff] %vm484_vm10, %v19764_v17  ;;  %v6616_v59 = vld [vmem:[#allocation2 + $0x60] sm:$0xff]  ;;  %12069 = vmatpush2.msra.mxu1 %v17398_v49 }
 0x4df   : > { %v17474_v48 = vadd.f32 %v6299_v40, %v19846_v0  ;;  %v5948_v14 = vpop.f32.mrf.mxu0  ;;  %v13149_v35 = vpack.i.bf16 %v6583_v12, %v6616_v59  ;;  %v17476_v11 = vld [vmem:[#allocation2 + $0x61] sm:$0xff] }
 0x4e0   : > { %v5949_v42 = vadd.f32 %v17217_v19, %v5948_v14  ;;  %13145 = vrot.lane.b32.xlu0 %v13144_v60, %s14140_s21  ;;  %v17481_v54 = vld [vmem:[#allocation2 + $0x62] sm:$0xff]  ;;  %v13154_v50 = vpack.i.bf16 %v6615_v18, %v17476_v11  ;;  %v14057_v14 = vld [vmem:[#allocation2 + $0x1f1] sm:$0xff] }
 0x4e1   : > { %19847 = vst [vmem:[#allocation23_spill] sm:$0xff] %v17474_v48  ;;  %v19765_v32 = vmax.f32 %v17474_v48, 0.0  ;;  %v5950_v33 = vpop.f32.mrf.mxu0  ;;  %v13159_v31 = vpack.i.bf16 %v6647_v21, %v17481_v54 }
 0x4e2   : > { %13150 = vrot.lane.b32.xlu1 %v13149_v35, %s14139_s29  ;;  %v6174_v12 = vadd.f32 %v6173_v45, %v5949_v42  ;;  %v5629_v35 = vsel %vm484_vm10, %v14057_v14, %v12967_v13  ;;  %v5533_v42 = vsel %vm484_vm10, %v4477_v16, %v12968_v1  ;;  %v19848_v45 = vmax.f32 %v15457_v61, 0.0 }
 0x4e3   : > { %6395 = vst.msk [vmem:[#allocation2 + $0x81] sm:$0xff] %vm484_vm10, %v19765_v32  ;;  %v12971_v15 = vpop.permute.xlu1 %12970 }
 0x4e4   : > { %v12976_v23 = vpop.permute.xlu0 %12975  ;;  %v6300_v3 = vmax.f32 %v6174_v12, 0.0  ;;  %v12973_v40 = vunpack.i.h.bf16 %v12971_v15  ;;  %v12972_v5 = vunpack.i.l.bf16 %v12971_v15  ;;  %v5953_v60 = vpop.f32.mrf.mxu0  ;;  %13155 = vrot.lane.b32.xlu0 %v13154_v50, %s14141_s28 }
 0x4e5   : > { %v12978_v20 = vunpack.i.h.bf16 %v12976_v23  ;;  %v12977_v18 = vunpack.i.l.bf16 %v12976_v23  ;;  %v5954_v0 = vadd.f32 %v17217_v19, %v5953_v60  ;;  %v17499_v21 = vld [vmem:[#allocation2 + $0x70] sm:$0xff] }
 0x4e6   : > { %13160 = vrot.lane.b32.xlu1 %v13159_v31, %s14140_s21  ;;  %v6649_v49 = vld [vmem:[#allocation2 + $0x71] sm:$0xff]  ;;  %v17503_v33 = vadd.f32 %v6300_v3, %v19848_v45  ;;  %v5955_v12 = vpop.f32.mrf.mxu0  ;;  %v5661_v50 = vsel %vm3638_vm12, %v5629_v35, %v12972_v5  ;;  %v5565_v15 = vsel %vm3638_vm12, %v5533_v42, %v12973_v40  ;;  %v13164_v23 = vpack.i.bf16 %v17454_v55, %v17499_v21  ;;  %v11828_v5 = vpop.f32.mrf.mxu1 }
 0x4e7   : > { %v6179_v31 = vadd.f32 %v11825_v51, %v5954_v0  ;;  %v12981_v60 = vpop.permute.xlu1 %12980  ;;  %v5693_v13 = vsel %vm3671_vm13, %v5661_v50, %v12977_v18  ;;  %v5597_v1 = vsel %vm3671_vm13, %v5565_v15, %v12978_v20  ;;  %v13169_v16 = vpack.i.bf16 %v6616_v59, %v6649_v49  ;;  %v6586_v14 = vld [vmem:[#allocation2 + $0x72] sm:$0xff]  ;;  %v14058_v15 = vld [vmem:[#allocation2 + $0x201] sm:$0xff] }
 0x4e8   : > { %19849 = vst [vmem:[#allocation24_spill] sm:$0xff] %v17503_v33  ;;  %v19768_v61 = vmax.f32 %v17503_v33, 0.0  ;;  %v12983_v3 = vunpack.i.h.bf16 %v12981_v60  ;;  %v12982_v45 = vunpack.i.l.bf16 %v12981_v60  ;;  %6026 = vmatprep.mubr.f32.mxu0 %v5693_v13  ;;  %13165 = vrot.lane.b32.xlu0 %v13164_v23, %s14139_s29  ;;  %v13174_v59 = vpack.i.bf16 %v17476_v11, %v6586_v14  ;;  %v6619_v13 = vld [vmem:[#allocation2 + $0x90] sm:$0xff] }
 0x4e9   : > { %v6301_v40 = vmax.f32 %v6179_v31, 0.0  ;;  %6027 = vmatmul.mubr.f32.gmra.mxu0 %v5597_v1  ;;  %v19850_v18 = vmax.f32 %v15449_v43, 0.0  ;;  %v14059_v31 = vld [vmem:[#allocation2 + $0x1f0] sm:$0xff] }
 0x4ea   : > { %v12986_v35 = vpop.permute.xlu0 %12985  ;;  %13170 = vrot.lane.b32.xlu1 %v13169_v16, %s14141_s28  ;;  %6396 = vst.msk [vmem:[#allocation2 + $0xb1] sm:$0xff] %vm484_vm10, %v19768_v61  ;;  %v6618_v20 = vld [vmem:[#allocation2 + $0x80] sm:$0xff]  ;;  %v5630_v23 = vsel %vm484_vm10, %v14058_v15, %v12982_v45  ;;  %v5534_v60 = vsel %vm484_vm10, %v14059_v31, %v12983_v3  ;;  %v13179_v31 = vpack.i.bf16 %v6586_v14, %v6619_v13  ;;  %v19851_v14 = vmax.f32 %v15558_v39, 0.0 }
 0x4eb   : > { %v12988_v55 = vunpack.i.h.bf16 %v12986_v35  ;;  %v12987_v51 = vunpack.i.l.bf16 %v12986_v35  ;;  %v17520_v0 = vadd.f32 %v6301_v40, %v19850_v18  ;;  %v12991_v42 = vpop.permute.xlu1 %12990  ;;  %v5958_v12 = vpop.f32.mrf.mxu0  ;;  %v13184_v50 = vpack.i.bf16 %v17481_v54, %v6618_v20  ;;  %v6587_v40 = vld [vmem:[#allocation2 + $0x82] sm:$0xff] }
 0x4ec   : > { %v12993_v1 = vunpack.i.h.bf16 %v12991_v42  ;;  %v12992_v16 = vunpack.i.l.bf16 %v12991_v42  ;;  %v5959_v11 = vadd.f32 %v17217_v19, %v5958_v12  ;;  %13175 = vrot.lane.b32.xlu0 %v13174_v59, %s14140_s21  ;;  %v6183_v35 = vpop.f32.mrf.mxu1  ;;  %v13194_v59 = vpack.i.bf16 %v6649_v49, %v6587_v40  ;;  %v6650_v42 = vld [vmem:[#allocation2 + $0x81] sm:$0xff] }
 0x4ed   : > { %v5662_v43 = vsel %vm3638_vm12, %v5630_v23, %v12987_v51  ;;  %v19769_v18 = vmax.f32 %v17520_v0, 0.0  ;;  %v5960_v54 = vpop.f32.mrf.mxu0  ;;  %v5566_v45 = vsel %vm3638_vm12, %v5534_v60, %v12988_v55 }
 0x4ee   : > { %13185 = vrot.lane.b32.xlu1 %v13184_v50, %s14139_s29  ;;  %v6184_v15 = vadd.f32 %v6183_v35, %v5959_v11  ;;  %v5694_v3 = vsel %vm3671_vm13, %v5662_v43, %v12992_v16  ;;  %v5598_v51 = vsel %vm3671_vm13, %v5566_v45, %v12993_v1  ;;  %v6651_v50 = vld [vmem:[#allocation2 + $0x91] sm:$0xff]  ;;  %v13189_v16 = vpack.i.bf16 %v17499_v21, %v6650_v42  ;;  %v6460_v11 = vld [vmem:[#allocation2 + $0xa1] sm:$0xff]  ;;  %v11831_v54 = vpop.f32.mrf.mxu1 }
 0x4ef   : > { %6397 = vst.msk [vmem:[#allocation2 + $0xc1] sm:$0xff] %vm484_vm10, %v19769_v18  ;;  %6031 = vmatprep.mubr.f32.mxu0 %v5694_v3  ;;  %v13199_v49 = vpack.i.bf16 %v6618_v20, %v6651_v50  ;;  %v6492_v35 = vld [vmem:[#allocation2 + $0xa2] sm:$0xff]  ;;  %v19852_v21 = vmax.f32 %v15546_v4, 0.0 }
 0x4f0   : > { %v6302_v12 = vmax.f32 %v6184_v15, 0.0  ;;  %6032 = vmatmul.mubr.f32.gmra.mxu0 %v5598_v51  ;;  %v5963_v23 = vpop.f32.mrf.mxu0  ;;  %13180 = vrot.lane.b32.xlu0 %v13179_v31, %s14139_s29  ;;  %v6193_v42 = vpop.f32.mrf.mxu1 }
 0x4f1   : > { %v5964_v55 = vadd.f32 %v17217_v19, %v5963_v23  ;;  %v6588_v43 = vld [vmem:[#allocation2 + $0xb2] sm:$0xff] }
 0x4f2   : > { %13195 = vrot.lane.b32.xlu1 %v13194_v59, %s14140_s21  ;;  %v17541_v60 = vadd.f32 %v6302_v12, %v19851_v14  ;;  %v5965_v13 = vpop.f32.mrf.mxu0  ;;  %v13204_v39 = vpack.i.bf16 %v6460_v11, %v6588_v43  ;;  %v6524_v50 = vld [vmem:[#allocation2 + $0xb0] sm:$0xff] }
 0x4f3   : > { %v6189_v1 = vadd.f32 %v11828_v5, %v5964_v55  ;;  %v6461_v4 = vld [vmem:[#allocation2 + $0xb1] sm:$0xff]  ;;  %v12996_v13 = vpop.permute.xlu0 %12995 }
 0x4f4   : > { %v19770_v40 = vmax.f32 %v17541_v60, 0.0  ;;  %13190 = vrot.lane.b32.xlu0 %v13189_v16, %s14141_s28 }
 0x4f5   : > { %v6303_v45 = vmax.f32 %v6189_v1, 0.0 }
 0x4f6   : > { %13200 = vrot.lane.b32.xlu1 %v13199_v49, %s14141_s28  ;;  %6398 = vst.msk [vmem:[#allocation2 + $0xd1] sm:$0xff] %vm484_vm10, %v19770_v40  ;;  %v6620_v15 = vld [vmem:[#allocation2 + $0xc0] sm:$0xff] }
 0x4f7   : > { %v17552_v5 = vadd.f32 %v6303_v45, %v19852_v21  ;;  %v5968_v20 = vpop.f32.mrf.mxu0  ;;  %v13209_v3 = vpack.i.bf16 %v6492_v35, %v6620_v15  ;;  %v6652_v31 = vld [vmem:[#allocation2 + $0xc1] sm:$0xff]  ;;  %v19853_v21 = vmax.f32 %v15670_v28, 0.0 }
 0x4f8   : > { %v5969_v51 = vadd.f32 %v17217_v19, %v5968_v20  ;;  %13205 = vrot.lane.b32.xlu0 %v13204_v39, %s14140_s21  ;;  %v6589_v59 = vld [vmem:[#allocation2 + $0xc2] sm:$0xff]  ;;  %v13214_v14 = vpack.i.bf16 %v6524_v50, %v6652_v31  ;;  %v12997_v39 = vunpack.i.l.bf16 %v12996_v13 }
 0x4f9   : > { %v19771_v12 = vmax.f32 %v17552_v5, 0.0  ;;  %v5970_v23 = vpop.f32.mrf.mxu0  ;;  %v13219_v16 = vpack.i.bf16 %v6461_v4, %v6589_v59  ;;  %v11834_v4 = vpop.f32.mrf.mxu1 }
 0x4fa   : > { %13210 = vrot.lane.b32.xlu1 %v13209_v3, %s14139_s29  ;;  %v6194_v55 = vadd.f32 %v6193_v42, %v5969_v51 }
 0x4fb   : > { %6399 = vst.msk [vmem:[#allocation2 + $0xe1] sm:$0xff] %vm484_vm10, %v19771_v12 }
 0x4fc   : > { %v6304_v1 = vmax.f32 %v6194_v55, 0.0  ;;  %v5973_v49 = vpop.f32.mrf.mxu0  ;;  %13215 = vrot.lane.b32.xlu0 %v13214_v14, %s14141_s28  ;;  %v12998_v55 = vunpack.i.h.bf16 %v12996_v13 }
 0x4fd   : > { %v5974_v11 = vadd.f32 %v17217_v19, %v5973_v49  ;;  %v6621_v35 = vld [vmem:[#allocation2 + $0xd0] sm:$0xff] }
 0x4fe   : > { %13220 = vrot.lane.b32.xlu1 %v13219_v16, %s14140_s21  ;;  %v17564_v45 = vld [vmem:[#allocation2 + $0xd1] sm:$0xff]  ;;  %v17568_v20 = vadd.f32 %v6304_v1, %v19853_v21  ;;  %v5975_v3 = vpop.f32.mrf.mxu0  ;;  %v13224_v51 = vpack.i.bf16 %v6588_v43, %v6621_v35  ;;  %v19854_v1 = vmax.f32 %v15663_v10, 0.0 }
 0x4ff   : > { %v13229_v42 = vpack.i.bf16 %v6620_v15, %v17564_v45  ;;  %v6199_v23 = vadd.f32 %v11831_v54, %v5974_v11  ;;  %v17571_v50 = vld [vmem:[#allocation2 + $0xd2] sm:$0xff] }
 0x500   : > { %v19772_v14 = vmax.f32 %v17568_v20, 0.0  ;;  %13225 = vrot.lane.b32.xlu0 %v13224_v51, %s14139_s29  ;;  %v4607_v49 = vld [vmem:[#allocation2 + $0x211] sm:$0xff]  ;;  %v13234_v54 = vpack.i.bf16 %v6652_v31, %v17571_v50 }
 0x501   : > { %v6305_v16 = vmax.f32 %v6199_v23, 0.0  ;;  %v5631_v13 = vsel %vm484_vm10, %v4607_v49, %v12997_v39  ;;  %v4479_v23 = vld [vmem:[#allocation2 + $0x200] sm:$0xff]  ;;  %v6203_v49 = vpop.f32.mrf.mxu1 }
 0x502   : > { %13230 = vrot.lane.b32.xlu1 %v13229_v42, %s14141_s28  ;;  %6400 = vst.msk [vmem:[#allocation2 + $0xf1] sm:$0xff] %vm484_vm10, %v19772_v14  ;;  %v17580_v15 = vld [vmem:[#allocation2 + $0xe0] sm:$0xff]  ;;  %v5535_v39 = vsel %vm484_vm10, %v4479_v23, %v12998_v55 }
 0x503   : > { %v13001_v28 = vpop.permute.xlu1 %13000  ;;  %v17585_v11 = vadd.f32 %v6305_v16, %v19854_v1  ;;  %v5978_v42 = vpop.f32.mrf.mxu0  ;;  %v17587_v27 = vld [vmem:[#allocation2 + $0xe1] sm:$0xff]  ;;  %v13239_v31 = vpack.i.bf16 %v6589_v59, %v17580_v15 }
 0x504   : > { %v13006_v43 = vpop.permute.xlu0 %13005  ;;  %v13003_v21 = vunpack.i.h.bf16 %v13001_v28  ;;  %v13002_v3 = vunpack.i.l.bf16 %v13001_v28  ;;  %v5979_v29 = vadd.f32 %v17217_v19, %v5978_v42  ;;  %13235 = vrot.lane.b32.xlu0 %v13234_v54, %s14140_s21  ;;  %v6591_v37 = vld [vmem:[#allocation2 + $0xe2] sm:$0xff]  ;;  %v13244_v59 = vpack.i.bf16 %v6621_v35, %v17587_v27 }
 0x505   : > { %v13008_v51 = vunpack.i.h.bf16 %v13006_v43  ;;  %v13007_v24 = vunpack.i.l.bf16 %v13006_v43  ;;  %v19779_v10 = vmax.f32 %v17585_v11, 0.0  ;;  %v5980_v16 = vpop.f32.mrf.mxu0 }
 0x506   : > { %v5663_v28 = vsel %vm3638_vm12, %v5631_v13, %v13002_v3  ;;  %v5567_v1 = vsel %vm3638_vm12, %v5535_v39, %v13003_v21  ;;  %v6204_v57 = vadd.f32 %v6203_v49, %v5979_v29  ;;  %13240 = vrot.lane.b32.xlu1 %v13239_v31, %s14139_s29  ;;  %v13249_v29 = vpack.i.bf16 %v17564_v45, %v6591_v37  ;;  %v4608_v3 = vld [vmem:[#allocation2 + $0x221] sm:$0xff] }
 0x507   : > { %v13011_v43 = vpop.permute.xlu1 %13010  ;;  %v5695_v42 = vsel %vm3671_vm13, %v5663_v28, %v13007_v24  ;;  %v5599_v54 = vsel %vm3671_vm13, %v5567_v1, %v13008_v51  ;;  %6401 = vst.msk [vmem:[#allocation2 + $0x101] sm:$0xff] %vm484_vm10, %v19779_v10  ;;  %v4480_v24 = vld [vmem:[#allocation2 + $0x210] sm:$0xff]  ;;  %v19855_v28 = vmax.f32 %v15758_v63, 0.0 }
 0x508   : > { %v13013_v55 = vunpack.i.h.bf16 %v13011_v43  ;;  %v13012_v23 = vunpack.i.l.bf16 %v13011_v43  ;;  %6036 = vmatprep.mubr.f32.mxu0 %v5695_v42  ;;  %v6306_v13 = vmax.f32 %v6204_v57, 0.0  ;;  %v5983_v21 = vpop.f32.mrf.mxu0  ;;  %13245 = vrot.lane.b32.xlu0 %v13244_v59, %s14141_s28 }
 0x509   : > { %6037 = vmatmul.mubr.f32.gmra.mxu0 %v5599_v54  ;;  %v5984_v51 = vadd.f32 %v17217_v19, %v5983_v21  ;;  %v6623_v35 = vld [vmem:[#allocation2 + $0xf0] sm:$0xff] }
 0x50a   : > { %v13016_v31 = vpop.permute.xlu0 %13015  ;;  %v6655_v39 = vld [vmem:[#allocation2 + $0xf1] sm:$0xff]  ;;  %v5632_v49 = vsel %vm484_vm10, %v4608_v3, %v13012_v23  ;;  %v5536_v16 = vsel %vm484_vm10, %v4480_v24, %v13013_v55  ;;  %v17610_v57 = vadd.f32 %v6306_v13, %v19855_v28  ;;  %13250 = vrot.lane.b32.xlu1 %v13249_v29, %s14140_s21  ;;  %v5985_v42 = vpop.f32.mrf.mxu0  ;;  %v13254_v54 = vpack.i.bf16 %v17571_v50, %v6623_v35 }
 0x50b   : > { %v13018_v1 = vunpack.i.h.bf16 %v13016_v31  ;;  %v13017_v43 = vunpack.i.l.bf16 %v13016_v31  ;;  %v13021_v45 = vpop.permute.xlu1 %13020  ;;  %v6209_v19 = vadd.f32 %v11834_v4, %v5984_v51  ;;  %v13259_v7 = vpack.i.bf16 %v17580_v15, %v6655_v39  ;;  %v6592_v23 = vld [vmem:[#allocation2 + $0xf2] sm:$0xff] }
 0x50c   : > { %v13023_v59 = vunpack.i.h.bf16 %v13021_v45  ;;  %v13022_v21 = vunpack.i.l.bf16 %v13021_v45  ;;  %v19780_v55 = vmax.f32 %v17610_v57, 0.0  ;;  %13255 = vrot.lane.b32.xlu0 %v13254_v54, %s14139_s29  ;;  %v13264_v50 = vpack.i.bf16 %v17587_v27, %v6592_v23 }
 0x50d   : > { %v5664_v63 = vsel %vm3638_vm12, %v5632_v49, %v13017_v43  ;;  %v5568_v13 = vsel %vm3638_vm12, %v5536_v16, %v13018_v1  ;;  %v6307_v3 = vmax.f32 %v6209_v19, 0.0  ;;  %v19856_v15 = vmax.f32 %v15752_v8, 0.0 }
 0x50e   : > { %v5696_v29 = vsel %vm3671_vm13, %v5664_v63, %v13022_v21  ;;  %v5600_v24 = vsel %vm3671_vm13, %v5568_v13, %v13023_v59  ;;  %6402 = vst.msk [vmem:[#allocation2 + $0x111] sm:$0xff] %vm484_vm10, %v19780_v55  ;;  %13260 = vrot.lane.b32.xlu1 %v13259_v7, %s14141_s28  ;;  %v6624_v4 = vld [vmem:[#allocation2 + $0x100] sm:$0xff]  ;;  %v13026_v42 = vpop.permute.xlu0 %13025  ;;  %v6627_v59 = vld [vmem:[#allocation2 + $0x130] sm:$0xff] }
 0x50f   : > { %6041 = vmatprep.mubr.f32.mxu0 %v5696_v29  ;;  %v17628_v51 = vadd.f32 %v6307_v3, %v19856_v15  ;;  %v13269_v31 = vpack.i.bf16 %v6591_v37, %v6624_v4  ;;  %v6656_v49 = vld [vmem:[#allocation2 + $0x101] sm:$0xff]  ;;  %v13028_v21 = vunpack.i.h.bf16 %v13026_v42  ;;  %v4609_v15 = vld [vmem:[#allocation2 + $0x231] sm:$0xff] }
 0x510   : > { %6042 = vmatmul.mubr.f32.gmra.mxu0 %v5600_v24  ;;  %13265 = vrot.lane.b32.xlu0 %v13264_v50, %s14140_s21  ;;  %v6593_v28 = vld [vmem:[#allocation2 + $0x102] sm:$0xff]  ;;  %v13274_v1 = vpack.i.bf16 %v6623_v35, %v6656_v49 }
 0x511   : > { %v19781_v16 = vmax.f32 %v17628_v51, 0.0  ;;  %v13279_v8 = vpack.i.bf16 %v6655_v39, %v6593_v28  ;;  %v13027_v39 = vunpack.i.l.bf16 %v13026_v42 }
 0x512   : > { %13270 = vrot.lane.b32.xlu1 %v13269_v31, %s14139_s29  ;;  %v4481_v31 = vld [vmem:[#allocation2 + $0x220] sm:$0xff] }
 0x513   : > { %6403 = vst.msk [vmem:[#allocation2 + $0x121] sm:$0xff] %vm484_vm10, %v19781_v16 }
 0x514   : > { %13275 = vrot.lane.b32.xlu0 %v13274_v1, %s14141_s28  ;;  %v5633_v1 = vsel %vm484_vm10, %v4609_v15, %v13027_v39 }
 0x515   : > { %v6625_v27 = vld [vmem:[#allocation2 + $0x110] sm:$0xff] }
 0x516   : > { %v6657_v7 = vld [vmem:[#allocation2 + $0x111] sm:$0xff]  ;;  %13280 = vrot.lane.b32.xlu1 %v13279_v8, %s14140_s21  ;;  %v13284_v37 = vpack.i.bf16 %v6592_v23, %v6625_v27  ;;  %v5537_v8 = vsel %vm484_vm10, %v4481_v31, %v13028_v21  ;;  %v11837_v21 = vpop.f32.mrf.mxu1 }
 0x517   : > { %v13289_v43 = vpack.i.bf16 %v6624_v4, %v6657_v7  ;;  %v6594_v45 = vld [vmem:[#allocation2 + $0x112] sm:$0xff] }
 0x518   : > { %13285 = vrot.lane.b32.xlu0 %v13284_v37, %s14139_s29  ;;  %v13294_v35 = vpack.i.bf16 %v6656_v49, %v6594_v45  ;;  %v13299_v13 = vpack.i.bf16 %v6594_v45, %v6627_v59  ;;  %v6659_v37 = vld [vmem:[#allocation2 + $0x131] sm:$0xff] }
 0x51a   : > { %13290 = vrot.lane.b32.xlu1 %v13289_v43, %s14141_s28  ;;  %v6626_v54 = vld [vmem:[#allocation2 + $0x120] sm:$0xff] }
 0x51b   : > { %v13304_v19 = vpack.i.bf16 %v6593_v28, %v6626_v54  ;;  %v6595_v63 = vld [vmem:[#allocation2 + $0x122] sm:$0xff]  ;;  %v13319_v39 = vpack.i.bf16 %v6626_v54, %v6659_v37  ;;  %v17657_v54 = vld [vmem:[%s19686_s4 + $0x1] ss:$0 sm:$0xff] }
 0x51c   : > { %13295 = vrot.lane.b32.xlu0 %v13294_v35, %s14140_s21  ;;  %v6658_v3 = vld [vmem:[#allocation2 + $0x121] sm:$0xff]  ;;  %v13314_v4 = vpack.i.bf16 %v6657_v7, %v6595_v63 }
 0x51d   : > { %v13309_v45 = vpack.i.bf16 %v6625_v27, %v6658_v3 }
 0x51e   : > { %13305 = vrot.lane.b32.xlu1 %v13304_v19, %s14139_s29 }
 0x520   : > { %v13031_v23 = vpop.permute.xlu1 %13030  ;;  %13300 = vrot.lane.b32.xlu0 %v13299_v13, %s14139_s29 }
 0x521   : > { %v13033_v29 = vunpack.i.h.bf16 %v13031_v23  ;;  %v13032_v24 = vunpack.i.l.bf16 %v13031_v23  ;;  %v13036_v50 = vpop.permute.xlu0 %13035 }
 0x522   : > { %v13038_v49 = vunpack.i.h.bf16 %v13036_v50  ;;  %v13037_v28 = vunpack.i.l.bf16 %v13036_v50  ;;  %13315 = vrot.lane.b32.xlu1 %v13314_v4, %s14140_s21 }
 0x523   : > { %v5665_v43 = vsel %vm3638_vm12, %v5633_v1, %v13032_v24  ;;  %v5569_v42 = vsel %vm3638_vm12, %v5537_v8, %v13033_v29  ;;  %v4610_v29 = vld [vmem:[#allocation2 + $0x241] sm:$0xff]  ;;  %v4482_v24 = vld [vmem:[#allocation2 + $0x230] sm:$0xff] }
 0x524   : > { %v13041_v35 = vpop.permute.xlu1 %13040  ;;  %v5697_v19 = vsel %vm3671_vm13, %v5665_v43, %v13037_v28  ;;  %v5601_v7 = vsel %vm3671_vm13, %v5569_v42, %v13038_v49  ;;  %13310 = vrot.lane.b32.xlu0 %v13309_v45, %s14141_s28  ;;  %v6213_v28 = vpop.f32.mrf.mxu1 }
 0x525   : > { %v13043_v59 = vunpack.i.h.bf16 %v13041_v35  ;;  %v13042_v63 = vunpack.i.l.bf16 %v13041_v35  ;;  %6046 = vmatprep.mubr.f32.mxu0 %v5697_v19 }
 0x526   : > { %6047 = vmatmul.mubr.f32.gmra.mxu0 %v5601_v7  ;;  %13320 = vrot.lane.b32.xlu1 %v13319_v39, %s14141_s28 }
 0x527   : > { %v13046_v13 = vpop.permute.xlu0 %13045  ;;  %v5634_v31 = vsel %vm484_vm10, %v4610_v29, %v13042_v63  ;;  %v5538_v49 = vsel %vm484_vm10, %v4482_v24, %v13043_v59  ;;  %v4483_v29 = vld [vmem:[#allocation2 + $0x240] sm:$0xff] }
 0x528   : > { %v13048_v23 = vunpack.i.h.bf16 %v13046_v13  ;;  %v13047_v27 = vunpack.i.l.bf16 %v13046_v13  ;;  %v13051_v3 = vpop.permute.xlu1 %13050  ;;  %v5988_v15 = vpop.f32.mrf.mxu0 }
 0x529   : > { %v13053_v50 = vunpack.i.h.bf16 %v13051_v3  ;;  %v13052_v4 = vunpack.i.l.bf16 %v13051_v3  ;;  %v5989_v1 = vadd.f32 %v17657_v54, %v5988_v15  ;;  %v4611_v3 = vld [vmem:[#allocation2 + $0x251] sm:$0xff] }
 0x52a   : > { %v5666_v8 = vsel %vm3638_vm12, %v5634_v31, %v13047_v27  ;;  %v5570_v37 = vsel %vm3638_vm12, %v5538_v49, %v13048_v23  ;;  %v5990_v45 = vpop.f32.mrf.mxu0 }
 0x52b   : > { %v13056_v43 = vpop.permute.xlu0 %13055  ;;  %v5698_v42 = vsel %vm3671_vm13, %v5666_v8, %v13052_v4  ;;  %v5602_v35 = vsel %vm3671_vm13, %v5570_v37, %v13053_v50  ;;  %v6214_v19 = vadd.f32 %v6213_v28, %v5989_v1  ;;  %v19857_v4 = vmax.f32 %v15837_v52, 0.0 }
 0x52c   : > { %v13058_v7 = vunpack.i.h.bf16 %v13056_v43  ;;  %v13057_v59 = vunpack.i.l.bf16 %v13056_v43  ;;  %v13061_v63 = vpop.permute.xlu1 %13060  ;;  %6051 = vmatprep.mubr.f32.mxu0 %v5698_v42 }
 0x52d   : > { %v13063_v39 = vunpack.i.h.bf16 %v13061_v63  ;;  %v13062_v13 = vunpack.i.l.bf16 %v13061_v63  ;;  %6052 = vmatmul.mubr.f32.gmra.mxu0 %v5602_v35  ;;  %v6308_v24 = vmax.f32 %v6214_v19, 0.0 }
 0x52e   : > { %v5635_v27 = vsel %vm484_vm10, %v4611_v3, %v13057_v59  ;;  %v5539_v23 = vsel %vm484_vm10, %v4483_v29, %v13058_v7 }
 0x52f   : > { %v13066_v15 = vpop.permute.xlu0 %13065  ;;  %v17668_v31 = vadd.f32 %v6308_v24, %v19857_v4  ;;  %v5667_v43 = vsel %vm3638_vm12, %v5635_v27, %v13062_v13  ;;  %v5571_v45 = vsel %vm3638_vm12, %v5539_v23, %v13063_v39  ;;  %v4612_v39 = vld [vmem:[#allocation2 + $0x261] sm:$0xff]  ;;  %v4484_v24 = vld [vmem:[#allocation2 + $0x250] sm:$0xff] }
 0x530   : > { %v13068_v50 = vunpack.i.h.bf16 %v13066_v15  ;;  %v13067_v49 = vunpack.i.l.bf16 %v13066_v15  ;;  %v13071_v28 = vpop.permute.xlu1 %13070  ;;  %v5993_v37 = vpop.f32.mrf.mxu0 }
 0x531   : > { %19858 = vst [vmem:[#allocation25_spill] sm:$0xff] %v17668_v31  ;;  %v13073_v1 = vunpack.i.h.bf16 %v13071_v28  ;;  %v13072_v8 = vunpack.i.l.bf16 %v13071_v28  ;;  %v19762_v42 = vmax.f32 %v17668_v31, 0.0  ;;  %v5994_v35 = vadd.f32 %v17657_v54, %v5993_v37 }
 0x532   : > { %v5699_v19 = vsel %vm3671_vm13, %v5667_v43, %v13067_v49  ;;  %v5603_v52 = vsel %vm3671_vm13, %v5571_v45, %v13068_v50  ;;  %v5995_v7 = vpop.f32.mrf.mxu0  ;;  %v19859_v45 = vmax.f32 %v15833_v6, 0.0 }
 0x533   : > { %v13076_v59 = vpop.permute.xlu0 %13075  ;;  %6056 = vmatprep.mubr.f32.mxu0 %v5699_v19  ;;  %6404 = vst.msk [vmem:[#allocation2 + $0x151] sm:$0xff] %vm484_vm10, %v19762_v42  ;;  %v6219_v63 = vadd.f32 %v11837_v21, %v5994_v35  ;;  %v5636_v15 = vsel %vm484_vm10, %v4612_v39, %v13072_v8  ;;  %v5540_v4 = vsel %vm484_vm10, %v4484_v24, %v13073_v1  ;;  %v6468_v19 = vld [vmem:[#allocation2 + $0x141] sm:$0xff] }
 0x534   : > { %v13078_v3 = vunpack.i.h.bf16 %v13076_v59  ;;  %v13077_v13 = vunpack.i.l.bf16 %v13076_v59  ;;  %v13081_v29 = vpop.permute.xlu1 %13080  ;;  %6057 = vmatmul.mubr.f32.gmra.mxu0 %v5603_v52  ;;  %v6420_v7 = vld [vmem:[#allocation2] sm:$0xff] }
 0x535   : > { %v13083_v27 = vunpack.i.h.bf16 %v13081_v29  ;;  %v13082_v23 = vunpack.i.l.bf16 %v13081_v29  ;;  %v6309_v50 = vmax.f32 %v6219_v63, 0.0 }
 0x536   : > { %v5668_v49 = vsel %vm3638_vm12, %v5636_v15, %v13077_v13  ;;  %v5572_v28 = vsel %vm3638_vm12, %v5540_v4, %v13078_v3 }
 0x537   : > { %v13086_v37 = vpop.permute.xlu0 %13085  ;;  %v5700_v21 = vsel %vm3671_vm13, %v5668_v49, %v13082_v23  ;;  %v5604_v43 = vsel %vm3671_vm13, %v5572_v28, %v13083_v27  ;;  %v17687_v35 = vadd.f32 %v6309_v50, %v19859_v45  ;;  %v6548_v27 = vld [vmem:[#allocation2 + $0x11] sm:$0xff]  ;;  %v6500_v45 = vld [vmem:[#allocation2 + $0x142] sm:$0xff] }
 0x538   : > { %6061 = vmatprep.mubr.f32.mxu0 %v5700_v21  ;;  %v13088_v1 = vunpack.i.h.bf16 %v13086_v37  ;;  %v13087_v52 = vunpack.i.l.bf16 %v13086_v37 }
 0x539   : > { %19860 = vst [vmem:[#allocation26_spill] sm:$0xff] %v17687_v35  ;;  %6062 = vmatmul.mubr.f32.gmra.mxu0 %v5604_v43  ;;  %v19763_v8 = vmax.f32 %v17687_v35, 0.0 }
 0x53a   : > { %v17690_v59 = vld [vmem:[#allocation2 + $0x152] sm:$0xff]  ;;  %v7476_v23 = vsel %vm484_vm10, %v6420_v7, %v13088_v1  ;;  %v7572_v15 = vsel %vm484_vm10, %v6548_v27, %v13087_v52 }
 0x53b   : > { %6405 = vst.msk [vmem:[#allocation2 + $0x161] sm:$0xff] %vm484_vm10, %v19763_v8  ;;  %v13096_v63 = vpop.permute.xlu0 %13095  ;;  %v13324_v6 = vpack.i.bf16 %v6468_v19, %v17690_v59  ;;  %v11270_v19 = vld [vmem:[%s19685_s3 + $0x350] sm:$0xff] }
 0x53c   : > { %v13091_v3 = vpop.permute.xlu1 %13090  ;;  %v13098_v13 = vunpack.i.h.bf16 %v13096_v63  ;;  %v13097_v29 = vunpack.i.l.bf16 %v13096_v63  ;;  %v6532_v52 = vld [vmem:[#allocation2 + $0x150] sm:$0xff] }
 0x53d   : > { %v13093_v39 = vunpack.i.h.bf16 %v13091_v3  ;;  %v13092_v24 = vunpack.i.l.bf16 %v13091_v3  ;;  %13325 = vrot.lane.b32.xlu0 %v13324_v6, %s14140_s21  ;;  %v6421_v27 = vld [vmem:[#allocation2 + $0x10] sm:$0xff] }
 0x53e   : > { %v6437_v55 = vld [vmem:[#allocation2 + $0x150] sm:$0xff] }
 0x53f   : > { %v7604_v4 = vsel %vm3638_vm12, %v7572_v15, %v13092_v24  ;;  %v7508_v50 = vsel %vm3638_vm12, %v7476_v23, %v13093_v39  ;;  %v6549_v24 = vld [vmem:[#allocation2 + $0x21] sm:$0xff] }
 0x540   : > { %v13101_v49 = vpop.permute.xlu1 %13100  ;;  %v7636_v28 = vsel %vm3671_vm13, %v7604_v4, %v13097_v29  ;;  %v7540_v37 = vsel %vm3671_vm13, %v7508_v50, %v13098_v13  ;;  %v11269_v23 = vld [vmem:[%s19685_s3 + $0x348] sm:$0xff] }
 0x541   : > { %v13103_v21 = vunpack.i.h.bf16 %v13101_v49  ;;  %v13102_v43 = vunpack.i.l.bf16 %v13101_v49  ;;  %7873 = vmatprep.mubr.f32.mxu0 %v7636_v28  ;;  %v17720_v28 = vpop.f32.mrf.mxu1 }
 0x542   : > { %7874 = vmatmul.mubr.f32.vlgmr.msra.gmra.mxu0 %v7540_v37  ;;  %v13106_v1 = vpop.permute.xlu0 %13105  ;;  %v17706_v7 = vld [vmem:[#allocation2 + $0x161] sm:$0xff] }
 0x543   : > { %v17708_v63 = vld [vmem:[#allocation2 + $0x160] sm:$0xff]  ;;  %11860 = vmatpush3.msra.mxu0 %v17462_v38  ;;  %v13108_v3 = vunpack.i.h.bf16 %v13106_v1  ;;  %v13107_v6 = vunpack.i.l.bf16 %v13106_v1  ;;  %v13334_v29 = vpack.i.bf16 %v6532_v52, %v17706_v7  ;;  %v7573_v50 = vsel %vm484_vm10, %v6549_v24, %v13102_v43 }
 0x544   : > { %v13111_v13 = vpop.permute.xlu1 %13110  ;;  %v13329_v39 = vpack.i.bf16 %v6500_v45, %v17708_v63  ;;  %11861 = vmatprep.subr.mxu0 %v11270_v19  ;;  %v7477_v38 = vsel %vm484_vm10, %v6421_v27, %v13103_v21  ;;  %v17718_v49 = vld [vmem:[#allocation2 + $0x162] sm:$0xff] }
 0x545   : > { %v13113_v15 = vunpack.i.h.bf16 %v13111_v13  ;;  %v13112_v4 = vunpack.i.l.bf16 %v13111_v13  ;;  %11862 = vmatpush3.msra.mxu0 %v11270_v19  ;;  %13335 = vrot.lane.b32.xlu0 %v13334_v29, %s14141_s28  ;;  %v7605_v37 = vsel %vm3638_vm12, %v7573_v50, %v13107_v6  ;;  %v7509_v45 = vsel %vm3638_vm12, %v7477_v38, %v13108_v3  ;;  %v11268_v1 = vld [vmem:[%s19685_s3 + $0x340] sm:$0xff]  ;;  %v17731_v19 = vld [vmem:[#allocation2 + $0x151] sm:$0xff] }
 0x546   : > { %13330 = vrot.lane.b32.xlu1 %v13329_v39, %s14139_s29  ;;  %v13116_v43 = vpop.permute.xlu0 %13115  ;;  %11863 = vmatprep.subr.mxu0 %v11269_v23  ;;  %v13339_v6 = vpack.i.bf16 %v17731_v19, %v17718_v49  ;;  %v6550_v50 = vld [vmem:[#allocation2 + $0x31] sm:$0xff]  ;;  %v6422_v38 = vld [vmem:[#allocation2 + $0x20] sm:$0xff] }
 0x547   : > { %v7637_v21 = vsel %vm3671_vm13, %v7605_v37, %v13112_v4  ;;  %v7541_v52 = vsel %vm3671_vm13, %v7509_v45, %v13113_v15  ;;  %v13118_v13 = vunpack.i.h.bf16 %v13116_v43  ;;  %v13117_v29 = vunpack.i.l.bf16 %v13116_v43  ;;  %11864 = vmatpush3.msra.mxu0 %v11269_v23  ;;  %v6223_v4 = vpop.f32.mrf.mxu1 }
 0x548   : > { %v13121_v24 = vpop.permute.xlu1 %13120  ;;  %7878 = vmatprep.mubr.f32.mxu0 %v7637_v21  ;;  %11865 = vmatprep.subr.mxu0 %v11268_v1 }
 0x549   : > { %v13123_v3 = vunpack.i.h.bf16 %v13121_v24  ;;  %v13122_v39 = vunpack.i.l.bf16 %v13121_v24  ;;  %v5998_v27 = vpop.f32.mrf.mxu0  ;;  %7879 = vmatmul.mubr.f32.gmra.mxu0 %v7541_v52  ;;  %v7574_v37 = vsel %vm484_vm10, %v6550_v50, %v13117_v29  ;;  %v7478_v45 = vsel %vm484_vm10, %v6422_v38, %v13118_v13  ;;  %v6551_v50 = vld [vmem:[#allocation2 + $0x41] sm:$0xff] }
 0x54a   : > { %v5999_v15 = vadd.f32 %v17657_v54, %v5998_v27  ;;  %13340 = vrot.lane.b32.xlu1 %v13339_v6, %s14140_s21  ;;  %11866 = vmatpush3.msra.mxu0 %v11268_v1  ;;  %v13126_v21 = vpop.permute.xlu0 %13125  ;;  %v19861_v38 = vmax.f32 %v15898_v9, 0.0 }
 0x54b   : > { %v6000_v43 = vpop.f32.mrf.mxu0  ;;  %9712 = vmatprep.subr.mxu0 %v19827_v47  ;;  %v13128_v24 = vunpack.i.h.bf16 %v13126_v21  ;;  %v13127_v52 = vunpack.i.l.bf16 %v13126_v21  ;;  %v7606_v32 = vsel %vm3638_vm12, %v7574_v37, %v13122_v39  ;;  %v7510_v27 = vsel %vm3638_vm12, %v7478_v45, %v13123_v3  ;;  %v6423_v3 = vld [vmem:[#allocation2 + $0x30] sm:$0xff] }
 0x54c   : > { %v6224_v23 = vadd.f32 %v6223_v4, %v5999_v15  ;;  %v13131_v42 = vpop.permute.xlu1 %13130 }
 0x54d   : > { %v13133_v8 = vunpack.i.h.bf16 %v13131_v42  ;;  %v13132_v17 = vunpack.i.l.bf16 %v13131_v42  ;;  %v7638_v29 = vsel %vm3671_vm13, %v7606_v32, %v13127_v52  ;;  %v7542_v13 = vsel %vm3671_vm13, %v7510_v27, %v13128_v24 }
 0x54e   : > { %v6310_v6 = vmax.f32 %v6224_v23, 0.0  ;;  %7883 = vmatprep.mubr.f32.mxu0 %v7638_v29  ;;  %v13136_v1 = vpop.permute.xlu0 %13135 }
 0x54f   : > { %v13138_v15 = vunpack.i.h.bf16 %v13136_v1  ;;  %v13137_v43 = vunpack.i.l.bf16 %v13136_v1  ;;  %7884 = vmatmul.mubr.f32.gmra.mxu0 %v7542_v13  ;;  %v7575_v39 = vsel %vm484_vm10, %v6551_v50, %v13132_v17  ;;  %v7479_v23 = vsel %vm484_vm10, %v6423_v3, %v13133_v8 }
 0x550   : > { %v17746_v4 = vadd.f32 %v6310_v6, %v19861_v38  ;;  %v6003_v21 = vpop.f32.mrf.mxu0  ;;  %v13141_v42 = vpop.permute.xlu1 %13140  ;;  %v19863_v3 = vmax.f32 %v15892_v46, 0.0 }
 0x551   : > { %v6004_v37 = vadd.f32 %v17657_v54, %v6003_v21  ;;  %v13143_v32 = vunpack.i.h.bf16 %v13141_v42  ;;  %v13142_v45 = vunpack.i.l.bf16 %v13141_v42  ;;  %v7607_v9 = vsel %vm3638_vm12, %v7575_v39, %v13137_v43  ;;  %v6424_v42 = vld [vmem:[#allocation2 + $0x40] sm:$0xff] }
 0x552   : > { %19862 = vst [vmem:[#allocation27_spill] sm:$0xff] %v17746_v4  ;;  %v19766_v24 = vmax.f32 %v17746_v4, 0.0  ;;  %v6005_v52 = vpop.f32.mrf.mxu0  ;;  %v7511_v27 = vsel %vm3638_vm12, %v7479_v23, %v13138_v15  ;;  %v13146_v29 = vpop.permute.xlu0 %13145  ;;  %v6552_v15 = vld [vmem:[#allocation2 + $0x51] sm:$0xff] }
 0x553   : > { %v6229_v6 = vadd.f32 %v17720_v28, %v6004_v37  ;;  %v7639_v13 = vsel %vm3671_vm13, %v7607_v9, %v13142_v45  ;;  %v7543_v17 = vsel %vm3671_vm13, %v7511_v27, %v13143_v32  ;;  %v13148_v1 = vunpack.i.h.bf16 %v13146_v29 }
 0x554   : > { %6406 = vst.msk [vmem:[#allocation2 + $0x171] sm:$0xff] %vm484_vm10, %v19766_v24  ;;  %v13147_v8 = vunpack.i.l.bf16 %v13146_v29  ;;  %v13151_v50 = vpop.permute.xlu1 %13150  ;;  %7888 = vmatprep.mubr.f32.mxu0 %v7639_v13 }
 0x555   : > { %v6311_v38 = vmax.f32 %v6229_v6, 0.0  ;;  %v13153_v21 = vunpack.i.h.bf16 %v13151_v50  ;;  %v13152_v43 = vunpack.i.l.bf16 %v13151_v50  ;;  %7889 = vmatmul.mubr.f32.gmra.mxu0 %v7543_v17  ;;  %v7480_v39 = vsel %vm484_vm10, %v6424_v42, %v13148_v1 }
 0x556   : > { %v7576_v28 = vsel %vm484_vm10, %v6552_v15, %v13147_v8  ;;  %v13156_v32 = vpop.permute.xlu0 %13155 }
 0x557   : > { %v17764_v37 = vadd.f32 %v6311_v38, %v19863_v3  ;;  %v13158_v45 = vunpack.i.h.bf16 %v13156_v32  ;;  %v13157_v23 = vunpack.i.l.bf16 %v13156_v32  ;;  %v7608_v9 = vsel %vm3638_vm12, %v7576_v28, %v13152_v43  ;;  %v6553_v28 = vld [vmem:[#allocation2 + $0x61] sm:$0xff] }
 0x558   : > { %v13161_v52 = vpop.permute.xlu1 %13160  ;;  %v7512_v13 = vsel %vm3638_vm12, %v7480_v39, %v13153_v21  ;;  %v6425_v39 = vld [vmem:[#allocation2 + $0x50] sm:$0xff] }
 0x559   : > { %19864 = vst [vmem:[#allocation28_spill] sm:$0xff] %v17764_v37  ;;  %v19767_v27 = vmax.f32 %v17764_v37, 0.0  ;;  %v13163_v6 = vunpack.i.h.bf16 %v13161_v52  ;;  %v13162_v29 = vunpack.i.l.bf16 %v13161_v52  ;;  %v7640_v17 = vsel %vm3671_vm13, %v7608_v9, %v13157_v23 }
 0x55a   : > { %v7544_v1 = vsel %vm3671_vm13, %v7512_v13, %v13158_v45  ;;  %v13166_v46 = vpop.permute.xlu0 %13165  ;;  %7893 = vmatprep.mubr.f32.mxu0 %v7640_v17 }
 0x55b   : > { %6407 = vst.msk [vmem:[#allocation2 + $0x181] sm:$0xff] %vm484_vm10, %v19767_v27  ;;  %v6629_v8 = vld [vmem:[#allocation2 + $0x170] sm:$0xff]  ;;  %v13168_v38 = vunpack.i.h.bf16 %v13166_v46  ;;  %v13167_v43 = vunpack.i.l.bf16 %v13166_v46  ;;  %7894 = vmatmul.mubr.f32.gmra.mxu0 %v7544_v1  ;;  %v7577_v45 = vsel %vm484_vm10, %v6553_v28, %v13162_v29  ;;  %v7481_v23 = vsel %vm484_vm10, %v6425_v39, %v13163_v6  ;;  %v6676_v29 = vld [vmem:[#allocation2 + $0x22] sm:$0xff] }
 0x55c   : > { %v17774_v50 = vld [vmem:[#allocation2 + $0x171] sm:$0xff]  ;;  %v13171_v15 = vpop.permute.xlu1 %13170  ;;  %v13344_v42 = vpack.i.bf16 %v17690_v59, %v6629_v8 }
 0x55d   : > { %v13349_v21 = vpack.i.bf16 %v17708_v63, %v17774_v50  ;;  %v13173_v3 = vunpack.i.h.bf16 %v13171_v15  ;;  %v13172_v32 = vunpack.i.l.bf16 %v13171_v15  ;;  %v17781_v52 = vld [vmem:[#allocation2 + $0x172] sm:$0xff]  ;;  %v7609_v9 = vsel %vm3638_vm12, %v7577_v45, %v13167_v43  ;;  %v6426_v45 = vld [vmem:[#allocation2 + $0x60] sm:$0xff] }
 0x55e   : > { %13345 = vrot.lane.b32.xlu0 %v13344_v42, %s14139_s29  ;;  %v7513_v59 = vsel %vm3638_vm12, %v7481_v23, %v13168_v38  ;;  %v13176_v13 = vpop.permute.xlu0 %13175  ;;  %v13354_v6 = vpack.i.bf16 %v17706_v7, %v17781_v52  ;;  %v17797_v42 = vpop.f32.mrf.mxu1 }
 0x55f   : > { %13350 = vrot.lane.b32.xlu1 %v13349_v21, %s14141_s28  ;;  %v7641_v63 = vsel %vm3671_vm13, %v7609_v9, %v13172_v32  ;;  %v7545_v17 = vsel %vm3671_vm13, %v7513_v59, %v13173_v3  ;;  %v13178_v46 = vunpack.i.h.bf16 %v13176_v13  ;;  %v13177_v15 = vunpack.i.l.bf16 %v13176_v13  ;;  %v6677_v3 = vld [vmem:[#allocation2 + $0x32] sm:$0xff]  ;;  %v6678_v13 = vld [vmem:[#allocation2 + $0x42] sm:$0xff] }
 0x560   : > { %v13186_v1 = vpop.permute.xlu1 %13185  ;;  %7898 = vmatprep.mubr.f32.mxu0 %v7641_v63  ;;  %v6554_v63 = vld [vmem:[#allocation2 + $0x71] sm:$0xff]  ;;  %v6233_v24 = vpop.f32.mrf.mxu1 }
 0x561   : > { %7899 = vmatmul.mubr.f32.gmra.mxu0 %v7545_v17  ;;  %v13188_v23 = vunpack.i.h.bf16 %v13186_v1  ;;  %v13187_v9 = vunpack.i.l.bf16 %v13186_v1  ;;  %v7482_v17 = vsel %vm484_vm10, %v6426_v45, %v13178_v46 }
 0x562   : > { %13355 = vrot.lane.b32.xlu0 %v13354_v6, %s14140_s21  ;;  %11867 = vmatprep.mubr.msk.f32.mxu0 %vm484_vm10, %v6676_v29  ;;  %v17793_v43 = vld [vmem:[#allocation2 + $0x180] sm:$0xff]  ;;  %v17799_v21 = vpop.permute.xlu0 %13180 }
 0x563   : > { %v17795_v38 = vld [vmem:[#allocation2 + $0x181] sm:$0xff]  ;;  %v13359_v28 = vpack.i.bf16 %v17718_v49, %v17793_v43  ;;  %v13182_v46 = vunpack.i.l.bf16 %v17799_v21 }
 0x564   : > { %v13364_v7 = vpack.i.bf16 %v6629_v8, %v17795_v38  ;;  %v13196_v39 = vpop.permute.xlu1 %13195  ;;  %v17804_v32 = vld [vmem:[#allocation2 + $0x182] sm:$0xff]  ;;  %v7578_v8 = vsel %vm484_vm10, %v6554_v63, %v13177_v15  ;;  %v7514_v15 = vsel %vm3638_vm12, %v7482_v17, %v13188_v23 }
 0x565   : > { %v13197_v59 = vunpack.i.l.bf16 %v13196_v39  ;;  %13360 = vrot.lane.b32.xlu1 %v13359_v28, %s14139_s29  ;;  %11868 = vmatmul.mubr.msk.f32.vlgmr.msra.gmra.mxu0 %vm484_vm10, %v6677_v3  ;;  %v6555_v29 = vld [vmem:[#allocation2 + $0x81] sm:$0xff]  ;;  %v13198_v27 = vunpack.i.h.bf16 %v13196_v39  ;;  %v13369_v28 = vpack.i.bf16 %v17774_v50, %v17804_v32 }
 0x566   : > { %v6008_v6 = vpop.f32.mrf.mxu0  ;;  %13365 = vrot.lane.b32.xlu0 %v13364_v7, %s14141_s28  ;;  %11870 = vmatprep.mubr.msk.f32.mxu0 %vm484_vm10, %v6678_v13  ;;  %v13191_v61 = vpop.permute.xlu0 %13190  ;;  %v6679_v13 = vld [vmem:[#allocation2 + $0x52] sm:$0xff]  ;;  %v6680_v39 = vld [vmem:[#allocation2 + $0x62] sm:$0xff] }
 0x567   : > { %v6009_v1 = vadd.f32 %v17657_v54, %v6008_v6  ;;  %v7579_v3 = vsel %vm484_vm10, %v6555_v29, %v13197_v59  ;;  %v13193_v45 = vunpack.i.h.bf16 %v13191_v61  ;;  %v13192_v18 = vunpack.i.l.bf16 %v13191_v61 }
 0x568   : > { %v6010_v7 = vpop.f32.mrf.mxu0  ;;  %v13201_v40 = vpop.permute.xlu1 %13200  ;;  %v7610_v6 = vsel %vm3638_vm12, %v7578_v8, %v13187_v9  ;;  %v7611_v29 = vsel %vm3638_vm12, %v7579_v3, %v13182_v46  ;;  %v13183_v9 = vunpack.i.h.bf16 %v17799_v21 }
 0x569   : > { %v6234_v63 = vadd.f32 %v6233_v24, %v6009_v1  ;;  %v13202_v12 = vunpack.i.l.bf16 %v13201_v40  ;;  %13370 = vrot.lane.b32.xlu1 %v13369_v28, %s14140_s21  ;;  %11871 = vmatmul.mubr.msk.f32.gmra.mxu0 %vm484_vm10, %v6679_v13  ;;  %v7546_v59 = vsel %vm3671_vm13, %v7514_v15, %v13193_v45  ;;  %v7642_v61 = vsel %vm3671_vm13, %v7610_v6, %v13192_v18  ;;  %v6427_v7 = vld [vmem:[#allocation2 + $0x70] sm:$0xff]  ;;  %v6428_v28 = vld [vmem:[#allocation2 + $0xa0] sm:$0xff] }
 0x56a   : > { %11873 = vmatprep.mubr.msk.f32.mxu0 %vm484_vm10, %v6680_v39  ;;  %v13203_v23 = vunpack.i.h.bf16 %v13201_v40  ;;  %v13206_v24 = vpop.permute.xlu0 %13205  ;;  %7903 = vmatprep.mubr.f32.mxu1 %v7642_v61  ;;  %v7483_v1 = vsel %vm484_vm10, %v6427_v7, %v13198_v27  ;;  %v6681_v15 = vld [vmem:[#allocation2 + $0x72] sm:$0xff]  ;;  %v19865_v18 = vmax.f32 %v15978_v25, 0.0 }
 0x56b   : > { %v6312_v14 = vmax.f32 %v6234_v63, 0.0  ;;  %v7643_v17 = vsel %vm3671_vm13, %v7611_v29, %v13202_v12  ;;  %v13208_v8 = vunpack.i.h.bf16 %v13206_v24  ;;  %v13207_v45 = vunpack.i.l.bf16 %v13206_v24  ;;  %7904 = vmatmul.mubr.f32.vlgmr.msra.gmra.mxu1 %v7546_v59  ;;  %v6682_v12 = vld [vmem:[#allocation2 + $0x82] sm:$0xff]  ;;  %v6556_v27 = vld [vmem:[#allocation2 + $0xb1] sm:$0xff] }
 0x56c   : > { %v13211_v13 = vpop.permute.xlu1 %13210  ;;  %7908 = vmatprep.mubr.f32.mxu1 %v7643_v17  ;;  %v7515_v21 = vsel %vm3638_vm12, %v7483_v1, %v13183_v9  ;;  %v6683_v6 = vld [vmem:[#allocation2 + $0x92] sm:$0xff] }
 0x56d   : > { %v17830_v3 = vadd.f32 %v6312_v14, %v19865_v18  ;;  %v13213_v46 = vunpack.i.h.bf16 %v13211_v13  ;;  %v13212_v40 = vunpack.i.l.bf16 %v13211_v13  ;;  %v6013_v63 = vpop.f32.mrf.mxu0  ;;  %11874 = vmatmul.mubr.msk.f32.gmra.mxu0 %vm484_vm10, %v6681_v15  ;;  %v7580_v59 = vsel %vm484_vm10, %v6556_v27, %v13207_v45  ;;  %v6557_v27 = vld [vmem:[#allocation2 + $0xc1] sm:$0xff] }
 0x56e   : > { %v6014_v39 = vadd.f32 %v17657_v54, %v6013_v63  ;;  %11876 = vmatprep.mubr.msk.f32.mxu0 %vm484_vm10, %v6682_v12  ;;  %v7484_v25 = vsel %vm484_vm10, %v6428_v28, %v13208_v8  ;;  %v13216_v29 = vpop.permute.xlu0 %13215  ;;  %v7547_v7 = vsel %vm3671_vm13, %v7515_v21, %v13203_v23  ;;  %v6684_v28 = vld [vmem:[#allocation2 + $0xc2] sm:$0xff]  ;;  %v17847_v23 = vpop.f32.mrf.mxu1 }
 0x56f   : > { %19866 = vst [vmem:[#allocation29_spill] sm:$0xff] %v17830_v3  ;;  %v19773_v14 = vmax.f32 %v17830_v3, 0.0  ;;  %v6015_v61 = vpop.f32.mrf.mxu0  ;;  %v13218_v17 = vunpack.i.h.bf16 %v13216_v29  ;;  %v13217_v13 = vunpack.i.l.bf16 %v13216_v29  ;;  %7909 = vmatmul.mubr.f32.gmra.mxu1 %v7547_v7  ;;  %v7612_v8 = vsel %vm3638_vm12, %v7580_v59, %v13212_v40  ;;  %v6429_v29 = vld [vmem:[#allocation2 + $0xb0] sm:$0xff] }
 0x570   : > { %v6239_v24 = vadd.f32 %v17797_v42, %v6014_v39  ;;  %v13221_v15 = vpop.permute.xlu1 %13220  ;;  %v7516_v45 = vsel %vm3638_vm12, %v7484_v25, %v13213_v46  ;;  %v19867_v39 = vmax.f32 %v15970_v58, 0.0  ;;  %v6685_v25 = vld [vmem:[#allocation2 + $0xd2] sm:$0xff] }
 0x571   : > { %6408 = vst.msk [vmem:[#allocation2 + $0x191] sm:$0xff] %vm484_vm10, %v19773_v14  ;;  %v13223_v1 = vunpack.i.h.bf16 %v13221_v15  ;;  %v13222_v9 = vunpack.i.l.bf16 %v13221_v15  ;;  %11877 = vmatmul.mubr.msk.f32.gmra.mxu0 %vm484_vm10, %v6683_v6  ;;  %v7644_v18 = vsel %vm3671_vm13, %v7612_v8, %v13217_v13  ;;  %v7548_v63 = vsel %vm3671_vm13, %v7516_v45, %v13218_v17  ;;  %v6686_v13 = vld [vmem:[#allocation2 + $0xe2] sm:$0xff]  ;;  %v6243_v15 = vpop.f32.mrf.mxu1  ;;  %v6699_v14 = vld [vmem:[#allocation2 + $0x1d2] sm:$0xff] }
 0x572   : > { %v6313_v42 = vmax.f32 %v6239_v24, 0.0  ;;  %11879 = vmatprep.mubr.msk.f32.mxu0 %vm484_vm10, %v6684_v28  ;;  %v13226_v12 = vpop.permute.xlu0 %13225  ;;  %7913 = vmatprep.mubr.f32.mxu1 %v7644_v18 }
 0x573   : > { %v13228_v6 = vunpack.i.h.bf16 %v13226_v12  ;;  %v13227_v40 = vunpack.i.l.bf16 %v13226_v12  ;;  %7914 = vmatmul.mubr.f32.gmra.mxu1 %v7548_v63  ;;  %v7581_v61 = vsel %vm484_vm10, %v6557_v27, %v13222_v9  ;;  %v7485_v58 = vsel %vm484_vm10, %v6429_v29, %v13223_v1  ;;  %v6430_v27 = vld [vmem:[#allocation2 + $0xc0] sm:$0xff] }
 0x574   : > { %v17854_v21 = vadd.f32 %v6313_v42, %v19867_v39  ;;  %v6018_v59 = vpop.f32.mrf.mxu0  ;;  %v13231_v46 = vpop.permute.xlu1 %13230 }
 0x575   : > { %v6019_v7 = vadd.f32 %v17657_v54, %v6018_v59  ;;  %v13233_v24 = vunpack.i.h.bf16 %v13231_v46  ;;  %v13232_v17 = vunpack.i.l.bf16 %v13231_v46  ;;  %11880 = vmatmul.mubr.msk.f32.gmra.mxu0 %vm484_vm10, %v6685_v25  ;;  %v7613_v45 = vsel %vm3638_vm12, %v7581_v61, %v13227_v40  ;;  %v6687_v59 = vld [vmem:[#allocation2 + $0xf2] sm:$0xff]  ;;  %v6688_v61 = vld [vmem:[#allocation2 + $0x102] sm:$0xff] }
 0x576   : > { %19868 = vst [vmem:[#allocation30_spill] sm:$0xff] %v17854_v21  ;;  %v19774_v28 = vmax.f32 %v17854_v21, 0.0  ;;  %v6020_v8 = vpop.f32.mrf.mxu0  ;;  %11882 = vmatprep.mubr.msk.f32.mxu0 %vm484_vm10, %v6686_v13  ;;  %v7517_v9 = vsel %vm3638_vm12, %v7485_v58, %v13228_v6  ;;  %v13236_v18 = vpop.permute.xlu0 %13235 }
 0x577   : > { %v6244_v42 = vadd.f32 %v6243_v15, %v6019_v7  ;;  %v7645_v63 = vsel %vm3671_vm13, %v7613_v45, %v13232_v17  ;;  %v7549_v12 = vsel %vm3671_vm13, %v7517_v9, %v13233_v24  ;;  %v13238_v1 = vunpack.i.h.bf16 %v13236_v18  ;;  %v6558_v17 = vld [vmem:[#allocation2 + $0xd1] sm:$0xff] }
 0x578   : > { %6409 = vst.msk [vmem:[#allocation2 + $0x1a1] sm:$0xff] %vm484_vm10, %v19774_v28  ;;  %v13237_v39 = vunpack.i.l.bf16 %v13236_v18  ;;  %7918 = vmatprep.mubr.f32.mxu1 %v7645_v63  ;;  %v17869_v46 = vld [vmem:[#allocation2 + $0x190] sm:$0xff]  ;;  %v13241_v25 = vpop.permute.xlu1 %13240  ;;  %v19869_v9 = vmax.f32 %v16057_v2, 0.0 }
 0x579   : > { %v17871_v40 = vld [vmem:[#allocation2 + $0x191] sm:$0xff]  ;;  %v6314_v6 = vmax.f32 %v6244_v42, 0.0  ;;  %7919 = vmatmul.mubr.f32.gmra.mxu1 %v7549_v12  ;;  %11883 = vmatmul.mubr.msk.f32.gmra.mxu0 %vm484_vm10, %v6687_v59  ;;  %v13374_v29 = vpack.i.bf16 %v17781_v52, %v17869_v46  ;;  %v13243_v13 = vunpack.i.h.bf16 %v13241_v25  ;;  %v13242_v58 = vunpack.i.l.bf16 %v13241_v25  ;;  %v6023_v15 = vpop.f32.mrf.mxu0 }
 0x57a   : > { %v13379_v7 = vpack.i.bf16 %v17793_v43, %v17871_v40  ;;  %v17878_v24 = vld [vmem:[#allocation2 + $0x192] sm:$0xff]  ;;  %11885 = vmatprep.mubr.msk.f32.mxu0 %vm484_vm10, %v6688_v61  ;;  %v7582_v8 = vsel %vm484_vm10, %v6558_v17, %v13237_v39  ;;  %v7486_v45 = vsel %vm484_vm10, %v6430_v27, %v13238_v1  ;;  %v6024_v18 = vadd.f32 %v17657_v54, %v6023_v15  ;;  %v13246_v43 = vpop.permute.xlu0 %13245  ;;  %v6690_v54 = vld [vmem:[#allocation2 + $0x122] sm:$0xff] }
 0x57b   : > { %v17885_v42 = vadd.f32 %v6314_v6, %v19869_v9  ;;  %13375 = vrot.lane.b32.xlu0 %v13374_v29, %s14139_s29  ;;  %v6025_v63 = vpop.f32.mrf.mxu0  ;;  %v13248_v12 = vunpack.i.h.bf16 %v13246_v43  ;;  %v13247_v59 = vunpack.i.l.bf16 %v13246_v43  ;;  %v6689_v25 = vld [vmem:[#allocation2 + $0x112] sm:$0xff]  ;;  %v13384_v39 = vpack.i.bf16 %v17795_v38, %v17878_v24 }
 0x57c   : > { %13380 = vrot.lane.b32.xlu1 %v13379_v7, %s14141_s28  ;;  %v6249_v2 = vadd.f32 %v17847_v23, %v6024_v18  ;;  %v13251_v1 = vpop.permute.xlu1 %13250  ;;  %v7614_v6 = vsel %vm3638_vm12, %v7582_v8, %v13242_v58  ;;  %v7518_v61 = vsel %vm3638_vm12, %v7486_v45, %v13243_v13  ;;  %v6691_v9 = vld [vmem:[#allocation2 + $0x132] sm:$0xff] }
 0x57d   : > { %19870 = vst [vmem:[#allocation31_spill] sm:$0xff] %v17885_v42  ;;  %v19775_v27 = vmax.f32 %v17885_v42, 0.0  ;;  %11886 = vmatmul.mubr.msk.f32.gmra.mxu0 %vm484_vm10, %v6689_v25  ;;  %v13253_v29 = vunpack.i.h.bf16 %v13251_v1  ;;  %v13252_v7 = vunpack.i.l.bf16 %v13251_v1  ;;  %v7646_v17 = vsel %vm3671_vm13, %v7614_v6, %v13247_v59  ;;  %v6431_v59 = vld [vmem:[#allocation2 + $0xd0] sm:$0xff] }
 0x57e   : > { %11888 = vmatprep.mubr.msk.f32.mxu0 %vm484_vm10, %v6690_v54  ;;  %v7550_v15 = vsel %vm3671_vm13, %v7518_v61, %v13248_v12  ;;  %v6315_v23 = vmax.f32 %v6249_v2, 0.0  ;;  %v13256_v18 = vpop.permute.xlu0 %13255  ;;  %7923 = vmatprep.mubr.f32.mxu1 %v7646_v17  ;;  %v6559_v12 = vld [vmem:[#allocation2 + $0xe1] sm:$0xff] }
 0x57f   : > { %6410 = vst.msk [vmem:[#allocation2 + $0x1b1] sm:$0xff] %vm484_vm10, %v19775_v27  ;;  %13385 = vrot.lane.b32.xlu0 %v13384_v39, %s14140_s21  ;;  %v17904_v58 = vld [vmem:[#allocation2 + $0x1a0] sm:$0xff]  ;;  %v13258_v8 = vunpack.i.h.bf16 %v13256_v18  ;;  %v13257_v45 = vunpack.i.l.bf16 %v13256_v18  ;;  %7924 = vmatmul.mubr.f32.gmra.mxu1 %v7550_v15  ;;  %v19871_v39 = vmax.f32 %v16053_v44, 0.0  ;;  %v7583_v54 = vsel %vm484_vm10, %v6559_v12, %v13252_v7 }
 0x580   : > { %v17906_v13 = vld [vmem:[#allocation2 + $0x1a1] sm:$0xff]  ;;  %v13389_v43 = vpack.i.bf16 %v17804_v32, %v17904_v58  ;;  %v13261_v1 = vpop.permute.xlu1 %13260  ;;  %v7487_v6 = vsel %vm484_vm10, %v6431_v59, %v13253_v29 }
 0x581   : > { %v13394_v63 = vpack.i.bf16 %v17869_v46, %v17906_v13  ;;  %v17912_v25 = vld [vmem:[#allocation2 + $0x1a2] sm:$0xff]  ;;  %v17916_v2 = vadd.f32 %v6315_v23, %v19871_v39  ;;  %11889 = vmatmul.mubr.msk.f32.gmra.mxu0 %vm484_vm10, %v6691_v9  ;;  %v13263_v61 = vunpack.i.h.bf16 %v13261_v1  ;;  %v13262_v17 = vunpack.i.l.bf16 %v13261_v1 }
 0x582   : > { %13390 = vrot.lane.b32.xlu1 %v13389_v43, %s14139_s29  ;;  %11891 = vmatprep.mubr.msk.f32.mxu0 %vm484_vm10, %v17718_v49  ;;  %v7615_v15 = vsel %vm3638_vm12, %v7583_v54, %v13257_v45  ;;  %v7519_v44 = vsel %vm3638_vm12, %v7487_v6, %v13258_v8  ;;  %v13266_v9 = vpop.permute.xlu0 %13265  ;;  %v13399_v7 = vpack.i.bf16 %v17871_v40, %v17912_v25  ;;  %v6560_v8 = vld [vmem:[#allocation2 + $0xf1] sm:$0xff]  ;;  %v6432_v45 = vld [vmem:[#allocation2 + $0xe0] sm:$0xff] }
 0x583   : > { %19872 = vst [vmem:[#allocation32_spill] sm:$0xff] %v17916_v2  ;;  %v19776_v23 = vmax.f32 %v17916_v2, 0.0  ;;  %13395 = vrot.lane.b32.xlu0 %v13394_v63, %s14141_s28  ;;  %v13268_v29 = vunpack.i.h.bf16 %v13266_v9  ;;  %v13267_v18 = vunpack.i.l.bf16 %v13266_v9  ;;  %v7647_v12 = vsel %vm3671_vm13, %v7615_v15, %v13262_v17 }
 0x584   : > { %v7551_v43 = vsel %vm3671_vm13, %v7519_v44, %v13263_v61  ;;  %v13271_v49 = vpop.permute.xlu1 %13270  ;;  %7928 = vmatprep.mubr.f32.mxu1 %v7647_v12 }
 0x585   : > { %6411 = vst.msk [vmem:[#allocation2 + $0x1c1] sm:$0xff] %vm484_vm10, %v19776_v23  ;;  %11892 = vmatmul.mubr.msk.f32.gmra.mxu0 %vm484_vm10, %v17781_v52  ;;  %v13273_v63 = vunpack.i.h.bf16 %v13271_v49  ;;  %v13272_v59 = vunpack.i.l.bf16 %v13271_v49  ;;  %7929 = vmatmul.mubr.f32.gmra.mxu1 %v7551_v43  ;;  %v7584_v54 = vsel %vm484_vm10, %v6560_v8, %v13267_v18  ;;  %v7488_v6 = vsel %vm484_vm10, %v6432_v45, %v13268_v29  ;;  %v6565_v23 = vld [vmem:[#allocation2 + $0x161] sm:$0xff] }
 0x586   : > { %13400 = vrot.lane.b32.xlu1 %v13399_v7, %s14140_s21  ;;  %v17938_v39 = vld [vmem:[#allocation2 + $0x1b0] sm:$0xff]  ;;  %11894 = vmatprep.mubr.msk.f32.mxu0 %vm484_vm10, %v17804_v32  ;;  %v13276_v61 = vpop.permute.xlu0 %13275 }
 0x587   : > { %v17940_v1 = vld [vmem:[#allocation2 + $0x1b1] sm:$0xff]  ;;  %v13404_v52 = vpack.i.bf16 %v17878_v24, %v17938_v39  ;;  %v13278_v15 = vunpack.i.h.bf16 %v13276_v61  ;;  %v13277_v44 = vunpack.i.l.bf16 %v13276_v61  ;;  %v7616_v29 = vsel %vm3638_vm12, %v7584_v54, %v13272_v59  ;;  %v6561_v54 = vld [vmem:[#allocation2 + $0x101] sm:$0xff] }
 0x588   : > { %v13409_v17 = vpack.i.bf16 %v17904_v58, %v17940_v1  ;;  %v6602_v9 = vld [vmem:[#allocation2 + $0x1b2] sm:$0xff]  ;;  %v13281_v7 = vpop.permute.xlu1 %13280  ;;  %v7520_v32 = vsel %vm3638_vm12, %v7488_v6, %v13273_v63 }
 0x589   : > { %13405 = vrot.lane.b32.xlu0 %v13404_v52, %s14139_s29  ;;  %11895 = vmatmul.mubr.msk.f32.gmra.mxu0 %vm484_vm10, %v17878_v24  ;;  %v13283_v18 = vunpack.i.h.bf16 %v13281_v7  ;;  %v13282_v12 = vunpack.i.l.bf16 %v13281_v7  ;;  %v7648_v43 = vsel %vm3671_vm13, %v7616_v29, %v13277_v44  ;;  %v7552_v49 = vsel %vm3671_vm13, %v7520_v32, %v13278_v15  ;;  %v6635_v24 = vld [vmem:[#allocation2 + $0x1d0] sm:$0xff] }
 0x58a   : > { %13410 = vrot.lane.b32.xlu1 %v13409_v17, %s14141_s28  ;;  %11897 = vmatprep.mubr.msk.f32.mxu0 %vm484_vm10, %v17912_v25  ;;  %v13286_v8 = vpop.permute.xlu0 %13285  ;;  %v13414_v45 = vpack.i.bf16 %v17906_v13, %v6602_v9  ;;  %v6433_v6 = vld [vmem:[#allocation2 + $0xf0] sm:$0xff] }
 0x58b   : > { %7933 = vmatprep.mubr.f32.mxu1 %v7648_v43  ;;  %v13288_v61 = vunpack.i.h.bf16 %v13286_v8  ;;  %v13287_v59 = vunpack.i.l.bf16 %v13286_v8  ;;  %v7585_v15 = vsel %vm484_vm10, %v6561_v54, %v13282_v12  ;;  %v7489_v7 = vsel %vm484_vm10, %v6433_v6, %v13283_v18 }
 0x58c   : > { %7934 = vmatmul.mubr.f32.gmra.mxu1 %v7552_v49  ;;  %v6634_v63 = vld [vmem:[#allocation2 + $0x1c0] sm:$0xff]  ;;  %v13291_v52 = vpop.permute.xlu1 %13290 }
 0x58d   : > { %13415 = vrot.lane.b32.xlu0 %v13414_v45, %s14140_s21  ;;  %11898 = vmatmul.mubr.msk.f32.gmra.mxu0 %vm484_vm10, %v6602_v9  ;;  %v13424_v17 = vpack.i.bf16 %v17912_v25, %v6634_v63  ;;  %v6698_v44 = vld [vmem:[#allocation2 + $0x1c2] sm:$0xff]  ;;  %v13293_v29 = vunpack.i.h.bf16 %v13291_v52  ;;  %v13292_v32 = vunpack.i.l.bf16 %v13291_v52  ;;  %v7617_v43 = vsel %vm3638_vm12, %v7585_v15, %v13287_v59 }
 0x58e   : > { %11900 = vmatprep.mubr.msk.f32.mxu0 %vm484_vm10, %v6698_v44  ;;  %v7521_v49 = vsel %vm3638_vm12, %v7489_v7, %v13288_v61  ;;  %v13296_v8 = vpop.permute.xlu0 %13295  ;;  %v13419_v45 = vpack.i.bf16 %v6602_v9, %v6635_v24  ;;  %v17972_v12 = vld [vmem:[#allocation2 + $0x1c1] sm:$0xff]  ;;  %v13434_v54 = vpack.i.bf16 %v17940_v1, %v6698_v44  ;;  %v6667_v61 = vld [vmem:[#allocation2 + $0x1d1] sm:$0xff] }
 0x58f   : > { %13425 = vrot.lane.b32.xlu1 %v13424_v17, %s14139_s29  ;;  %v7649_v25 = vsel %vm3671_vm13, %v7617_v43, %v13292_v32  ;;  %v7553_v28 = vsel %vm3671_vm13, %v7521_v49, %v13293_v29  ;;  %v13298_v59 = vunpack.i.h.bf16 %v13296_v8  ;;  %v13297_v6 = vunpack.i.l.bf16 %v13296_v8  ;;  %v6562_v29 = vld [vmem:[#allocation2 + $0x111] sm:$0xff]  ;;  %v6434_v44 = vld [vmem:[#allocation2 + $0x100] sm:$0xff] }
 0x590   : > { %v13306_v18 = vpop.permute.xlu1 %13305  ;;  %7938 = vmatprep.mubr.f32.mxu1 %v7649_v25  ;;  %v13429_v24 = vpack.i.bf16 %v17938_v39, %v17972_v12  ;;  %v13439_v7 = vpack.i.bf16 %v6634_v63, %v6667_v61  ;;  %v6563_v8 = vld [vmem:[#allocation2 + $0x121] sm:$0xff] }
 0x591   : > { %13420 = vrot.lane.b32.xlu0 %v13419_v45, %s14139_s29  ;;  %7939 = vmatmul.mubr.f32.gmra.mxu1 %v7553_v28  ;;  %v13308_v52 = vunpack.i.h.bf16 %v13306_v18  ;;  %v13307_v17 = vunpack.i.l.bf16 %v13306_v18  ;;  %v7586_v28 = vsel %vm484_vm10, %v6562_v29, %v13297_v6  ;;  %v7490_v43 = vsel %vm484_vm10, %v6434_v44, %v13298_v59 }
 0x592   : > { %11901 = vmatmul.mubr.msk.f32.gmra.mxu0 %vm484_vm10, %v6699_v14  ;;  %v13301_v9 = vpop.permute.xlu0 %13300 }
 0x593   : > { %13435 = vrot.lane.b32.xlu1 %v13434_v54, %s14140_s21  ;;  %v13302_v54 = vunpack.i.l.bf16 %v13301_v9  ;;  %v7618_v63 = vsel %vm3638_vm12, %v7586_v28, %v13307_v17  ;;  %v7522_v61 = vsel %vm3638_vm12, %v7490_v43, %v13308_v52  ;;  %v11849_v28 = vpop.f32.mrf.mxu1 }
 0x594   : > { %v13316_v15 = vpop.permute.xlu1 %13315 }
 0x595   : > { %13430 = vrot.lane.b32.xlu0 %v13429_v24, %s14141_s28  ;;  %v13317_v32 = vunpack.i.l.bf16 %v13316_v15  ;;  %v13318_v14 = vunpack.i.h.bf16 %v13316_v15  ;;  %v6435_v15 = vld [vmem:[#allocation2 + $0x110] sm:$0xff] }
 0x596   : > { %v13311_v49 = vpop.permute.xlu0 %13310 }
 0x597   : > { %13440 = vrot.lane.b32.xlu1 %v13439_v7, %s14141_s28  ;;  %v13313_v45 = vunpack.i.h.bf16 %v13311_v49  ;;  %v13312_v25 = vunpack.i.l.bf16 %v13311_v49  ;;  %v7587_v18 = vsel %vm484_vm10, %v6563_v8, %v13317_v32  ;;  %v7491_v44 = vsel %vm484_vm10, %v6435_v15, %v13318_v14  ;;  %v6253_v14 = vpop.f32.mrf.mxu1 }
 0x598   : > { %v13321_v27 = vpop.permute.xlu1 %13320  ;;  %v7619_v7 = vsel %vm3638_vm12, %v7587_v18, %v13302_v54  ;;  %v13303_v49 = vunpack.i.h.bf16 %v13301_v9  ;;  %v19873_v18 = vmax.f32 %v16136_v22, 0.0  ;;  %v19875_v22 = vmax.f32 %v16132_v36, 0.0 }
 0x599   : > { %v13322_v24 = vunpack.i.l.bf16 %v13321_v27  ;;  %v7650_v6 = vsel %vm3671_vm13, %v7618_v63, %v13312_v25  ;;  %v7554_v59 = vsel %vm3671_vm13, %v7522_v61, %v13313_v45  ;;  %v13323_v29 = vunpack.i.h.bf16 %v13321_v27  ;;  %v17997_v27 = vld [vmem:[%s19686_s4 + $0x1] ss:$0 sm:$0xff] }
 0x59a   : > { %7943 = vmatprep.mubr.f32.mxu1 %v7650_v6  ;;  %v7523_v17 = vsel %vm3638_vm12, %v7491_v44, %v13303_v49  ;;  %v6436_v49 = vld [vmem:[#allocation2 + $0x140] sm:$0xff] }
 0x59b   : > { %7944 = vmatmul.mubr.f32.gmra.mxu1 %v7554_v59  ;;  %v7651_v32 = vsel %vm3671_vm13, %v7619_v7, %v13322_v24  ;;  %v7555_v52 = vsel %vm3671_vm13, %v7523_v17, %v13323_v29 }
 0x59c   : > { %7948 = vmatprep.mubr.f32.mxu1 %v7651_v32 }
 0x59f   : > { %7949 = vmatmul.mubr.f32.gmra.mxu1 %v7555_v52 }
 0x5a9   : > { %v6028_v43 = vpop.f32.mrf.mxu0 }
 0x5aa   : > { %v6029_v8 = vadd.f32 %v17997_v27, %v6028_v43 }
 0x5ab   : > { %v6030_v9 = vpop.f32.mrf.mxu0 }
 0x5ac   : > { %v6254_v45 = vadd.f32 %v6253_v14, %v6029_v8 }
 0x5ae   : > { %v6316_v25 = vmax.f32 %v6254_v45, 0.0 }
 0x5af   : > { %v13326_v6 = vpop.permute.xlu0 %13325 }
 0x5b0   : > { %v18002_v54 = vadd.f32 %v6316_v25, %v19873_v18  ;;  %v6033_v63 = vpop.f32.mrf.mxu0  ;;  %v13328_v7 = vunpack.i.h.bf16 %v13326_v6  ;;  %v13327_v44 = vunpack.i.l.bf16 %v13326_v6  ;;  %v6476_v18 = vld [vmem:[#allocation2 + $0x1e1] sm:$0xff] }
 0x5b1   : > { %v6034_v61 = vadd.f32 %v17997_v27, %v6033_v63 }
 0x5b2   : > { %19874 = vst [vmem:[#allocation33_spill] sm:$0xff] %v18002_v54  ;;  %v19777_v24 = vmax.f32 %v18002_v54, 0.0  ;;  %v6035_v59 = vpop.f32.mrf.mxu0  ;;  %v7588_v45 = vsel %vm484_vm10, %v17731_v19, %v13327_v44  ;;  %v7492_v25 = vsel %vm484_vm10, %v6436_v49, %v13328_v7 }
 0x5b3   : > { %v6259_v15 = vadd.f32 %v11849_v28, %v6034_v61 }
 0x5b4   : > { %6412 = vst.msk [vmem:[#allocation2 + $0x1f1] sm:$0xff] %vm484_vm10, %v19777_v24 }
 0x5b5   : > { %v6317_v29 = vmax.f32 %v6259_v15, 0.0  ;;  %v6508_v15 = vld [vmem:[#allocation2 + $0x1e2] sm:$0xff] }
 0x5b7   : > { %v18011_v32 = vadd.f32 %v6317_v29, %v19875_v22  ;;  %v13336_v17 = vpop.permute.xlu0 %13335 }
 0x5b8   : > { %v13331_v52 = vpop.permute.xlu1 %13330  ;;  %v13338_v43 = vunpack.i.h.bf16 %v13336_v17  ;;  %v13337_v8 = vunpack.i.l.bf16 %v13336_v17 }
 0x5b9   : > { %v13333_v14 = vunpack.i.h.bf16 %v13331_v52  ;;  %v13332_v9 = vunpack.i.l.bf16 %v13331_v52  ;;  %v19778_v28 = vmax.f32 %v18011_v32, 0.0  ;;  %v11852_v52 = vpop.f32.mrf.mxu1 }
 0x5bb   : > { %v7620_v63 = vsel %vm3638_vm12, %v7588_v45, %v13332_v9  ;;  %v7524_v36 = vsel %vm3638_vm12, %v7492_v25, %v13333_v14  ;;  %6413 = vst.msk [vmem:[#allocation2 + $0x201] sm:$0xff] %vm484_vm10, %v19778_v28  ;;  %v18024_v59 = vld [vmem:[#allocation2 + $0x1f2] sm:$0xff]  ;;  %v6263_v25 = vpop.f32.mrf.mxu1 }
 0x5bc   : > { %v7652_v61 = vsel %vm3671_vm13, %v7620_v63, %v13337_v8  ;;  %v7556_v6 = vsel %vm3671_vm13, %v7524_v36, %v13338_v43  ;;  %v13444_v19 = vpack.i.bf16 %v6476_v18, %v18024_v59  ;;  %v6540_v29 = vld [vmem:[#allocation2 + $0x1f0] sm:$0xff]  ;;  %v13341_v9 = vpop.permute.xlu1 %13340 }
 0x5bd   : > { %7953 = vmatprep.mubr.f32.mxu1 %v7652_v61  ;;  %v18040_v43 = vld [vmem:[#allocation2 + $0x1f1] sm:$0xff]  ;;  %v13342_v36 = vunpack.i.l.bf16 %v13341_v9  ;;  %v13343_v61 = vunpack.i.h.bf16 %v13341_v9 }
 0x5be   : > { %7954 = vmatmul.mubr.f32.gmra.mxu1 %v7556_v6  ;;  %13445 = vrot.lane.b32.xlu0 %v13444_v19, %s14140_s21  ;;  %v19876_v19 = vld [vmem:[#allocation11_spill] sm:$0xff] }
 0x5c2   : > { %v18028_v7 = vld [vmem:[#allocation2 + $0x202] sm:$0xff] }
 0x5c3   : > { %v18030_v44 = vld [vmem:[#allocation2 + $0x201] sm:$0xff]  ;;  %11903 = vmatprep.mubr.msk.f32.mxu0 %vm484_vm10, %v18028_v7  ;;  %v13459_v8 = vpack.i.bf16 %v18040_v43, %v18028_v7 }
 0x5c4   : > { %v18032_v49 = vld [vmem:[#allocation2 + $0x200] sm:$0xff]  ;;  %v13454_v22 = vpack.i.bf16 %v6540_v29, %v18030_v44 }
 0x5c5   : > { %v13449_v17 = vpack.i.bf16 %v6508_v15, %v18032_v49  ;;  %v19877_v15 = vmax.f32 %v19876_v19, 0.0 }
 0x5c6   : > { %13455 = vrot.lane.b32.xlu0 %v13454_v22, %s14141_s28 }
 0x5c7   : > { %13450 = vrot.lane.b32.xlu1 %v13449_v17, %s14139_s29 }
 0x5c9   : > { %v6038_v14 = vpop.f32.mrf.mxu0 }
 0x5ca   : > { %v6039_v45 = vadd.f32 %v17997_v27, %v6038_v14 }
 0x5cb   : > { %13460 = vrot.lane.b32.xlu1 %v13459_v8, %s14140_s21  ;;  %v6040_v18 = vpop.f32.mrf.mxu0  ;;  %v7589_v8 = vsel %vm484_vm10, %v6565_v23, %v13342_v36 }
 0x5cc   : > { %v6264_v63 = vadd.f32 %v6263_v25, %v6039_v45 }
 0x5ce   : > { %v6318_v6 = vmax.f32 %v6264_v63, 0.0  ;;  %v7493_v63 = vsel %vm484_vm10, %v6437_v55, %v13343_v61  ;;  %v19878_v55 = vld [vmem:[#allocation10_spill] sm:$0xff] }
 0x5d0   : > { %v18048_v29 = vadd.f32 %v6318_v6, %v19877_v15  ;;  %v6043_v22 = vpop.f32.mrf.mxu0  ;;  %v13346_v17 = vpop.permute.xlu0 %13345 }
 0x5d1   : > { %v6044_v24 = vadd.f32 %v17997_v27, %v6043_v22  ;;  %v13348_v28 = vunpack.i.h.bf16 %v13346_v17  ;;  %v13347_v10 = vunpack.i.l.bf16 %v13346_v17  ;;  %v13351_v14 = vpop.permute.xlu1 %13350 }
 0x5d2   : > { %v19782_v45 = vmax.f32 %v18048_v29, 0.0  ;;  %v13353_v25 = vunpack.i.h.bf16 %v13351_v14  ;;  %v13352_v9 = vunpack.i.l.bf16 %v13351_v14  ;;  %v6045_v18 = vpop.f32.mrf.mxu0 }
 0x5d3   : > { %v6269_v6 = vadd.f32 %v11852_v52, %v6044_v24  ;;  %v7621_v19 = vsel %vm3638_vm12, %v7589_v8, %v13347_v10  ;;  %v7525_v15 = vsel %vm3638_vm12, %v7493_v63, %v13348_v28  ;;  %v19879_v24 = vmax.f32 %v19878_v55, 0.0  ;;  %v6438_v63 = vld [vmem:[#allocation2 + $0x160] sm:$0xff] }
 0x5d4   : > { %6414 = vst.msk [vmem:[#allocation2 + $0x211] sm:$0xff] %vm484_vm10, %v19782_v45  ;;  %v13356_v22 = vpop.permute.xlu0 %13355  ;;  %v7653_v23 = vsel %vm3671_vm13, %v7621_v19, %v13352_v9  ;;  %v7557_v36 = vsel %vm3671_vm13, %v7525_v15, %v13353_v25 }
 0x5d5   : > { %v6319_v17 = vmax.f32 %v6269_v6, 0.0  ;;  %v13358_v16 = vunpack.i.h.bf16 %v13356_v22  ;;  %v13357_v14 = vunpack.i.l.bf16 %v13356_v22  ;;  %7958 = vmatprep.mubr.f32.mxu1 %v7653_v23 }
 0x5d6   : > { %7959 = vmatmul.mubr.f32.gmra.mxu1 %v7557_v36 }
 0x5d7   : > { %v18063_v52 = vadd.f32 %v6319_v17, %v19879_v24  ;;  %v13361_v10 = vpop.permute.xlu1 %13360  ;;  %v7590_v18 = vsel %vm484_vm10, %v17774_v50, %v13357_v14  ;;  %v7494_v19 = vsel %vm484_vm10, %v6438_v63, %v13358_v16 }
 0x5d8   : > { %v13363_v28 = vunpack.i.h.bf16 %v13361_v10  ;;  %v13362_v61 = vunpack.i.l.bf16 %v13361_v10  ;;  %v13366_v8 = vpop.permute.xlu0 %13365 }
 0x5d9   : > { %v19783_v9 = vmax.f32 %v18063_v52, 0.0  ;;  %v13368_v25 = vunpack.i.h.bf16 %v13366_v8  ;;  %v13367_v6 = vunpack.i.l.bf16 %v13366_v8  ;;  %v11855_v8 = vpop.f32.mrf.mxu1 }
 0x5da   : > { %v7622_v15 = vsel %vm3638_vm12, %v7590_v18, %v13362_v61  ;;  %v7526_v22 = vsel %vm3638_vm12, %v7494_v19, %v13363_v28 }
 0x5db   : > { %6415 = vst.msk [vmem:[#allocation2 + $0x221] sm:$0xff] %vm484_vm10, %v19783_v9  ;;  %v7654_v23 = vsel %vm3671_vm13, %v7622_v15, %v13367_v6  ;;  %v18075_v36 = vld [vmem:[#allocation2 + $0x212] sm:$0xff]  ;;  %v7558_v50 = vsel %vm3671_vm13, %v7526_v22, %v13368_v25  ;;  %v13371_v18 = vpop.permute.xlu1 %13370  ;;  %v6273_v6 = vpop.f32.mrf.mxu1 }
 0x5dc   : > { %v6637_v17 = vld [vmem:[#allocation2 + $0x210] sm:$0xff]  ;;  %7963 = vmatprep.mubr.f32.mxu1 %v7654_v23  ;;  %11904 = vmatmul.mubr.msk.f32.gmra.mxu0 %vm484_vm10, %v18075_v36  ;;  %v13474_v24 = vpack.i.bf16 %v18030_v44, %v18075_v36  ;;  %v13373_v22 = vunpack.i.h.bf16 %v13371_v18 }
 0x5dd   : > { %v18078_v14 = vld [vmem:[#allocation2 + $0x211] sm:$0xff]  ;;  %v13464_v16 = vpack.i.bf16 %v18024_v59, %v6637_v17  ;;  %7964 = vmatmul.mubr.f32.gmra.mxu1 %v7558_v50  ;;  %v19880_v50 = vld [vmem:[#allocation13_spill] sm:$0xff] }
 0x5de   : > { %v13469_v55 = vpack.i.bf16 %v18032_v49, %v18078_v14 }
 0x5df   : > { %13465 = vrot.lane.b32.xlu0 %v13464_v16, %s14139_s29 }
 0x5e0   : > { %13470 = vrot.lane.b32.xlu1 %v13469_v55, %s14141_s28 }
 0x5e2   : > { %v18090_v10 = vld [vmem:[#allocation2 + $0x222] sm:$0xff] }
 0x5e3   : > { %13475 = vrot.lane.b32.xlu0 %v13474_v24, %s14140_s21  ;;  %v18092_v28 = vld [vmem:[#allocation2 + $0x220] sm:$0xff]  ;;  %11906 = vmatprep.mubr.msk.f32.mxu0 %vm484_vm10, %v18090_v10  ;;  %v13489_v25 = vpack.i.bf16 %v18078_v14, %v18090_v10 }
 0x5e4   : > { %v18094_v61 = vld [vmem:[#allocation2 + $0x221] sm:$0xff]  ;;  %v13479_v59 = vpack.i.bf16 %v18028_v7, %v18092_v28  ;;  %v13372_v7 = vunpack.i.l.bf16 %v13371_v18 }
 0x5e5   : > { %v13484_v49 = vpack.i.bf16 %v6637_v17, %v18094_v61  ;;  %v19881_v17 = vmax.f32 %v19880_v50, 0.0 }
 0x5e6   : > { %13480 = vrot.lane.b32.xlu1 %v13479_v59, %s14139_s29  ;;  %v6048_v44 = vpop.f32.mrf.mxu0 }
 0x5e7   : > { %13485 = vrot.lane.b32.xlu0 %v13484_v49, %s14141_s28  ;;  %v6049_v63 = vadd.f32 %v17997_v27, %v6048_v44 }
 0x5e8   : > { %v6050_v19 = vpop.f32.mrf.mxu0 }
 0x5e9   : > { %v6274_v15 = vadd.f32 %v6273_v6, %v6049_v63  ;;  %v7591_v19 = vsel %vm484_vm10, %v17795_v38, %v13372_v7  ;;  %v6439_v63 = vld [vmem:[#allocation2 + $0x170] sm:$0xff] }
 0x5ea   : > { %13490 = vrot.lane.b32.xlu1 %v13489_v25, %s14140_s21  ;;  %v7495_v50 = vsel %vm484_vm10, %v6439_v63, %v13373_v22  ;;  %v19882_v22 = vld [vmem:[#allocation12_spill] sm:$0xff] }
 0x5eb   : > { %v6320_v23 = vmax.f32 %v6274_v15, 0.0 }
 0x5ed   : > { %v18109_v16 = vadd.f32 %v6320_v23, %v19881_v17  ;;  %v6053_v55 = vpop.f32.mrf.mxu0  ;;  %v13376_v24 = vpop.permute.xlu0 %13375 }
 0x5ee   : > { %v6054_v59 = vadd.f32 %v17997_v27, %v6053_v55  ;;  %v13378_v49 = vunpack.i.h.bf16 %v13376_v24  ;;  %v13377_v44 = vunpack.i.l.bf16 %v13376_v24  ;;  %v13381_v45 = vpop.permute.xlu1 %13380 }
 0x5ef   : > { %v19785_v25 = vmax.f32 %v18109_v16, 0.0  ;;  %v13383_v6 = vunpack.i.h.bf16 %v13381_v45  ;;  %v13382_v18 = vunpack.i.l.bf16 %v13381_v45  ;;  %v6055_v15 = vpop.f32.mrf.mxu0 }
 0x5f0   : > { %v6279_v23 = vadd.f32 %v11855_v8, %v6054_v59  ;;  %v7623_v17 = vsel %vm3638_vm12, %v7591_v19, %v13377_v44  ;;  %v7527_v9 = vsel %vm3638_vm12, %v7495_v50, %v13378_v49  ;;  %v11858_v15 = vpop.f32.mrf.mxu1  ;;  %v11321_v8 = vld [vmem:[%s19685_s3 + $0x3d8] sm:$0xff]  ;;  %v19883_v59 = vmax.f32 %v19882_v22, 0.0 }
 0x5f1   : > { %6416 = vst.msk [vmem:[#allocation2 + $0x231] sm:$0xff] %vm484_vm10, %v19785_v25  ;;  %v13386_v55 = vpop.permute.xlu0 %13385  ;;  %v7655_v38 = vsel %vm3671_vm13, %v7623_v17, %v13382_v18  ;;  %v7559_v7 = vsel %vm3671_vm13, %v7527_v9, %v13383_v6  ;;  %9713 = vmatpush1.msra.mxu0 %v11321_v8  ;;  %v11320_v17 = vld [vmem:[%s19685_s3 + $0x3d0] sm:$0xff] }
 0x5f2   : > { %v6321_v24 = vmax.f32 %v6279_v23, 0.0  ;;  %v13388_v34 = vunpack.i.h.bf16 %v13386_v55  ;;  %v13387_v45 = vunpack.i.l.bf16 %v13386_v55  ;;  %7968 = vmatprep.mubr.f32.mxu1 %v7655_v38  ;;  %9714 = vmatprep.subr.mxu0 %v19827_v47  ;;  %v6440_v23 = vld [vmem:[#allocation2 + $0x180] sm:$0xff]  ;;  %v6283_v38 = vpop.f32.mrf.mxu1 }
 0x5f3   : > { %7969 = vmatmul.mubr.f32.gmra.mxu1 %v7559_v7  ;;  %9715 = vmatpush1.msra.mxu0 %v11320_v17 }
 0x5f4   : > { %v18128_v49 = vadd.f32 %v6321_v24, %v19883_v59  ;;  %v6058_v44 = vpop.f32.mrf.mxu0  ;;  %v13391_v19 = vpop.permute.xlu1 %13390  ;;  %v7592_v50 = vsel %vm484_vm10, %v17871_v40, %v13387_v45  ;;  %v7496_v22 = vsel %vm484_vm10, %v6440_v23, %v13388_v34  ;;  %v11319_v59 = vld [vmem:[%s19685_s3 + $0x3c8] sm:$0xff]  ;;  %9716 = vmatprep.subr.mxu0 %v19827_v47 }
 0x5f5   : > { %v6059_v9 = vadd.f32 %v17997_v27, %v6058_v44  ;;  %v13393_v63 = vunpack.i.h.bf16 %v13391_v19  ;;  %v13392_v6 = vunpack.i.l.bf16 %v13391_v19  ;;  %v13396_v18 = vpop.permute.xlu0 %13395  ;;  %9717 = vmatpush1.msra.mxu0 %v11319_v59  ;;  %v11317_v59 = vld [vmem:[%s19685_s3 + $0x3b8] sm:$0xff] }
 0x5f6   : > { %v19786_v55 = vmax.f32 %v18128_v49, 0.0  ;;  %v13398_v7 = vunpack.i.h.bf16 %v13396_v18  ;;  %v13397_v24 = vunpack.i.l.bf16 %v13396_v18  ;;  %v6060_v8 = vpop.f32.mrf.mxu0  ;;  %9718 = vmatprep.subr.mxu0 %v19827_v47 }
 0x5f7   : > { %v6284_v44 = vadd.f32 %v6283_v38, %v6059_v9  ;;  %v7624_v40 = vsel %vm3638_vm12, %v7592_v50, %v13392_v6  ;;  %v7528_v45 = vsel %vm3638_vm12, %v7496_v22, %v13393_v63 }
 0x5f8   : > { %6417 = vst.msk [vmem:[#allocation2 + $0x241] sm:$0xff] %vm484_vm10, %v19786_v55  ;;  %v13401_v19 = vpop.permute.xlu1 %13400  ;;  %v7656_v18 = vsel %vm3671_vm13, %v7624_v40, %v13397_v24  ;;  %v18149_v34 = vld [vmem:[#allocation2 + $0x232] sm:$0xff]  ;;  %v7560_v23 = vsel %vm3671_vm13, %v7528_v45, %v13398_v7  ;;  %v11318_v7 = vld [vmem:[%s19685_s3 + $0x3c0] sm:$0xff] }
 0x5f9   : > { %v18152_v17 = vld [vmem:[#allocation2 + $0x230] sm:$0xff]  ;;  %v6322_v6 = vmax.f32 %v6284_v44, 0.0  ;;  %v13403_v63 = vunpack.i.h.bf16 %v13401_v19  ;;  %v13402_v50 = vunpack.i.l.bf16 %v13401_v19  ;;  %v6063_v38 = vpop.f32.mrf.mxu0  ;;  %7973 = vmatprep.mubr.f32.mxu1 %v7656_v18  ;;  %11907 = vmatmul.mubr.msk.f32.gmra.mxu0 %vm484_vm10, %v18149_v34 }
 0x5fa   : > { %v18154_v9 = vld [vmem:[#allocation2 + $0x231] sm:$0xff]  ;;  %v13494_v24 = vpack.i.bf16 %v18075_v36, %v18152_v17  ;;  %v6064_v8 = vadd.f32 %v17997_v27, %v6063_v38  ;;  %7974 = vmatmul.mubr.f32.gmra.mxu1 %v7560_v23  ;;  %v13504_v27 = vpack.i.bf16 %v18094_v61, %v18149_v34  ;;  %9719 = vmatpush1.msra.mxu0 %v11318_v7 }
 0x5fb   : > { %v13499_v22 = vpack.i.bf16 %v18092_v28, %v18154_v9  ;;  %v19884_v44 = vld [vmem:[#allocation15_spill] sm:$0xff]  ;;  %v6065_v36 = vpop.f32.mrf.mxu0  ;;  %v13406_v19 = vpop.permute.xlu0 %13405  ;;  %v7593_v25 = vsel %vm484_vm10, %v17906_v13, %v13402_v50  ;;  %9720 = vmatprep.subr.mxu0 %v19827_v47 }
 0x5fc   : > { %v19885_v40 = vmax.f32 %v19884_v44, 0.0  ;;  %13495 = vrot.lane.b32.xlu0 %v13494_v24, %s14139_s29  ;;  %v6289_v18 = vadd.f32 %v11858_v15, %v6064_v8  ;;  %v13408_v28 = vunpack.i.h.bf16 %v13406_v19  ;;  %v13407_v23 = vunpack.i.l.bf16 %v13406_v19  ;;  %v13411_v38 = vpop.permute.xlu1 %13410  ;;  %9721 = vmatpush1.msra.mxu0 %v11317_v59  ;;  %v11316_v61 = vld [vmem:[%s19685_s3 + $0x3b0] sm:$0xff] }
 0x5fd   : > { %13500 = vrot.lane.b32.xlu1 %v13499_v22, %s14141_s28  ;;  %v13413_v44 = vunpack.i.h.bf16 %v13411_v38  ;;  %v13412_v24 = vunpack.i.l.bf16 %v13411_v38  ;;  %9722 = vmatprep.subr.mxu0 %v19827_v47 }
 0x5fe   : > { %v18172_v45 = vadd.f32 %v6322_v6, %v19885_v40  ;;  %v7497_v40 = vsel %vm484_vm10, %v17869_v46, %v13403_v63  ;;  %v6323_v15 = vmax.f32 %v6289_v18, 0.0  ;;  %v7625_v7 = vsel %vm3638_vm12, %v7593_v25, %v13407_v23  ;;  %9723 = vmatpush1.msra.mxu0 %v11316_v61  ;;  %v19886_v25 = vld [vmem:[#allocation14_spill] sm:$0xff] }
 0x5ff   : > { %v7529_v8 = vsel %vm3638_vm12, %v7497_v40, %v13408_v28  ;;  %v13416_v13 = vpop.permute.xlu0 %13415  ;;  %v7657_v46 = vsel %vm3671_vm13, %v7625_v7, %v13412_v24  ;;  %v18195_v63 = vld [vmem:[#allocation2 + $0x242] sm:$0xff]  ;;  %v19887_v36 = vmax.f32 %v19886_v25, 0.0  ;;  %9724 = vmatprep.subr.mxu0 %v19827_v47  ;;  %v11313_v7 = vld [vmem:[%s19685_s3 + $0x398] sm:$0xff] }
 0x600   : > { %v19788_v6 = vmax.f32 %v18172_v45, 0.0  ;;  %13505 = vrot.lane.b32.xlu0 %v13504_v27, %s14140_s21  ;;  %v7561_v50 = vsel %vm3671_vm13, %v7529_v8, %v13413_v44  ;;  %v6640_v22 = vld [vmem:[#allocation2 + $0x240] sm:$0xff]  ;;  %7978 = vmatprep.mubr.f32.mxu1 %v7657_v46  ;;  %v11315_v18 = vld [vmem:[%s19685_s3 + $0x3a8] sm:$0xff]  ;;  %v13417_v44 = vunpack.i.l.bf16 %v13416_v13  ;;  %v13418_v40 = vunpack.i.h.bf16 %v13416_v13  ;;  %v11312_v46 = vld [vmem:[%s19685_s3 + $0x390] sm:$0xff] }
 0x601   : > { %v18198_v59 = vld [vmem:[#allocation2 + $0x241] sm:$0xff]  ;;  %v18202_v19 = vadd.f32 %v6323_v15, %v19887_v36  ;;  %11909 = vmatprep.mubr.msk.f32.mxu0 %vm484_vm10, %v18195_v63  ;;  %v13509_v27 = vpack.i.bf16 %v18090_v10, %v6640_v22  ;;  %v13426_v28 = vpop.permute.xlu1 %13425  ;;  %7979 = vmatmul.mubr.f32.gmra.mxu1 %v7561_v50  ;;  %v13519_v15 = vpack.i.bf16 %v18154_v9, %v18195_v63 }
 0x602   : > { %6418 = vst.msk [vmem:[#allocation2 + $0x251] sm:$0xff] %vm484_vm10, %v19788_v6  ;;  %v13514_v23 = vpack.i.bf16 %v18152_v17, %v18198_v59  ;;  %v18214_v24 = vpop.f32.mrf.mxu0  ;;  %9725 = vmatpush1.msra.mxu0 %v11315_v18  ;;  %v11314_v10 = vld [vmem:[%s19685_s3 + $0x3a0] sm:$0xff]  ;;  %v13427_v8 = vunpack.i.l.bf16 %v13426_v28  ;;  %v13428_v50 = vunpack.i.h.bf16 %v13426_v28  ;;  %v7594_v18 = vsel %vm484_vm10, %v17940_v1, %v13417_v44  ;;  %v11311_v1 = vld [vmem:[%s19685_s3 + $0x388] sm:$0xff] }
 0x603   : > { %v19787_v38 = vmax.f32 %v18202_v19, 0.0  ;;  %13510 = vrot.lane.b32.xlu1 %v13509_v27, %s14139_s29  ;;  %v18221_v61 = vpop.permute.xlu0 %13420  ;;  %9726 = vmatprep.subr.mxu0 %v19827_v47 }
 0x604   : > { %13515 = vrot.lane.b32.xlu0 %v13514_v23, %s14141_s28  ;;  %v7877_v17 = vpop.f32.mrf.mxu0  ;;  %9727 = vmatpush1.msra.mxu0 %v11314_v10  ;;  %v13422_v44 = vunpack.i.l.bf16 %v18221_v61 }
 0x605   : > { %6419 = vst.msk [vmem:[#allocation2 + $0x261] sm:$0xff] %vm484_vm10, %v19787_v38  ;;  %v13436_v13 = vpop.permute.xlu1 %13435  ;;  %9728 = vmatprep.subr.mxu0 %v19827_v47 }
 0x606   : > { %v13437_v25 = vunpack.i.l.bf16 %v13436_v13  ;;  %9729 = vmatpush1.msra.mxu0 %v11313_v7  ;;  %v13438_v23 = vunpack.i.h.bf16 %v13436_v13 }
 0x607   : > { %13520 = vrot.lane.b32.xlu1 %v13519_v15, %s14140_s21  ;;  %v13431_v10 = vpop.permute.xlu0 %13430  ;;  %v7498_v15 = vsel %vm484_vm10, %v17904_v58, %v13418_v40  ;;  %9730 = vmatprep.subr.mxu0 %v19827_v47  ;;  %v7626_v58 = vsel %vm3638_vm12, %v7594_v18, %v13427_v8 }
 0x608   : > { %v13433_v55 = vunpack.i.h.bf16 %v13431_v10  ;;  %v13432_v38 = vunpack.i.l.bf16 %v13431_v10  ;;  %v7595_v6 = vsel %vm484_vm10, %v17972_v12, %v13437_v25  ;;  %9731 = vmatpush1.msra.mxu0 %v11312_v46  ;;  %v7530_v40 = vsel %vm3638_vm12, %v7498_v15, %v13428_v50 }
 0x609   : > { %v18237_v36 = vld [vmem:[#allocation2 + $0x252] sm:$0xff]  ;;  %v13441_v7 = vpop.permute.xlu1 %13440  ;;  %9732 = vmatprep.subr.mxu0 %v19827_v47  ;;  %v7627_v8 = vsel %vm3638_vm12, %v7595_v6, %v13422_v44  ;;  %v7499_v18 = vsel %vm484_vm10, %v17938_v39, %v13438_v23  ;;  %v13423_v50 = vunpack.i.h.bf16 %v18221_v61  ;;  %v11310_v39 = vld [vmem:[%s19685_s3 + $0x380] sm:$0xff] }
 0x60a   : > { %v6641_v9 = vld [vmem:[#allocation2 + $0x250] sm:$0xff]  ;;  %11910 = vmatmul.mubr.msk.f32.gmra.mxu0 %vm484_vm10, %v18237_v36  ;;  %v7658_v12 = vsel %vm3671_vm13, %v7626_v58, %v13432_v38  ;;  %v13534_v13 = vpack.i.bf16 %v18198_v59, %v18237_v36  ;;  %v13443_v25 = vunpack.i.h.bf16 %v13441_v7  ;;  %v11309_v23 = vld [vmem:[%s19685_s3 + $0x378] sm:$0xff] }
 0x60b   : > { %v18239_v27 = vld [vmem:[#allocation2 + $0x251] sm:$0xff]  ;;  %v13524_v17 = vpack.i.bf16 %v18149_v34, %v6641_v9  ;;  %v18256_v34 = vpop.f32.mrf.mxu0  ;;  %7983 = vmatprep.mubr.f32.mxu1 %v7658_v12  ;;  %9733 = vmatpush1.msra.mxu0 %v11311_v1  ;;  %v7531_v6 = vsel %vm3638_vm12, %v7499_v18, %v13423_v50 }
 0x60c   : > { %v13529_v28 = vpack.i.bf16 %v6640_v22, %v18239_v27  ;;  %v13442_v22 = vunpack.i.l.bf16 %v13441_v7  ;;  %v6706_v31 = vld [vmem:[#allocation2 + $0x262] sm:$0xff]  ;;  %v6707_v38 = vld [vmem:[#allocation2 + $0x272] sm:$0xff]  ;;  %9734 = vmatprep.subr.mxu0 %v19827_v47 }
 0x60d   : > { %13525 = vrot.lane.b32.xlu0 %v13524_v17, %s14139_s29  ;;  %v7882_v10 = vpop.f32.mrf.mxu0  ;;  %v7562_v17 = vsel %vm3671_vm13, %v7530_v40, %v13433_v55  ;;  %v6642_v46 = vld [vmem:[#allocation2 + $0x260] sm:$0xff]  ;;  %11912 = vmatprep.mubr.msk.f32.mxu0 %vm484_vm10, %v6706_v31  ;;  %v11341_v55 = vld [vmem:[%s19685_s3 + $0x478] sm:$0xff]  ;;  %v13554_v44 = vpack.i.bf16 %v18239_v27, %v6706_v31  ;;  %v6643_v58 = vld [vmem:[#allocation2 + $0x270] sm:$0xff] }
 0x60e   : > { %13530 = vrot.lane.b32.xlu1 %v13529_v28, %s14141_s28  ;;  %7984 = vmatmul.mubr.f32.gmra.mxu1 %v7562_v17  ;;  %v7659_v28 = vsel %vm3671_vm13, %v7627_v8, %v13442_v22  ;;  %v13539_v15 = vpack.i.bf16 %v18195_v63, %v6642_v46  ;;  %v18274_v7 = vld [vmem:[#allocation2 + $0x261] sm:$0xff]  ;;  %v7563_v63 = vsel %vm3671_vm13, %v7531_v6, %v13443_v25  ;;  %v6675_v22 = vld [vmem:[#allocation2 + $0x271] sm:$0xff] }
 0x60f   : > { %7988 = vmatprep.mubr.f32.mxu1 %v7659_v28  ;;  %11913 = vmatmul.mubr.msk.f32.gmra.mxu0 %vm484_vm10, %v6707_v38  ;;  %v13544_v61 = vpack.i.bf16 %v6641_v9, %v18274_v7  ;;  %v18292_v1 = vpop.f32.mrf.mxu0  ;;  %v11340_v9 = vld [vmem:[%s19685_s3 + $0x470] sm:$0xff]  ;;  %v13549_v31 = vpack.i.bf16 %v18237_v36, %v6643_v58  ;;  %v11339_v25 = vld [vmem:[%s19685_s3 + $0x468] sm:$0xff]  ;;  %v11338_v36 = vld [vmem:[%s19685_s3 + $0x460] sm:$0xff] }
 0x610   : > { %11915 = vmatprep.subr.mxu1 %v11341_v55  ;;  %9735 = vmatpush1.msra.mxu0 %v11310_v39  ;;  %v11308_v12 = vld [vmem:[%s19685_s3 + $0x370] sm:$0xff]  ;;  %v11307_v10 = vld [vmem:[%s19685_s3 + $0x368] sm:$0xff]  ;;  %v11306_v8 = vld [vmem:[%s19685_s3 + $0x360] sm:$0xff] }
 0x611   : > { %13535 = vrot.lane.b32.xlu0 %v13534_v13, %s14140_s21  ;;  %9736 = vmatprep.subr.mxu0 %v19827_v47  ;;  %v7887_v40 = vpop.f32.mrf.mxu0  ;;  %v13559_v13 = vpack.i.bf16 %v6642_v46, %v6675_v22  ;;  %v11337_v18 = vld [vmem:[%s19685_s3 + $0x458] sm:$0xff]  ;;  %v11336_v38 = vld [vmem:[%s19685_s3 + $0x450] sm:$0xff]  ;;  %v11335_v28 = vld [vmem:[%s19685_s3 + $0x448] sm:$0xff] }
 0x612   : > { %13540 = vrot.lane.b32.xlu1 %v13539_v15, %s14139_s29  ;;  %7989 = vmatmul.mubr.f32.gmra.mxu1 %v7563_v63  ;;  %v11333_v39 = vld [vmem:[%s19685_s3 + $0x438] sm:$0xff]  ;;  %v11332_v63 = vld [vmem:[%s19685_s3 + $0x430] sm:$0xff]  ;;  %v11331_v58 = vld [vmem:[%s19685_s3 + $0x428] sm:$0xff] }
 0x613   : > { %9737 = vmatpush1.msra.mxu0 %v11309_v23  ;;  %11916 = vmatpush3.msra.mxu1 %v11341_v55  ;;  %v11334_v55 = vld [vmem:[%s19685_s3 + $0x440] sm:$0xff] }
 0x614   : > { %9738 = vmatprep.subr.mxu0 %v19827_v47  ;;  %11917 = vmatprep.subr.mxu1 %v11340_v9  ;;  %v11330_v40 = vld [vmem:[%s19685_s3 + $0x420] sm:$0xff] }
 0x615   : > { %13545 = vrot.lane.b32.xlu0 %v13544_v61, %s14141_s28  ;;  %9739 = vmatpush1.msra.mxu0 %v11308_v12  ;;  %v7890_v17 = vpop.f32.mrf.mxu0  ;;  %v18348_v61 = vld [vmem:[%s19686_s4 + $0x2] ss:$0 sm:$0xff] }
 0x616   : > { %13555 = vrot.lane.b32.xlu1 %v13554_v44, %s14140_s21  ;;  %11918 = vmatpush3.msra.mxu1 %v11340_v9  ;;  %v7881_v44 = vadd.f32 %v18348_v61, %v18256_v34  ;;  %v7876_v9 = vadd.f32 %v18348_v61, %v18214_v24  ;;  %v7891_v34 = vadd.f32 %v18348_v61, %v7890_v17  ;;  %v11328_v17 = vld [vmem:[%s19685_s3 + $0x410] sm:$0xff] }
 0x617   : > { %9740 = vmatprep.subr.mxu0 %v19827_v47  ;;  %v7892_v46 = vpop.f32.mrf.mxu0  ;;  %11919 = vmatprep.subr.mxu1 %v11339_v25 }
 0x618   : > { %9741 = vmatpush1.msra.mxu0 %v11307_v10  ;;  %11920 = vmatpush3.msra.mxu1 %v11339_v25  ;;  %v11329_v10 = vld [vmem:[%s19685_s3 + $0x418] sm:$0xff] }
 0x619   : > { %13550 = vrot.lane.b32.xlu0 %v13549_v31, %s14139_s29  ;;  %9742 = vmatprep.subr.mxu0 %v19827_v47 }
 0x61a   : > { %13560 = vrot.lane.b32.xlu1 %v13559_v13, %s14141_s28  ;;  %11921 = vmatprep.subr.mxu1 %v11338_v36 }
 0x61b   : > { %9743 = vmatpush1.msra.mxu0 %v11306_v8  ;;  %11922 = vmatpush3.msra.mxu1 %v11338_v36  ;;  %v7895_v50 = vpop.f32.mrf.mxu0  ;;  %v7886_v36 = vadd.f32 %v18348_v61, %v18292_v1  ;;  %v11327_v1 = vld [vmem:[%s19685_s3 + $0x408] sm:$0xff] }
 0x61c   : > { %9744 = vmatprep.subr.mxu0 %v19827_v47 }
 0x61d   : > { %9745 = vmatpush2.msra.mxu0 %v11337_v18  ;;  %v7897_v15 = vpop.f32.mrf.mxu0 }
 0x61e   : > { %9746 = vmatprep.subr.mxu0 %v19827_v47 }
 0x61f   : > { %9747 = vmatpush2.msra.mxu0 %v11336_v38 }
 0x620   : > { %9748 = vmatprep.subr.mxu0 %v19827_v47 }
 0x621   : > { %9749 = vmatpush2.msra.mxu0 %v11335_v28  ;;  %v7900_v6 = vpop.f32.mrf.mxu0 }
 0x622   : > { %9750 = vmatprep.subr.mxu0 %v19827_v47  ;;  %v7901_v38 = vadd.f32 %v18348_v61, %v7900_v6 }
 0x623   : > { %9751 = vmatpush2.msra.mxu0 %v11334_v55  ;;  %v7902_v23 = vpop.f32.mrf.mxu0 }
 0x624   : > { %9752 = vmatprep.subr.mxu0 %v19827_v47 }
 0x625   : > { %9753 = vmatpush2.msra.mxu0 %v11333_v39  ;;  %v11869_v22 = vpop.f32.mrf.mxu0 }
 0x626   : > { %9754 = vmatprep.subr.mxu0 %v19827_v47  ;;  %v8106_v12 = vadd.f32 %v11869_v22, %v7881_v44 }
 0x627   : > { %9755 = vmatpush2.msra.mxu0 %v11332_v63  ;;  %v8100_v31 = vpop.f32.mrf.mxu0  ;;  %v7896_v63 = vadd.f32 %v18348_v61, %v7895_v50  ;;  %v11325_v50 = vld [vmem:[%s19685_s3 + $0x3f8] sm:$0xff] }
 0x628   : > { %9756 = vmatprep.subr.mxu0 %v19827_v47  ;;  %v8260_v13 = vmax.f32 %v8106_v12, 0.0  ;;  %v8101_v25 = vadd.f32 %v8100_v31, %v7876_v9  ;;  %v8387_v9 = vld [vmem:[#allocation2 + $0x2] sm:$0xff] }
 0x629   : > { %9757 = vmatpush2.msra.mxu0 %v11331_v58  ;;  %v11872_v24 = vpop.f32.mrf.mxu0  ;;  %v11326_v58 = vld [vmem:[%s19685_s3 + $0x400] sm:$0xff] }
 0x62a   : > { %9758 = vmatprep.subr.mxu0 %v19827_v47  ;;  %8292 = vst.msk [vmem:[#allocation2 + $0x21] sm:$0xff] %vm484_vm10, %v8260_v13  ;;  %v8259_v8 = vmax.f32 %v8101_v25, 0.0  ;;  %v8116_v46 = vadd.f32 %v11872_v24, %v7891_v34  ;;  %v8355_v24 = vld [vmem:[#allocation2 + $0x1] sm:$0xff] }
 0x62b   : > { %9759 = vmatpush2.msra.mxu0 %v11330_v40  ;;  %v8110_v18 = vpop.f32.mrf.mxu0  ;;  %v7905_v55 = vpop.f32.mrf.mxu1 }
 0x62c   : > { %9760 = vmatprep.subr.mxu0 %v19827_v47  ;;  %8291 = vst.msk [vmem:[#allocation2 + $0x11] sm:$0xff] %vm484_vm10, %v8259_v8  ;;  %v8262_v28 = vmax.f32 %v8116_v46, 0.0  ;;  %v8111_v15 = vadd.f32 %v8110_v18, %v7886_v36  ;;  %v7906_v36 = vadd.f32 %v18348_v61, %v7905_v55 }
 0x62d   : > { %9761 = vmatpush2.msra.mxu0 %v11329_v10  ;;  %v11875_v39 = vpop.f32.mrf.mxu0  ;;  %v7907_v6 = vpop.f32.mrf.mxu1 }
 0x62e   : > { %9762 = vmatprep.subr.mxu0 %v19827_v47  ;;  %8294 = vst.msk [vmem:[#allocation2 + $0x41] sm:$0xff] %vm484_vm10, %v8262_v28  ;;  %v8261_v23 = vmax.f32 %v8111_v15, 0.0  ;;  %v8126_v44 = vadd.f32 %v11875_v39, %v7901_v38 }
 0x62f   : > { %9763 = vmatpush2.msra.mxu0 %v11328_v17  ;;  %v8120_v22 = vpop.f32.mrf.mxu0  ;;  %v7910_v31 = vpop.f32.mrf.mxu1 }
 0x630   : > { %9764 = vmatprep.subr.mxu0 %v19827_v47  ;;  %8293 = vst.msk [vmem:[#allocation2 + $0x31] sm:$0xff] %vm484_vm10, %v8261_v23  ;;  %v8264_v12 = vmax.f32 %v8126_v44, 0.0  ;;  %v8121_v40 = vadd.f32 %v8120_v22, %v7896_v63  ;;  %v18391_v34 = vpop.permute.xlu0 %13445  ;;  %v7911_v13 = vadd.f32 %v18348_v61, %v7910_v31 }
 0x631   : > { %9765 = vmatpush2.msra.mxu0 %v11327_v1  ;;  %v11878_v25 = vpop.f32.mrf.mxu0  ;;  %v18394_v10 = vld [vmem:[#allocation2 + $0x20] sm:$0xff]  ;;  %v7912_v46 = vpop.f32.mrf.mxu1  ;;  %v11324_v1 = vld [vmem:[%s19685_s3 + $0x3f0] sm:$0xff]  ;;  %v13447_v55 = vunpack.i.l.bf16 %v18391_v34 }
 0x632   : > { %9766 = vmatprep.subr.mxu0 %v19827_v47  ;;  %8296 = vst.msk [vmem:[#allocation2 + $0x61] sm:$0xff] %vm484_vm10, %v8264_v12  ;;  %v8263_v8 = vmax.f32 %v8121_v40, 0.0  ;;  %v13564_v17 = vpack.i.bf16 %v8387_v9, %v18394_v10  ;;  %v8136_v18 = vadd.f32 %v11878_v25, %v7911_v13  ;;  %v18410_v22 = vld [vmem:[#allocation2 + $0x22] sm:$0xff]  ;;  %v13448_v12 = vunpack.i.h.bf16 %v18391_v34 }
 0x633   : > { %9767 = vmatpush2.msra.mxu0 %v11326_v58  ;;  %v8130_v38 = vpop.f32.mrf.mxu0  ;;  %v18400_v28 = vld [vmem:[#allocation2 + $0x12] sm:$0xff]  ;;  %v7915_v63 = vpop.f32.mrf.mxu1  ;;  %v11323_v13 = vld [vmem:[%s19685_s3 + $0x3e8] sm:$0xff] }
 0x634   : > { %9768 = vmatprep.subr.mxu0 %v19827_v47  ;;  %v8356_v15 = vld [vmem:[#allocation2 + $0x11] sm:$0xff]  ;;  %8295 = vst.msk [vmem:[#allocation2 + $0x51] sm:$0xff] %vm484_vm10, %v8263_v8  ;;  %v8131_v39 = vadd.f32 %v8130_v38, %v7906_v36  ;;  %13565 = vrot.lane.b32.xlu1 %v13564_v17, %s14139_s29  ;;  %v13569_v23 = vpack.i.bf16 %v8355_v24, %v18400_v28  ;;  %v8266_v44 = vmax.f32 %v8136_v18, 0.0  ;;  %v8547_v24 = vld [vmem:[#allocation2 + $0x21] sm:$0xff] }
 0x635   : > { %9769 = vmatpush2.msra.mxu0 %v11325_v50  ;;  %v7916_v6 = vadd.f32 %v18348_v61, %v7915_v63  ;;  %v11881_v58 = vpop.f32.mrf.mxu0  ;;  %v8419_v9 = vld [vmem:[#allocation2 + $0x10] sm:$0xff]  ;;  %v7917_v31 = vpop.f32.mrf.mxu1  ;;  %v13579_v50 = vpack.i.bf16 %v8356_v15, %v18410_v22  ;;  %v18420_v36 = vld [vmem:[#allocation2 + $0x40] sm:$0xff]  ;;  %v7596_v38 = vsel %vm484_vm10, %v18040_v43, %v13447_v55 }
 0x636   : > { %9770 = vmatprep.subr.mxu0 %v19827_v47  ;;  %v8265_v40 = vmax.f32 %v8131_v39, 0.0  ;;  %13570 = vrot.lane.b32.xlu0 %v13569_v23, %s14140_s21  ;;  %8298 = vst.msk [vmem:[#allocation2 + $0x81] sm:$0xff] %vm484_vm10, %v8266_v44  ;;  %v6444_v8 = vld [vmem:[#allocation2 + $0x1e0] sm:$0xff]  ;;  %v13574_v18 = vpack.i.bf16 %v8419_v9, %v8547_v24  ;;  %v13584_v9 = vpack.i.bf16 %v18410_v22, %v18420_v36 }
 0x637   : > { %9771 = vmatpush2.msra.mxu0 %v11324_v1  ;;  %v8140_v25 = vpop.f32.mrf.mxu0  ;;  %v11322_v15 = vld [vmem:[%s19685_s3 + $0x3e0] sm:$0xff]  ;;  %v8516_v31 = vld [vmem:[#allocation2 + $0x30] sm:$0xff]  ;;  %v7500_v43 = vsel %vm484_vm10, %v6444_v8, %v13448_v12 }
 0x638   : > { %9772 = vmatprep.subr.mxu0 %v19827_v47  ;;  %8297 = vst.msk [vmem:[#allocation2 + $0x71] sm:$0xff] %vm484_vm10, %v8265_v40  ;;  %v13456_v34 = vpop.permute.xlu0 %13455  ;;  %v8141_v17 = vadd.f32 %v8140_v25, %v7916_v6  ;;  %13580 = vrot.lane.b32.xlu1 %v13579_v50, %s14140_s21  ;;  %v13589_v12 = vpack.i.bf16 %v18400_v28, %v8516_v31  ;;  %v18443_v8 = vld [vmem:[#allocation2 + $0x32] sm:$0xff] }
 0x639   : > { %v13451_v46 = vpop.permute.xlu1 %13450  ;;  %v13458_v1 = vunpack.i.h.bf16 %v13456_v34  ;;  %v13457_v39 = vunpack.i.l.bf16 %v13456_v34  ;;  %v7920_v44 = vpop.f32.mrf.mxu1  ;;  %9773 = vmatpush2.msra.mxu0 %v11323_v13  ;;  %v8548_v34 = vld [vmem:[#allocation2 + $0x31] sm:$0xff] }
 0x63a   : > { %v13453_v63 = vunpack.i.h.bf16 %v13451_v46  ;;  %v13452_v23 = vunpack.i.l.bf16 %v13451_v46  ;;  %v8267_v40 = vmax.f32 %v8141_v17, 0.0  ;;  %v7921_v6 = vadd.f32 %v18348_v61, %v7920_v44  ;;  %13575 = vrot.lane.b32.xlu0 %v13574_v18, %s14141_s28  ;;  %9774 = vmatprep.subr.mxu0 %v19827_v47 }
 0x63b   : > { %v7922_v55 = vpop.f32.mrf.mxu1  ;;  %9775 = vmatpush2.msra.mxu0 %v11322_v15 }
 0x63c   : > { %v7628_v50 = vsel %vm3638_vm12, %v7596_v38, %v13452_v23  ;;  %v7532_v25 = vsel %vm3638_vm12, %v7500_v43, %v13453_v63  ;;  %8299 = vst.msk [vmem:[#allocation2 + $0xb1] sm:$0xff] %vm484_vm10, %v8267_v40  ;;  %v8146_v13 = vadd.f32 %v11881_v58, %v7921_v6  ;;  %13585 = vrot.lane.b32.xlu1 %v13584_v9, %s14139_s29  ;;  %v11884_v38 = vpop.f32.mrf.mxu0  ;;  %v8549_v6 = vld [vmem:[#allocation2 + $0x41] sm:$0xff]  ;;  %v8518_v55 = vld [vmem:[#allocation2 + $0x50] sm:$0xff] }
 0x63d   : > { %v7660_v46 = vsel %vm3671_vm13, %v7628_v50, %v13457_v39  ;;  %v7564_v17 = vsel %vm3671_vm13, %v7532_v25, %v13458_v1  ;;  %11971 = vmatprep.subr.mxu0 %v19827_v47  ;;  %v13594_v58 = vpack.i.bf16 %v18394_v10, %v8548_v34  ;;  %v13599_v1 = vpack.i.bf16 %v8547_v24, %v18443_v8  ;;  %v18452_v39 = vld [vmem:[#allocation2 + $0x42] sm:$0xff] }
 0x63e   : > { %7993 = vmatprep.mubr.f32.mxu1 %v7660_v46  ;;  %v8268_v18 = vmax.f32 %v8146_v13, 0.0  ;;  %13590 = vrot.lane.b32.xlu0 %v13589_v12, %s14139_s29  ;;  %v8150_v63 = vpop.f32.mrf.mxu0  ;;  %v13609_v44 = vpack.i.bf16 %v8548_v34, %v18452_v39  ;;  %v18456_v10 = vld [vmem:[#allocation2 + $0x60] sm:$0xff]  ;;  %v13604_v9 = vpack.i.bf16 %v8516_v31, %v8549_v6  ;;  %v8550_v34 = vld [vmem:[#allocation2 + $0x51] sm:$0xff]  ;;  %v13619_v46 = vpack.i.bf16 %v18443_v8, %v8518_v55 }
 0x63f   : > { %7994 = vmatmul.mubr.f32.gmra.mxu1 %v7564_v17  ;;  %v7925_v15 = vpop.f32.mrf.mxu1  ;;  %v13614_v50 = vpack.i.bf16 %v18452_v39, %v18456_v10  ;;  %v18466_v31 = vld [vmem:[#allocation2 + $0x52] sm:$0xff] }
 0x640   : > { %8300 = vst.msk [vmem:[#allocation2 + $0xc1] sm:$0xff] %vm484_vm10, %v8268_v18  ;;  %13595 = vrot.lane.b32.xlu1 %v13594_v58, %s14141_s28  ;;  %v7926_v28 = vadd.f32 %v18348_v61, %v7925_v15  ;;  %v11887_v12 = vpop.f32.mrf.mxu0  ;;  %v13624_v18 = vpack.i.bf16 %v18420_v36, %v8550_v34  ;;  %v13461_v58 = vpop.permute.xlu1 %13460 }
 0x641   : > { %v7927_v23 = vpop.f32.mrf.mxu1 }
 0x642   : > { %13600 = vrot.lane.b32.xlu0 %v13599_v1, %s14140_s21  ;;  %v8151_v40 = vadd.f32 %v8150_v63, %v7926_v28  ;;  %v13629_v28 = vpack.i.bf16 %v8549_v6, %v18466_v31  ;;  %v18474_v23 = vld [vmem:[#allocation2 + $0x62] sm:$0xff] }
 0x643   : > { %v13639_v36 = vpack.i.bf16 %v8550_v34, %v18474_v23  ;;  %v14062_v34 = vld [vmem:[#allocation2 + $0x201] sm:$0xff] }
 0x644   : > { %13610 = vrot.lane.b32.xlu1 %v13609_v44, %s14140_s21  ;;  %v8269_v43 = vmax.f32 %v8151_v40, 0.0  ;;  %v13462_v44 = vunpack.i.l.bf16 %v13461_v58  ;;  %v8160_v40 = vpop.f32.mrf.mxu0 }
 0x645   : > { %v7930_v24 = vpop.f32.mrf.mxu1 }
 0x646   : > { %13605 = vrot.lane.b32.xlu0 %v13604_v9, %s14141_s28  ;;  %8301 = vst.msk [vmem:[#allocation2 + $0xd1] sm:$0xff] %vm484_vm10, %v8269_v43  ;;  %v7931_v25 = vadd.f32 %v18348_v61, %v7930_v24  ;;  %v8551_v24 = vld [vmem:[#allocation2 + $0x61] sm:$0xff] }
 0x647   : > { %v7932_v13 = vpop.f32.mrf.mxu1  ;;  %v13634_v6 = vpack.i.bf16 %v8518_v55, %v8551_v24 }
 0x648   : > { %13615 = vrot.lane.b32.xlu1 %v13614_v50, %s14139_s29  ;;  %v8156_v17 = vadd.f32 %v11884_v38, %v7931_v25  ;;  %v13463_v38 = vunpack.i.h.bf16 %v13461_v58  ;;  %v8521_v50 = vld [vmem:[#allocation2 + $0x80] sm:$0xff] }
 0x64a   : > { %13620 = vrot.lane.b32.xlu0 %v13619_v46, %s14139_s29  ;;  %v8270_v15 = vmax.f32 %v8156_v17, 0.0 }
 0x64c   : > { %v7935_v1 = vpop.f32.mrf.mxu1  ;;  %13625 = vrot.lane.b32.xlu1 %v13624_v18, %s14141_s28  ;;  %8302 = vst.msk [vmem:[#allocation2 + $0xe1] sm:$0xff] %vm484_vm10, %v8270_v15 }
 0x64d   : > { %v7936_v63 = vadd.f32 %v18348_v61, %v7935_v1  ;;  %v8520_v1 = vld [vmem:[#allocation2 + $0x70] sm:$0xff] }
 0x64e   : > { %v7937_v9 = vpop.f32.mrf.mxu1  ;;  %13630 = vrot.lane.b32.xlu0 %v13629_v28, %s14140_s21  ;;  %v13644_v28 = vpack.i.bf16 %v18474_v23, %v8521_v50 }
 0x64f   : > { %v8161_v43 = vadd.f32 %v8160_v40, %v7936_v63  ;;  %v7597_v63 = vsel %vm484_vm10, %v14062_v34, %v13462_v44  ;;  %v14063_v40 = vld [vmem:[#allocation2 + $0x1f0] sm:$0xff]  ;;  %v13654_v34 = vpack.i.bf16 %v18466_v31, %v8520_v1 }
 0x650   : > { %13640 = vrot.lane.b32.xlu1 %v13639_v36, %s14140_s21  ;;  %v7501_v9 = vsel %vm484_vm10, %v14063_v40, %v13463_v38 }
 0x651   : > { %v13466_v25 = vpop.permute.xlu0 %13465  ;;  %v8271_v46 = vmax.f32 %v8161_v43, 0.0  ;;  %v7940_v47 = vpop.f32.mrf.mxu1 }
 0x652   : > { %v13471_v13 = vpop.permute.xlu1 %13470  ;;  %v13468_v17 = vunpack.i.h.bf16 %v13466_v25  ;;  %v13467_v18 = vunpack.i.l.bf16 %v13466_v25  ;;  %13635 = vrot.lane.b32.xlu0 %v13634_v6, %s14141_s28  ;;  %v7941_v55 = vadd.f32 %v18348_v61, %v7940_v47  ;;  %v8554_v25 = vld [vmem:[#allocation2 + $0x91] sm:$0xff] }
 0x653   : > { %v13473_v15 = vunpack.i.h.bf16 %v13471_v13  ;;  %v13472_v58 = vunpack.i.l.bf16 %v13471_v13  ;;  %8303 = vst.msk [vmem:[#allocation2 + $0xf1] sm:$0xff] %vm484_vm10, %v8271_v46  ;;  %v7942_v13 = vpop.f32.mrf.mxu1  ;;  %v18491_v47 = vld [vmem:[#allocation2 + $0x72] sm:$0xff]  ;;  %v8557_v35 = vld [vmem:[#allocation2 + $0xe1] sm:$0xff] }
 0x654   : > { %v7629_v36 = vsel %vm3638_vm12, %v7597_v63, %v13467_v18  ;;  %v7533_v43 = vsel %vm3638_vm12, %v7501_v9, %v13468_v17  ;;  %13645 = vrot.lane.b32.xlu1 %v13644_v28, %s14139_s29  ;;  %v8166_v38 = vadd.f32 %v11887_v12, %v7941_v55  ;;  %v13649_v17 = vpack.i.bf16 %v8521_v50, %v8554_v25  ;;  %v8552_v9 = vld [vmem:[#allocation2 + $0x71] sm:$0xff]  ;;  %v6446_v12 = vld [vmem:[#allocation2 + $0x200] sm:$0xff]  ;;  %v11890_v25 = vpop.f32.mrf.mxu0 }
 0x655   : > { %v13476_v30 = vpop.permute.xlu0 %13475  ;;  %v7661_v6 = vsel %vm3671_vm13, %v7629_v36, %v13472_v58  ;;  %v7565_v44 = vsel %vm3671_vm13, %v7533_v43, %v13473_v15  ;;  %v13664_v15 = vpack.i.bf16 %v8551_v24, %v18491_v47  ;;  %v8553_v43 = vld [vmem:[#allocation2 + $0x81] sm:$0xff] }
 0x656   : > { %v13478_v40 = vunpack.i.h.bf16 %v13476_v30  ;;  %v13477_v46 = vunpack.i.l.bf16 %v13476_v30  ;;  %7998 = vmatprep.mubr.f32.mxu1 %v7661_v6  ;;  %13655 = vrot.lane.b32.xlu0 %v13654_v34, %s14139_s29  ;;  %v8272_v18 = vmax.f32 %v8166_v38, 0.0 }
 0x657   : > { %7999 = vmatmul.mubr.f32.gmra.mxu1 %v7565_v44  ;;  %v13659_v44 = vpack.i.bf16 %v18456_v10, %v8552_v9 }
 0x658   : > { %v13481_v63 = vpop.permute.xlu1 %13480  ;;  %13650 = vrot.lane.b32.xlu1 %v13649_v17, %s14141_s28  ;;  %8304 = vst.msk [vmem:[#allocation2 + $0x101] sm:$0xff] %vm484_vm10, %v8272_v18  ;;  %v7598_v36 = vsel %vm484_vm10, %v18078_v14, %v13477_v46  ;;  %v7502_v50 = vsel %vm484_vm10, %v6446_v12, %v13478_v40  ;;  %v18506_v17 = vld [vmem:[#allocation2 + $0x82] sm:$0xff]  ;;  %v13669_v14 = vpack.i.bf16 %v8520_v1, %v8553_v43  ;;  %v8522_v46 = vld [vmem:[#allocation2 + $0x90] sm:$0xff] }
 0x659   : > { %v13483_v28 = vunpack.i.h.bf16 %v13481_v63  ;;  %v13482_v13 = vunpack.i.l.bf16 %v13481_v63  ;;  %v13486_v58 = vpop.permute.xlu0 %13485  ;;  %v8170_v63 = vpop.f32.mrf.mxu0  ;;  %v13674_v10 = vpack.i.bf16 %v8552_v9, %v18506_v17 }
 0x65a   : > { %v13488_v30 = vunpack.i.h.bf16 %v13486_v58  ;;  %v13487_v55 = vunpack.i.l.bf16 %v13486_v58  ;;  %13665 = vrot.lane.b32.xlu0 %v13664_v15, %s14140_s21  ;;  %v8395_v58 = vld [vmem:[#allocation2 + $0xa2] sm:$0xff] }
 0x65b   : > { %v7630_v6 = vsel %vm3638_vm12, %v7598_v36, %v13482_v13  ;;  %v7534_v24 = vsel %vm3638_vm12, %v7502_v50, %v13483_v28  ;;  %v7945_v18 = vpop.f32.mrf.mxu1  ;;  %v8523_v15 = vld [vmem:[#allocation2 + $0xc0] sm:$0xff]  ;;  %v8491_v50 = vld [vmem:[#allocation2 + $0xb2] sm:$0xff] }
 0x65c   : > { %v7662_v34 = vsel %vm3671_vm13, %v7630_v6, %v13487_v55  ;;  %v7566_v38 = vsel %vm3671_vm13, %v7534_v24, %v13488_v30  ;;  %13660 = vrot.lane.b32.xlu1 %v13659_v44, %s14141_s28  ;;  %v7946_v40 = vadd.f32 %v18348_v61, %v7945_v18  ;;  %v13679_v30 = vpack.i.bf16 %v18491_v47, %v8522_v46  ;;  %v8363_v36 = vld [vmem:[#allocation2 + $0xa1] sm:$0xff]  ;;  %v8556_v46 = vld [vmem:[#allocation2 + $0xd1] sm:$0xff] }
 0x65d   : > { %8003 = vmatprep.mubr.f32.mxu1 %v7662_v34  ;;  %v7947_v13 = vpop.f32.mrf.mxu1  ;;  %v13684_v6 = vpack.i.bf16 %v8395_v58, %v8523_v15  ;;  %v18517_v44 = vld [vmem:[#allocation2 + $0xc2] sm:$0xff]  ;;  %v13689_v24 = vpack.i.bf16 %v8363_v36, %v8491_v50 }
 0x65e   : > { %8004 = vmatmul.mubr.f32.gmra.mxu1 %v7566_v38  ;;  %13670 = vrot.lane.b32.xlu0 %v13669_v14, %s14141_s28  ;;  %v8171_v28 = vadd.f32 %v8170_v63, %v7946_v40  ;;  %v8364_v38 = vld [vmem:[#allocation2 + $0xb1] sm:$0xff]  ;;  %v8555_v18 = vld [vmem:[#allocation2 + $0xc1] sm:$0xff]  ;;  %v13491_v63 = vpop.permute.xlu1 %13490 }
 0x65f   : > { %v7950_v12 = vpop.f32.mrf.mxu1  ;;  %v13699_v14 = vpack.i.bf16 %v8364_v38, %v18517_v44  ;;  %v8427_v40 = vld [vmem:[#allocation2 + $0xb0] sm:$0xff]  ;;  %v13492_v58 = vunpack.i.l.bf16 %v13491_v63 }
 0x660   : > { %13675 = vrot.lane.b32.xlu1 %v13674_v10, %s14140_s21  ;;  %v8273_v55 = vmax.f32 %v8171_v28, 0.0  ;;  %v7951_v1 = vadd.f32 %v18348_v61, %v7950_v12  ;;  %v8524_v13 = vld [vmem:[#allocation2 + $0xd0] sm:$0xff]  ;;  %v13709_v10 = vpack.i.bf16 %v8523_v15, %v8556_v46  ;;  %v13493_v28 = vunpack.i.h.bf16 %v13491_v63  ;;  %v8525_v12 = vld [vmem:[#allocation2 + $0xe0] sm:$0xff] }
 0x661   : > { %v7952_v43 = vpop.f32.mrf.mxu1  ;;  %v14064_v15 = vld [vmem:[#allocation2 + $0x221] sm:$0xff] }
 0x662   : > { %13680 = vrot.lane.b32.xlu0 %v13679_v30, %s14139_s29  ;;  %8305 = vst.msk [vmem:[#allocation2 + $0x111] sm:$0xff] %vm484_vm10, %v8273_v55  ;;  %v8176_v9 = vadd.f32 %v11890_v25, %v7951_v1  ;;  %v13694_v25 = vpack.i.bf16 %v8427_v40, %v8555_v18  ;;  %v13704_v30 = vpack.i.bf16 %v8491_v50, %v8524_v13  ;;  %v18526_v1 = vld [vmem:[#allocation2 + $0xd2] sm:$0xff]  ;;  %v18532_v63 = vld [vmem:[#allocation2 + $0xe2] sm:$0xff] }
 0x664   : > { %13685 = vrot.lane.b32.xlu1 %v13684_v6, %s14139_s29  ;;  %v8274_v34 = vmax.f32 %v8176_v9, 0.0  ;;  %v13719_v9 = vpack.i.bf16 %v18517_v44, %v8525_v12 }
 0x666   : > { %13690 = vrot.lane.b32.xlu0 %v13689_v24, %s14140_s21  ;;  %8306 = vst.msk [vmem:[#allocation2 + $0x121] sm:$0xff] %vm484_vm10, %v8274_v34  ;;  %v6447_v24 = vld [vmem:[#allocation2 + $0x210] sm:$0xff] }
 0x667   : > { %v7503_v40 = vsel %vm484_vm10, %v6447_v24, %v13493_v28  ;;  %v13729_v28 = vpack.i.bf16 %v8556_v46, %v18532_v63 }
 0x668   : > { %13700 = vrot.lane.b32.xlu1 %v13699_v14, %s14140_s21  ;;  %v7599_v14 = vsel %vm484_vm10, %v14064_v15, %v13492_v58 }
 0x66a   : > { %13695 = vrot.lane.b32.xlu0 %v13694_v25, %s14141_s28  ;;  %v13714_v25 = vpack.i.bf16 %v8555_v18, %v18526_v1  ;;  %v13724_v18 = vpack.i.bf16 %v8524_v13, %v8557_v35  ;;  %v8527_v13 = vld [vmem:[#allocation2 + $0x100] sm:$0xff] }
 0x66c   : > { %13710 = vrot.lane.b32.xlu1 %v13709_v10, %s14141_s28 }
 0x66e   : > { %v13496_v55 = vpop.permute.xlu0 %13495  ;;  %13705 = vrot.lane.b32.xlu0 %v13704_v30, %s14139_s29 }
 0x66f   : > { %v13498_v36 = vunpack.i.h.bf16 %v13496_v55  ;;  %v13497_v43 = vunpack.i.l.bf16 %v13496_v55  ;;  %v13501_v6 = vpop.permute.xlu1 %13500 }
 0x670   : > { %v13503_v34 = vunpack.i.h.bf16 %v13501_v6  ;;  %v13502_v38 = vunpack.i.l.bf16 %v13501_v6  ;;  %13720 = vrot.lane.b32.xlu1 %v13719_v9, %s14139_s29  ;;  %v8558_v9 = vld [vmem:[#allocation2 + $0xf1] sm:$0xff] }
 0x671   : > { %v7631_v50 = vsel %vm3638_vm12, %v7599_v14, %v13497_v43  ;;  %v7535_v10 = vsel %vm3638_vm12, %v7503_v40, %v13498_v36  ;;  %v6448_v14 = vld [vmem:[#allocation2 + $0x220] sm:$0xff] }
 0x672   : > { %v13506_v30 = vpop.permute.xlu0 %13505  ;;  %v7663_v55 = vsel %vm3671_vm13, %v7631_v50, %v13502_v38  ;;  %v7567_v6 = vsel %vm3671_vm13, %v7535_v10, %v13503_v34  ;;  %13715 = vrot.lane.b32.xlu0 %v13714_v25, %s14140_s21  ;;  %v13739_v38 = vpack.i.bf16 %v8525_v12, %v8558_v9  ;;  %v8526_v34 = vld [vmem:[#allocation2 + $0xf0] sm:$0xff] }
 0x673   : > { %v13508_v26 = vunpack.i.h.bf16 %v13506_v30  ;;  %v13507_v58 = vunpack.i.l.bf16 %v13506_v30  ;;  %8008 = vmatprep.mubr.f32.mxu1 %v7663_v55  ;;  %v14065_v10 = vld [vmem:[#allocation2 + $0x231] sm:$0xff] }
 0x674   : > { %8009 = vmatmul.mubr.f32.gmra.mxu1 %v7567_v6  ;;  %13730 = vrot.lane.b32.xlu1 %v13729_v28, %s14140_s21 }
 0x675   : > { %v13511_v43 = vpop.permute.xlu1 %13510  ;;  %v7600_v25 = vsel %vm484_vm10, %v14065_v10, %v13507_v58  ;;  %v7504_v46 = vsel %vm484_vm10, %v6448_v14, %v13508_v26  ;;  %v18552_v58 = vld [vmem:[#allocation2 + $0xf2] sm:$0xff]  ;;  %v13749_v26 = vpack.i.bf16 %v18532_v63, %v8527_v13 }
 0x676   : > { %v13513_v36 = vunpack.i.h.bf16 %v13511_v43  ;;  %v13512_v24 = vunpack.i.l.bf16 %v13511_v43  ;;  %v13516_v15 = vpop.permute.xlu0 %13515  ;;  %13725 = vrot.lane.b32.xlu0 %v13724_v18, %s14141_s28  ;;  %v13734_v43 = vpack.i.bf16 %v18526_v1, %v8526_v34  ;;  %v13744_v10 = vpack.i.bf16 %v8557_v35, %v18552_v58 }
 0x677   : > { %v13518_v40 = vunpack.i.h.bf16 %v13516_v15  ;;  %v13517_v50 = vunpack.i.l.bf16 %v13516_v15 }
 0x678   : > { %v7632_v30 = vsel %vm3638_vm12, %v7600_v25, %v13512_v24  ;;  %v7536_v55 = vsel %vm3638_vm12, %v7504_v46, %v13513_v36  ;;  %13740 = vrot.lane.b32.xlu1 %v13739_v38, %s14141_s28  ;;  %v18556_v36 = vpop.f32.mrf.mxu0  ;;  %v18558_v38 = vld [vmem:[#allocation2 + $0x102] sm:$0xff]  ;;  %v6449_v25 = vld [vmem:[#allocation2 + $0x230] sm:$0xff] }
 0x679   : > { %v13521_v6 = vpop.permute.xlu1 %13520  ;;  %v7664_v12 = vsel %vm3671_vm13, %v7632_v30, %v13517_v50  ;;  %v7568_v28 = vsel %vm3671_vm13, %v7536_v55, %v13518_v40 }
 0x67a   : > { %v13523_v18 = vunpack.i.h.bf16 %v13521_v6  ;;  %v13522_v15 = vunpack.i.l.bf16 %v13521_v6  ;;  %8013 = vmatprep.mubr.f32.mxu1 %v7664_v12  ;;  %13735 = vrot.lane.b32.xlu0 %v13734_v43, %s14139_s29  ;;  %v8559_v12 = vld [vmem:[#allocation2 + $0x101] sm:$0xff]  ;;  %v8180_v4 = vpop.f32.mrf.mxu0 }
 0x67b   : > { %8014 = vmatmul.mubr.f32.gmra.mxu1 %v7568_v28 }
 0x67c   : > { %13750 = vrot.lane.b32.xlu1 %v13749_v26, %s14139_s29  ;;  %v7601_v55 = vsel %vm484_vm10, %v18198_v59, %v13522_v15  ;;  %v7505_v6 = vsel %vm484_vm10, %v6449_v25, %v13523_v18  ;;  %v8560_v15 = vld [vmem:[#allocation2 + $0x111] sm:$0xff] }
 0x67e   : > { %v7955_v28 = vpop.f32.mrf.mxu1  ;;  %13745 = vrot.lane.b32.xlu0 %v13744_v10, %s14140_s21 }
 0x67f   : > { %v13526_v24 = vpop.permute.xlu0 %13525  ;;  %v7956_v35 = vadd.f32 %v18348_v61, %v7955_v28 }
 0x680   : > { %v13528_v14 = vunpack.i.h.bf16 %v13526_v24  ;;  %v13527_v50 = vunpack.i.l.bf16 %v13526_v24  ;;  %v13531_v40 = vpop.permute.xlu1 %13530  ;;  %v13759_v24 = vpack.i.bf16 %v8558_v9, %v18558_v38  ;;  %v7957_v37 = vpop.f32.mrf.mxu1 }
 0x681   : > { %v13533_v46 = vunpack.i.h.bf16 %v13531_v40  ;;  %v13532_v30 = vunpack.i.l.bf16 %v13531_v40  ;;  %v8181_v9 = vadd.f32 %v8180_v4, %v7956_v35 }
 0x682   : > { %v7633_v43 = vsel %vm3638_vm12, %v7601_v55, %v13527_v50  ;;  %v7537_v26 = vsel %vm3638_vm12, %v7505_v6, %v13528_v14  ;;  %13760 = vrot.lane.b32.xlu1 %v13759_v24, %s14140_s21  ;;  %v13754_v50 = vpack.i.bf16 %v8526_v34, %v8559_v12  ;;  %v8528_v55 = vld [vmem:[#allocation2 + $0x110] sm:$0xff]  ;;  %v6450_v6 = vld [vmem:[#allocation2 + $0x240] sm:$0xff] }
 0x683   : > { %v13536_v41 = vpop.permute.xlu0 %13535  ;;  %v7665_v40 = vsel %vm3671_vm13, %v7633_v43, %v13532_v30  ;;  %v7569_v59 = vsel %vm3671_vm13, %v7537_v26, %v13533_v46  ;;  %v13769_v30 = vpack.i.bf16 %v8527_v13, %v8560_v15  ;;  %v8275_v37 = vmax.f32 %v8181_v9, 0.0  ;;  %v8529_v43 = vld [vmem:[#allocation2 + $0x120] sm:$0xff] }
 0x684   : > { %v13538_v18 = vunpack.i.h.bf16 %v13536_v41  ;;  %v13537_v25 = vunpack.i.l.bf16 %v13536_v41  ;;  %v13541_v53 = vpop.permute.xlu1 %13540  ;;  %8018 = vmatprep.mubr.f32.mxu1 %v7665_v40  ;;  %13755 = vrot.lane.b32.xlu0 %v13754_v50, %s14141_s28  ;;  %v18582_v40 = vld [vmem:[#allocation2 + $0x112] sm:$0xff]  ;;  %v18588_v9 = vld [vmem:[#allocation2 + $0x122] sm:$0xff] }
 0x685   : > { %v13543_v10 = vunpack.i.h.bf16 %v13541_v53  ;;  %v13542_v14 = vunpack.i.l.bf16 %v13541_v53  ;;  %8019 = vmatmul.mubr.f32.gmra.mxu1 %v7569_v59  ;;  %v13764_v53 = vpack.i.bf16 %v18552_v58, %v8528_v55  ;;  %8307 = vst.msk [vmem:[#allocation2 + $0x151] sm:$0xff] %vm484_vm10, %v8275_v37 }
 0x686   : > { %v7602_v46 = vsel %vm484_vm10, %v18239_v27, %v13537_v25  ;;  %v7506_v41 = vsel %vm484_vm10, %v6450_v6, %v13538_v18  ;;  %13770 = vrot.lane.b32.xlu1 %v13769_v30, %s14141_s28  ;;  %v13784_v25 = vpack.i.bf16 %v18558_v38, %v8529_v43 }
 0x687   : > { %v13546_v28 = vpop.permute.xlu0 %13545  ;;  %v7634_v13 = vsel %vm3638_vm12, %v7602_v46, %v13542_v14  ;;  %v7538_v27 = vsel %vm3638_vm12, %v7506_v41, %v13543_v10  ;;  %v13774_v10 = vpack.i.bf16 %v8559_v12, %v18582_v40  ;;  %v6451_v14 = vld [vmem:[#allocation2 + $0x250] sm:$0xff] }
 0x688   : > { %v13548_v26 = vunpack.i.h.bf16 %v13546_v28  ;;  %v13547_v24 = vunpack.i.l.bf16 %v13546_v28  ;;  %v13556_v34 = vpop.permute.xlu1 %13555  ;;  %13765 = vrot.lane.b32.xlu0 %v13764_v53, %s14139_s29  ;;  %v13794_v53 = vpack.i.bf16 %v8560_v15, %v18588_v9 }
 0x689   : > { %v13558_v4 = vunpack.i.h.bf16 %v13556_v34  ;;  %v13557_v35 = vunpack.i.l.bf16 %v13556_v34 }
 0x68a   : > { %v7666_v59 = vsel %vm3671_vm13, %v7634_v13, %v13547_v24  ;;  %v7570_v18 = vsel %vm3671_vm13, %v7538_v27, %v13548_v26  ;;  %13785 = vrot.lane.b32.xlu1 %v13784_v25, %s14139_s29  ;;  %v8530_v24 = vld [vmem:[#allocation2 + $0x130] sm:$0xff] }
 0x68b   : > { %v13551_v50 = vpop.permute.xlu0 %13550  ;;  %8023 = vmatprep.mubr.f32.mxu1 %v7666_v59  ;;  %v7603_v28 = vsel %vm484_vm10, %v18274_v7, %v13557_v35  ;;  %v7507_v26 = vsel %vm484_vm10, %v6451_v14, %v13558_v4  ;;  %v8562_v59 = vld [vmem:[#allocation2 + $0x131] sm:$0xff]  ;;  %v13779_v7 = vpack.i.bf16 %v18582_v40, %v8530_v24  ;;  %v8561_v4 = vld [vmem:[#allocation2 + $0x121] sm:$0xff] }
 0x68c   : > { %v13553_v6 = vunpack.i.h.bf16 %v13551_v50  ;;  %v13552_v30 = vunpack.i.l.bf16 %v13551_v50  ;;  %v13561_v37 = vpop.permute.xlu1 %13560  ;;  %8024 = vmatmul.mubr.f32.gmra.mxu1 %v7570_v18  ;;  %13775 = vrot.lane.b32.xlu0 %v13774_v10, %s14140_s21  ;;  %v13799_v15 = vpack.i.bf16 %v8529_v43, %v8562_v59  ;;  %v13789_v35 = vpack.i.bf16 %v8528_v55, %v8561_v4  ;;  %v8371_v18 = vld [vmem:[#allocation2 + $0x141] sm:$0xff]  ;;  %v18609_v25 = vld [vmem:[#allocation2 + $0x152] sm:$0xff] }
 0x68d   : > { %v13563_v46 = vunpack.i.h.bf16 %v13561_v37  ;;  %v13562_v41 = vunpack.i.l.bf16 %v13561_v37  ;;  %v13804_v50 = vpack.i.bf16 %v8371_v18, %v18609_v25  ;;  %v8403_v10 = vld [vmem:[#allocation2 + $0x142] sm:$0xff]  ;;  %v18649_v24 = vld [vmem:[#allocation2 + $0x151] sm:$0xff] }
 0x68e   : > { %v7635_v34 = vsel %vm3638_vm12, %v7603_v28, %v13552_v30  ;;  %v7539_v13 = vsel %vm3638_vm12, %v7507_v26, %v13553_v6  ;;  %13795 = vrot.lane.b32.xlu1 %v13794_v53, %s14140_s21  ;;  %v18626_v6 = vpop.f32.mrf.mxu0 }
 0x68f   : > { %v7667_v27 = vsel %vm3671_vm13, %v7635_v34, %v13562_v41  ;;  %v7571_v12 = vsel %vm3671_vm13, %v7539_v13, %v13563_v46  ;;  %v18638_v46 = vld [vmem:[#allocation2 + $0x150] sm:$0xff] }
 0x690   : > { %8028 = vmatprep.mubr.f32.mxu1 %v7667_v27  ;;  %13780 = vrot.lane.b32.xlu0 %v13779_v7, %s14139_s29  ;;  %v8451_v27 = vld [vmem:[#allocation2 + $0x11] sm:$0xff] }
 0x691   : > { %8029 = vmatmul.mubr.f32.gmra.mxu1 %v7571_v12 }
 0x692   : > { %11923 = vmatprep.mubr.msk.f32.mxu1 %vm484_vm10, %v18410_v22  ;;  %13800 = vrot.lane.b32.xlu1 %v13799_v15, %s14141_s28 }
 0x694   : > { %13790 = vrot.lane.b32.xlu0 %v13789_v35, %s14141_s28 }
 0x695   : > { %11924 = vmatmul.mubr.msk.f32.vlgmr.msra.gmra.mxu1 %vm484_vm10, %v18443_v8 }
 0x696   : > { %11926 = vmatprep.mubr.msk.f32.mxu1 %vm484_vm10, %v18452_v39  ;;  %v7960_v22 = vpop.f32.mrf.mxu1  ;;  %v8586_v39 = vld [vmem:[#allocation2 + $0x92] sm:$0xff] }
 0x697   : > { %v7961_v8 = vadd.f32 %v18348_v61, %v7960_v22 }
 0x698   : > { %13805 = vrot.lane.b32.xlu0 %v13804_v50, %s14140_s21  ;;  %v7962_v55 = vpop.f32.mrf.mxu1 }
 0x699   : > { %11927 = vmatmul.mubr.msk.f32.gmra.mxu1 %vm484_vm10, %v18466_v31  ;;  %v8186_v43 = vadd.f32 %v18556_v36, %v7961_v8  ;;  %v8190_v36 = vpop.f32.mrf.mxu0 }
 0x69a   : > { %11929 = vmatprep.mubr.msk.f32.mxu1 %vm484_vm10, %v18474_v23 }
 0x69b   : > { %v8276_v31 = vmax.f32 %v8186_v43, 0.0 }
 0x69d   : > { %11930 = vmatmul.mubr.msk.f32.gmra.mxu1 %vm484_vm10, %v18491_v47  ;;  %8308 = vst.msk [vmem:[#allocation2 + $0x161] sm:$0xff] %vm484_vm10, %v8276_v31  ;;  %v7965_v23 = vpop.f32.mrf.mxu1 }
 0x69e   : > { %11932 = vmatprep.mubr.msk.f32.mxu1 %vm484_vm10, %v18506_v17  ;;  %v7966_v30 = vadd.f32 %v18348_v61, %v7965_v23 }
 0x69f   : > { %v7967_v37 = vpop.f32.mrf.mxu1 }
 0x6a0   : > { %v8191_v47 = vadd.f32 %v8190_v36, %v7966_v30 }
 0x6a1   : > { %11933 = vmatmul.mubr.msk.f32.gmra.mxu1 %vm484_vm10, %v8586_v39 }
 0x6a2   : > { %11935 = vmatprep.mubr.msk.f32.mxu1 %vm484_vm10, %v18517_v44  ;;  %v8277_v17 = vmax.f32 %v8191_v47, 0.0 }
 0x6a4   : > { %8309 = vst.msk [vmem:[#allocation2 + $0x171] sm:$0xff] %vm484_vm10, %v8277_v17  ;;  %v8531_v14 = vld [vmem:[#allocation2 + $0x160] sm:$0xff] }
 0x6a5   : > { %11936 = vmatmul.mubr.msk.f32.gmra.mxu1 %vm484_vm10, %v18526_v1  ;;  %v8563_v61 = vld [vmem:[#allocation2 + $0x161] sm:$0xff]  ;;  %v13809_v44 = vpack.i.bf16 %v8403_v10, %v8531_v14 }
 0x6a6   : > { %11938 = vmatprep.mubr.msk.f32.mxu1 %vm484_vm10, %v18532_v63  ;;  %v13814_v41 = vpack.i.bf16 %v18638_v46, %v8563_v61  ;;  %v13566_v28 = vpop.permute.xlu1 %13565  ;;  %v18645_v1 = vld [vmem:[#allocation2 + $0x162] sm:$0xff] }
 0x6a7   : > { %13810 = vrot.lane.b32.xlu1 %v13809_v44, %s14139_s29  ;;  %v8323_v63 = vld [vmem:[#allocation2] sm:$0xff]  ;;  %v13567_v15 = vunpack.i.l.bf16 %v13566_v28 }
 0x6a8   : > { %13815 = vrot.lane.b32.xlu0 %v13814_v41, %s14141_s28  ;;  %v13571_v26 = vpop.permute.xlu0 %13570  ;;  %v8452_v10 = vld [vmem:[#allocation2 + $0x21] sm:$0xff] }
 0x6a9   : > { %11939 = vmatmul.mubr.msk.f32.gmra.mxu1 %vm484_vm10, %v18552_v58  ;;  %v13573_v34 = vunpack.i.h.bf16 %v13571_v26  ;;  %v13572_v53 = vunpack.i.l.bf16 %v13571_v26  ;;  %v13819_v58 = vpack.i.bf16 %v18649_v24, %v18645_v1 }
 0x6aa   : > { %11941 = vmatprep.mubr.msk.f32.mxu1 %vm484_vm10, %v18558_v38  ;;  %v13581_v13 = vpop.permute.xlu1 %13580  ;;  %v8594_v38 = vld [vmem:[#allocation2 + $0x132] sm:$0xff] }
 0x6ab   : > { %v9379_v12 = vsel %vm484_vm10, %v8323_v63, %v13573_v34  ;;  %13820 = vrot.lane.b32.xlu1 %v13819_v58, %s14140_s21  ;;  %v18659_v59 = vld [vmem:[#allocation2 + $0x170] sm:$0xff]  ;;  %v9475_v4 = vsel %vm484_vm10, %v8451_v27, %v13572_v53  ;;  %v13583_v55 = vunpack.i.h.bf16 %v13581_v13  ;;  %v13582_v43 = vunpack.i.l.bf16 %v13581_v13  ;;  %v18689_v58 = vld [vmem:[%s19686_s4 + $0x2] ss:$0 sm:$0xff] }
 0x6ac   : > { %v18661_v7 = vld [vmem:[#allocation2 + $0x171] sm:$0xff]  ;;  %v13576_v35 = vpop.permute.xlu0 %13575  ;;  %v13824_v18 = vpack.i.bf16 %v18609_v25, %v18659_v59  ;;  %v9507_v25 = vsel %vm3638_vm12, %v9475_v4, %v13567_v15 }
 0x6ad   : > { %11942 = vmatmul.mubr.msk.f32.gmra.mxu1 %vm484_vm10, %v18582_v40  ;;  %v13568_v40 = vunpack.i.h.bf16 %v13566_v28  ;;  %v13578_v50 = vunpack.i.h.bf16 %v13576_v35  ;;  %v13577_v22 = vunpack.i.l.bf16 %v13576_v35  ;;  %v18668_v8 = vld [vmem:[#allocation2 + $0x172] sm:$0xff]  ;;  %v9476_v41 = vsel %vm484_vm10, %v8452_v10, %v13582_v43 }
 0x6ae   : > { %11944 = vmatprep.mubr.msk.f32.mxu1 %vm484_vm10, %v18588_v9  ;;  %v13829_v9 = vpack.i.bf16 %v8531_v14, %v18661_v7  ;;  %v13586_v31 = vpop.permute.xlu1 %13585  ;;  %13825 = vrot.lane.b32.xlu0 %v13824_v18, %s14139_s29  ;;  %v13834_v37 = vpack.i.bf16 %v8563_v61, %v18668_v8  ;;  %v8324_v14 = vld [vmem:[#allocation2 + $0x10] sm:$0xff] }
 0x6af   : > { %v9411_v39 = vsel %vm3638_vm12, %v9379_v12, %v13568_v40  ;;  %v9539_v30 = vsel %vm3671_vm13, %v9507_v25, %v13577_v22  ;;  %v9380_v28 = vsel %vm484_vm10, %v8324_v14, %v13583_v55  ;;  %v8325_v22 = vld [vmem:[#allocation2 + $0x20] sm:$0xff]  ;;  %v13587_v43 = vunpack.i.l.bf16 %v13586_v31 }
 0x6b0   : > { %v9443_v23 = vsel %vm3671_vm13, %v9411_v39, %v13578_v50  ;;  %13830 = vrot.lane.b32.xlu1 %v13829_v9, %s14141_s28  ;;  %9776 = vmatprep.mubr.f32.mxu0 %v9539_v30  ;;  %v13591_v36 = vpop.permute.xlu0 %13590  ;;  %v8453_v9 = vld [vmem:[#allocation2 + $0x31] sm:$0xff]  ;;  %v11899_v50 = vpop.f32.mrf.mxu0  ;;  %v13588_v30 = vunpack.i.h.bf16 %v13586_v31 }
 0x6b1   : > { %11945 = vmatmul.mubr.msk.f32.gmra.mxu1 %vm484_vm10, %v8594_v38  ;;  %v13593_v47 = vunpack.i.h.bf16 %v13591_v36  ;;  %v13592_v17 = vunpack.i.l.bf16 %v13591_v36  ;;  %9777 = vmatmul.mubr.f32.vlgmr.msra.gmra.mxu0 %v9443_v23 }
 0x6b2   : > { %11947 = vmatprep.mubr.msk.f32.mxu1 %vm484_vm10, %v18645_v1  ;;  %v13596_v44 = vpop.permute.xlu1 %13595  ;;  %13835 = vrot.lane.b32.xlu0 %v13834_v37, %s14140_s21 }
 0x6b3   : > { %v13598_v63 = vunpack.i.h.bf16 %v13596_v44  ;;  %v13597_v26 = vunpack.i.l.bf16 %v13596_v44  ;;  %v7970_v34 = vpop.f32.mrf.mxu1  ;;  %v9508_v61 = vsel %vm3638_vm12, %v9476_v41, %v13592_v17  ;;  %v9412_v53 = vsel %vm3638_vm12, %v9380_v28, %v13593_v47  ;;  %v8200_v44 = vpop.f32.mrf.mxu0 }
 0x6b4   : > { %v7971_v13 = vadd.f32 %v18689_v58, %v7970_v34  ;;  %v13601_v38 = vpop.permute.xlu0 %13600 }
 0x6b5   : > { %11948 = vmatmul.mubr.msk.f32.gmra.mxu1 %vm484_vm10, %v18668_v8  ;;  %v13603_v27 = vunpack.i.h.bf16 %v13601_v38  ;;  %v13602_v12 = vunpack.i.l.bf16 %v13601_v38  ;;  %v7972_v4 = vpop.f32.mrf.mxu1  ;;  %v9540_v40 = vsel %vm3671_vm13, %v9508_v61, %v13597_v26  ;;  %v9444_v15 = vsel %vm3671_vm13, %v9412_v53, %v13598_v63  ;;  %v8326_v61 = vld [vmem:[#allocation2 + $0x30] sm:$0xff] }
 0x6b6   : > { %v8196_v35 = vadd.f32 %v18626_v6, %v7971_v13  ;;  %9781 = vmatprep.mubr.f32.mxu0 %v9540_v40  ;;  %v13611_v18 = vpop.permute.xlu1 %13610 }
 0x6b7   : > { %9782 = vmatmul.mubr.f32.gmra.mxu0 %v9444_v15  ;;  %v9477_v55 = vsel %vm484_vm10, %v8453_v9, %v13602_v12  ;;  %v9381_v25 = vsel %vm484_vm10, %v8325_v22, %v13603_v27  ;;  %v13613_v47 = vunpack.i.h.bf16 %v13611_v18  ;;  %v13612_v6 = vunpack.i.l.bf16 %v13611_v18  ;;  %v8454_v27 = vld [vmem:[#allocation2 + $0x41] sm:$0xff] }
 0x6b8   : > { %v8278_v39 = vmax.f32 %v8196_v35, 0.0  ;;  %v13606_v23 = vpop.permute.xlu0 %13605  ;;  %v9509_v14 = vsel %vm3638_vm12, %v9477_v55, %v13587_v43  ;;  %v9413_v63 = vsel %vm3638_vm12, %v9381_v25, %v13588_v30 }
 0x6b9   : > { %v13608_v36 = vunpack.i.h.bf16 %v13606_v23  ;;  %v13607_v37 = vunpack.i.l.bf16 %v13606_v23  ;;  %v9382_v12 = vsel %vm484_vm10, %v8326_v61, %v13613_v47  ;;  %v9478_v40 = vsel %vm484_vm10, %v8454_v27, %v13612_v6  ;;  %v8327_v6 = vld [vmem:[#allocation2 + $0x40] sm:$0xff] }
 0x6ba   : > { %8310 = vst.msk [vmem:[#allocation2 + $0x181] sm:$0xff] %vm484_vm10, %v8278_v39  ;;  %v7975_v17 = vpop.f32.mrf.mxu1  ;;  %v13616_v10 = vpop.permute.xlu1 %13615 }
 0x6bb   : > { %v7976_v41 = vadd.f32 %v18689_v58, %v7975_v17  ;;  %v9541_v28 = vsel %vm3671_vm13, %v9509_v14, %v13607_v37  ;;  %v9445_v31 = vsel %vm3671_vm13, %v9413_v63, %v13608_v36 }
 0x6bc   : > { %v7977_v26 = vpop.f32.mrf.mxu1  ;;  %v13621_v34 = vpop.permute.xlu0 %13620  ;;  %9786 = vmatprep.mubr.f32.mxu0 %v9541_v28 }
 0x6bd   : > { %v8201_v53 = vadd.f32 %v8200_v44, %v7976_v41  ;;  %v13623_v13 = vunpack.i.h.bf16 %v13621_v34  ;;  %v13622_v38 = vunpack.i.l.bf16 %v13621_v34  ;;  %9787 = vmatmul.mubr.f32.gmra.mxu0 %v9445_v31  ;;  %v8455_v26 = vld [vmem:[#allocation2 + $0x51] sm:$0xff]  ;;  %v13618_v34 = vunpack.i.h.bf16 %v13616_v10 }
 0x6be   : > { %v13626_v4 = vpop.permute.xlu1 %13625  ;;  %v13617_v31 = vunpack.i.l.bf16 %v13616_v10 }
 0x6bf   : > { %v8279_v15 = vmax.f32 %v8201_v53, 0.0  ;;  %v13628_v35 = vunpack.i.h.bf16 %v13626_v4  ;;  %v13627_v18 = vunpack.i.l.bf16 %v13626_v4  ;;  %v9510_v9 = vsel %vm3638_vm12, %v9478_v40, %v13622_v38 }
 0x6c0   : > { %v13631_v22 = vpop.permute.xlu0 %13630  ;;  %v9414_v55 = vsel %vm3638_vm12, %v9382_v12, %v13623_v13 }
 0x6c1   : > { %8311 = vst.msk [vmem:[#allocation2 + $0x191] sm:$0xff] %vm484_vm10, %v8279_v15  ;;  %v13633_v43 = vunpack.i.h.bf16 %v13631_v22  ;;  %v13632_v39 = vunpack.i.l.bf16 %v13631_v22  ;;  %v7980_v25 = vpop.f32.mrf.mxu1  ;;  %v18708_v23 = vld [vmem:[#allocation2 + $0x182] sm:$0xff]  ;;  %v9542_v30 = vsel %vm3671_vm13, %v9510_v9, %v13627_v18  ;;  %v9446_v36 = vsel %vm3671_vm13, %v9414_v55, %v13628_v35 }
 0x6c2   : > { %v18712_v37 = vld [vmem:[#allocation2 + $0x180] sm:$0xff]  ;;  %v7981_v17 = vadd.f32 %v18689_v58, %v7980_v25  ;;  %11950 = vmatprep.mubr.msk.f32.mxu1 %vm484_vm10, %v18708_v23  ;;  %v13641_v14 = vpop.permute.xlu1 %13640  ;;  %9791 = vmatprep.mubr.f32.mxu0 %v9542_v30 }
 0x6c3   : > { %v18714_v47 = vld [vmem:[#allocation2 + $0x181] sm:$0xff]  ;;  %v13839_v44 = vpack.i.bf16 %v18645_v1, %v18712_v37  ;;  %v9383_v28 = vsel %vm484_vm10, %v8327_v6, %v13633_v43  ;;  %v7982_v63 = vpop.f32.mrf.mxu1  ;;  %9792 = vmatmul.mubr.f32.gmra.mxu0 %v9446_v36  ;;  %v9479_v13 = vsel %vm484_vm10, %v8455_v26, %v13632_v39  ;;  %v13643_v43 = vunpack.i.h.bf16 %v13641_v14 }
 0x6c4   : > { %v13844_v41 = vpack.i.bf16 %v18659_v59, %v18714_v47  ;;  %v8206_v61 = vadd.f32 %v11899_v50, %v7981_v17  ;;  %v13636_v53 = vpop.permute.xlu0 %13635  ;;  %v13849_v59 = vpack.i.bf16 %v18661_v7, %v18708_v23  ;;  %v9511_v4 = vsel %vm3638_vm12, %v9479_v13, %v13617_v31  ;;  %v11902_v7 = vpop.f32.mrf.mxu0 }
 0x6c5   : > { %13840 = vrot.lane.b32.xlu1 %v13839_v44, %s14139_s29  ;;  %v13638_v38 = vunpack.i.h.bf16 %v13636_v53  ;;  %v13637_v1 = vunpack.i.l.bf16 %v13636_v53  ;;  %v9415_v10 = vsel %vm3638_vm12, %v9383_v28, %v13618_v34  ;;  %v13642_v39 = vunpack.i.l.bf16 %v13641_v14  ;;  %v8456_v14 = vld [vmem:[#allocation2 + $0x61] sm:$0xff] }
 0x6c6   : > { %13845 = vrot.lane.b32.xlu0 %v13844_v41, %s14141_s28  ;;  %v8280_v27 = vmax.f32 %v8206_v61, 0.0  ;;  %v18727_v12 = vpop.permute.xlu1 %13645  ;;  %v8210_v44 = vpop.f32.mrf.mxu0  ;;  %v8328_v41 = vld [vmem:[#allocation2 + $0x50] sm:$0xff] }
 0x6c7   : > { %v9543_v50 = vsel %vm3671_vm13, %v9511_v4, %v13637_v1  ;;  %v9447_v40 = vsel %vm3671_vm13, %v9415_v10, %v13638_v38  ;;  %v9384_v34 = vsel %vm484_vm10, %v8328_v41, %v13643_v43  ;;  %v13647_v31 = vunpack.i.l.bf16 %v18727_v12  ;;  %v8457_v38 = vld [vmem:[#allocation2 + $0x71] sm:$0xff] }
 0x6c8   : > { %8312 = vst.msk [vmem:[#allocation2 + $0x1a1] sm:$0xff] %vm484_vm10, %v8280_v27  ;;  %v13656_v15 = vpop.permute.xlu0 %13655  ;;  %9796 = vmatprep.mubr.f32.mxu0 %v9543_v50  ;;  %v18737_v35 = vld [vmem:[#allocation2 + $0x192] sm:$0xff]  ;;  %v9480_v13 = vsel %vm484_vm10, %v8456_v14, %v13642_v39 }
 0x6c9   : > { %13850 = vrot.lane.b32.xlu1 %v13849_v59, %s14140_s21  ;;  %v18739_v18 = vld [vmem:[#allocation2 + $0x190] sm:$0xff]  ;;  %9797 = vmatmul.mubr.f32.gmra.mxu0 %v9447_v40  ;;  %v13657_v30 = vunpack.i.l.bf16 %v13656_v15  ;;  %v13658_v36 = vunpack.i.h.bf16 %v13656_v15  ;;  %v13864_v26 = vpack.i.bf16 %v18714_v47, %v18737_v35  ;;  %v8329_v15 = vld [vmem:[#allocation2 + $0x60] sm:$0xff] }
 0x6ca   : > { %v18741_v9 = vld [vmem:[#allocation2 + $0x191] sm:$0xff]  ;;  %11951 = vmatmul.mubr.msk.f32.gmra.mxu1 %vm484_vm10, %v18737_v35  ;;  %v13854_v22 = vpack.i.bf16 %v18668_v8, %v18739_v18  ;;  %v18749_v25 = vpop.permute.xlu1 %13650 }
 0x6cb   : > { %v13859_v55 = vpack.i.bf16 %v18712_v37, %v18741_v9  ;;  %v9512_v50 = vsel %vm3638_vm12, %v9480_v13, %v13657_v30 }
 0x6cc   : > { %13855 = vrot.lane.b32.xlu0 %v13854_v22, %s14139_s29  ;;  %v13666_v17 = vpop.permute.xlu0 %13665 }
 0x6cd   : > { %13860 = vrot.lane.b32.xlu1 %v13859_v55, %s14141_s28  ;;  %v13668_v8 = vunpack.i.h.bf16 %v13666_v17  ;;  %v13667_v63 = vunpack.i.l.bf16 %v13666_v17 }
 0x6ce   : > { %v7985_v6 = vpop.f32.mrf.mxu1  ;;  %v13661_v53 = vpop.permute.xlu1 %13660 }
 0x6cf   : > { %v7986_v28 = vadd.f32 %v18689_v58, %v7985_v6  ;;  %v13663_v27 = vunpack.i.h.bf16 %v13661_v53  ;;  %v13662_v59 = vunpack.i.l.bf16 %v13661_v53  ;;  %v18760_v4 = vld [vmem:[#allocation2 + $0x1a2] sm:$0xff]  ;;  %v9416_v6 = vsel %vm3638_vm12, %v9384_v34, %v13658_v36 }
 0x6d0   : > { %v7987_v61 = vpop.f32.mrf.mxu1  ;;  %13865 = vrot.lane.b32.xlu0 %v13864_v26, %s14140_s21  ;;  %v18762_v10 = vld [vmem:[#allocation2 + $0x1a0] sm:$0xff]  ;;  %11953 = vmatprep.mubr.msk.f32.mxu1 %vm484_vm10, %v18760_v4  ;;  %v13671_v55 = vpop.permute.xlu0 %13670  ;;  %v9481_v17 = vsel %vm484_vm10, %v8457_v38, %v13667_v63  ;;  %v9385_v30 = vsel %vm484_vm10, %v8329_v15, %v13668_v8  ;;  %v13648_v38 = vunpack.i.h.bf16 %v18727_v12 }
 0x6d1   : > { %v8211_v1 = vadd.f32 %v8210_v44, %v7986_v28  ;;  %v18765_v40 = vld [vmem:[#allocation2 + $0x1a1] sm:$0xff]  ;;  %v13869_v43 = vpack.i.bf16 %v18708_v23, %v18762_v10  ;;  %v13672_v28 = vunpack.i.l.bf16 %v13671_v55  ;;  %v13673_v26 = vunpack.i.h.bf16 %v13671_v55 }
 0x6d2   : > { %v7990_v22 = vpop.f32.mrf.mxu1  ;;  %v13874_v39 = vpack.i.bf16 %v18739_v18, %v18765_v40  ;;  %v13676_v61 = vpop.permute.xlu1 %13675  ;;  %v9544_v23 = vsel %vm3671_vm13, %v9512_v50, %v13662_v59  ;;  %v9448_v53 = vsel %vm3671_vm13, %v9416_v6, %v13663_v27  ;;  %v9513_v13 = vsel %vm3638_vm12, %v9481_v17, %v13647_v31 }
 0x6d3   : > { %v8281_v44 = vmax.f32 %v8211_v1, 0.0  ;;  %v7991_v41 = vadd.f32 %v18689_v58, %v7990_v22  ;;  %13870 = vrot.lane.b32.xlu1 %v13869_v43, %s14139_s29  ;;  %v13678_v63 = vunpack.i.h.bf16 %v13676_v61  ;;  %v13677_v34 = vunpack.i.l.bf16 %v13676_v61  ;;  %9801 = vmatprep.mubr.f32.mxu0 %v9544_v23  ;;  %v8330_v1 = vld [vmem:[#allocation2 + $0x70] sm:$0xff]  ;;  %v8458_v22 = vld [vmem:[#allocation2 + $0x81] sm:$0xff] }
 0x6d4   : > { %v7992_v14 = vpop.f32.mrf.mxu1  ;;  %13875 = vrot.lane.b32.xlu0 %v13874_v39, %s14141_s28  ;;  %v9545_v8 = vsel %vm3671_vm13, %v9513_v13, %v13672_v28  ;;  %9802 = vmatmul.mubr.f32.gmra.mxu0 %v9448_v53  ;;  %v13681_v15 = vpop.permute.xlu0 %13680  ;;  %v13879_v27 = vpack.i.bf16 %v18741_v9, %v18760_v4  ;;  %v13652_v55 = vunpack.i.l.bf16 %v18749_v25  ;;  %v9417_v12 = vsel %vm3638_vm12, %v9385_v30, %v13648_v38  ;;  %v8331_v61 = vld [vmem:[#allocation2 + $0xa0] sm:$0xff] }
 0x6d5   : > { %8313 = vst.msk [vmem:[#allocation2 + $0x1b1] sm:$0xff] %vm484_vm10, %v8281_v44  ;;  %v8216_v36 = vadd.f32 %v11902_v7, %v7991_v41  ;;  %v9386_v31 = vsel %vm484_vm10, %v8330_v1, %v13678_v63  ;;  %v13683_v50 = vunpack.i.h.bf16 %v13681_v15  ;;  %v13682_v7 = vunpack.i.l.bf16 %v13681_v15  ;;  %9806 = vmatprep.mubr.f32.mxu0 %v9545_v8  ;;  %v8459_v8 = vld [vmem:[#allocation2 + $0xb1] sm:$0xff] }
 0x6d6   : > { %v13686_v43 = vpop.permute.xlu1 %13685  ;;  %v9482_v39 = vsel %vm484_vm10, %v8458_v22, %v13677_v34  ;;  %v9449_v6 = vsel %vm3671_vm13, %v9417_v12, %v13673_v26  ;;  %v13653_v14 = vunpack.i.h.bf16 %v18749_v25 }
 0x6d7   : > { %v8282_v59 = vmax.f32 %v8216_v36, 0.0  ;;  %13880 = vrot.lane.b32.xlu1 %v13879_v27, %s14140_s21  ;;  %v9514_v17 = vsel %vm3638_vm12, %v9482_v39, %v13682_v7  ;;  %v9418_v28 = vsel %vm3638_vm12, %v9386_v31, %v13683_v50  ;;  %v13687_v38 = vunpack.i.l.bf16 %v13686_v43 }
 0x6d8   : > { %9807 = vmatmul.mubr.f32.gmra.mxu0 %v9449_v6  ;;  %v13691_v44 = vpop.permute.xlu0 %13690  ;;  %v9546_v41 = vsel %vm3671_vm13, %v9514_v17, %v13652_v55  ;;  %v9450_v26 = vsel %vm3671_vm13, %v9418_v28, %v13653_v14 }
 0x6d9   : > { %8314 = vst.msk [vmem:[#allocation2 + $0x1c1] sm:$0xff] %vm484_vm10, %v8282_v59  ;;  %v13693_v23 = vunpack.i.h.bf16 %v13691_v44  ;;  %v13692_v53 = vunpack.i.l.bf16 %v13691_v44  ;;  %9811 = vmatprep.mubr.f32.mxu0 %v9546_v41  ;;  %v13688_v59 = vunpack.i.h.bf16 %v13686_v43  ;;  %v8602_v44 = vld [vmem:[#allocation2 + $0x1d2] sm:$0xff] }
 0x6da   : > { %v13701_v30 = vpop.permute.xlu1 %13700 }
 0x6db   : > { %v9387_v25 = vsel %vm484_vm10, %v8331_v61, %v13693_v23  ;;  %v9483_v27 = vsel %vm484_vm10, %v8459_v8, %v13692_v53  ;;  %v13703_v7 = vunpack.i.h.bf16 %v13701_v30  ;;  %v13702_v22 = vunpack.i.l.bf16 %v13701_v30  ;;  %v8332_v61 = vld [vmem:[#allocation2 + $0xb0] sm:$0xff] }
 0x6dc   : > { %v8600_v13 = vld [vmem:[#allocation2 + $0x1b2] sm:$0xff]  ;;  %9812 = vmatmul.mubr.f32.gmra.mxu0 %v9450_v26  ;;  %v13696_v1 = vpop.permute.xlu0 %13695  ;;  %v9515_v39 = vsel %vm3638_vm12, %v9483_v27, %v13687_v38  ;;  %v9419_v43 = vsel %vm3638_vm12, %v9387_v25, %v13688_v59  ;;  %v8460_v26 = vld [vmem:[#allocation2 + $0xc1] sm:$0xff] }
 0x6dd   : > { %v18798_v36 = vld [vmem:[#allocation2 + $0x1b1] sm:$0xff]  ;;  %11954 = vmatmul.mubr.msk.f32.gmra.mxu1 %vm484_vm10, %v8600_v13  ;;  %v13698_v31 = vunpack.i.h.bf16 %v13696_v1  ;;  %v13697_v50 = vunpack.i.l.bf16 %v13696_v1  ;;  %v13894_v28 = vpack.i.bf16 %v18765_v40, %v8600_v13  ;;  %v9484_v25 = vsel %vm484_vm10, %v8460_v26, %v13702_v22 }
 0x6de   : > { %v18800_v63 = vld [vmem:[#allocation2 + $0x1b0] sm:$0xff]  ;;  %v13889_v34 = vpack.i.bf16 %v18762_v10, %v18798_v36  ;;  %v13711_v55 = vpop.permute.xlu1 %13710 }
 0x6df   : > { %v13884_v15 = vpack.i.bf16 %v18737_v35, %v18800_v63  ;;  %v9547_v35 = vsel %vm3671_vm13, %v9515_v39, %v13697_v50  ;;  %v9451_v14 = vsel %vm3671_vm13, %v9419_v43, %v13698_v31  ;;  %v8538_v30 = vld [vmem:[#allocation2 + $0x1d0] sm:$0xff]  ;;  %v13712_v8 = vunpack.i.l.bf16 %v13711_v55 }
 0x6e0   : > { %13890 = vrot.lane.b32.xlu1 %v13889_v34, %s14141_s28  ;;  %v8601_v12 = vld [vmem:[#allocation2 + $0x1c2] sm:$0xff]  ;;  %v13706_v41 = vpop.permute.xlu0 %13705  ;;  %9816 = vmatprep.mubr.f32.mxu0 %v9547_v35  ;;  %v9388_v34 = vsel %vm484_vm10, %v8332_v61, %v13703_v7  ;;  %v13899_v31 = vpack.i.bf16 %v8600_v13, %v8538_v30  ;;  %v8461_v43 = vld [vmem:[#allocation2 + $0xd1] sm:$0xff] }
 0x6e1   : > { %13885 = vrot.lane.b32.xlu0 %v13884_v15, %s14139_s29  ;;  %v8537_v6 = vld [vmem:[#allocation2 + $0x1c0] sm:$0xff]  ;;  %11956 = vmatprep.mubr.msk.f32.mxu1 %vm484_vm10, %v8601_v12  ;;  %v13708_v23 = vunpack.i.h.bf16 %v13706_v41  ;;  %v13707_v53 = vunpack.i.l.bf16 %v13706_v41  ;;  %v13914_v1 = vpack.i.bf16 %v18798_v36, %v8601_v12 }
 0x6e2   : > { %v13904_v17 = vpack.i.bf16 %v18760_v4, %v8537_v6  ;;  %9817 = vmatmul.mubr.f32.gmra.mxu0 %v9451_v14  ;;  %v13713_v4 = vunpack.i.h.bf16 %v13711_v55  ;;  %v13721_v38 = vpop.permute.xlu1 %13720  ;;  %11957 = vmatmul.mubr.msk.f32.gmra.mxu1 %vm484_vm10, %v8602_v44  ;;  %v8570_v55 = vld [vmem:[#allocation2 + $0x1d1] sm:$0xff]  ;;  %v18830_v22 = vld [vmem:[#allocation2 + $0x1c1] sm:$0xff] }
 0x6e3   : > { %v9516_v15 = vsel %vm3638_vm12, %v9484_v25, %v13707_v53  ;;  %v9420_v27 = vsel %vm3638_vm12, %v9388_v34, %v13708_v23  ;;  %v13919_v44 = vpack.i.bf16 %v8537_v6, %v8570_v55  ;;  %v13722_v14 = vunpack.i.l.bf16 %v13721_v38 }
 0x6e4   : > { %13905 = vrot.lane.b32.xlu1 %v13904_v17, %s14139_s29  ;;  %v13716_v59 = vpop.permute.xlu0 %13715  ;;  %v9548_v50 = vsel %vm3671_vm13, %v9516_v15, %v13712_v8  ;;  %v9452_v7 = vsel %vm3671_vm13, %v9420_v27, %v13713_v4  ;;  %v8333_v17 = vld [vmem:[#allocation2 + $0xc0] sm:$0xff]  ;;  %v13909_v23 = vpack.i.bf16 %v18800_v63, %v18830_v22  ;;  %v8334_v15 = vld [vmem:[#allocation2 + $0xd0] sm:$0xff] }
 0x6e5   : > { %13895 = vrot.lane.b32.xlu0 %v13894_v28, %s14140_s21  ;;  %v13718_v39 = vunpack.i.h.bf16 %v13716_v59  ;;  %v13717_v35 = vunpack.i.l.bf16 %v13716_v59  ;;  %9821 = vmatprep.mubr.f32.mxu0 %v9548_v50  ;;  %v13723_v28 = vunpack.i.h.bf16 %v13721_v38 }
 0x6e6   : > { %v13731_v12 = vpop.permute.xlu1 %13730  ;;  %9822 = vmatmul.mubr.f32.gmra.mxu0 %v9452_v7 }
 0x6e7   : > { %v9389_v13 = vsel %vm484_vm10, %v8333_v17, %v13718_v39  ;;  %v9485_v41 = vsel %vm484_vm10, %v8461_v43, %v13717_v35  ;;  %v13733_v26 = vunpack.i.h.bf16 %v13731_v12  ;;  %v13732_v34 = vunpack.i.l.bf16 %v13731_v12 }
 0x6e8   : > { %13915 = vrot.lane.b32.xlu1 %v13914_v1, %s14140_s21  ;;  %v13726_v61 = vpop.permute.xlu0 %13725  ;;  %v9517_v8 = vsel %vm3638_vm12, %v9485_v41, %v13722_v14  ;;  %v9421_v6 = vsel %vm3638_vm12, %v9389_v13, %v13723_v28  ;;  %v8335_v14 = vld [vmem:[#allocation2 + $0xe0] sm:$0xff] }
 0x6e9   : > { %13900 = vrot.lane.b32.xlu0 %v13899_v31, %s14139_s29  ;;  %v13728_v53 = vunpack.i.h.bf16 %v13726_v61  ;;  %v13727_v30 = vunpack.i.l.bf16 %v13726_v61  ;;  %v8462_v31 = vld [vmem:[#allocation2 + $0xe1] sm:$0xff]  ;;  %v9390_v50 = vsel %vm484_vm10, %v8334_v15, %v13733_v26 }
 0x6ea   : > { %v13741_v4 = vpop.permute.xlu1 %13740  ;;  %v9486_v35 = vsel %vm484_vm10, %v8462_v31, %v13732_v34 }
 0x6eb   : > { %v9549_v25 = vsel %vm3671_vm13, %v9517_v8, %v13727_v30  ;;  %v9453_v38 = vsel %vm3671_vm13, %v9421_v6, %v13728_v53  ;;  %v13743_v7 = vunpack.i.h.bf16 %v13741_v4  ;;  %v13742_v55 = vunpack.i.l.bf16 %v13741_v4 }
 0x6ec   : > { %13920 = vrot.lane.b32.xlu1 %v13919_v44, %s14141_s28  ;;  %v13736_v1 = vpop.permute.xlu0 %13735  ;;  %9826 = vmatprep.mubr.f32.mxu0 %v9549_v25 }
 0x6ed   : > { %13910 = vrot.lane.b32.xlu0 %v13909_v23, %s14141_s28  ;;  %v13738_v27 = vunpack.i.h.bf16 %v13736_v1  ;;  %v13737_v59 = vunpack.i.l.bf16 %v13736_v1  ;;  %9827 = vmatmul.mubr.f32.gmra.mxu0 %v9453_v38  ;;  %v8463_v23 = vld [vmem:[#allocation2 + $0xf1] sm:$0xff] }
 0x6ee   : > { %v13751_v39 = vpop.permute.xlu1 %13750 }
 0x6ef   : > { %v9518_v17 = vsel %vm3638_vm12, %v9486_v35, %v13737_v59  ;;  %v9422_v12 = vsel %vm3638_vm12, %v9390_v50, %v13738_v27  ;;  %v13753_v26 = vunpack.i.h.bf16 %v13751_v39  ;;  %v13752_v34 = vunpack.i.l.bf16 %v13751_v39  ;;  %v8464_v39 = vld [vmem:[#allocation2 + $0x101] sm:$0xff] }
 0x6f0   : > { %v13746_v43 = vpop.permute.xlu0 %13745  ;;  %v9550_v13 = vsel %vm3671_vm13, %v9518_v17, %v13742_v55  ;;  %v9454_v44 = vsel %vm3671_vm13, %v9422_v12, %v13743_v7  ;;  %v8336_v7 = vld [vmem:[#allocation2 + $0xf0] sm:$0xff] }
 0x6f1   : > { %v13748_v41 = vunpack.i.h.bf16 %v13746_v43  ;;  %v13747_v28 = vunpack.i.l.bf16 %v13746_v43  ;;  %9831 = vmatprep.mubr.f32.mxu0 %v9550_v13 }
 0x6f2   : > { %9832 = vmatmul.mubr.f32.gmra.mxu0 %v9454_v44 }
 0x6f3   : > { %v9391_v53 = vsel %vm484_vm10, %v8335_v14, %v13748_v41  ;;  %v9487_v30 = vsel %vm484_vm10, %v8463_v23, %v13747_v28  ;;  %v11905_v41 = vpop.f32.mrf.mxu0 }
 0x6f4   : > { %v13761_v61 = vpop.permute.xlu1 %13760  ;;  %v9519_v15 = vsel %vm3638_vm12, %v9487_v30, %v13752_v34  ;;  %v9423_v27 = vsel %vm3638_vm12, %v9391_v53, %v13753_v26 }
 0x6f5   : > { %v13763_v25 = vunpack.i.h.bf16 %v13761_v61  ;;  %v13762_v38 = vunpack.i.l.bf16 %v13761_v61  ;;  %v8220_v34 = vpop.f32.mrf.mxu0 }
 0x6f6   : > { %v13756_v4 = vpop.permute.xlu0 %13755 }
 0x6f7   : > { %v13758_v8 = vunpack.i.h.bf16 %v13756_v4  ;;  %v13757_v6 = vunpack.i.l.bf16 %v13756_v4  ;;  %v9392_v17 = vsel %vm484_vm10, %v8336_v7, %v13763_v25  ;;  %v9488_v44 = vsel %vm484_vm10, %v8464_v39, %v13762_v38  ;;  %v8465_v7 = vld [vmem:[#allocation2 + $0x111] sm:$0xff] }
 0x6f8   : > { %v13771_v1 = vpop.permute.xlu1 %13770 }
 0x6f9   : > { %v9551_v59 = vsel %vm3671_vm13, %v9519_v15, %v13757_v6  ;;  %v9455_v31 = vsel %vm3671_vm13, %v9423_v27, %v13758_v8  ;;  %v13773_v12 = vunpack.i.h.bf16 %v13771_v1  ;;  %v13772_v43 = vunpack.i.l.bf16 %v13771_v1  ;;  %v8337_v27 = vld [vmem:[#allocation2 + $0x100] sm:$0xff] }
 0x6fa   : > { %v13766_v50 = vpop.permute.xlu0 %13765  ;;  %9836 = vmatprep.mubr.f32.mxu0 %v9551_v59 }
 0x6fb   : > { %v13768_v55 = vunpack.i.h.bf16 %v13766_v50  ;;  %v13767_v35 = vunpack.i.l.bf16 %v13766_v50  ;;  %9837 = vmatmul.mubr.f32.gmra.mxu0 %v9455_v31 }
 0x6fc   : > { %v13786_v13 = vpop.permute.xlu1 %13785 }
 0x6fd   : > { %v9520_v28 = vsel %vm3638_vm12, %v9488_v44, %v13767_v35  ;;  %v9424_v14 = vsel %vm3638_vm12, %v9392_v17, %v13768_v55  ;;  %v8466_v55 = vld [vmem:[#allocation2 + $0x121] sm:$0xff]  ;;  %v13787_v44 = vunpack.i.l.bf16 %v13786_v13 }
 0x6fe   : > { %v13776_v61 = vpop.permute.xlu0 %13775  ;;  %v9552_v23 = vsel %vm3671_vm13, %v9520_v28, %v13772_v43  ;;  %v9456_v53 = vsel %vm3671_vm13, %v9424_v14, %v13773_v12  ;;  %v13788_v43 = vunpack.i.h.bf16 %v13786_v13  ;;  %v8338_v14 = vld [vmem:[#allocation2 + $0x110] sm:$0xff] }
 0x6ff   : > { %9841 = vmatprep.mubr.f32.mxu0 %v9552_v23  ;;  %v7995_v30 = vpop.f32.mrf.mxu1  ;;  %v13778_v4 = vunpack.i.h.bf16 %v13776_v61  ;;  %v13777_v8 = vunpack.i.l.bf16 %v13776_v61 }
 0x700   : > { %v13796_v26 = vpop.permute.xlu1 %13795  ;;  %9842 = vmatmul.mubr.f32.gmra.mxu0 %v9456_v53  ;;  %v7996_v6 = vadd.f32 %v18689_v58, %v7995_v30 }
 0x701   : > { %v13797_v25 = vunpack.i.l.bf16 %v13796_v26  ;;  %v7997_v38 = vpop.f32.mrf.mxu1  ;;  %v13798_v59 = vunpack.i.h.bf16 %v13796_v26  ;;  %v9393_v35 = vsel %vm484_vm10, %v8337_v27, %v13778_v4  ;;  %v9489_v17 = vsel %vm484_vm10, %v8465_v7, %v13777_v8 }
 0x702   : > { %v13781_v1 = vpop.permute.xlu0 %13780  ;;  %v8221_v15 = vadd.f32 %v8220_v34, %v7996_v6  ;;  %v9521_v34 = vsel %vm3638_vm12, %v9489_v17, %v13787_v44  ;;  %v9425_v4 = vsel %vm3638_vm12, %v9393_v35, %v13788_v43  ;;  %v8339_v17 = vld [vmem:[#allocation2 + $0x140] sm:$0xff] }
 0x703   : > { %v13782_v31 = vunpack.i.l.bf16 %v13781_v1  ;;  %v9490_v12 = vsel %vm484_vm10, %v8466_v55, %v13797_v25  ;;  %v13783_v61 = vunpack.i.h.bf16 %v13781_v1  ;;  %v9394_v26 = vsel %vm484_vm10, %v8338_v14, %v13798_v59 }
 0x704   : > { %v13801_v50 = vpop.permute.xlu1 %13800  ;;  %v8283_v39 = vmax.f32 %v8221_v15, 0.0  ;;  %v8379_v15 = vld [vmem:[#allocation2 + $0x1e1] sm:$0xff] }
 0x705   : > { %v13802_v23 = vunpack.i.l.bf16 %v13801_v50  ;;  %v9522_v8 = vsel %vm3638_vm12, %v9490_v12, %v13782_v31  ;;  %v13803_v25 = vunpack.i.h.bf16 %v13801_v50  ;;  %v9426_v1 = vsel %vm3638_vm12, %v9394_v26, %v13783_v61 }
 0x706   : > { %v13791_v28 = vpop.permute.xlu0 %13790  ;;  %8315 = vst.msk [vmem:[#allocation2 + $0x1f1] sm:$0xff] %vm484_vm10, %v8283_v39 }
 0x707   : > { %v13793_v53 = vunpack.i.h.bf16 %v13791_v28  ;;  %v13792_v30 = vunpack.i.l.bf16 %v13791_v28  ;;  %v9554_v38 = vsel %vm3671_vm13, %v9522_v8, %v13802_v23  ;;  %v9458_v27 = vsel %vm3671_vm13, %v9426_v1, %v13803_v25 }
 0x709   : > { %v9553_v6 = vsel %vm3671_vm13, %v9521_v34, %v13792_v30  ;;  %v9457_v13 = vsel %vm3671_vm13, %v9425_v4, %v13793_v53  ;;  %v18880_v30 = vpop.f32.mrf.mxu0 }
 0x70a   : > { %9846 = vmatprep.mubr.f32.mxu0 %v9553_v6  ;;  %v13806_v7 = vpop.permute.xlu0 %13805 }
 0x70b   : > { %9847 = vmatmul.mubr.f32.gmra.mxu0 %v9457_v13  ;;  %v13808_v50 = vunpack.i.h.bf16 %v13806_v7  ;;  %v13807_v35 = vunpack.i.l.bf16 %v13806_v7 }
 0x70c   : > { %9851 = vmatprep.mubr.f32.mxu0 %v9554_v38 }
 0x70d   : > { %v18875_v59 = vld [vmem:[#allocation2 + $0x1f2] sm:$0xff]  ;;  %v9395_v26 = vsel %vm484_vm10, %v8339_v17, %v13808_v50  ;;  %v9491_v4 = vsel %vm484_vm10, %v18649_v24, %v13807_v35 }
 0x70e   : > { %v13924_v31 = vpack.i.bf16 %v8379_v15, %v18875_v59 }
 0x70f   : > { %9852 = vmatmul.mubr.f32.gmra.mxu0 %v9458_v27 }
 0x710   : > { %13925 = vrot.lane.b32.xlu0 %v13924_v31, %s14140_s21  ;;  %v8230_v31 = vpop.f32.mrf.mxu0 }
 0x717   : > { %v8000_v55 = vpop.f32.mrf.mxu1 }
 0x718   : > { %v8001_v39 = vadd.f32 %v18689_v58, %v8000_v55 }
 0x719   : > { %v8002_v12 = vpop.f32.mrf.mxu1  ;;  %v13811_v44 = vpop.permute.xlu1 %13810 }
 0x71a   : > { %v8226_v43 = vadd.f32 %v11905_v41, %v8001_v39  ;;  %v13816_v28 = vpop.permute.xlu0 %13815  ;;  %v13813_v14 = vunpack.i.h.bf16 %v13811_v44  ;;  %v13812_v61 = vunpack.i.l.bf16 %v13811_v44  ;;  %v8468_v12 = vld [vmem:[#allocation2 + $0x161] sm:$0xff] }
 0x71b   : > { %v13818_v23 = vunpack.i.h.bf16 %v13816_v28  ;;  %v13817_v53 = vunpack.i.l.bf16 %v13816_v28 }
 0x71c   : > { %v8284_v34 = vmax.f32 %v8226_v43, 0.0  ;;  %v9523_v8 = vsel %vm3638_vm12, %v9491_v4, %v13812_v61  ;;  %v9427_v6 = vsel %vm3638_vm12, %v9395_v26, %v13813_v14  ;;  %v8411_v61 = vld [vmem:[#allocation2 + $0x1e2] sm:$0xff]  ;;  %v18896_v26 = vld [vmem:[#allocation2 + $0x1f0] sm:$0xff] }
 0x71d   : > { %v13821_v13 = vpop.permute.xlu1 %13820  ;;  %v9555_v25 = vsel %vm3671_vm13, %v9523_v8, %v13817_v53  ;;  %v9459_v38 = vsel %vm3671_vm13, %v9427_v6, %v13818_v23 }
 0x71e   : > { %8316 = vst.msk [vmem:[#allocation2 + $0x201] sm:$0xff] %vm484_vm10, %v8284_v34  ;;  %v8005_v41 = vpop.f32.mrf.mxu1  ;;  %v13823_v15 = vunpack.i.h.bf16 %v13821_v13  ;;  %v13822_v27 = vunpack.i.l.bf16 %v13821_v13  ;;  %9856 = vmatprep.mubr.f32.mxu0 %v9555_v25  ;;  %v18914_v25 = vld [vmem:[#allocation2 + $0x1f1] sm:$0xff] }
 0x71f   : > { %v8006_v1 = vadd.f32 %v18689_v58, %v8005_v41  ;;  %9857 = vmatmul.mubr.f32.gmra.mxu0 %v9459_v38 }
 0x720   : > { %v8007_v7 = vpop.f32.mrf.mxu1  ;;  %v13826_v55 = vpop.permute.xlu0 %13825  ;;  %v9396_v50 = vsel %vm484_vm10, %v18638_v46, %v13823_v15  ;;  %v9492_v14 = vsel %vm484_vm10, %v8468_v12, %v13822_v27 }
 0x721   : > { %v8231_v24 = vadd.f32 %v8230_v31, %v8006_v1  ;;  %v13828_v35 = vunpack.i.h.bf16 %v13826_v55  ;;  %v13827_v39 = vunpack.i.l.bf16 %v13826_v55 }
 0x722   : > { %v13831_v17 = vpop.permute.xlu1 %13830 }
 0x723   : > { %v8285_v43 = vmax.f32 %v8231_v24, 0.0  ;;  %v13833_v44 = vunpack.i.h.bf16 %v13831_v17  ;;  %v13832_v28 = vunpack.i.l.bf16 %v13831_v17  ;;  %v9524_v23 = vsel %vm3638_vm12, %v9492_v14, %v13827_v39 }
 0x724   : > { %v9428_v53 = vsel %vm3638_vm12, %v9396_v50, %v13828_v35  ;;  %v13836_v55 = vpop.permute.xlu0 %13835 }
 0x725   : > { %8317 = vst.msk [vmem:[#allocation2 + $0x211] sm:$0xff] %vm484_vm10, %v8285_v43  ;;  %v9556_v46 = vsel %vm3671_vm13, %v9524_v23, %v13832_v28  ;;  %v18900_v34 = vld [vmem:[#allocation2 + $0x202] sm:$0xff]  ;;  %v9460_v4 = vsel %vm3671_vm13, %v9428_v53, %v13833_v44  ;;  %v13838_v35 = vunpack.i.h.bf16 %v13836_v55  ;;  %v13837_v39 = vunpack.i.l.bf16 %v13836_v55 }
 0x726   : > { %v18903_v8 = vld [vmem:[#allocation2 + $0x200] sm:$0xff]  ;;  %9861 = vmatprep.mubr.f32.mxu0 %v9556_v46  ;;  %11959 = vmatprep.mubr.msk.f32.mxu1 %vm484_vm10, %v18900_v34  ;;  %v13939_v38 = vpack.i.bf16 %v18914_v25, %v18900_v34  ;;  %v8469_v46 = vld [vmem:[#allocation2 + $0x171] sm:$0xff] }
 0x727   : > { %v18905_v6 = vld [vmem:[#allocation2 + $0x201] sm:$0xff]  ;;  %v13929_v41 = vpack.i.bf16 %v8411_v61, %v18903_v8  ;;  %9862 = vmatmul.mubr.f32.gmra.mxu0 %v9460_v4  ;;  %v11911_v4 = vpop.f32.mrf.mxu0 }
 0x728   : > { %v13934_v13 = vpack.i.bf16 %v18896_v26, %v18905_v6  ;;  %v8341_v28 = vld [vmem:[#allocation2 + $0x160] sm:$0xff] }
 0x729   : > { %13930 = vrot.lane.b32.xlu1 %v13929_v41, %s14139_s29  ;;  %v9397_v41 = vsel %vm484_vm10, %v8341_v28, %v13838_v35  ;;  %v8240_v35 = vpop.f32.mrf.mxu0 }
 0x72a   : > { %13935 = vrot.lane.b32.xlu0 %v13934_v13, %s14141_s28 }
 0x72c   : > { %v18919_v1 = vld [vmem:[#allocation2 + $0x212] sm:$0xff] }
 0x72d   : > { %13940 = vrot.lane.b32.xlu1 %v13939_v38, %s14140_s21  ;;  %v18921_v15 = vld [vmem:[#allocation2 + $0x210] sm:$0xff]  ;;  %11960 = vmatmul.mubr.msk.f32.gmra.mxu1 %vm484_vm10, %v18919_v1  ;;  %v13954_v24 = vpack.i.bf16 %v18905_v6, %v18919_v1  ;;  %v9493_v38 = vsel %vm484_vm10, %v8469_v46, %v13837_v39 }
 0x72e   : > { %v18923_v27 = vld [vmem:[#allocation2 + $0x211] sm:$0xff]  ;;  %v13944_v31 = vpack.i.bf16 %v18875_v59, %v18921_v15 }
 0x72f   : > { %v13949_v7 = vpack.i.bf16 %v18903_v8, %v18923_v27 }
 0x730   : > { %13945 = vrot.lane.b32.xlu0 %v13944_v31, %s14139_s29 }
 0x731   : > { %13950 = vrot.lane.b32.xlu1 %v13949_v7, %s14141_s28 }
 0x734   : > { %13955 = vrot.lane.b32.xlu0 %v13954_v24, %s14140_s21  ;;  %v8010_v50 = vpop.f32.mrf.mxu1 }
 0x735   : > { %v8011_v17 = vadd.f32 %v18689_v58, %v8010_v50 }
 0x736   : > { %v8012_v12 = vpop.f32.mrf.mxu1 }
 0x737   : > { %v8236_v59 = vadd.f32 %v18880_v30, %v8011_v17  ;;  %v13841_v43 = vpop.permute.xlu1 %13840 }
 0x738   : > { %v13846_v44 = vpop.permute.xlu0 %13845  ;;  %v13843_v14 = vunpack.i.h.bf16 %v13841_v43  ;;  %v13842_v61 = vunpack.i.l.bf16 %v13841_v43 }
 0x739   : > { %v13848_v23 = vunpack.i.h.bf16 %v13846_v44  ;;  %v13847_v53 = vunpack.i.l.bf16 %v13846_v44  ;;  %v8286_v13 = vmax.f32 %v8236_v59, 0.0  ;;  %v8342_v44 = vld [vmem:[#allocation2 + $0x170] sm:$0xff] }
 0x73a   : > { %v9525_v31 = vsel %vm3638_vm12, %v9493_v38, %v13842_v61  ;;  %v9429_v7 = vsel %vm3638_vm12, %v9397_v41, %v13843_v14 }
 0x73b   : > { %8318 = vst.msk [vmem:[#allocation2 + $0x221] sm:$0xff] %vm484_vm10, %v8286_v13  ;;  %v8015_v30 = vpop.f32.mrf.mxu1  ;;  %v13851_v24 = vpop.permute.xlu1 %13850  ;;  %v9557_v55 = vsel %vm3671_vm13, %v9525_v31, %v13847_v53  ;;  %v9461_v50 = vsel %vm3671_vm13, %v9429_v7, %v13848_v23 }
 0x73c   : > { %v8016_v17 = vadd.f32 %v18689_v58, %v8015_v30  ;;  %v13853_v12 = vunpack.i.h.bf16 %v13851_v24  ;;  %v13852_v43 = vunpack.i.l.bf16 %v13851_v24  ;;  %9866 = vmatprep.mubr.f32.mxu0 %v9557_v55 }
 0x73d   : > { %v8017_v59 = vpop.f32.mrf.mxu1  ;;  %9867 = vmatmul.mubr.f32.gmra.mxu0 %v9461_v50 }
 0x73e   : > { %v8241_v39 = vadd.f32 %v8240_v35, %v8016_v17  ;;  %v13856_v28 = vpop.permute.xlu0 %13855  ;;  %v9398_v14 = vsel %vm484_vm10, %v8342_v44, %v13853_v12  ;;  %v9494_v23 = vsel %vm484_vm10, %v18714_v47, %v13852_v43 }
 0x73f   : > { %v13858_v61 = vunpack.i.h.bf16 %v13856_v28  ;;  %v13857_v46 = vunpack.i.l.bf16 %v13856_v28  ;;  %v13861_v41 = vpop.permute.xlu1 %13860 }
 0x740   : > { %v8287_v13 = vmax.f32 %v8241_v39, 0.0  ;;  %v13863_v53 = vunpack.i.h.bf16 %v13861_v41  ;;  %v13862_v38 = vunpack.i.l.bf16 %v13861_v41 }
 0x741   : > { %v9526_v31 = vsel %vm3638_vm12, %v9494_v23, %v13857_v46  ;;  %v9430_v7 = vsel %vm3638_vm12, %v9398_v14, %v13858_v61 }
 0x742   : > { %8319 = vst.msk [vmem:[#allocation2 + $0x231] sm:$0xff] %vm484_vm10, %v8287_v13  ;;  %v13866_v24 = vpop.permute.xlu0 %13865  ;;  %v9558_v55 = vsel %vm3671_vm13, %v9526_v31, %v13862_v38  ;;  %v18953_v50 = vld [vmem:[#allocation2 + $0x222] sm:$0xff]  ;;  %v9462_v17 = vsel %vm3671_vm13, %v9430_v7, %v13863_v53  ;;  %v11914_v31 = vpop.f32.mrf.mxu0 }
 0x743   : > { %v18956_v12 = vld [vmem:[#allocation2 + $0x220] sm:$0xff]  ;;  %v13868_v43 = vunpack.i.h.bf16 %v13866_v24  ;;  %v13867_v59 = vunpack.i.l.bf16 %v13866_v24  ;;  %9871 = vmatprep.mubr.f32.mxu0 %v9558_v55  ;;  %11962 = vmatprep.mubr.msk.f32.mxu1 %vm484_vm10, %v18953_v50 }
 0x744   : > { %v18958_v35 = vld [vmem:[#allocation2 + $0x221] sm:$0xff]  ;;  %v13959_v39 = vpack.i.bf16 %v18900_v34, %v18956_v12  ;;  %9872 = vmatmul.mubr.f32.gmra.mxu0 %v9462_v17  ;;  %v13969_v34 = vpack.i.bf16 %v18923_v27, %v18953_v50 }
 0x745   : > { %v8020_v30 = vpop.f32.mrf.mxu1  ;;  %v13964_v28 = vpack.i.bf16 %v18921_v15, %v18958_v35  ;;  %v13871_v61 = vpop.permute.xlu1 %13870 }
 0x746   : > { %v8021_v47 = vadd.f32 %v18689_v58, %v8020_v30  ;;  %13960 = vrot.lane.b32.xlu1 %v13959_v39, %s14139_s29  ;;  %v9399_v58 = vsel %vm484_vm10, %v18712_v37, %v13868_v43  ;;  %v13873_v46 = vunpack.i.h.bf16 %v13871_v61  ;;  %v13872_v41 = vunpack.i.l.bf16 %v13871_v61  ;;  %v13876_v13 = vpop.permute.xlu0 %13875 }
 0x747   : > { %v8022_v44 = vpop.f32.mrf.mxu1  ;;  %13965 = vrot.lane.b32.xlu0 %v13964_v28, %s14141_s28  ;;  %v13878_v38 = vunpack.i.h.bf16 %v13876_v13  ;;  %v13877_v23 = vunpack.i.l.bf16 %v13876_v13 }
 0x748   : > { %v8246_v14 = vadd.f32 %v11911_v4, %v8021_v47  ;;  %v9495_v4 = vsel %vm484_vm10, %v18741_v9, %v13867_v59  ;;  %v9431_v30 = vsel %vm3638_vm12, %v9399_v58, %v13873_v46  ;;  %v14067_v9 = vld [vmem:[%s19686_s4 + $0x2] ss:$0 sm:$0xff]  ;;  %v8250_v44 = vpop.f32.mrf.mxu0 }
 0x749   : > { %v9527_v7 = vsel %vm3638_vm12, %v9495_v4, %v13872_v41  ;;  %v18980_v55 = vld [vmem:[#allocation2 + $0x232] sm:$0xff]  ;;  %v9463_v17 = vsel %vm3671_vm13, %v9431_v30, %v13878_v38  ;;  %v13881_v58 = vpop.permute.xlu1 %13880 }
 0x74a   : > { %v8288_v53 = vmax.f32 %v8246_v14, 0.0  ;;  %13970 = vrot.lane.b32.xlu1 %v13969_v34, %s14140_s21  ;;  %v9559_v24 = vsel %vm3671_vm13, %v9527_v7, %v13877_v23  ;;  %v18983_v47 = vld [vmem:[#allocation2 + $0x230] sm:$0xff]  ;;  %11963 = vmatmul.mubr.msk.f32.gmra.mxu1 %vm484_vm10, %v18980_v55  ;;  %v13984_v13 = vpack.i.bf16 %v18958_v35, %v18980_v55  ;;  %v13883_v34 = vunpack.i.h.bf16 %v13881_v58 }
 0x74b   : > { %v18985_v43 = vld [vmem:[#allocation2 + $0x231] sm:$0xff]  ;;  %9876 = vmatprep.mubr.f32.mxu0 %v9559_v24  ;;  %v13974_v39 = vpack.i.bf16 %v18919_v1, %v18983_v47 }
 0x74c   : > { %8320 = vst.msk [vmem:[#allocation2 + $0x241] sm:$0xff] %vm484_vm10, %v8288_v53  ;;  %v8025_v37 = vpop.f32.mrf.mxu1  ;;  %9877 = vmatmul.mubr.f32.gmra.mxu0 %v9463_v17  ;;  %v13979_v14 = vpack.i.bf16 %v18956_v12, %v18985_v43  ;;  %v13882_v53 = vunpack.i.l.bf16 %v13881_v58 }
 0x74d   : > { %v8026_v59 = vadd.f32 %v14067_v9, %v8025_v37  ;;  %13975 = vrot.lane.b32.xlu0 %v13974_v39, %s14139_s29 }
 0x74e   : > { %v8027_v28 = vpop.f32.mrf.mxu1  ;;  %13980 = vrot.lane.b32.xlu1 %v13979_v14, %s14141_s28  ;;  %v9400_v14 = vsel %vm484_vm10, %v18739_v18, %v13883_v34 }
 0x74f   : > { %v8251_v61 = vadd.f32 %v8250_v44, %v8026_v59 }
 0x751   : > { %v8289_v46 = vmax.f32 %v8251_v61, 0.0  ;;  %v8030_v41 = vpop.f32.mrf.mxu1  ;;  %13985 = vrot.lane.b32.xlu0 %v13984_v13, %s14140_s21 }
 0x752   : > { %v8031_v1 = vadd.f32 %v14067_v9, %v8030_v41  ;;  %v13891_v23 = vpop.permute.xlu1 %13890 }
 0x753   : > { %8321 = vst.msk [vmem:[#allocation2 + $0x251] sm:$0xff] %vm484_vm10, %v8289_v46  ;;  %v8032_v38 = vpop.f32.mrf.mxu1  ;;  %v8607_v4 = vld [vmem:[#allocation2 + $0x242] sm:$0xff]  ;;  %v13893_v24 = vunpack.i.h.bf16 %v13891_v23  ;;  %v13892_v17 = vunpack.i.l.bf16 %v13891_v23  ;;  %v13886_v59 = vpop.permute.xlu0 %13885 }
 0x754   : > { %v19002_v7 = vld [vmem:[#allocation2 + $0x240] sm:$0xff]  ;;  %v8256_v37 = vadd.f32 %v11914_v31, %v8031_v1  ;;  %11965 = vmatprep.mubr.msk.f32.mxu1 %vm484_vm10, %v8607_v4  ;;  %v13888_v39 = vunpack.i.h.bf16 %v13886_v59  ;;  %v13887_v44 = vunpack.i.l.bf16 %v13886_v59  ;;  %v9496_v31 = vsel %vm484_vm10, %v18765_v40, %v13882_v53 }
 0x755   : > { %v19004_v30 = vld [vmem:[#allocation2 + $0x241] sm:$0xff]  ;;  %v13989_v9 = vpack.i.bf16 %v18953_v50, %v19002_v7  ;;  %v13999_v34 = vpack.i.bf16 %v18985_v43, %v8607_v4 }
 0x756   : > { %v13994_v28 = vpack.i.bf16 %v18983_v47, %v19004_v30  ;;  %v8290_v61 = vmax.f32 %v8256_v37, 0.0  ;;  %v13906_v58 = vpop.permute.xlu1 %13905  ;;  %v9528_v46 = vsel %vm3638_vm12, %v9496_v31, %v13887_v44  ;;  %v9432_v50 = vsel %vm3638_vm12, %v9400_v14, %v13888_v39 }
 0x757   : > { %13990 = vrot.lane.b32.xlu1 %v13989_v9, %s14139_s29  ;;  %v13896_v41 = vpop.permute.xlu0 %13895  ;;  %v9560_v13 = vsel %vm3671_vm13, %v9528_v46, %v13892_v17  ;;  %v9464_v18 = vsel %vm3671_vm13, %v9432_v50, %v13893_v24  ;;  %v13908_v39 = vunpack.i.h.bf16 %v13906_v58  ;;  %v13907_v44 = vunpack.i.l.bf16 %v13906_v58 }
 0x758   : > { %13995 = vrot.lane.b32.xlu0 %v13994_v28, %s14141_s28  ;;  %8322 = vst.msk [vmem:[#allocation2 + $0x261] sm:$0xff] %vm484_vm10, %v8290_v61  ;;  %9881 = vmatprep.mubr.f32.mxu0 %v9560_v13  ;;  %v13898_v38 = vunpack.i.h.bf16 %v13896_v41  ;;  %v13897_v23 = vunpack.i.l.bf16 %v13896_v41  ;;  %v8610_v28 = vld [vmem:[#allocation2 + $0x272] sm:$0xff] }
 0x759   : > { %9882 = vmatmul.mubr.f32.gmra.mxu0 %v9464_v18 }
 0x75a   : > { %v8608_v40 = vld [vmem:[#allocation2 + $0x252] sm:$0xff]  ;;  %v13916_v37 = vpop.permute.xlu1 %13915  ;;  %v9401_v14 = vsel %vm484_vm10, %v18762_v10, %v13898_v38  ;;  %v9497_v50 = vsel %vm484_vm10, %v18798_v36, %v13897_v23 }
 0x75b   : > { %14000 = vrot.lane.b32.xlu1 %v13999_v34, %s14140_s21  ;;  %v19024_v53 = vld [vmem:[#allocation2 + $0x250] sm:$0xff]  ;;  %11966 = vmatmul.mubr.msk.f32.gmra.mxu1 %vm484_vm10, %v8608_v40  ;;  %v13901_v59 = vpop.permute.xlu0 %13900  ;;  %v13917_v9 = vunpack.i.l.bf16 %v13916_v37  ;;  %v14014_v46 = vpack.i.bf16 %v19004_v30, %v8608_v40  ;;  %v13918_v41 = vunpack.i.h.bf16 %v13916_v37  ;;  %v9529_v36 = vsel %vm3638_vm12, %v9497_v50, %v13907_v44  ;;  %v19068_v50 = vld [vmem:[%s19686_s4 + $0x3] ss:$0 sm:$0xff] }
 0x75c   : > { %v19026_v1 = vld [vmem:[#allocation2 + $0x251] sm:$0xff]  ;;  %v14004_v17 = vpack.i.bf16 %v18980_v55, %v19024_v53  ;;  %v13902_v13 = vunpack.i.l.bf16 %v13901_v59  ;;  %v9433_v38 = vsel %vm3638_vm12, %v9401_v14, %v13908_v39  ;;  %v13903_v23 = vunpack.i.h.bf16 %v13901_v59 }
 0x75d   : > { %v14009_v24 = vpack.i.bf16 %v19002_v7, %v19026_v1  ;;  %v9498_v10 = vsel %vm484_vm10, %v18830_v22, %v13917_v9  ;;  %v8546_v44 = vld [vmem:[#allocation2 + $0x270] sm:$0xff] }
 0x75e   : > { %14005 = vrot.lane.b32.xlu0 %v14004_v17, %s14139_s29  ;;  %v13921_v61 = vpop.permute.xlu1 %13920  ;;  %v9530_v9 = vsel %vm3638_vm12, %v9498_v10, %v13902_v13  ;;  %v8578_v59 = vld [vmem:[#allocation2 + $0x271] sm:$0xff]  ;;  %v14029_v14 = vpack.i.bf16 %v8608_v40, %v8546_v44 }
 0x75f   : > { %14010 = vrot.lane.b32.xlu1 %v14009_v24, %s14141_s28  ;;  %v8609_v31 = vld [vmem:[#allocation2 + $0x262] sm:$0xff]  ;;  %v13911_v18 = vpop.permute.xlu0 %13910  ;;  %v13922_v17 = vunpack.i.l.bf16 %v13921_v61  ;;  %v13923_v22 = vunpack.i.h.bf16 %v13921_v61 }
 0x760   : > { %v8545_v55 = vld [vmem:[#allocation2 + $0x260] sm:$0xff]  ;;  %11968 = vmatprep.mubr.msk.f32.mxu1 %vm484_vm10, %v8609_v31  ;;  %v13913_v24 = vunpack.i.h.bf16 %v13911_v18  ;;  %v13912_v3 = vunpack.i.l.bf16 %v13911_v18 }
 0x761   : > { %v14019_v58 = vpack.i.bf16 %v8607_v4, %v8545_v55  ;;  %v19041_v34 = vld [vmem:[#allocation2 + $0x261] sm:$0xff]  ;;  %11969 = vmatmul.mubr.msk.f32.gmra.mxu1 %vm484_vm10, %v8610_v28  ;;  %v14034_v28 = vpack.i.bf16 %v19026_v1, %v8609_v31  ;;  %v14039_v61 = vpack.i.bf16 %v8545_v55, %v8578_v59  ;;  %v11925_v31 = vpop.f32.mrf.mxu1 }
 0x762   : > { %14015 = vrot.lane.b32.xlu0 %v14014_v46, %s14140_s21  ;;  %v9561_v4 = vsel %vm3671_vm13, %v9529_v36, %v13912_v3  ;;  %v9465_v37 = vsel %vm3671_vm13, %v9433_v38, %v13913_v24  ;;  %v14024_v18 = vpack.i.bf16 %v19024_v53, %v19041_v34  ;;  %v9402_v46 = vsel %vm484_vm10, %v18800_v63, %v13918_v41 }
 0x763   : > { %14020 = vrot.lane.b32.xlu1 %v14019_v58, %s14139_s29  ;;  %9886 = vmatprep.mubr.f32.mxu0 %v9561_v4  ;;  %v9562_v3 = vsel %vm3671_vm13, %v9530_v9, %v13922_v17  ;;  %v9434_v39 = vsel %vm3638_vm12, %v9402_v46, %v13903_v23  ;;  %v10003_v58 = vpop.f32.mrf.mxu1 }
 0x764   : > { %9887 = vmatmul.mubr.f32.gmra.mxu0 %v9465_v37  ;;  %v9466_v63 = vsel %vm3671_vm13, %v9434_v39, %v13923_v22 }
 0x765   : > { %9891 = vmatprep.mubr.f32.mxu0 %v9562_v3  ;;  %v11928_v38 = vpop.f32.mrf.mxu1 }
 0x766   : > { %14025 = vrot.lane.b32.xlu0 %v14024_v18, %s14141_s28 }
 0x767   : > { %14035 = vrot.lane.b32.xlu1 %v14034_v28, %s14140_s21  ;;  %v10013_v37 = vpop.f32.mrf.mxu1 }
 0x768   : > { %9892 = vmatmul.mubr.f32.gmra.mxu0 %v9466_v63 }
 0x769   : > { %v11931_v3 = vpop.f32.mrf.mxu1 }
 0x76a   : > { %14030 = vrot.lane.b32.xlu0 %v14029_v14, %s14139_s29 }
 0x76b   : > { %14040 = vrot.lane.b32.xlu1 %v14039_v61, %s14141_s28  ;;  %v10023_v14 = vpop.f32.mrf.mxu1  ;;  %s11413_s28 = sshll.u32 %s14244_s12, 6 }
 0x771   : > { %v9778_v41 = vpop.f32.mrf.mxu0 }
 0x772   : > { %v9779_v13 = vadd.f32 %v19068_v50, %v9778_v41 }
 0x773   : > { %v9780_v17 = vpop.f32.mrf.mxu0 }
 0x774   : > { %v19071_v40 = vadd.f32 %v10003_v58, %v9779_v13  ;;  %v11934_v58 = vpop.f32.mrf.mxu1 }
 0x776   : > { %19888 = vst [vmem:[#allocation11_spill] sm:$0xff] %v19071_v40 }
 0x777   : > { %v9783_v24 = vpop.f32.mrf.mxu0 }
 0x778   : > { %v9784_v55 = vadd.f32 %v19068_v50, %v9783_v24 }
 0x779   : > { %v9785_v10 = vpop.f32.mrf.mxu0 }
 0x77a   : > { %v19074_v36 = vadd.f32 %v11925_v31, %v9784_v55 }
 0x77c   : > { %19889 = vst [vmem:[#allocation10_spill] sm:$0xff] %v19074_v36 }
 0x77d   : > { %v9788_v23 = vpop.f32.mrf.mxu0 }
 0x77e   : > { %v9789_v4 = vadd.f32 %v19068_v50, %v9788_v23 }
 0x77f   : > { %v9790_v18 = vpop.f32.mrf.mxu0 }
 0x780   : > { %v19077_v46 = vadd.f32 %v10013_v37, %v9789_v4 }
 0x782   : > { %19890 = vst [vmem:[#allocation13_spill] sm:$0xff] %v19077_v46  ;;  %v13926_v31 = vpop.permute.xlu0 %13925 }
 0x783   : > { %v9793_v22 = vpop.f32.mrf.mxu0  ;;  %v13928_v24 = vunpack.i.h.bf16 %v13926_v31  ;;  %v13927_v55 = vunpack.i.l.bf16 %v13926_v31 }
 0x784   : > { %v9794_v9 = vadd.f32 %v19068_v50, %v9793_v22  ;;  %v10033_v22 = vpop.f32.mrf.mxu1 }
 0x785   : > { %v9795_v28 = vpop.f32.mrf.mxu0 }
 0x786   : > { %v19080_v44 = vadd.f32 %v11928_v38, %v9794_v9  ;;  %v8347_v38 = vld [vmem:[#allocation2 + $0x1e0] sm:$0xff] }
 0x788   : > { %19891 = vst [vmem:[#allocation12_spill] sm:$0xff] %v19080_v44 }
 0x789   : > { %v9798_v59 = vpop.f32.mrf.mxu0 }
 0x78a   : > { %v9799_v39 = vadd.f32 %v19068_v50, %v9798_v59 }
 0x78b   : > { %v9800_v63 = vpop.f32.mrf.mxu0 }
 0x78c   : > { %v19083_v61 = vadd.f32 %v10023_v14, %v9799_v39  ;;  %v9403_v63 = vsel %vm484_vm10, %v8347_v38, %v13928_v24  ;;  %v19099_v38 = vpop.f32.mrf.mxu1 }
 0x78e   : > { %19892 = vst [vmem:[#allocation15_spill] sm:$0xff] %v19083_v61 }
 0x794   : > { %v9803_v41 = vpop.f32.mrf.mxu0 }
 0x795   : > { %v9804_v13 = vadd.f32 %v19068_v50, %v9803_v41 }
 0x796   : > { %v9805_v17 = vpop.f32.mrf.mxu0 }
 0x797   : > { %v19086_v10 = vadd.f32 %v11931_v3, %v9804_v13  ;;  %v9499_v3 = vsel %vm484_vm10, %v18914_v25, %v13927_v55 }
 0x798   : > { %v9808_v23 = vpop.f32.mrf.mxu0 }
 0x799   : > { %19893 = vst [vmem:[#allocation14_spill] sm:$0xff] %v19086_v10  ;;  %v9809_v4 = vadd.f32 %v19068_v50, %v9808_v23 }
 0x79a   : > { %v9810_v14 = vpop.f32.mrf.mxu0 }
 0x79b   : > { %v13931_v37 = vpop.permute.xlu1 %13930  ;;  %v19090_v41 = vadd.f32 %v10033_v22, %v9809_v4 }
 0x79c   : > { %v13936_v18 = vpop.permute.xlu0 %13935  ;;  %v13933_v9 = vunpack.i.h.bf16 %v13931_v37  ;;  %v13932_v28 = vunpack.i.l.bf16 %v13931_v37  ;;  %v9813_v31 = vpop.f32.mrf.mxu0 }
 0x79d   : > { %v13938_v59 = vunpack.i.h.bf16 %v13936_v18  ;;  %v13937_v39 = vunpack.i.l.bf16 %v13936_v18  ;;  %19894 = vst [vmem:[#allocation34_spill] sm:$0xff] %v19090_v41  ;;  %v9814_v23 = vadd.f32 %v19068_v50, %v9813_v31  ;;  %v10043_v31 = vpop.f32.mrf.mxu1 }
 0x79e   : > { %v9531_v13 = vsel %vm3638_vm12, %v9499_v3, %v13932_v28  ;;  %v9435_v17 = vsel %vm3638_vm12, %v9403_v63, %v13933_v9  ;;  %v9815_v14 = vpop.f32.mrf.mxu0 }
 0x79f   : > { %v13941_v40 = vpop.permute.xlu1 %13940  ;;  %v9563_v37 = vsel %vm3671_vm13, %v9531_v13, %v13937_v39  ;;  %v9467_v24 = vsel %vm3671_vm13, %v9435_v17, %v13938_v59  ;;  %v19101_v4 = vadd.f32 %v11934_v58, %v9814_v23 }
 0x7a0   : > { %v13943_v36 = vunpack.i.h.bf16 %v13941_v40  ;;  %v13942_v18 = vunpack.i.l.bf16 %v13941_v40  ;;  %9896 = vmatprep.mubr.f32.mxu0 %v9563_v37 }
 0x7a1   : > { %19895 = vst [vmem:[#allocation35_spill] sm:$0xff] %v19101_v4  ;;  %9897 = vmatmul.mubr.f32.gmra.mxu0 %v9467_v24 }
 0x7a2   : > { %v13946_v25 = vpop.permute.xlu0 %13945  ;;  %v9404_v55 = vsel %vm484_vm10, %v18896_v26, %v13943_v36  ;;  %v9818_v63 = vpop.f32.mrf.mxu0  ;;  %v9500_v59 = vsel %vm484_vm10, %v18905_v6, %v13942_v18 }
 0x7a3   : > { %v13948_v22 = vunpack.i.h.bf16 %v13946_v25  ;;  %v13947_v9 = vunpack.i.l.bf16 %v13946_v25  ;;  %v13951_v28 = vpop.permute.xlu1 %13950  ;;  %v9819_v40 = vadd.f32 %v19068_v50, %v9818_v63 }
 0x7a4   : > { %v13953_v39 = vunpack.i.h.bf16 %v13951_v28  ;;  %v13952_v3 = vunpack.i.l.bf16 %v13951_v28  ;;  %v9820_v13 = vpop.f32.mrf.mxu0 }
 0x7a5   : > { %v9532_v58 = vsel %vm3638_vm12, %v9500_v59, %v13947_v9  ;;  %v9436_v17 = vsel %vm3638_vm12, %v9404_v55, %v13948_v22  ;;  %v19110_v23 = vadd.f32 %v10043_v31, %v9819_v40 }
 0x7a6   : > { %v9564_v26 = vsel %vm3671_vm13, %v9532_v58, %v13952_v3  ;;  %v9468_v36 = vsel %vm3671_vm13, %v9436_v17, %v13953_v39  ;;  %v19114_v37 = vpop.f32.mrf.mxu0  ;;  %v13956_v18 = vpop.permute.xlu0 %13955 }
 0x7a7   : > { %9901 = vmatprep.mubr.f32.mxu0 %v9564_v26  ;;  %v13958_v9 = vunpack.i.h.bf16 %v13956_v18  ;;  %v13957_v28 = vunpack.i.l.bf16 %v13956_v18 }
 0x7a8   : > { %9902 = vmatmul.mubr.f32.gmra.mxu0 %v9468_v36  ;;  %v9825_v14 = vpop.f32.mrf.mxu0 }
 0x7a9   : > { %v9405_v39 = vsel %vm484_vm10, %v18903_v8, %v13958_v9  ;;  %v9501_v13 = vsel %vm484_vm10, %v18923_v27, %v13957_v28 }
 0x7ad   : > { %v19116_v24 = vpop.f32.mrf.mxu0 }
 0x7af   : > { %v9830_v6 = vpop.f32.mrf.mxu0 }
 0x7b2   : > { %v19118_v25 = vpop.f32.mrf.mxu0 }
 0x7b4   : > { %v9835_v55 = vpop.f32.mrf.mxu0 }
 0x7b8   : > { %v13961_v22 = vpop.permute.xlu1 %13960 }
 0x7b9   : > { %v13963_v63 = vunpack.i.h.bf16 %v13961_v22  ;;  %v13962_v40 = vunpack.i.l.bf16 %v13961_v22  ;;  %v13966_v3 = vpop.permute.xlu0 %13965 }
 0x7ba   : > { %v13968_v59 = vunpack.i.h.bf16 %v13966_v3  ;;  %v13967_v31 = vunpack.i.l.bf16 %v13966_v3 }
 0x7bb   : > { %v19124_v58 = vpop.f32.mrf.mxu0  ;;  %v9533_v17 = vsel %vm3638_vm12, %v9501_v13, %v13962_v40  ;;  %v9437_v26 = vsel %vm3638_vm12, %v9405_v39, %v13963_v63 }
 0x7bc   : > { %v13971_v36 = vpop.permute.xlu1 %13970  ;;  %v9565_v14 = vsel %vm3671_vm13, %v9533_v17, %v13967_v31  ;;  %v9469_v6 = vsel %vm3671_vm13, %v9437_v26, %v13968_v59 }
 0x7bd   : > { %v13973_v18 = vunpack.i.h.bf16 %v13971_v36  ;;  %v13972_v55 = vunpack.i.l.bf16 %v13971_v36  ;;  %v9840_v22 = vpop.f32.mrf.mxu0  ;;  %9906 = vmatprep.mubr.f32.mxu0 %v9565_v14 }
 0x7be   : > { %9907 = vmatmul.mubr.f32.gmra.mxu0 %v9469_v6 }
 0x7bf   : > { %v13976_v8 = vpop.permute.xlu0 %13975  ;;  %v9406_v40 = vsel %vm484_vm10, %v18921_v15, %v13973_v18  ;;  %v9502_v31 = vsel %vm484_vm10, %v18958_v35, %v13972_v55 }
 0x7c0   : > { %v13978_v9 = vunpack.i.h.bf16 %v13976_v8  ;;  %v13977_v3 = vunpack.i.l.bf16 %v13976_v8  ;;  %v13981_v27 = vpop.permute.xlu1 %13980  ;;  %v19130_v28 = vpop.f32.mrf.mxu0 }
 0x7c1   : > { %v13983_v63 = vunpack.i.h.bf16 %v13981_v27  ;;  %v13982_v39 = vunpack.i.l.bf16 %v13981_v27 }
 0x7c2   : > { %v9845_v59 = vpop.f32.mrf.mxu0  ;;  %v9534_v13 = vsel %vm3638_vm12, %v9502_v31, %v13977_v3  ;;  %v9438_v17 = vsel %vm3638_vm12, %v9406_v40, %v13978_v9 }
 0x7c3   : > { %v13986_v26 = vpop.permute.xlu0 %13985  ;;  %v9566_v36 = vsel %vm3671_vm13, %v9534_v13, %v13982_v39  ;;  %v9470_v14 = vsel %vm3671_vm13, %v9438_v17, %v13983_v63 }
 0x7c4   : > { %v13988_v6 = vunpack.i.h.bf16 %v13986_v26  ;;  %v13987_v22 = vunpack.i.l.bf16 %v13986_v26  ;;  %9911 = vmatprep.mubr.f32.mxu0 %v9566_v36 }
 0x7c5   : > { %9912 = vmatmul.mubr.f32.gmra.mxu0 %v9470_v14 }
 0x7c6   : > { %v9407_v35 = vsel %vm484_vm10, %v18956_v12, %v13988_v6  ;;  %v9503_v9 = vsel %vm484_vm10, %v18985_v43, %v13987_v22 }
 0x7c9   : > { %v13991_v15 = vpop.permute.xlu1 %13990 }
 0x7ca   : > { %v13993_v18 = vunpack.i.h.bf16 %v13991_v15  ;;  %v13992_v8 = vunpack.i.l.bf16 %v13991_v15  ;;  %v13996_v27 = vpop.permute.xlu0 %13995 }
 0x7cb   : > { %v13998_v55 = vunpack.i.h.bf16 %v13996_v27  ;;  %v13997_v3 = vunpack.i.l.bf16 %v13996_v27  ;;  %v19148_v26 = vpop.f32.mrf.mxu0 }
 0x7cc   : > { %v9535_v40 = vsel %vm3638_vm12, %v9503_v9, %v13992_v8  ;;  %v9439_v63 = vsel %vm3638_vm12, %v9407_v35, %v13993_v18 }
 0x7cd   : > { %v14001_v39 = vpop.permute.xlu1 %14000  ;;  %v9567_v31 = vsel %vm3671_vm13, %v9535_v40, %v13997_v3  ;;  %v9471_v59 = vsel %vm3671_vm13, %v9439_v63, %v13998_v55  ;;  %v9850_v36 = vpop.f32.mrf.mxu0 }
 0x7ce   : > { %v14003_v13 = vunpack.i.h.bf16 %v14001_v39  ;;  %v14002_v17 = vunpack.i.l.bf16 %v14001_v39  ;;  %9916 = vmatprep.mubr.f32.mxu0 %v9567_v31 }
 0x7cf   : > { %9917 = vmatmul.mubr.f32.gmra.mxu0 %v9471_v59  ;;  %v19152_v8 = vpop.f32.mrf.mxu0 }
 0x7d0   : > { %v14006_v12 = vpop.permute.xlu0 %14005  ;;  %v9408_v22 = vsel %vm484_vm10, %v18983_v47, %v14003_v13  ;;  %v9504_v27 = vsel %vm484_vm10, %v19004_v30, %v14002_v17 }
 0x7d1   : > { %v14008_v14 = vunpack.i.h.bf16 %v14006_v12  ;;  %v14007_v6 = vunpack.i.l.bf16 %v14006_v12  ;;  %v14011_v43 = vpop.permute.xlu1 %14010  ;;  %v9855_v9 = vpop.f32.mrf.mxu0 }
 0x7d2   : > { %v14013_v15 = vunpack.i.h.bf16 %v14011_v43  ;;  %v14012_v18 = vunpack.i.l.bf16 %v14011_v43 }
 0x7d3   : > { %v9536_v35 = vsel %vm3638_vm12, %v9504_v27, %v14007_v6  ;;  %v9440_v55 = vsel %vm3638_vm12, %v9408_v22, %v14008_v14 }
 0x7d4   : > { %v14016_v3 = vpop.permute.xlu0 %14015  ;;  %v9568_v40 = vsel %vm3671_vm13, %v9536_v35, %v14012_v18  ;;  %v9472_v63 = vsel %vm3671_vm13, %v9440_v55, %v14013_v15 }
 0x7d5   : > { %v14018_v39 = vunpack.i.h.bf16 %v14016_v3  ;;  %v14017_v31 = vunpack.i.l.bf16 %v14016_v3  ;;  %v14021_v47 = vpop.permute.xlu1 %14020  ;;  %9921 = vmatprep.mubr.f32.mxu0 %v9568_v40 }
 0x7d6   : > { %v14023_v59 = vunpack.i.h.bf16 %v14021_v47  ;;  %v14022_v13 = vunpack.i.l.bf16 %v14021_v47  ;;  %9922 = vmatmul.mubr.f32.gmra.mxu0 %v9472_v63 }
 0x7d7   : > { %v9409_v30 = vsel %vm484_vm10, %v19002_v7, %v14018_v39  ;;  %v9505_v17 = vsel %vm484_vm10, %v19026_v1, %v14017_v31 }
 0x7d8   : > { %v14026_v12 = vpop.permute.xlu0 %14025  ;;  %v9537_v15 = vsel %vm3638_vm12, %v9505_v17, %v14022_v13  ;;  %v9441_v18 = vsel %vm3638_vm12, %v9409_v30, %v14023_v59 }
 0x7d9   : > { %v14028_v36 = vunpack.i.h.bf16 %v14026_v12  ;;  %v14027_v14 = vunpack.i.l.bf16 %v14026_v12  ;;  %v14036_v6 = vpop.permute.xlu1 %14035 }
 0x7da   : > { %v14038_v43 = vunpack.i.h.bf16 %v14036_v6  ;;  %v14037_v22 = vunpack.i.l.bf16 %v14036_v6 }
 0x7db   : > { %v9569_v27 = vsel %vm3671_vm13, %v9537_v15, %v14027_v14  ;;  %v9473_v35 = vsel %vm3671_vm13, %v9441_v18, %v14028_v36 }
 0x7dc   : > { %v14031_v55 = vpop.permute.xlu0 %14030  ;;  %9926 = vmatprep.mubr.f32.mxu0 %v9569_v27  ;;  %v9410_v1 = vsel %vm484_vm10, %v19024_v53, %v14038_v43  ;;  %v9506_v39 = vsel %vm484_vm10, %v19041_v34, %v14037_v22 }
 0x7dd   : > { %v14033_v7 = vunpack.i.h.bf16 %v14031_v55  ;;  %v14032_v3 = vunpack.i.l.bf16 %v14031_v55  ;;  %v14041_v9 = vpop.permute.xlu1 %14040  ;;  %9927 = vmatmul.mubr.f32.gmra.mxu0 %v9473_v35 }
 0x7de   : > { %v14043_v40 = vunpack.i.h.bf16 %v14041_v9  ;;  %v14042_v63 = vunpack.i.l.bf16 %v14041_v9 }
 0x7df   : > { %v9538_v31 = vsel %vm3638_vm12, %v9506_v39, %v14032_v3  ;;  %v9442_v47 = vsel %vm3638_vm12, %v9410_v1, %v14033_v7  ;;  %v19176_v30 = vpop.f32.mrf.mxu0  ;;  %v19192_v3 = vpop.f32.mrf.mxu1 }
 0x7e0   : > { %v9570_v59 = vsel %vm3671_vm13, %v9538_v31, %v14042_v63  ;;  %v9474_v13 = vsel %vm3671_vm13, %v9442_v47, %v14043_v40  ;;  %19896 = vst [vmem:[#allocation36_spill] sm:$0xff] %v19176_v30 }
 0x7e1   : > { %9931 = vmatprep.mubr.f32.mxu0 %v9570_v59  ;;  %v9860_v17 = vpop.f32.mrf.mxu0  ;;  %v19194_v9 = vpop.f32.mrf.mxu1  ;;  %v19203_v59 = vld [vmem:[%s19687_s5] sm:$0x7] }
 0x7e2   : > { %9932 = vmatmul.mubr.f32.gmra.mxu0 %v9474_v13  ;;  %19901 = vst [vmem:[#allocation41_spill] sm:$0xff] %v19203_v59  ;;  %11631 = vmatprep.mubr.msk.f32.mxu1 %vm484_vm10, %v19203_v59 }
 0x7e3   : > { %v11943_v1 = vpop.f32.mrf.mxu1 }
 0x7e5   : > { %v19196_v40 = vpop.f32.mrf.mxu1 }
 0x7e7   : > { %v19178_v12 = vpop.f32.mrf.mxu0  ;;  %v11946_v39 = vpop.f32.mrf.mxu1 }
 0x7e8   : > { %19897 = vst [vmem:[#allocation37_spill] sm:$0xff] %v19178_v12 }
 0x7e9   : > { %v9865_v53 = vpop.f32.mrf.mxu0  ;;  %v10073_v47 = vpop.f32.mrf.mxu1 }
 0x7ea   : > { %v10259_v53 = vld [vmem:[%s19688_s6] sm:$0x7] }
 0x7fd   : > { %v19180_v36 = vpop.f32.mrf.mxu0 }
 0x7fe   : > { %19898 = vst [vmem:[#allocation38_spill] sm:$0xff] %v19180_v36 }
 0x7ff   : > { %v9870_v14 = vpop.f32.mrf.mxu0 }
 0x800   : > { %v19212_v14 = vpop.f32.mrf.mxu1 }
 0x801   : > { %19902 = vst [vmem:[#allocation42_spill] sm:$0xff] %v19212_v14 }
 0x804   : > { %v19182_v34 = vpop.f32.mrf.mxu0 }
 0x805   : > { %19899 = vst [vmem:[#allocation39_spill] sm:$0xff] %v19182_v34 }
 0x806   : > { %v9875_v6 = vpop.f32.mrf.mxu0 }
 0x807   : > { %v14142_v6 = vmov 0  }
 0x808   : > { %14044 = vset.pattern.permute.xlu0 %v14142_v6 }
 0x809   : > { %10262 = vperm.xlu0 %14044, %v10259_v53  }
 0x80c   : > { %v19184_v43 = vpop.f32.mrf.mxu0 }
 0x80d   : > { %19900 = vst [vmem:[#allocation40_spill] sm:$0xff] %v19184_v43 }
 0x80e   : > { %v9880_v22 = vpop.f32.mrf.mxu0 }
 0x80f   : > { %v19214_v22 = vpop.f32.mrf.mxu1 }
 0x810   : > { %19903 = vst [vmem:[#allocation43_spill] sm:$0xff] %v19214_v22 }
 0x819   : > { %v19186_v15 = vpop.f32.mrf.mxu0 }
 0x81b   : > { %v9885_v18 = vpop.f32.mrf.mxu0 }
 0x81c   : > { %v19216_v18 = vpop.f32.mrf.mxu1 }
 0x81d   : > { %19904 = vst [vmem:[#allocation44_spill] sm:$0xff] %v19216_v18 }
 0x824   : > { %v19188_v27 = vpop.f32.mrf.mxu0 }
 0x826   : > { %v9890_v35 = vpop.f32.mrf.mxu0 }
 0x827   : > { %v19218_v35 = vpop.f32.mrf.mxu1 }
 0x828   : > { %v19190_v55 = vpop.f32.mrf.mxu0  ;;  %19905 = vst [vmem:[#allocation45_spill] sm:$0xff] %v19218_v35 }
 0x82a   : > { %v9895_v7 = vpop.f32.mrf.mxu0 }
 0x82b   : > { %v19220_v7 = vpop.f32.mrf.mxu1 }
 0x82c   : > { %19906 = vst [vmem:[#allocation46_spill] sm:$0xff] %v19220_v7 }
 0x861   : > { %v19198_v63 = vpop.f32.mrf.mxu0 }
 0x863   : > { %v9900_v31 = vpop.f32.mrf.mxu0 }
 0x864   : > { %v19222_v31 = vpop.f32.mrf.mxu1 }
 0x865   : > { %19907 = vst [vmem:[#allocation47_spill] sm:$0xff] %v19222_v31 }
 0x868   : > { %v19205_v13 = vpop.f32.mrf.mxu0 }
 0x86a   : > { %v9905_v17 = vpop.f32.mrf.mxu0 }
 0x86b   : > { %v19224_v17 = vpop.f32.mrf.mxu1 }
 0x86d   : > { %v19226_v30 = vpop.f32.mrf.mxu1 }
 0x86f   : > { %v19228_v14 = vpop.f32.mrf.mxu1 }
 0x871   : > { %v19230_v44 = vpop.f32.mrf.mxu1 }
 0x873   : > { %v11964_v22 = vpop.f32.mrf.mxu1 }
 0x875   : > { %v10133_v35 = vpop.f32.mrf.mxu1 }
 0x877   : > { %v11967_v61 = vpop.f32.mrf.mxu1 }
 0x879   : > { %v10143_v18 = vpop.f32.mrf.mxu1 }
 0x87b   : > { %v11970_v56 = vpop.f32.mrf.mxu1 }
 0x87d   : > { %v10153_v31 = vpop.f32.mrf.mxu1 }
 0x87e   : > { %v9908_v59 = vpop.f32.mrf.mxu0 }
 0x880   : > { %v9910_v46 = vpop.f32.mrf.mxu0 }
 0x881   : > { %v9854_v46 = vadd.f32 %v19068_v50, %v19152_v8 }
 0x883   : > { %v10079_v48 = vadd.f32 %v11946_v39, %v9854_v46 }
 0x885   : > { %v9913_v6 = vpop.f32.mrf.mxu0  ;;  %v10177_v8 = vmax.f32 %v10079_v48, 0.0  ;;  %v19909_v48 = vmax.f32 %v18172_v45, 0.0  ;;  %v19912_v45 = vmax.f32 %v18128_v49, 0.0  ;;  %v9904_v49 = vadd.f32 %v19068_v50, %v19205_v13 }
 0x886   : > { %v9914_v46 = vadd.f32 %v19068_v50, %v9913_v6 }
 0x887   : > { %v9915_v53 = vpop.f32.mrf.mxu0 }
 0x888   : > { %v9849_v53 = vadd.f32 %v19068_v50, %v19148_v26  ;;  %v9839_v26 = vadd.f32 %v19068_v50, %v19124_v58 }
 0x88a   : > { %v10074_v43 = vadd.f32 %v10073_v47, %v9849_v53 }
 0x88f   : > { %v9918_v12 = vpop.f32.mrf.mxu0 }
 0x891   : > { %v9920_v62 = vpop.f32.mrf.mxu0 }
 0x896   : > { %v9923_v21 = vpop.f32.mrf.mxu0 }
 0x897   : > { %v9924_v62 = vadd.f32 %v19068_v50, %v9923_v21 }
 0x898   : > { %v9925_v36 = vpop.f32.mrf.mxu0 }
 0x899   : > { %v9844_v36 = vadd.f32 %v19068_v50, %v19130_v28  ;;  %v10149_v4 = vadd.f32 %v11967_v61, %v9924_v62  ;;  %v19910_v61 = vmax.f32 %v18202_v19, 0.0 }
 0x89b   : > { %v10069_v21 = vadd.f32 %v11943_v1, %v9844_v36  ;;  %v10191_v47 = vmax.f32 %v10149_v4, 0.0  ;;  %v10139_v4 = vadd.f32 %v11964_v22, %v9914_v46 }
 0x89d   : > { %v9928_v10 = vpop.f32.mrf.mxu0  ;;  %v10223_v6 = vadd.f32 %v10191_v47, %v19912_v45  ;;  %v10189_v36 = vmax.f32 %v10139_v4, 0.0  ;;  %v19924_v45 = vld [vmem:[#allocation35_spill] sm:$0xff] }
 0x89e   : > { %v9929_v42 = vadd.f32 %v19068_v50, %v9928_v10  ;;  %v9919_v10 = vadd.f32 %v19068_v50, %v9918_v12  ;;  %v10175_v12 = vmax.f32 %v10069_v21, 0.0 }
 0x89f   : > { %v9930_v34 = vpop.f32.mrf.mxu0 }
 0x8a0   : > { %v10154_v41 = vadd.f32 %v10153_v31, %v9929_v42  ;;  %v10176_v42 = vmax.f32 %v10074_v43, 0.0  ;;  %v19908_v31 = vmax.f32 %v17628_v51, 0.0  ;;  %v10144_v28 = vadd.f32 %v10143_v18, %v9919_v10 }
 0x8a1   : > { %v19911_v51 = vmax.f32 %v17610_v57, 0.0  ;;  %v9909_v18 = vadd.f32 %v19068_v50, %v9908_v59  ;;  %v19913_v59 = vmax.f32 %v17585_v11, 0.0 }
 0x8a2   : > { %v9933_v2 = vpop.f32.mrf.mxu0  ;;  %v10192_v34 = vmax.f32 %v10154_v41, 0.0 }
 0x8a3   : > { %v9934_v7 = vadd.f32 %v19068_v50, %v9933_v2  ;;  %v10209_v2 = vadd.f32 %v10177_v8, %v19908_v31  ;;  %v10208_v43 = vadd.f32 %v10176_v42, %v19911_v51  ;;  %v10207_v22 = vadd.f32 %v10175_v12, %v19913_v59 }
 0x8a4   : > { %v9935_v33 = vpop.f32.mrf.mxu0  ;;  %v10134_v62 = vadd.f32 %v10133_v35, %v9909_v18  ;;  %v19914_v8 = vmax.f32 %v18109_v16, 0.0  ;;  %v9899_v35 = vadd.f32 %v19068_v50, %v19198_v63  ;;  %v10129_v16 = vadd.f32 %v19228_v14, %v9904_v49  ;;  %v19922_v18 = vld [vmem:[#allocation33_spill] sm:$0xff] }
 0x8a5   : > { %v10159_v54 = vadd.f32 %v11970_v56, %v9934_v7  ;;  %v10224_v33 = vadd.f32 %v10192_v34, %v19909_v48  ;;  %v9834_v56 = vadd.f32 %v19068_v50, %v19118_v25  ;;  %v10241_v1 = vmax.f32 %v10209_v2, 0.0 }
 0x8a6   : > { %v10190_v7 = vmax.f32 %v10144_v28, 0.0  ;;  %v9829_v25 = vadd.f32 %v19068_v50, %v19116_v24  ;;  %v10240_v53 = vmax.f32 %v10208_v43, 0.0  ;;  %v10255_v34 = vmax.f32 %v10223_v6, 0.0  ;;  %v19925_v6 = vld [vmem:[#allocation24_spill] sm:$0xff] }
 0x8a7   : > { %v10193_v39 = vmax.f32 %v10159_v54, 0.0  ;;  %v10064_v54 = vadd.f32 %v19196_v40, %v9839_v26  ;;  %v10256_v19 = vmax.f32 %v10224_v33, 0.0  ;;  %v10059_v40 = vadd.f32 %v19192_v3, %v9834_v56 }
 0x8a8   : > { %v10222_v10 = vadd.f32 %v10190_v7, %v19914_v8  ;;  %v9824_v24 = vadd.f32 %v19068_v50, %v19114_v37  ;;  %v10054_v3 = vadd.f32 %v19194_v9, %v9829_v25  ;;  %v19915_v26 = vmax.f32 %v17568_v20, 0.0 }
 0x8a9   : > { %v10225_v41 = vadd.f32 %v10193_v39, %v19910_v61  ;;  %v10174_v57 = vmax.f32 %v10064_v54, 0.0  ;;  %v10173_v11 = vmax.f32 %v10059_v40, 0.0  ;;  %v10239_v13 = vmax.f32 %v10207_v22, 0.0  ;;  %v19927_v40 = vld [vmem:[#allocation40_spill] sm:$0xff] }
 0x8aa   : > { %v10188_v21 = vmax.f32 %v10134_v62, 0.0  ;;  %v19916_v42 = vmax.f32 %v18063_v52, 0.0  ;;  %v10254_v2 = vmax.f32 %v10222_v10, 0.0  ;;  %v10049_v37 = vadd.f32 %v19099_v38, %v9824_v24  ;;  %v19929_v22 = vld [vmem:[#allocation32_spill] sm:$0xff]  ;;  %v19932_v10 = vld [vmem:[#allocation23_spill] sm:$0xff] }
 0x8ab   : > { %v10257_v58 = vmax.f32 %v10225_v41, 0.0  ;;  %v10206_v39 = vadd.f32 %v10174_v57, %v19915_v26  ;;  %v10172_v9 = vmax.f32 %v10054_v3, 0.0  ;;  %v19917_v20 = vmax.f32 %v17552_v5, 0.0  ;;  %v19928_v57 = vld [vmem:[#allocation46_spill] sm:$0xff] }
 0x8ac   : > { %v10221_v31 = vadd.f32 %v10189_v36, %v19916_v42  ;;  %v9894_v63 = vadd.f32 %v19068_v50, %v19190_v55  ;;  %v10124_v14 = vadd.f32 %v19230_v44, %v9899_v35  ;;  %v10187_v47 = vmax.f32 %v10129_v16, 0.0  ;;  %v19931_v36 = vld [vmem:[#allocation34_spill] sm:$0xff]  ;;  %v19936_v16 = vld [vmem:[#allocation31_spill] sm:$0xff] }
 0x8ad   : > { %11599 = vmatprep.subr.msk.mxu1 %vm484_vm10, %v10257_v58  ;;  %v10205_v46 = vadd.f32 %v10173_v11, %v19917_v20  ;;  %v10238_v28 = vmax.f32 %v10206_v39, 0.0  ;;  %v19918_v52 = vmax.f32 %v18048_v29, 0.0  ;;  %v10171_v38 = vmax.f32 %v10049_v37, 0.0  ;;  %v19934_v11 = vld [vmem:[#allocation39_spill] sm:$0xff] }
 0x8ae   : > { %11600 = vmatpush3.xpose.msk.msra.mxu1 %vm484_vm10, %v10241_v1  ;;  %v10253_v33 = vmax.f32 %v10221_v31, 0.0  ;;  %v19919_v61 = vmax.f32 %v17541_v60, 0.0  ;;  %v9889_v56 = vadd.f32 %v19068_v50, %v19188_v27  ;;  %v10119_v55 = vadd.f32 %v19224_v17, %v9894_v63  ;;  %v19935_v39 = vld [vmem:[#allocation47_spill] sm:$0xff]  ;;  %v19941_v63 = vld [vmem:[#allocation38_spill] sm:$0xff] }
 0x8af   : > { %11601 = vmatprep.subr.msk.mxu1 %vm484_vm10, %v10256_v19  ;;  %v10220_v48 = vadd.f32 %v10188_v21, %v19918_v52  ;;  %v10237_v41 = vmax.f32 %v10205_v46, 0.0  ;;  %v10186_v44 = vmax.f32 %v10124_v14, 0.0  ;;  %v19920_v54 = vmax.f32 %v18011_v32, 0.0 }
 0x8b0   : > { %v10204_v5 = vadd.f32 %v10172_v9, %v19919_v61  ;;  %v10170_v12 = vmax.f32 %v19110_v23, 0.0  ;;  %v19921_v60 = vmax.f32 %v17520_v0, 0.0  ;;  %v9884_v27 = vadd.f32 %v19068_v50, %v19186_v15  ;;  %v19939_v9 = vld [vmem:[#allocation22_spill] sm:$0xff] }
 0x8b1   : > { %v10219_v29 = vadd.f32 %v10187_v47, %v19920_v54  ;;  %v10252_v58 = vmax.f32 %v10220_v48, 0.0  ;;  %v10114_v17 = vadd.f32 %v19226_v30, %v9889_v56  ;;  %v10185_v1 = vmax.f32 %v10119_v55, 0.0  ;;  %v19942_v47 = vld [vmem:[#allocation44_spill] sm:$0xff]  ;;  %v19946_v55 = vld [vmem:[#allocation21_spill] sm:$0xff] }
 0x8b2   : > { %11602 = vmatpush3.xpose.msk.msra.mxu1 %vm484_vm10, %v10240_v53  ;;  %v10203_v51 = vadd.f32 %v10171_v38, %v19921_v60  ;;  %v10236_v43 = vmax.f32 %v10204_v5, 0.0  ;;  %v19923_v32 = vmax.f32 %v19922_v18, 0.0  ;;  %v10169_v23 = vmax.f32 %v19924_v45, 0.0  ;;  %v19949_v60 = vld [vmem:[#allocation45_spill] sm:$0xff] }
 0x8b3   : > { %11603 = vmatprep.subr.msk.mxu1 %vm484_vm10, %v10255_v34  ;;  %v10251_v7 = vmax.f32 %v10219_v29, 0.0  ;;  %v19926_v0 = vmax.f32 %v19925_v6, 0.0  ;;  %v9879_v15 = vadd.f32 %v19068_v50, %v19927_v40  ;;  %v10109_v30 = vadd.f32 %v19928_v57, %v9884_v27  ;;  %v19950_v27 = vld [vmem:[#allocation29_spill] sm:$0xff]  ;;  %v19957_v57 = vld [vmem:[#allocation28_spill] sm:$0xff] }
 0x8b4   : > { %v10218_v4 = vadd.f32 %v10186_v44, %v19923_v32  ;;  %v10235_v25 = vmax.f32 %v10203_v51, 0.0  ;;  %v10184_v59 = vmax.f32 %v10114_v17, 0.0  ;;  %v19930_v53 = vmax.f32 %v19929_v22, 0.0  ;;  %v19952_v32 = vld [vmem:[#allocation12_spill] sm:$0xff] }
 0x8b5   : > { %v10202_v19 = vadd.f32 %v10170_v12, %v19926_v0  ;;  %v10168_v8 = vmax.f32 %v19931_v36, 0.0  ;;  %v19933_v34 = vmax.f32 %v19932_v10, 0.0  ;;  %v9874_v26 = vadd.f32 %v19068_v50, %v19934_v11  ;;  %v19955_v0 = vld [vmem:[#allocation36_spill] sm:$0xff] }
 0x8b6   : > { %11604 = vmatpush3.xpose.msk.msra.mxu1 %vm484_vm10, %v10239_v13  ;;  %v10217_v49 = vadd.f32 %v10185_v1, %v19930_v53  ;;  %v10250_v62 = vmax.f32 %v10218_v4, 0.0  ;;  %v10104_v13 = vadd.f32 %v19935_v39, %v9879_v15  ;;  %v10183_v35 = vmax.f32 %v10109_v30, 0.0  ;;  %v19959_v53 = vld [vmem:[#allocation13_spill] sm:$0xff] }
 0x8b7   : > { %11605 = vmatprep.subr.msk.mxu1 %vm484_vm10, %v10254_v2  ;;  %v10201_v24 = vadd.f32 %v10169_v23, %v19933_v34  ;;  %v10234_v3 = vmax.f32 %v10202_v19, 0.0  ;;  %v19937_v21 = vmax.f32 %v19936_v16, 0.0  ;;  %v19938_v2 = vld [vmem:[#allocation14_spill] sm:$0xff]  ;;  %v19940_v20 = vmax.f32 %v19939_v9, 0.0  ;;  %v19962_v34 = vld [vmem:[#allocation43_spill] sm:$0xff] }
 0x8b8   : > { %v10249_v31 = vmax.f32 %v10217_v49, 0.0  ;;  %v10167_v37 = vmax.f32 %v19938_v2, 0.0  ;;  %v9869_v14 = vadd.f32 %v19068_v50, %v19941_v63  ;;  %v10099_v52 = vadd.f32 %v19942_v47, %v9874_v26  ;;  %v19966_v16 = vld [vmem:[#allocation18_spill] sm:$0xff] }
 0x8b9   : > { %v10216_v42 = vadd.f32 %v10184_v59, %v19937_v21  ;;  %v10200_v46 = vadd.f32 %v10168_v8, %v19940_v20  ;;  %v10182_v48 = vmax.f32 %v10104_v13, 0.0  ;;  %v19947_v44 = vmax.f32 %v19946_v55, 0.0  ;;  %v19965_v13 = vld [vmem:[#allocation10_spill] sm:$0xff] }
 0x8ba   : > { %11606 = vmatpush3.xpose.msk.msra.mxu1 %vm484_vm10, %v10238_v28  ;;  %v10233_v28 = vmax.f32 %v10201_v24, 0.0  ;;  %v10094_v51 = vadd.f32 %v19949_v60, %v9869_v14  ;;  %v19951_v17 = vmax.f32 %v19950_v27, 0.0  ;;  %v10165_v4 = vmax.f32 %v19952_v32, 0.0  ;;  %v19971_v14 = vld [vmem:[#allocation17_spill] sm:$0xff]  ;;  %v10594_v60 = vld [vmem:[%s19691_s9 + $0x78] sm:$0xff] }
 0x8bb   : > { %11607 = vmatprep.subr.msk.mxu1 %vm484_vm10, %v10253_v33  ;;  %v19943_v33 = vld [vmem:[#allocation30_spill] sm:$0xff]  ;;  %v10248_v5 = vmax.f32 %v10216_v42, 0.0  ;;  %v10199_v54 = vadd.f32 %v10167_v37, %v19947_v44  ;;  %v10232_v29 = vmax.f32 %v10200_v46, 0.0  ;;  %v9859_v19 = vadd.f32 %v19068_v50, %v19955_v0  ;;  %v10591_v27 = vld [vmem:[%s19691_s9 + $0x60] sm:$0xff] }
 0x8bc   : > { %v19944_v38 = vmax.f32 %v19943_v33, 0.0  ;;  %v10214_v1 = vadd.f32 %v10182_v48, %v19951_v17  ;;  %v10180_v15 = vmax.f32 %v10094_v51, 0.0  ;;  %v19958_v30 = vmax.f32 %v19957_v57, 0.0  ;;  %v19968_v37 = vld [vmem:[#allocation26_spill] sm:$0xff]  ;;  %v19973_v33 = vld [vmem:[#allocation25_spill] sm:$0xff]  ;;  %v10590_v17 = vld [vmem:[%s19691_s9 + $0x58] sm:$0xff] }
 0x8bd   : > { %v10231_v6 = vmax.f32 %v10199_v54, 0.0  ;;  %v10164_v49 = vmax.f32 %v19959_v53, 0.0  ;;  %v10084_v24 = vadd.f32 %v19962_v34, %v9859_v19  ;;  %v19967_v21 = vmax.f32 %v19966_v16, 0.0  ;;  %v10593_v51 = vld [vmem:[%s19691_s9 + $0x70] sm:$0xff]  ;;  %v10587_v32 = vld [vmem:[%s19691_s9 + $0x40] sm:$0xff]  ;;  %v10580_v19 = vld [vmem:[%s19691_s9 + $0x8] sm:$0xff] }
 0x8be   : > { %11608 = vmatpush3.xpose.msk.msra.mxu1 %vm484_vm10, %v10237_v41  ;;  %v10215_v61 = vadd.f32 %v10183_v35, %v19944_v38  ;;  %v19945_v41 = vld [vmem:[#allocation15_spill] sm:$0xff]  ;;  %v10246_v22 = vmax.f32 %v10214_v1, 0.0  ;;  %v10163_v35 = vmax.f32 %v19965_v13, 0.0  ;;  %v19969_v9 = vmax.f32 %v19968_v37, 0.0  ;;  %v10482_v13 = vld [vmem:[%s19689_s7 + $0x48] sm:$0xff] }
 0x8bf   : > { %11609 = vmatprep.subr.msk.mxu1 %vm484_vm10, %v10252_v58  ;;  %v10166_v56 = vmax.f32 %v19945_v41, 0.0  ;;  %v19948_v58 = vld [vmem:[#allocation37_spill] sm:$0xff]  ;;  %v10196_v42 = vadd.f32 %v10164_v49, %v19967_v21  ;;  %v10178_v2 = vmax.f32 %v10084_v24, 0.0  ;;  %v19972_v47 = vmax.f32 %v19971_v14, 0.0  ;;  %v19975_v41 = vld [vmem:[#allocation16_spill] sm:$0xff]  ;;  %v10589_v1 = vld [vmem:[%s19691_s9 + $0x50] sm:$0xff] }
 0x8c0   : > { %v9864_v12 = vadd.f32 %v19068_v50, %v19948_v58  ;;  %v10247_v18 = vmax.f32 %v10215_v61, 0.0  ;;  %v19974_v38 = vmax.f32 %v19973_v33, 0.0  ;;  %v19977_v58 = vld [vmem:[#allocation41_spill] sm:$0xff]  ;;  %v10581_v0 = vld [vmem:[%s19691_s9 + $0x10] sm:$0xff]  ;;  %v10488_v53 = vld [vmem:[%s19689_s7 + $0x78] sm:$0xff] }
 0x8c1   : > { %v10228_v48 = vmax.f32 %v10196_v42, 0.0  ;;  %v10487_v49 = vld [vmem:[%s19689_s7 + $0x70] sm:$0xff]  ;;  %11972 = vmatpush3.msra.mxu0 %v10488_v53  ;;  %v10485_v24 = vld [vmem:[%s19689_s7 + $0x60] sm:$0xff]  ;;  %v10480_v16 = vld [vmem:[%s19689_s7 + $0x38] sm:$0xff] }
 0x8c2   : > { %11610 = vmatpush3.xpose.msk.msra.mxu1 %vm484_vm10, %v10236_v43  ;;  %v10181_v43 = vmax.f32 %v10099_v52, 0.0  ;;  %v10195_v52 = vadd.f32 %v10163_v35, %v19972_v47  ;;  %v10210_v61 = vadd.f32 %v10178_v2, %v19974_v38  ;;  %v10481_v35 = vld [vmem:[%s19689_s7 + $0x40] sm:$0xff]  ;;  %v10479_v21 = vld [vmem:[%s19689_s7 + $0x30] sm:$0xff]  ;;  %v10478_v42 = vld [vmem:[%s19689_s7 + $0x28] sm:$0xff] }
 0x8c3   : > { %11611 = vmatprep.subr.msk.mxu1 %vm484_vm10, %v10251_v7  ;;  %v19953_v7 = vld [vmem:[#allocation20_spill] sm:$0xff]  ;;  %v10475_v37 = vld [vmem:[%s19689_s7 + $0x10] sm:$0xff] }
 0x8c4   : > { %v19954_v45 = vmax.f32 %v19953_v7, 0.0  ;;  %v10213_v59 = vadd.f32 %v10181_v43, %v19958_v30  ;;  %v10227_v44 = vmax.f32 %v10195_v52, 0.0  ;;  %v10242_v54 = vmax.f32 %v10210_v61, 0.0  ;;  %v10592_v43 = vld [vmem:[%s19691_s9 + $0x68] sm:$0xff]  ;;  %v10585_v7 = vld [vmem:[%s19691_s9 + $0x30] sm:$0xff]  ;;  %v10476_v2 = vld [vmem:[%s19689_s7 + $0x18] sm:$0xff] }
 0x8c5   : > { %v10703_v53 = vld [vmem:[%s19693_s11 + $0xa0] sm:$0xff] }
 0x8c6   : > { %11612 = vmatpush3.xpose.msk.msra.mxu1 %vm484_vm10, %v10235_v25  ;;  %v10198_v23 = vadd.f32 %v10166_v56, %v19954_v45  ;;  %v19956_v25 = vld [vmem:[#allocation42_spill] sm:$0xff]  ;;  %v10245_v39 = vmax.f32 %v10213_v59, 0.0  ;;  %v19976_v56 = vmax.f32 %v19975_v41, 0.0 }
 0x8c7   : > { %11613 = vmatprep.subr.msk.mxu1 %vm484_vm10, %v10250_v62  ;;  %v10089_v40 = vadd.f32 %v19956_v25, %v9864_v12  ;;  %v19960_v62 = vld [vmem:[#allocation19_spill] sm:$0xff]  ;;  %v19978_v12 = vmov 0.0   ;;  %v10584_v45 = vld [vmem:[%s19691_s9 + $0x28] sm:$0xff]  ;;  %v10263_v25 = vpop.permute.xlu0 %10262 }
 0x8c8   : > { %v19961_v36 = vmax.f32 %v19960_v62, 0.0  ;;  %v10230_v10 = vmax.f32 %v10198_v23, 0.0  ;;  %v10583_v23 = vld [vmem:[%s19691_s9 + $0x20] sm:$0xff]  ;;  %11973 = vmatprep.subr.mxu0 %v19978_v12  ;;  %12003 = vmatprep.mubr.msk.f32.mxu0 %vm14143_vm14, %v19978_v12 }
 0x8c9   : > { %v10179_v50 = vmax.f32 %v10089_v40, 0.0  ;;  %11974 = vmatpush3.msra.mxu0 %v10487_v49  ;;  %v10687_v49 = vld [vmem:[%s19693_s11 + $0x20] sm:$0xff] }
 0x8ca   : > { %11614 = vmatpush3.xpose.msk.msra.mxu1 %vm484_vm10, %v10234_v3  ;;  %v10197_v8 = vadd.f32 %v10165_v4, %v19961_v36  ;;  %v19963_v3 = vld [vmem:[#allocation27_spill] sm:$0xff]  ;;  %11975 = vmatprep.subr.mxu0 %v19978_v12 }
 0x8cb   : > { %11615 = vmatprep.subr.msk.mxu1 %vm484_vm10, %v10249_v31  ;;  %v19964_v11 = vmax.f32 %v19963_v3, 0.0  ;;  %v10211_v20 = vadd.f32 %v10179_v50, %v19969_v9  ;;  %v10586_v4 = vld [vmem:[%s19691_s9 + $0x38] sm:$0xff]  ;;  %v10474_v9 = vld [vmem:[%s19689_s7 + $0x8] sm:$0xff] }
 0x8cc   : > { %v10229_v31 = vmax.f32 %v10197_v8, 0.0  ;;  %v10486_v8 = vld [vmem:[%s19689_s7 + $0x68] sm:$0xff] }
 0x8cd   : > { %v10212_v26 = vadd.f32 %v10180_v15, %v19964_v11  ;;  %v10579_v15 = vld [vmem:[%s19691_s9] sm:$0xff]  ;;  %11976 = vmatpush3.msra.mxu0 %v10486_v8  ;;  %v10484_v11 = vld [vmem:[%s19689_s7 + $0x58] sm:$0xff]  ;;  %v10701_v8 = vld [vmem:[%s19693_s11 + $0x90] sm:$0xff] }
 0x8ce   : > { %11616 = vmatpush3.xpose.msk.msra.mxu1 %vm484_vm10, %v10233_v28  ;;  %v19970_v28 = vld [vmem:[#allocation11_spill] sm:$0xff]  ;;  %11977 = vmatprep.subr.mxu0 %v19978_v12 }
 0x8cf   : > { %11617 = vmatprep.subr.msk.mxu1 %vm484_vm10, %v10248_v5  ;;  %v10244_v46 = vmax.f32 %v10212_v26, 0.0  ;;  %v10162_v63 = vmax.f32 %v19970_v28, 0.0  ;;  %v10243_v5 = vmax.f32 %v10211_v20, 0.0  ;;  %11978 = vmatpush3.msra.mxu0 %v10485_v24  ;;  %v10483_v26 = vld [vmem:[%s19689_s7 + $0x50] sm:$0xff]  ;;  %v10473_v20 = vld [vmem:[%s19689_s7] sm:$0xff]  ;;  %v10684_v24 = vld [vmem:[%s19693_s11 + $0x8] sm:$0xff] }
 0x8d0   : > { %11979 = vmatprep.subr.mxu0 %v19978_v12 }
 0x8d1   : > { %v10194_v55 = vadd.f32 %v10162_v63, %v19976_v56  ;;  %11980 = vmatpush3.msra.mxu0 %v10484_v11  ;;  %v10597_v11 = vlaneseq }
 0x8d2   : > { %11618 = vmatpush3.xpose.msk.msra.mxu1 %vm484_vm10, %v10232_v29  ;;  %11981 = vmatprep.subr.mxu0 %v19978_v12 }
 0x8d3   : > { %11619 = vmatprep.subr.msk.mxu1 %vm484_vm10, %v10247_v18  ;;  %v10226_v29 = vmax.f32 %v10194_v55, 0.0  ;;  %v10588_v18 = vld [vmem:[%s19691_s9 + $0x48] sm:$0xff]  ;;  %11982 = vmatpush3.msra.mxu0 %v10483_v26  ;;  %v10598_v26 = vshrl.u32 %v10597_v11, 7 }
 0x8d4   : > { %11983 = vmatprep.subr.mxu0 %v19978_v12 }
 0x8d5   : > { %11984 = vmatpush3.msra.mxu0 %v10482_v13  ;;  %v10595_v13 = vld [vmem:[%s19692_s10] sm:$0x3] }
 0x8d6   : > { %11620 = vmatpush3.xpose.msk.msra.mxu1 %vm484_vm10, %v10231_v6  ;;  %v10582_v6 = vld [vmem:[%s19691_s9 + $0x18] sm:$0xff]  ;;  %11985 = vmatprep.subr.mxu0 %v19978_v12 }
 0x8d7   : > { %11621 = vmatprep.subr.msk.mxu1 %vm484_vm10, %v10246_v22  ;;  %11986 = vmatpush3.msra.mxu0 %v10481_v35  ;;  %v10603_v35 = vsub.s32 1, %v10598_v26 }
 0x8d8   : > { %11987 = vmatprep.subr.mxu0 %v19978_v12 }
 0x8d9   : > { %11988 = vmatpush3.msra.mxu0 %v10480_v16 }
 0x8da   : > { %11622 = vmatpush3.xpose.msk.msra.mxu1 %vm484_vm10, %v10230_v10  ;;  %11989 = vmatprep.subr.mxu0 %v19978_v12 }
 0x8db   : > { %11623 = vmatprep.subr.msk.mxu1 %vm484_vm10, %v10245_v39  ;;  %11990 = vmatpush3.msra.mxu0 %v10479_v21  ;;  %v10604_v21 = vrot.slane %v10595_v13, %v10603_v35 }
 0x8dc   : > { %11991 = vmatprep.subr.mxu0 %v19978_v12 }
 0x8dd   : > { %11992 = vmatpush3.msra.mxu0 %v10478_v42 }
 0x8de   : > { %11624 = vmatpush3.xpose.msk.msra.mxu1 %vm484_vm10, %v10229_v31  ;;  %v10477_v31 = vld [vmem:[%s19689_s7 + $0x20] sm:$0xff]  ;;  %11993 = vmatprep.subr.mxu0 %v19978_v12 }
 0x8df   : > { %11625 = vmatprep.subr.msk.mxu1 %vm484_vm10, %v10244_v46  ;;  %11994 = vmatpush3.msra.mxu0 %v10477_v31  ;;  %v10714_v46 = vld [vmem:[%s19693_s11 + $0xf8] sm:$0xff] }
 0x8e0   : > { %11995 = vmatprep.subr.mxu0 %v19978_v12 }
 0x8e1   : > { %11996 = vmatpush3.msra.mxu0 %v10476_v2 }
 0x8e2   : > { %11626 = vmatpush3.xpose.msk.msra.mxu1 %vm484_vm10, %v10228_v48  ;;  %11997 = vmatprep.subr.mxu0 %v19978_v12 }
 0x8e3   : > { %11627 = vmatprep.subr.msk.mxu1 %vm484_vm10, %v10243_v5  ;;  %11998 = vmatpush3.msra.mxu0 %v10475_v37 }
 0x8e4   : > { %11999 = vmatprep.subr.mxu0 %v19978_v12 }
 0x8e5   : > { %12000 = vmatpush3.msra.mxu0 %v10474_v9 }
 0x8e6   : > { %11628 = vmatpush3.xpose.msk.msra.mxu1 %vm484_vm10, %v10227_v44  ;;  %12001 = vmatprep.subr.mxu0 %v19978_v12 }
 0x8e7   : > { %11629 = vmatprep.subr.msk.mxu1 %vm484_vm10, %v10242_v54  ;;  %12002 = vmatpush3.msra.mxu0 %v10473_v20 }
 0x8e8   : > { %11650 = vmatprep.subr.mxu0 %v10714_v46  ;;  %v11409_v46 = vld [vmem:[%s19690_s8] ss:$0 sm:$0xff] }
 0x8ea   : > { %11630 = vmatpush3.xpose.msk.msra.mxu1 %vm484_vm10, %v10226_v29 }
 0x8eb   : > { %10626 = vmatprep.subr.mxu1 %v10594_v60  ;;  %v10698_v60 = vld [vmem:[%s19693_s11 + $0x78] sm:$0xff] }
 0x8ed   : > { %11632 = vmatmul.mubr.msk.f32.vlgmr.msra.gmra.mxu1 %vm484_vm10, %v19977_v58 }
 0x8ee   : > { %10674 = vmatprep.mubr.f32.mxu1 %v19978_v12  ;;  %10627 = vmatpush1.msra.mxu1 %v10593_v51 }
 0x8ef   : > { %10628 = vmatprep.subr.mxu1 %v10592_v43  ;;  %v10713_v43 = vld [vmem:[%s19693_s11 + $0xf0] sm:$0xff] }
 0x8f0   : > { %10629 = vmatpush1.msra.mxu1 %v10591_v27  ;;  %v10697_v27 = vld [vmem:[%s19693_s11 + $0x70] sm:$0xff] }
 0x8f1   : > { %10630 = vmatprep.subr.mxu1 %v10590_v17  ;;  %v10712_v17 = vld [vmem:[%s19693_s11 + $0xe8] sm:$0xff] }
 0x8f2   : > { %10631 = vmatpush1.msra.mxu1 %v10589_v1  ;;  %v10696_v1 = vld [vmem:[%s19693_s11 + $0x68] sm:$0xff] }
 0x8f3   : > { %10632 = vmatprep.subr.mxu1 %v10588_v18  ;;  %v10711_v18 = vld [vmem:[%s19693_s11 + $0xe0] sm:$0xff] }
 0x8f4   : > { %10633 = vmatpush1.msra.mxu1 %v10587_v32  ;;  %v10695_v32 = vld [vmem:[%s19693_s11 + $0x60] sm:$0xff] }
 0x8f5   : > { %10634 = vmatprep.subr.mxu1 %v10586_v4  ;;  %v10710_v4 = vld [vmem:[%s19693_s11 + $0xd8] sm:$0xff] }
 0x8f6   : > { %10635 = vmatpush1.msra.mxu1 %v10585_v7  ;;  %v10694_v7 = vld [vmem:[%s19693_s11 + $0x58] sm:$0xff] }
 0x8f7   : > { %10636 = vmatprep.subr.mxu1 %v10584_v45  ;;  %v10709_v45 = vld [vmem:[%s19693_s11 + $0xd0] sm:$0xff] }
 0x8f8   : > { %10637 = vmatpush1.msra.mxu1 %v10583_v23  ;;  %v10693_v23 = vld [vmem:[%s19693_s11 + $0x50] sm:$0xff] }
 0x8f9   : > { %10638 = vmatprep.subr.mxu1 %v10582_v6  ;;  %v10708_v6 = vld [vmem:[%s19693_s11 + $0xc8] sm:$0xff] }
 0x8fa   : > { %10639 = vmatpush1.msra.mxu1 %v10581_v0  ;;  %v10692_v0 = vld [vmem:[%s19693_s11 + $0x48] sm:$0xff] }
 0x8fb   : > { %10640 = vmatprep.subr.mxu1 %v10580_v19  ;;  %v10707_v19 = vld [vmem:[%s19693_s11 + $0xc0] sm:$0xff] }
 0x8fc   : > { %10641 = vmatpush1.msra.mxu1 %v10579_v15  ;;  %v10690_v15 = vld [vmem:[%s19693_s11 + $0x38] sm:$0xff] }
 0x9ad   : > { %v10430_v40 = vpop.f32.mrf.mxu1 }
 0x9ae   : > { %v10431_v57 = vadd.f32 %v10430_v40, %v10263_v25  ;;  %v10706_v40 = vld [vmem:[%s19693_s11 + $0xb8] sm:$0xff] }
 0x9af   : > { %v10432_v30 = vpop.f32.mrf.mxu1 }
 0x9b0   : > { %v19442_v59 = vmax.f32 %v10431_v57, 0.0  ;;  %v10433_v22 = vadd.f32 %v10432_v30, %v10263_v25  ;;  %v10691_v25 = vld [vmem:[%s19693_s11 + $0x40] sm:$0xff]  ;;  %v10705_v57 = vld [vmem:[%s19693_s11 + $0xb0] sm:$0xff] }
 0x9b1   : > { %v10689_v30 = vld [vmem:[%s19693_s11 + $0x30] sm:$0xff] }
 0x9b2   : > { %v19450_v62 = vmax.f32 %v10433_v22, 0.0  ;;  %10457 = vrot.lane.b32.xlu0 %v19442_v59, %s14139_s29  ;;  %v10455_v36 = vrot.slane %v19442_v59, 1  ;;  %v10438_v34 = vrot.slane %v19442_v59, 7  ;;  %v10568_v28 = vrot.slane %v19442_v59, 2  ;;  %v10688_v22 = vld [vmem:[%s19693_s11 + $0x28] sm:$0xff] }
 0x9b4   : > { %v10445_v10 = vrot.slane %v19450_v62, 5  ;;  %10570 = vrot.lane.b32.xlu1 %v10455_v36, %s14139_s29  ;;  %v10460_v50 = vrot.slane %v19450_v62, 7  ;;  %v10443_v39 = vrot.slane %v19450_v62, 6 }
 0x9b6   : > { %v14045_v3 = vpack.i.bf16 %v10445_v10, %v10438_v34  ;;  %v10685_v10 = vld [vmem:[%s19693_s11 + $0x10] sm:$0xff]  ;;  %v10700_v34 = vld [vmem:[%s19693_s11 + $0x88] sm:$0xff] }
 0x9b8   : > { %10573 = vrot.lane.b32.xlu1 %v10460_v50, %s14139_s29  ;;  %14046 = vrot.lane.b32.xlu0 %v14045_v3, %s14139_s29  ;;  %v10683_v3 = vld [vmem:[%s19693_s11] sm:$0xff] }
 0x9bc   : > { %10462 = vrot.lane.b32.xlu1 %v10443_v39, %s14139_s29 }
 0xa24   : > { %v10458_v63 = vpop.permute.xlu0 %10457 }
 0xa25   : > { %v10465_v38 = vsel %vm10449_vm15, %v10455_v36, %v10458_v63  ;;  %v10686_v36 = vld [vmem:[%s19693_s11 + $0x18] sm:$0xff] }
 0xa26   : > { %v10571_v14 = vpop.permute.xlu1 %10570  ;;  %v10466_v44 = vsel %vm10451_vm1, %v10465_v38, %v10460_v50  ;;  %v10699_v50 = vld [vmem:[%s19693_s11 + $0x80] sm:$0xff] }
 0xa27   : > { %v10576_v47 = vsel %vm10449_vm15, %v10568_v28, %v10571_v14 }
 0xa28   : > { %v10577_v52 = vsel %vm10451_vm1, %v10576_v47, %v19450_v62  ;;  %v10702_v62 = vld [vmem:[%s19693_s11 + $0x98] sm:$0xff] }
 0xa2a   : > { %v10574_v48 = vpop.permute.xlu1 %10573  ;;  %v14047_v33 = vpop.permute.xlu0 %14046 }
 0xa2b   : > { %v10578_v61 = vsel %vm10453_vm0, %v10577_v52, %v10574_v48  ;;  %v14048_v5 = vunpack.i.l.bf16 %v14047_v33  ;;  %v14049_v41 = vunpack.i.h.bf16 %v14047_v33 }
 0xa2c   : > { %11410 = vmatmul.mubr.msk.f32.vlgmr.msra.gmra.mxu1 %vm3638_vm12, %v10578_v61 }
 0xa2d   : > { %v10450_v56 = vsel %vm10449_vm15, %v19442_v59, %v14048_v5  ;;  %v10704_v59 = vld [vmem:[%s19693_s11 + $0xa8] sm:$0xff] }
 0xa2e   : > { %v10463_v55 = vpop.permute.xlu1 %10462  ;;  %v10452_v54 = vsel %vm10451_vm1, %v10450_v56, %v10443_v39  ;;  %v10599_v39 = vsub.s32 0, %v10598_v26 }
 0xa2f   : > { %v10467_v29 = vsel %vm10453_vm0, %v10466_v44, %v10463_v55  ;;  %v10454_v58 = vsel %vm10453_vm0, %v10452_v54, %v14049_v41 }
 0xa30   : > { %10469 = vrot.lane.b32.xlu1 %v10467_v29, %s14139_s29  ;;  %v10600_v16 = vrot.slane %v10595_v13, %v10599_v39  ;;  %s19642_s29 = scalar_lea.hbm %s19695_s13, %s11413_s28 }
 0xaa2   : > { %v10470_v12 = vpop.permute.xlu1 %10469 }
 0xaa3   : > { %v10472_v51 = vsel %vm3638_vm12, %v10454_v58, %v10470_v12 }
 0xaa4   : > { %12004 = vmatmul.mubr.f32.vlgmr.msra.gmra.mxu0 %v10472_v51 }
 0xaa5   : > { %11651 = vmatpush3.msra.mxu0 %v10698_v60 }
 0xaa6   : > { %11652 = vmatprep.subr.mxu0 %v10713_v43 }
 0xaa7   : > { %11653 = vmatpush3.msra.mxu0 %v10697_v27 }
 0xaa8   : > { %11654 = vmatprep.subr.mxu0 %v10712_v17 }
 0xaa9   : > { %11655 = vmatpush3.msra.mxu0 %v10696_v1 }
 0xaaa   : > { %11656 = vmatprep.subr.mxu0 %v10711_v18 }
 0xaab   : > { %11657 = vmatpush3.msra.mxu0 %v10695_v32 }
 0xaac   : > { %11658 = vmatprep.subr.mxu0 %v10710_v4 }
 0xaad   : > { %11659 = vmatpush3.msra.mxu0 %v10694_v7 }
 0xaae   : > { %11660 = vmatprep.subr.mxu0 %v10709_v45 }
 0xaaf   : > { %11661 = vmatpush3.msra.mxu0 %v10693_v23 }
 0xab0   : > { %11662 = vmatprep.subr.mxu0 %v10708_v6 }
 0xab1   : > { %11663 = vmatpush3.msra.mxu0 %v10692_v0 }
 0xab2   : > { %11664 = vmatprep.subr.mxu0 %v10707_v19 }
 0xab3   : > { %11665 = vmatpush3.msra.mxu0 %v10691_v25 }
 0xab4   : > { %11666 = vmatprep.subr.mxu0 %v10706_v40 }
 0xab5   : > { %11667 = vmatpush3.msra.mxu0 %v10690_v15 }
 0xab6   : > { %11668 = vmatprep.subr.mxu0 %v10705_v57 }
 0xab7   : > { %11669 = vmatpush3.msra.mxu0 %v10689_v30 }
 0xab8   : > { %11670 = vmatprep.subr.mxu0 %v10704_v59 }
 0xab9   : > { %11671 = vmatpush3.msra.mxu0 %v10688_v22 }
 0xaba   : > { %11672 = vmatprep.subr.mxu0 %v10703_v53 }
 0xabb   : > { %11673 = vmatpush3.msra.mxu0 %v10687_v49 }
 0xabc   : > { %11674 = vmatprep.subr.mxu0 %v10702_v62 }
 0xabd   : > { %11675 = vmatpush3.msra.mxu0 %v10686_v36 }
 0xabe   : > { %11676 = vmatprep.subr.mxu0 %v10701_v8 }
 0xabf   : > { %11677 = vmatpush3.msra.mxu0 %v10685_v10 }
 0xac0   : > { %11678 = vmatprep.subr.mxu0 %v10700_v34 }
 0xac1   : > { %11679 = vmatpush3.msra.mxu0 %v10684_v24 }
 0xac2   : > { %11680 = vmatprep.subr.mxu0 %v10699_v50 }
 0xac3   : > { %11681 = vmatpush3.msra.mxu0 %v10683_v3 }
 0xaec   : > { %v10676_v42 = vpop.f32.mrf.mxu1 }
 0xaed   : > { %v10677_v31 = vadd.f32 %v10676_v42, %v10600_v16 }
 0xaee   : > { %v10678_v2 = vpop.f32.mrf.mxu1 }
 0xaef   : > { %v10679_v37 = vadd.f32 %v10678_v2, %v10604_v21  ;;  %v10681_v20 = vmax.f32 %v10677_v31, 0.0 }
 0xaf1   : > { %v10682_v9 = vmax.f32 %v10679_v37, 0.0 }
 0xaf3   : > { %10786 = vmatprep.mubr.f32.mxu0 %v10682_v9 }
 0xaf4   : > { %10787 = vmatmul.mubr.f32.vlgmr.msra.gmra.mxu0 %v10681_v20 }
 0xb64   : > { %v10562_v28 = vpop.f32.mrf.mxu0 }
 0xb65   : > { %v10563_v63 = vadd.f32 %v11409_v46, %v10562_v28 }
 0xb66   : > { %v12005_v14 = vpop.f32.mrf.mxu0 }
 0xb67   : > { %10567 = vst.msk [vmem:[%s466_s30] sm:$0xf] %vm10566_vm2, %v10563_v63 }
 0xb68   : > { %14081 = shalt.err (!%p14078_p3)
}
 0xb69   : > { %s14082_s21 = scalar_lea.hbm %s19642_s29, 64  ;;  %s14086_s30 = scalar_lea.hbm %s19695_s13, 128 }
 0xb6a   : > { %p14083_p4 = scmp.ne.s32.totalorder %s19642_s29, %s14082_s21  ;;  %p14087_p9 = scmp.lt.s32.totalorder %s19642_s29, %s19695_s13 }
 0xb6b   : > { %p14088_p10 = scmp.lt.s32.totalorder %s14086_s30, %s14082_s21 }
 0xb6c   : > { %p14084_p7 = pnand %p14083_p4, %p14261_p5 }
 0xb6d   : > { %p14089_p11 = por %p14088_p10, %p14087_p9 }
 0xb6e   : > { %p14085_p8 = pneg %p14084_p7 }
 0xb70   : > { %p14090_p12 = pnand %p14089_p11, %p14085_p8 }
 0xb72   : > { %14093 = shalt.err (!%p14090_p12)
}
 0xb73   : > { %12071 = dma.vmem_to_hbm [thread:$0]  (%p14261_p5), %s10814_s27, 64, %s19642_s29, %s10796_s20   ;;  %v11411_v52 = vld [vmem:[#allocation3] ss:$0 sm:$0xff]  ;;  %vm10793_vm3 = vcmask 3072  }
 0xb74   : > { %p480_p13 = scmp.lt.s32.totalorder %s14244_s12, 1 }
 0xb76   : > { %s19987_s12 = smov (!%p480_p13, %s14244_s12), 1 }
 0xb77   : > { %s10906_s19 = sshll.u32 %s19987_s12, 2 }
 0xb78   : > { %s483_s17 = scalar_lea.vmem %s19696_s14, %s10906_s19 }
 0xbb4   : > { %v11682_v47 = vpop.f32.mrf.mxu0 }
 0xbb6   : > { %v11683_v48 = vpop.f32.mrf.mxu0 }
 0xbb7   : > { %v11684_v33 = vadd.f32 %v11683_v48, %v11682_v47 }
 0xbb9   : > { %v10789_v38 = vadd.f32 %v11684_v33, %v11411_v52 }
 0xbbb   : > { %14050 = vtanh.f32 %v10789_v38 }
 0xbc8   : > { %v14051_v61 = vpop.eup %14050 }
 0xbc9   : > { %10794 = vst.msk [vmem:[%s483_s17] sm:$0xf] %vm10793_vm3, %v14051_v61 }
 0xbca PF: > { %p12077_p5 = scmp.ge.s32.totalorder %s14128_s18, 2  ;;  %s10828_s24 = sand.u32 1, %s14116_s15  }
 0xbcb   : > { %s10829_s27 = scalar_lea.sflag [#allocation5], %s10828_s24 }
 0xbcc   : > { %p12074_p0 = pnand %p12077_p5, %p14265_p6 }
 0xbce   : > { %p12075_p1 = pneg %p12074_p0 }
 0xbd0   : > { %14111 = dma.done.wait (%p12075_p1), %s10829_s27, 64  }
 0xbd1   : > { %14113 = vsyncadd (%p12075_p1), %s10829_s27, 4294967232  ;;  %s19979_s18 = sld [smem:[#allocation8_spill]]  ;;  %s19982_s15 = smov %s14120_s16 }
 0xbd2   : > { %s19980_s12 = sld [smem:[#allocation7_spill]] }
 0xbd3   : > { %s19981_s17 = sld [smem:[#allocation9_spill]] }
 0xbd7   : > { %p27_p2 = scmp.ge.s32.totalorder %s19979_s18, 4  }
 0xbd8   : > { %s19983_s16 = smov %s19980_s12 }
 0xbd9   :  { %29 = sbr.rel (!%p27_p2) target bundleno = 6 (0x6), region = 129 }
 0xbde   :  { %10841 = vsyncpa [#allocation5], 1 }
 0xbdf   :  { %10843 = vsyncpa [#allocation5 + $0x1], 1 }

</bundles_post_ra>
